<compile_context>
chip_gen: v7x
topology: tpu7x:2x2x1
jax: 0.10.0
libtpu: 0.0.40
codegen_flags: <defaults>
</compile_context>

<pallas_src>
import numpy as np
import jax
import jax.numpy as jnp
from jax import lax
from jax.experimental import pallas as pl
from jax.experimental.pallas import tpu as pltpu

EPS = 1e-5
BF16 = jnp.bfloat16
LANE = 128
VMEM_LIMIT = 32 * 1024 * 1024

LAYER_PLANES = (64, 128, 256, 512)
LAYER_STRIDES = (1, 2, 2, 2)


def _round_up(x, m):
    return ((x + m - 1) // m) * m


def _pad_last(a, target):
    c = a.shape[-1]
    if c >= target:
        return a
    pad = [(0, 0)] * a.ndim
    pad[-1] = (0, target - c)
    return jnp.pad(a, pad)


def fold_bn(bn, eps=EPS):
    gamma, beta, mean, var = bn
    scale = gamma / jnp.sqrt(var + eps)
    bias = beta - mean * scale
    return scale, bias


# --------------------- kernel A: fused matmul + bias ------------------------ #

def _make_matmul_kernel(apply_relu):
    def kernel(x_ref, w_ref, bias_ref, o_ref):
        y = jnp.dot(x_ref[...], w_ref[...], preferred_element_type=jnp.float32)
        y = y + bias_ref[...]
        if apply_relu:
            y = jnp.maximum(y, 0.0)
        o_ref[...] = y.astype(o_ref.dtype)
    return kernel


def fused_matmul(x, w, bias, *, apply_relu=False, out_dtype=BF16, tile_m=512):
    """x:(M,K), w:(K,C), bias:(C,). bf16 operands, f32 accumulate/epilogue."""
    x = x.astype(BF16)
    w = w.astype(BF16)
    M, K = x.shape
    K2, C = w.shape
    assert K == K2
    bias = bias.reshape(1, C).astype(jnp.float32)

    # Pick a tile so the grid has >= 2 steps when possible (both v7x TCs busy).
    if M >= 16:
        tm = min(tile_m, _round_up(pl.cdiv(M, 2), 8))
    else:
        tm = M
    Mp = _round_up(M, tm)
    if Mp != M:
        x = jnp.pad(x, ((0, Mp - M), (0, 0)))

    out = pl.pallas_call(
        _make_matmul_kernel(apply_relu),
        out_shape=jax.ShapeDtypeStruct((Mp, C), out_dtype),
        grid_spec=pltpu.PrefetchScalarGridSpec(
            num_scalar_prefetch=0,
            grid=(Mp // tm,),
            in_specs=[
                pl.BlockSpec((tm, K), lambda i: (i, 0)),   # activations
                pl.BlockSpec((K, C), lambda i: (0, 0)),    # resident weights
                pl.BlockSpec((1, C), lambda i: (0, 0)),    # bias (f32)
            ],
            out_specs=pl.BlockSpec((tm, C), lambda i: (i, 0)),
        ),
        compiler_params=pltpu.CompilerParams(
            dimension_semantics=("parallel",),
            vmem_limit_bytes=VMEM_LIMIT),
    )(x, w, bias)
    return out[:M]


# ------------- kernel B: fused 3x3 conv (9 shifted matmuls) ----------------- #

def _make_conv3x3_kernel(stride, Wps, Mq, apply_relu, has_residual, has_temb):
    s = stride

    def kernel(*refs):
        x_ref, w_ref, bias_ref = refs[0], refs[1], refs[2]
        i = 3
        res_ref = temb_ref = None
        if has_residual:
            res_ref = refs[i]
            i += 1
        if has_temb:
            temb_ref = refs[i]
            i += 1
        o_ref = refs[i]

        acc = jnp.zeros((Mq, o_ref.shape[-1]), jnp.float32)
        # 9 taps: each is a contiguous, statically-shifted window of the flat
        # phase-decomposed slab -> plain 2-D MXU matmul, accumulated in f32.
        for kh in range(3):
            for kw in range(3):
                p = (kh % s) * s + (kw % s)            # phase index (static)
                off = (kh // s) * Wps + (kw // s)      # flat shift (static)
                xv = x_ref[0, p, pl.ds(off, Mq), :]
                acc = acc + jnp.dot(xv, w_ref[kh * 3 + kw],
                                    preferred_element_type=jnp.float32)
        y = acc + bias_ref[...]                        # folded-BN bias (f32)
        if has_residual:
            y = y + res_ref[0].astype(jnp.float32)
        if apply_relu:
            y = jnp.maximum(y, 0.0)
        if has_temb:
            y = y + temb_ref[...].astype(jnp.float32)  # per-sample temb add
        o_ref[0] = y.astype(o_ref.dtype)

    return kernel


def _phase_decompose(x_nhwc, stride):
    """Zero-pad (pad=1 conv) and split into stride**2 phase grids, flattened
    over space, so every 3x3 tap becomes a contiguous shifted window."""
    N, H, W, C = x_nhwc.shape
    s = stride
    Ho = (H - 1) // s + 1
    Wo = (W - 1) // s + 1
    Hps = Ho + (2 // s) + 1            # extra rows so shifted windows stay in-bounds
    Wps = -(-(W + 2) // s)
    Hp, Wp = s * Hps, s * Wps
    xp = jnp.pad(x_nhwc, ((0, 0), (1, Hp - H - 1), (1, Wp - W - 1), (0, 0)))
    xr = xp.reshape(N, Hps, s, Wps, s, C).transpose(0, 2, 4, 1, 3, 5)
    return xr.reshape(N, s * s, Hps * Wps, C), Ho, Wo, Wps


def conv3x3_bn(x_nhwc, w_hwio, bn, *, stride, apply_relu=True,
               residual=None, temb=None, out_dtype=BF16):
    """3x3 conv (pad=1, stride) + folded BN + optional residual / ReLU / temb.

    Output channels are zero-padded up to LANE (=128) so every epilogue store
    is lane-dense; padded channels are exactly zero and ignored downstream
    (their weight rows/cols are zero-padded too)."""
    N, H, W, Cin_p = x_nhwc.shape
    Cin, Cout = w_hwio.shape[2], w_hwio.shape[3]
    Cout_p = max(Cout, LANE)

    scale, bias = fold_bn(bn)
    w = (w_hwio * scale).astype(jnp.float32)          # fold BN scale into weights
    if Cin_p > Cin:                                   # zero rows for padded inputs
        w = jnp.pad(w, ((0, 0), (0, 0), (0, Cin_p - Cin), (0, 0)))
    if Cout_p > Cout:                                 # zero cols for padded outputs
        w = jnp.pad(w, ((0, 0), (0, 0), (0, 0), (0, Cout_p - Cout)))
        bias = jnp.pad(bias, (0, Cout_p - Cout))
    w = w.reshape(9, Cin_p, Cout_p).astype(BF16)
    bias = bias.reshape(1, Cout_p).astype(jnp.float32)

    xf, Ho, Wo, Wps = _phase_decompose(x_nhwc.astype(BF16), stride)
    s = stride
    Lp = xf.shape[2]
    Mq = Ho * Wps                       # rows computed (garbage cols cropped)

    operands = [xf, w, bias]
    in_specs = [
        pl.BlockSpec((1, s * s, Lp, Cin_p), lambda n: (n, 0, 0, 0)),  # image slab
        pl.BlockSpec((9, Cin_p, Cout_p), lambda n: (0, 0, 0)),        # weights
        pl.BlockSpec((1, Cout_p), lambda n: (0, 0)),                  # BN bias
    ]
    if residual is not None:
        res = _pad_last(residual.astype(BF16), Cout_p)
        res = jnp.pad(res, ((0, 0), (0, 0), (0, Wps - Wo), (0, 0)))
        operands.append(res.reshape(N, Mq, Cout_p))
        in_specs.append(pl.BlockSpec((1, Mq, Cout_p), lambda n: (n, 0, 0)))
    if temb is not None:
        operands.append(_pad_last(temb.astype(BF16), Cout_p))
        in_specs.append(pl.BlockSpec((1, Cout_p), lambda n: (n, 0)))

    kernel = _make_conv3x3_kernel(s, Wps, Mq, apply_relu,
                                  residual is not None, temb is not None)
    out = pl.pallas_call(
        kernel,
        out_shape=jax.ShapeDtypeStruct((N, Mq, Cout_p), out_dtype),
        grid_spec=pltpu.PrefetchScalarGridSpec(
            num_scalar_prefetch=0,
            grid=(N,),
            in_specs=in_specs,
            out_specs=pl.BlockSpec((1, Mq, Cout_p), lambda n: (n, 0, 0)),
        ),
        compiler_params=pltpu.CompilerParams(
            dimension_semantics=("parallel",),
            vmem_limit_bytes=VMEM_LIMIT),
    )(*operands)
    return out.reshape(N, Ho, Wps, Cout_p)[:, :, :Wo, :]


# ------------------------------- network glue ------------------------------- #

def basic_block(x, bp, stride, temb_vec=None):
    """Standard BasicBlock: conv3x3+bn+relu, conv3x3+bn + shortcut, relu."""
    N = x.shape[0]
    in_planes = bp["w1"].shape[2]          # logical input channels (pre-padding)
    planes = bp["w1"].shape[3]
    y = conv3x3_bn(x, bp["w1"], bp["bn1"], stride=stride, apply_relu=True)
    if stride != 1 or in_planes != planes:
        xs = x[:, ::stride, ::stride, :]
        Ho, Wo, Cin_p = xs.shape[1], xs.shape[2], xs.shape[3]
        Cs_p = max(planes, LANE)
        ssc, bsc = fold_bn(bp["bnsc"])
        wsc = (bp["wsc"] * ssc).astype(jnp.float32)
        if Cin_p > wsc.shape[0]:           # zero rows for padded input channels
            wsc = jnp.pad(wsc, ((0, Cin_p - wsc.shape[0]), (0, 0)))
        if Cs_p > planes:                  # lane-dense shortcut output
            wsc = jnp.pad(wsc, ((0, 0), (0, Cs_p - planes)))
            bsc = jnp.pad(bsc, (0, Cs_p - planes))
        sc = fused_matmul(xs.reshape(N * Ho * Wo, Cin_p), wsc, bsc,
                          apply_relu=False, out_dtype=BF16)
        sc = sc.reshape(N, Ho, Wo, Cs_p)
    else:
        sc = x
    return conv3x3_bn(y, bp["w2"], bp["bn2"], stride=1, apply_relu=True,
                      residual=sc, temb=temb_vec)


def resnet_cond_forward(x_nchw, temb, params):
    x = jnp.transpose(x_nchw, (0, 2, 3, 1))            # NCHW -> NHWC
    out = conv3x3_bn(x, params["conv1_w"], params["bn1"], stride=1,
                     apply_relu=True)

    # All four temb projections in one fused matmul, then split per layer.
    dws = [dw for dw, _ in params["dense"]]
    dbs = [db for _, db in params["dense"]]
    temb_all = fused_matmul(jax.nn.silu(temb),
                            jnp.concatenate(dws, axis=1),
                            jnp.concatenate(dbs, axis=0),
                            apply_relu=False, out_dtype=BF16)
    offs = np.cumsum([0] + [int(w.shape[1]) for w in dws])
    temb_vecs = [temb_all[:, offs[i]:offs[i + 1]] for i in range(len(dws))]

    for li, blocks in enumerate(params["layers"]):
        for bi, bp in enumerate(blocks):
            stride = LAYER_STRIDES[li] if bi == 0 else 1
            tv = temb_vecs[li] if bi == len(blocks) - 1 else None  # fused temb add
            out = basic_block(out, bp, stride, temb_vec=tv)
    # F.avg_pool2d(out, 4) + flatten: final spatial is 4x4 for 32x32 inputs.
    assert out.shape[1] == 4 and out.shape[2] == 4
    pooled = jnp.mean(out.astype(jnp.float32), axis=(1, 2))
    fw, fb = params["fc"]
    return fused_matmul(pooled, fw, fb, apply_relu=False,
                        out_dtype=jnp.float32)


# -------- pure-JAX reference (mirrors the kernels' bf16/folded-BN math) ----- #

def ref_forward(x_nchw, temb, params):
    hi = lax.Precision.HIGHEST
    f32 = jnp.float32

    def conv3(xb, w, bn, stride, relu=True, residual=None, temb_vec=None):
        scale, bias = fold_bn(bn)
        wf = (w * scale).astype(BF16).astype(f32)
        y = lax.conv_general_dilated(
            xb.astype(BF16).astype(f32), wf, (stride, stride),
            [(1, 1), (1, 1)],
            dimension_numbers=("NHWC", "HWIO", "NHWC"), precision=hi)
        y = y + bias.astype(f32)[None, None, None, :]
        if residual is not None:
            y = y + residual.astype(f32)
        if relu:
            y = jnp.maximum(y, 0.0)
        if temb_vec is not None:
            y = y + temb_vec.astype(f32)[:, None, None, :]
        return y.astype(BF16)

    def mm(xm, w, b, out_dtype=BF16):
        y = jnp.dot(xm.astype(BF16).astype(f32), w.astype(BF16).astype(f32),
                    precision=hi)
        return (y + b.astype(f32)[None, :]).astype(out_dtype)

    def block(xb, bp, stride, tv):
        cin = xb.shape[-1]
        planes = bp["w1"].shape[-1]
        y = conv3(xb, bp["w1"], bp["bn1"], stride, relu=True)
        if stride != 1 or cin != planes:
            xs = xb[:, ::stride, ::stride, :]
            ssc, bsc = fold_bn(bp["bnsc"])
            sc = mm(xs.reshape(-1, cin), bp["wsc"] * ssc, bsc)
            sc = sc.reshape(xs.shape[0], xs.shape[1], xs.shape[2], planes)
        else:
            sc = xb
        return conv3(y, bp["w2"], bp["bn2"], 1, relu=True,
                     residual=sc, temb_vec=tv)

    x = jnp.transpose(x_nchw, (0, 2, 3, 1))
    out = conv3(x, params["conv1_w"], params["bn1"], 1, relu=True)
    for li, blocks in enumerate(params["layers"]):
        dw, db = params["dense"][li]
        temb_vec = mm(jax.nn.silu(temb), dw, db)
        for bi, bp in enumerate(blocks):
            stride = LAYER_STRIDES[li] if bi == 0 else 1
            tv = temb_vec if bi == len(blocks) - 1 else None
            out = block(out, bp, stride, tv)
    pooled = jnp.mean(out.astype(f32), axis=(1, 2))
    fw, fb = params["fc"]
    return mm(pooled, fw, fb, out_dtype=f32)


# ----------------------------------- main ----------------------------------- #

if __name__ == "__main__":
    key = jax.random.PRNGKey(0)
    N, H, W = 2, 32, 32
    in_channels, temb_dim, num_classes = 4, 32, 10
    num_blocks = [1, 1, 1, 1]

    kit = iter(jax.random.split(key, 128))

    def nrm(shape, scale):
        return jax.random.normal(next(kit), shape, jnp.float32) * scale

    def conv3_w(cin, cout):
        return nrm((3, 3, cin, cout), 1.0 / np.sqrt(9 * cin))

    def conv1_w(cin, cout):
        return nrm((cin, cout), 1.0 / np.sqrt(cin))

    def dense_p(cin, cout):
        return nrm((cin, cout), 1.0 / np.sqrt(cin)), nrm((cout,), 0.1)

    def bn_init(c):
        gamma = 1.0 + 0.1 * nrm((c,), 1.0)
        beta = 0.1 * nrm((c,), 1.0)
        mean = 0.1 * nrm((c,), 1.0)
        var = jnp.abs(nrm((c,), 1.0)) * 0.5 + 0.5
        return gamma, beta, mean, var

    layers = []
    in_planes = 64
    for li, planes in enumerate(LAYER_PLANES):
        blocks = []
        for bi in range(num_blocks[li]):
            stride = LAYER_STRIDES[li] if bi == 0 else 1
            bp = {"w1": conv3_w(in_planes, planes), "bn1": bn_init(planes),
                  "w2": conv3_w(planes, planes), "bn2": bn_init(planes)}
            if stride != 1 or in_planes != planes:
                bp["wsc"] = conv1_w(in_planes, planes)
                bp["bnsc"] = bn_init(planes)
            blocks.append(bp)
            in_planes = planes
        layers.append(blocks)

    params = {
        "conv1_w": conv3_w(in_channels, 64),
        "bn1": bn_init(64),
        "dense": [dense_p(temb_dim, p) for p in LAYER_PLANES],
        "layers": layers,
        "fc": dense_p(512, num_classes),
    }

    x = jax.random.normal(next(kit), (N, in_channels, H, W), jnp.float32)
    temb = jax.random.normal(next(kit), (N, temb_dim), jnp.float32)

    out = jax.block_until_ready(resnet_cond_forward(x, temb, params))
    ref = jax.block_until_ready(ref_forward(x, temb, params))

    np.testing.assert_allclose(np.asarray(out), np.asarray(ref),
                               atol=3e-2, rtol=3e-2)
    print("KERNEL_OK")
</pallas_src>

<mosaic_0001>
module attributes {stable_mosaic.version = 11 : i64} {
  func.func @kernel(%arg0: i32, %arg1: memref<1x1x1190x4xbf16, #tpu.memory_space<vmem>>, %arg2: memref<9x4x128xbf16, #tpu.memory_space<vmem>>, %arg3: memref<1x128xf32, #tpu.memory_space<vmem>>, %arg4: memref<1x1088x128xbf16, #tpu.memory_space<vmem>>) attributes {dimension_semantics = [#tpu.dimension_semantics<parallel>], iteration_bounds = array<i64: 2>, scalar_prefetch = 0 : i64, scratch_operands = 0 : i64, tpu.core_type = #tpu.core_type<tc>, window_params = [{transform_indices = @transform_0, window_bounds = array<i64: 1, 1, 1190, 4>}, {pipeline_mode = #tpu.pipeline_mode<synchronous>, transform_indices = @transform_1, window_bounds = array<i64: 9, 4, 128>}, {pipeline_mode = #tpu.pipeline_mode<synchronous>, transform_indices = @transform_2, window_bounds = array<i64: 1, 128>}, {transform_indices = @transform_3, window_bounds = array<i64: 1, 1088, 128>}]} {
    %cst = arith.constant 0.000000e+00 : f32
    %0 = vector.broadcast %cst : f32 to vector<1088x128xf32>
    %c0 = arith.constant 0 : index
    %c0_0 = arith.constant 0 : index
    %c0_1 = arith.constant 0 : index
    %c0_2 = arith.constant 0 : index
    %1 = vector.load %arg1[%c0, %c0_0, %c0_1, %c0_2] : memref<1x1x1190x4xbf16, #tpu.memory_space<vmem>>, vector<1x1x1088x4xbf16>
    %2 = vector.shape_cast %1 : vector<1x1x1088x4xbf16> to vector<1088x4xbf16>
    %c0_3 = arith.constant 0 : index
    %c0_4 = arith.constant 0 : index
    %c0_5 = arith.constant 0 : index
    %3 = vector.load %arg2[%c0_3, %c0_4, %c0_5] : memref<9x4x128xbf16, #tpu.memory_space<vmem>>, vector<1x4x128xbf16>
    %4 = vector.shape_cast %3 : vector<1x4x128xbf16> to vector<4x128xbf16>
    %cst_6 = arith.constant dense<0.000000e+00> : vector<1088x128xf32>
    %5 = tpu.matmul %2, %4, %cst_6 {dimension_numbers = #tpu.dot_dimension_numbers<[1], [0], [0], [1], [0, 0, 1, 1], [], []>} : vector<1088x4xbf16>, vector<4x128xbf16>, vector<1088x128xf32> -> vector<1088x128xf32>
    %6 = arith.addf %0, %5 : vector<1088x128xf32>
    %c0_7 = arith.constant 0 : index
    %c0_8 = arith.constant 0 : index
    %c1 = arith.constant 1 : index
    %c0_9 = arith.constant 0 : index
    %7 = vector.load %arg1[%c0_7, %c0_8, %c1, %c0_9] : memref<1x1x1190x4xbf16, #tpu.memory_space<vmem>>, vector<1x1x1088x4xbf16>
    %8 = vector.shape_cast %7 : vector<1x1x1088x4xbf16> to vector<1088x4xbf16>
    %c1_10 = arith.constant 1 : index
    %c0_11 = arith.constant 0 : index
    %c0_12 = arith.constant 0 : index
    %9 = vector.load %arg2[%c1_10, %c0_11, %c0_12] : memref<9x4x128xbf16, #tpu.memory_space<vmem>>, vector<1x4x128xbf16>
    %10 = vector.shape_cast %9 : vector<1x4x128xbf16> to vector<4x128xbf16>
    %cst_13 = arith.constant dense<0.000000e+00> : vector<1088x128xf32>
    %11 = tpu.matmul %8, %10, %cst_13 {dimension_numbers = #tpu.dot_dimension_numbers<[1], [0], [0], [1], [0, 0, 1, 1], [], []>} : vector<1088x4xbf16>, vector<4x128xbf16>, vector<1088x128xf32> -> vector<1088x128xf32>
    %12 = arith.addf %6, %11 : vector<1088x128xf32>
    %c0_14 = arith.constant 0 : index
    %c0_15 = arith.constant 0 : index
    %c2 = arith.constant 2 : index
    %c0_16 = arith.constant 0 : index
    %13 = vector.load %arg1[%c0_14, %c0_15, %c2, %c0_16] : memref<1x1x1190x4xbf16, #tpu.memory_space<vmem>>, vector<1x1x1088x4xbf16>
    %14 = vector.shape_cast %13 : vector<1x1x1088x4xbf16> to vector<1088x4xbf16>
    %c2_17 = arith.constant 2 : index
    %c0_18 = arith.constant 0 : index
    %c0_19 = arith.constant 0 : index
    %15 = vector.load %arg2[%c2_17, %c0_18, %c0_19] : memref<9x4x128xbf16, #tpu.memory_space<vmem>>, vector<1x4x128xbf16>
    %16 = vector.shape_cast %15 : vector<1x4x128xbf16> to vector<4x128xbf16>
    %cst_20 = arith.constant dense<0.000000e+00> : vector<1088x128xf32>
    %17 = tpu.matmul %14, %16, %cst_20 {dimension_numbers = #tpu.dot_dimension_numbers<[1], [0], [0], [1], [0, 0, 1, 1], [], []>} : vector<1088x4xbf16>, vector<4x128xbf16>, vector<1088x128xf32> -> vector<1088x128xf32>
    %18 = arith.addf %12, %17 : vector<1088x128xf32>
    %c0_21 = arith.constant 0 : index
    %c0_22 = arith.constant 0 : index
    %c34 = arith.constant 34 : index
    %c0_23 = arith.constant 0 : index
    %19 = vector.load %arg1[%c0_21, %c0_22, %c34, %c0_23] : memref<1x1x1190x4xbf16, #tpu.memory_space<vmem>>, vector<1x1x1088x4xbf16>
    %20 = vector.shape_cast %19 : vector<1x1x1088x4xbf16> to vector<1088x4xbf16>
    %c3 = arith.constant 3 : index
    %c0_24 = arith.constant 0 : index
    %c0_25 = arith.constant 0 : index
    %21 = vector.load %arg2[%c3, %c0_24, %c0_25] : memref<9x4x128xbf16, #tpu.memory_space<vmem>>, vector<1x4x128xbf16>
    %22 = vector.shape_cast %21 : vector<1x4x128xbf16> to vector<4x128xbf16>
    %cst_26 = arith.constant dense<0.000000e+00> : vector<1088x128xf32>
    %23 = tpu.matmul %20, %22, %cst_26 {dimension_numbers = #tpu.dot_dimension_numbers<[1], [0], [0], [1], [0, 0, 1, 1], [], []>} : vector<1088x4xbf16>, vector<4x128xbf16>, vector<1088x128xf32> -> vector<1088x128xf32>
    %24 = arith.addf %18, %23 : vector<1088x128xf32>
    %c0_27 = arith.constant 0 : index
    %c0_28 = arith.constant 0 : index
    %c35 = arith.constant 35 : index
    %c0_29 = arith.constant 0 : index
    %25 = vector.load %arg1[%c0_27, %c0_28, %c35, %c0_29] : memref<1x1x1190x4xbf16, #tpu.memory_space<vmem>>, vector<1x1x1088x4xbf16>
    %26 = vector.shape_cast %25 : vector<1x1x1088x4xbf16> to vector<1088x4xbf16>
    %c4 = arith.constant 4 : index
    %c0_30 = arith.constant 0 : index
    %c0_31 = arith.constant 0 : index
    %27 = vector.load %arg2[%c4, %c0_30, %c0_31] : memref<9x4x128xbf16, #tpu.memory_space<vmem>>, vector<1x4x128xbf16>
    %28 = vector.shape_cast %27 : vector<1x4x128xbf16> to vector<4x128xbf16>
    %cst_32 = arith.constant dense<0.000000e+00> : vector<1088x128xf32>
    %29 = tpu.matmul %26, %28, %cst_32 {dimension_numbers = #tpu.dot_dimension_numbers<[1], [0], [0], [1], [0, 0, 1, 1], [], []>} : vector<1088x4xbf16>, vector<4x128xbf16>, vector<1088x128xf32> -> vector<1088x128xf32>
    %30 = arith.addf %24, %29 : vector<1088x128xf32>
    %c0_33 = arith.constant 0 : index
    %c0_34 = arith.constant 0 : index
    %c36 = arith.constant 36 : index
    %c0_35 = arith.constant 0 : index
    %31 = vector.load %arg1[%c0_33, %c0_34, %c36, %c0_35] : memref<1x1x1190x4xbf16, #tpu.memory_space<vmem>>, vector<1x1x1088x4xbf16>
    %32 = vector.shape_cast %31 : vector<1x1x1088x4xbf16> to vector<1088x4xbf16>
    %c5 = arith.constant 5 : index
    %c0_36 = arith.constant 0 : index
    %c0_37 = arith.constant 0 : index
    %33 = vector.load %arg2[%c5, %c0_36, %c0_37] : memref<9x4x128xbf16, #tpu.memory_space<vmem>>, vector<1x4x128xbf16>
    %34 = vector.shape_cast %33 : vector<1x4x128xbf16> to vector<4x128xbf16>
    %cst_38 = arith.constant dense<0.000000e+00> : vector<1088x128xf32>
    %35 = tpu.matmul %32, %34, %cst_38 {dimension_numbers = #tpu.dot_dimension_numbers<[1], [0], [0], [1], [0, 0, 1, 1], [], []>} : vector<1088x4xbf16>, vector<4x128xbf16>, vector<1088x128xf32> -> vector<1088x128xf32>
    %36 = arith.addf %30, %35 : vector<1088x128xf32>
    %c0_39 = arith.constant 0 : index
    %c0_40 = arith.constant 0 : index
    %c68 = arith.constant 68 : index
    %c0_41 = arith.constant 0 : index
    %37 = vector.load %arg1[%c0_39, %c0_40, %c68, %c0_41] : memref<1x1x1190x4xbf16, #tpu.memory_space<vmem>>, vector<1x1x1088x4xbf16>
    %38 = vector.shape_cast %37 : vector<1x1x1088x4xbf16> to vector<1088x4xbf16>
    %c6 = arith.constant 6 : index
    %c0_42 = arith.constant 0 : index
    %c0_43 = arith.constant 0 : index
    %39 = vector.load %arg2[%c6, %c0_42, %c0_43] : memref<9x4x128xbf16, #tpu.memory_space<vmem>>, vector<1x4x128xbf16>
    %40 = vector.shape_cast %39 : vector<1x4x128xbf16> to vector<4x128xbf16>
    %cst_44 = arith.constant dense<0.000000e+00> : vector<1088x128xf32>
    %41 = tpu.matmul %38, %40, %cst_44 {dimension_numbers = #tpu.dot_dimension_numbers<[1], [0], [0], [1], [0, 0, 1, 1], [], []>} : vector<1088x4xbf16>, vector<4x128xbf16>, vector<1088x128xf32> -> vector<1088x128xf32>
    %42 = arith.addf %36, %41 : vector<1088x128xf32>
    %c0_45 = arith.constant 0 : index
    %c0_46 = arith.constant 0 : index
    %c69 = arith.constant 69 : index
    %c0_47 = arith.constant 0 : index
    %43 = vector.load %arg1[%c0_45, %c0_46, %c69, %c0_47] : memref<1x1x1190x4xbf16, #tpu.memory_space<vmem>>, vector<1x1x1088x4xbf16>
    %44 = vector.shape_cast %43 : vector<1x1x1088x4xbf16> to vector<1088x4xbf16>
    %c7 = arith.constant 7 : index
    %c0_48 = arith.constant 0 : index
    %c0_49 = arith.constant 0 : index
    %45 = vector.load %arg2[%c7, %c0_48, %c0_49] : memref<9x4x128xbf16, #tpu.memory_space<vmem>>, vector<1x4x128xbf16>
    %46 = vector.shape_cast %45 : vector<1x4x128xbf16> to vector<4x128xbf16>
    %cst_50 = arith.constant dense<0.000000e+00> : vector<1088x128xf32>
    %47 = tpu.matmul %44, %46, %cst_50 {dimension_numbers = #tpu.dot_dimension_numbers<[1], [0], [0], [1], [0, 0, 1, 1], [], []>} : vector<1088x4xbf16>, vector<4x128xbf16>, vector<1088x128xf32> -> vector<1088x128xf32>
    %48 = arith.addf %42, %47 : vector<1088x128xf32>
    %c0_51 = arith.constant 0 : index
    %c0_52 = arith.constant 0 : index
    %c70 = arith.constant 70 : index
    %c0_53 = arith.constant 0 : index
    %49 = vector.load %arg1[%c0_51, %c0_52, %c70, %c0_53] : memref<1x1x1190x4xbf16, #tpu.memory_space<vmem>>, vector<1x1x1088x4xbf16>
    %50 = vector.shape_cast %49 : vector<1x1x1088x4xbf16> to vector<1088x4xbf16>
    %c8 = arith.constant 8 : index
    %c0_54 = arith.constant 0 : index
    %c0_55 = arith.constant 0 : index
    %51 = vector.load %arg2[%c8, %c0_54, %c0_55] : memref<9x4x128xbf16, #tpu.memory_space<vmem>>, vector<1x4x128xbf16>
    %52 = vector.shape_cast %51 : vector<1x4x128xbf16> to vector<4x128xbf16>
    %cst_56 = arith.constant dense<0.000000e+00> : vector<1088x128xf32>
    %53 = tpu.matmul %50, %52, %cst_56 {dimension_numbers = #tpu.dot_dimension_numbers<[1], [0], [0], [1], [0, 0, 1, 1], [], []>} : vector<1088x4xbf16>, vector<4x128xbf16>, vector<1088x128xf32> -> vector<1088x128xf32>
    %54 = arith.addf %48, %53 : vector<1088x128xf32>
    %c0_57 = arith.constant 0 : index
    %c0_58 = arith.constant 0 : index
    %55 = vector.load %arg3[%c0_57, %c0_58] : memref<1x128xf32, #tpu.memory_space<vmem>>, vector<1x128xf32>
    %56 = vector.broadcast %55 : vector<1x128xf32> to vector<1088x128xf32>
    %57 = arith.addf %54, %56 : vector<1088x128xf32>
    %cst_59 = arith.constant 0.000000e+00 : f32
    %58 = vector.broadcast %cst_59 : f32 to vector<1088x128xf32>
    %59 = arith.maximumf %57, %58 : vector<1088x128xf32>
    %60 = arith.truncf %59 : vector<1088x128xf32> to vector<1088x128xbf16>
    %c0_60 = arith.constant 0 : index
    %c0_61 = arith.constant 0 : index
    %c0_62 = arith.constant 0 : index
    %61 = vector.load %arg4[%c0_60, %c0_61, %c0_62] : memref<1x1088x128xbf16, #tpu.memory_space<vmem>>, vector<1x1088x128xbf16>
    %62 = vector.shape_cast %61 : vector<1x1088x128xbf16> to vector<1088x128xbf16>
    %63 = vector.shape_cast %60 : vector<1088x128xbf16> to vector<1x1088x128xbf16>
    tpu.vector_store %arg4[%c0_60, %c0_61, %c0_62], %63 {strides = array<i32>} : memref<1x1088x128xbf16, #tpu.memory_space<vmem>>, vector<1x1088x128xbf16>,
    return
  }
  func.func @transform_0(%arg0: i32) -> (i32, i32, i32, i32) {
    %c0_i32 = arith.constant 0 : i32
    %c0_i32_0 = arith.constant 0 : i32
    %c0_i32_1 = arith.constant 0 : i32
    %c0_i32_2 = arith.constant 0 : i32
    return %arg0, %c0_i32, %c0_i32_0, %c0_i32_1 : i32, i32, i32, i32
  }
  func.func @transform_1(%arg0: i32) -> (i32, i32, i32) {
    %c0_i32 = arith.constant 0 : i32
    %c0_i32_0 = arith.constant 0 : i32
    %c0_i32_1 = arith.constant 0 : i32
    %c0_i32_2 = arith.constant 0 : i32
    return %c0_i32, %c0_i32_0, %c0_i32_1 : i32, i32, i32
  }
  func.func @transform_2(%arg0: i32) -> (i32, i32) {
    %c0_i32 = arith.constant 0 : i32
    %c0_i32_0 = arith.constant 0 : i32
    %c0_i32_1 = arith.constant 0 : i32
    return %c0_i32, %c0_i32_0 : i32, i32
  }
  func.func @transform_3(%arg0: i32) -> (i32, i32, i32) {
    %c0_i32 = arith.constant 0 : i32
    %c0_i32_0 = arith.constant 0 : i32
    %c0_i32_1 = arith.constant 0 : i32
    return %arg0, %c0_i32, %c0_i32_0 : i32, i32, i32
  }
}

</mosaic_0001>

<bundles_post_ra>
// kernel: tpu_custom_call.1
= control target key start
LH: loop header
LB: loop body
LE: loop exit
PB: predicated region body
PF: predicated region fallthrough
CT: control target
= control target key end

     0   :  { %8 = vsyncpa [#allocation3], 0  ;;  %s21047_s0 = inlined_call_operand.vmem [shape: bf16[2,1,1190,4], index: 0, kind: input, shape index: {}]   ;;  %s21048_s1 = inlined_call_operand.vmem [shape: bf16[9,4,128], index: 1, kind: input, shape index: {}]   ;;  %s21049_s2 = inlined_call_operand.vmem [shape: f32[1,128], index: 2, kind: input, shape index: {}]   ;;  %s21050_s3 = inlined_call_operand.hbm [shape: bf16[2,1088,128], index: 3, kind: output, shape index: {}]  }
   0x1   :  { %10 = vsyncpa [#allocation3 + $0x1], 0  ;;  %s18223_s12 = smov 0   ;;  %s18225_s13 = smov 0  }
   0x2   :  { %s18227_s14 = smov 0   ;;  %s18229_s15 = smov 0  }
   0x3 LB: > { %s18244_s16 = sadd.s32 4294967295, %s18198_s15   ;;  %s13103_s17 = sadd.s32 4294967294, %s18198_s15   ;;  %s18198_s15 = sphi %s18229_s15, %s21252_s15   ;;  %s18194_s14 = sphi %s18227_s14, %s21251_s14   ;;  %s18190_s13 = sphi %s18225_s13, %s21250_s13   ;;  %s18186_s12 = sphi %s18223_s12, %s21249_s12  }
   0x4   : > { %s18248_s18 = sadd.s32 1, %s18198_s15   ;;  %s91_s19 = sadd.s32 1, %s18194_s14 }
   0x5   : > { %s88_s20 = ssub.s32 %s18198_s15, %s18248_s18  ;;  %p101_p0 = scmp.ne.s32.totalorder %s18194_s14, %s18190_s13 }
   0x6   : > { %p89_p1 = scmp.eq.s32.totalorder %s88_s20, 0  ;;  %p102_p2 = scmp.eq.s32.totalorder %s18244_s16, 1 }
   0x7   : > { %p107_p3 = scmp.ne.s32.totalorder %s18190_s13, %s18186_s12  ;;  %p108_p4 = scmp.eq.s32.totalorder %s13103_s17, 1 }
   0x8   : > { %s18259_s21 = scalar_select %p89_p1, %s18194_s14, %s91_s19  }
   0x9   : > { %p18261_p5 = por %p102_p2, %p101_p0  ;;  %p18265_p6 = por %p108_p4, %p107_p3 }
   0xa   : > { %p13106_p7 = scmp.ge.s32.totalorder %s18198_s15, 1  ;;  %p140_p8 = scmp.lt.s32.totalorder %s18198_s15, 3 }
   0xc   : > { %p141_p9 = pnand %p13106_p7, %p140_p8 }
   0xe   : > { %144 = sbr.rel (%p141_p9) target bundleno = 1496 (0x5d8), region = 32 }
  0x15   : > { %v13108_v0 = vld [vmem:[%s21048_s1 + $0x2] sm:$0x3]  ;;  %vm1407_vm0 = vcmask 1041408   ;;  %v13522_v1 = vld [vmem:[%s21048_s1 + $0x8] sm:$0x3]  ;;  %p164_p10 = scmp.lt.s32.totalorder %s18244_s16, 1 }
  0x16   : > { %17576 = vmatprep.subr.msk.bf16.mxu1 %vm1407_vm0, %v13108_v0  ;;  %17580 = vmatprep.subr.msk.bf16.mxu0 %vm1407_vm0, %v13522_v1  ;;  %v1409_v2 = vsel %vm1407_vm0, %v13108_v0, 0  ;;  %v18282_v3 = vsel %vm1407_vm0, %v13522_v1, 0  ;;  %v306_v4 = vld [vmem:[%s21048_s1] sm:$0x3]  ;;  %v13592_v5 = vld [vmem:[%s21048_s1 + $0xa] sm:$0x3] }
  0x17   : > { %21107 = vst [vmem:[#allocation5_spill] sm:$0xff] %v18282_v3  ;;  %15245 = vmatpush3.bf16.msra.mxu1 %v1409_v2  ;;  %15797 = vmatpush3.bf16.msra.mxu0 %v18282_v3  ;;  %s165_s28 = scalar_select %p164_p10, %s18244_s16, 1  ;;  %vm653_vm1 = vsmask.f32 7424  ;;  %vm1202_vm2 = vcmask 31744   ;;  %v2125_v6 = vsel %vm1407_vm0, %v306_v4, 0 }
  0x18   : > { %17577 = vmatprep.subr.msk.bf16.mxu1 %vm1407_vm0, %v306_v4  ;;  %17582 = vmatprep.subr.msk.bf16.mxu0 %vm1407_vm0, %v13592_v5  ;;  %vm5313_vm3 = vsmask.f32 6400  ;;  %v18307_v12 = vsel %vm1407_vm0, %v13592_v5, 0  ;;  %vm6860_vm4 = vcmask 1045504   ;;  %vm2710_vm5 = vcmask 1046528   ;;  %s17588_s11 = smul.u32 8704, %s18244_s16 }
  0x19   : > { %s17587_s6 = smul.u32 596, %s165_s28  ;;  %vm9463_vm6 = vsmask.f32 5376  ;;  %vm11010_vm7 = vcmask 1044480   ;;  %s18200_s26 = smov [#allocation2]  }
  0x1a   : > { %s20998_s24 = scalar_lea.hbm %s21050_s3, %s17588_s11  ;;  %s18140_s27 = sshll.u32 %s18200_s26, 4  ;;  %s18141_s27 = int_to_ptr.vmem [resolvable:$false] %s18140_s27 }
  0x1b   : > { %s18297_s9 = scalar_lea.vmem %s21047_s0, %s17587_s6  ;;  %s161_s6 = sand.u32 1, %s18190_s13  }
  0x1c   : > { %v170_v7 = vld [vmem:[%s18297_s9] sm:$0xf]  ;;  %v171_v8 = vld [vmem:[%s18297_s9 + $0x4] sm:$0xf]  ;;  %v17631_v10 = vld [vmem:[%s18297_s9 + $0x8] sm:$0xff]   ;;  %s20643_s7 = smul.u32 544, %s161_s6 }
  0x1d   : > { %v18302_v9 = vcombine.low %v170_v7, %v171_v8  ;;  %v3768_v11 = vld [vmem:[%s18297_s9 + $0x10] sm:$0xe]  ;;  %v3769_v13 = vld [vmem:[%s18297_s9 + $0x14] sm:$0xf]  ;;  %v662_v16 = vshll.u32 %v17631_v10, 16  ;;  %v666_v17 = vshrl.u32 %v17631_v10, 16 }
  0x1e   : > { %v17633_v18 = vld [vmem:[%s18297_s9 + $0x18] sm:$0xff]   ;;  %v17634_v19 = vld [vmem:[%s18297_s9 + $0x10] sm:$0xff]   ;;  %v18314_v20 = vcombine.low %v3768_v11, %v3769_v13  ;;  %v17635_v28 = vld [vmem:[%s18297_s9 + $0x20] sm:$0xff]   ;;  %s20668_s8 = scalar_lea.vmem [#allocation2], %s20643_s7  ;;  %s21006_s16 = scalar_lea.sflag [#allocation3], %s161_s6 }
  0x1f   : > { %v655_v14 = vshrl.u32 %v18302_v9, 16  ;;  %v657_v15 = vshll.u32 %v18302_v9, 16  ;;  %v664_v22 = vrot.slane %v662_v16, 1  ;;  %v5323_v23 = vshrl.u32 %v17633_v18, 16  ;;  %v17636_v33 = vld [vmem:[%s18297_s9 + $0x18] sm:$0xff]   ;;  %v17637_v34 = vld [vmem:[%s18297_s9 + $0x28] sm:$0xff]  }
  0x20   : > { %21108 = vst [vmem:[#allocation6_spill] sm:$0xff] %v18314_v20  ;;  %v5326_v24 = vshll.u32 %v17633_v18, 16  ;;  %v5315_v25 = vshrl.u32 %v18314_v20, 16  ;;  %v5318_v26 = vshll.u32 %v18314_v20, 16  ;;  %v670_v27 = vshll.u32 %v17634_v19, 16  ;;  %v17638_v47 = vld [vmem:[%s18297_s9 + $0x20] sm:$0xff]  }
  0x21   : > { %v659_v21 = vrot.slane %v657_v15, 1  ;;  %v668_v30 = vor.u32 %v666_v17, %v664_v22  ;;  %v5325_v31 = vrot.slane %v5323_v23, 1  ;;  %v5332_v38 = vshrl.u32 %v17635_v28, 16  ;;  %v17639_v48 = vld [vmem:[%s18297_s9 + $0x30] sm:$0xff]   ;;  %v17640_v53 = vld [vmem:[%s18297_s9 + $0x28] sm:$0xff]   ;;  %v17641_v58 = vld [vmem:[%s18297_s9 + $0x38] sm:$0xff]  }
  0x22   : > { %v5328_v32 = vrot.slane %v5326_v24, 2  ;;  %v5317_v35 = vrot.slane %v5315_v25, 1  ;;  %v5320_v36 = vrot.slane %v5318_v26, 2  ;;  %v672_v37 = vrot.slane %v670_v27, 1  ;;  %v17642_v63 = vld [vmem:[%s18297_s9 + $0x30] sm:$0xff]   ;;  %v17643_v15 = vld [vmem:[%s18297_s9 + $0x40] sm:$0xff]  }
  0x23   : > { %v660_v29 = vor.u32 %v659_v21, %v655_v14  ;;  %v5335_v41 = vshll.u32 %v17635_v28, 16  ;;  %v674_v42 = vshrl.u32 %v17634_v19, 16  ;;  %v5334_v45 = vrot.slane %v5332_v38, 1  ;;  %v17644_v25 = vld [vmem:[%s18297_s9 + $0x38] sm:$0xff]   ;;  %v17646_v38 = vld [vmem:[%s18297_s9 + $0x40] sm:$0xff]   ;;  %s13041_s17 = sshll.u32 %s20668_s8, 4  ;;  %s21000_s17 = int_to_ptr.vmem [resolvable:$true] %s13041_s17 }
  0x24   : > { %v5329_v40 = vor.u32 %v5328_v32, %v5325_v31  ;;  %v5321_v43 = vor.u32 %v5320_v36, %v5317_v35  ;;  %v673_v44 = vsel %vm653_vm1, %v668_v30, %v672_v37  ;;  %v678_v46 = vshll.u32 %v17636_v33, 16  ;;  %s18136_s25 = scalar_lea.vmem %s21000_s17, 8704  ;;  %s18142_s28 = scalar_lea.vmem %s18141_s27, 17408 }
  0x25   : > { %v665_v39 = vsel %vm653_vm1, %v660_v29, %v664_v22  ;;  %v5337_v49 = vrot.slane %v5335_v41, 2  ;;  %v676_v50 = vor.u32 %v674_v42, %v672_v37  ;;  %v5341_v51 = vshrl.u32 %v17637_v34, 16  ;;  %p18137_p11 = scmp.ne.s32.totalorder %s21000_s17, %s18136_s25  ;;  %p18143_p0 = scmp.lt.s32.totalorder %s21000_s17, %s18141_s27 }
  0x26   : > { %15246 = vmatprep.mubr.msk.bf16.mxu1 %vm1202_vm2, %v665_v39  ;;  %v5344_v52 = vshll.u32 %v17637_v34, 16  ;;  %v5330_v54 = vsel %vm5313_vm3, %v5321_v43, %v5329_v40  ;;  %v680_v55 = vrot.slane %v678_v46, 1  ;;  %v682_v56 = vshrl.u32 %v17636_v33, 16  ;;  %v17645_v33 = vld [vmem:[%s18297_s9 + $0x48] sm:$0xff]   ;;  %v17647_v46 = vld [vmem:[%s18297_s9 + $0x50] sm:$0xff]   ;;  %p18144_p1 = scmp.lt.s32.totalorder %s18142_s28, %s18136_s25 }
  0x27   : > { %15247 = vmatmul.mubr.msk.bf16.vlgmr.msra.gmra.mrb[0].mxu1 %vm1202_vm2, %v673_v44  ;;  %v686_v57 = vshll.u32 %v17638_v47, 16  ;;  %15798 = vmatprep.mubr.msk.bf16.mxu0 %vm1202_vm2, %v5330_v54  ;;  %v5338_v59 = vor.u32 %v5337_v49, %v5334_v45  ;;  %v5343_v60 = vrot.slane %v5341_v51, 1  ;;  %v5350_v62 = vshrl.u32 %v17639_v48, 16  ;;  %p18138_p12 = pnand %p18137_p11, %p18261_p5 }
  0x28   : > { %15383 = vmatpush3.bf16.msra.mxu1 %v2125_v6  ;;  %v5346_v61 = vrot.slane %v5344_v52, 2  ;;  %v681_v0 = vsel %vm653_vm1, %v676_v50, %v680_v55  ;;  %v684_v1 = vor.u32 %v682_v56, %v680_v55  ;;  %v5353_v4 = vshll.u32 %v17639_v48, 16  ;;  %v17649_v55 = vld [vmem:[%s18297_s9 + $0x58] sm:$0xff]   ;;  %p18145_p2 = por %p18144_p1, %p18143_p0 }
  0x29   : > { %v688_v2 = vrot.slane %v686_v57, 1  ;;  %v5339_v5 = vsel %vm5313_vm3, %v5329_v40, %v5338_v59  ;;  %15250 = vmatprep.mubr.msk.bf16.mxu1 %vm1202_vm2, %v681_v0  ;;  %v5352_v7 = vrot.slane %v5350_v62, 1  ;;  %v690_v8 = vshrl.u32 %v17638_v47, 16  ;;  %v17648_v47 = vld [vmem:[%s18297_s9 + $0x48] sm:$0xff]   ;;  %p18139_p13 = pneg %p18138_p12 }
  0x2a   : > { %v5347_v6 = vor.u32 %v5346_v61, %v5343_v60  ;;  %15799 = vmatmul.mubr.msk.bf16.vlgmr.msra.gmra.mrb[0].mxu0 %vm1202_vm2, %v5339_v5  ;;  %v5355_v11 = vrot.slane %v5353_v4, 2  ;;  %v694_v13 = vshll.u32 %v17640_v53, 16  ;;  %v5359_v14 = vshrl.u32 %v17641_v58, 16 }
  0x2b   : > { %v689_v10 = vsel %vm653_vm1, %v684_v1, %v688_v2  ;;  %15935 = vmatpush3.bf16.msra.mxu0 %v18307_v12  ;;  %v692_v17 = vor.u32 %v690_v8, %v688_v2  ;;  %v5362_v18 = vshll.u32 %v17641_v58, 16  ;;  %v698_v19 = vshrl.u32 %v17640_v53, 16  ;;  %v17651_v2 = vld [vmem:[%s18297_s9 + $0x60] sm:$0xff]   ;;  %p18146_p3 = pnand %p18145_p2, %p18139_p13 }
  0x2c   : > { %v5348_v16 = vsel %vm5313_vm3, %v5338_v59, %v5347_v6  ;;  %v5356_v21 = vor.u32 %v5355_v11, %v5352_v7  ;;  %v696_v22 = vrot.slane %v694_v13, 1  ;;  %v5361_v23 = vrot.slane %v5359_v14, 1  ;;  %v17652_v13 = vld [vmem:[%s18297_s9 + $0x58] sm:$0xff]  }
  0x2d   : > { %15802 = vmatprep.mubr.msk.bf16.mxu0 %vm1202_vm2, %v5348_v16  ;;  %v702_v24 = vshll.u32 %v17642_v63, 16  ;;  %v5364_v26 = vrot.slane %v5362_v18, 2  ;;  %v5368_v27 = vshrl.u32 %v17643_v15, 16  ;;  %v5371_v28 = vshll.u32 %v17643_v15, 16  ;;  %v17653_v18 = vld [vmem:[%s18297_s9 + $0x68] sm:$0xff]  }
  0x2e   : > { %v706_v12 = vshrl.u32 %v17642_v63, 16  ;;  %v5357_v29 = vsel %vm5313_vm3, %v5347_v6, %v5356_v21  ;;  %v697_v30 = vsel %vm653_vm1, %v692_v17, %v696_v22  ;;  %v700_v31 = vor.u32 %v698_v19, %v696_v22  ;;  %v17650_v63 = vld [vmem:[%s18297_s9 + $0x50] sm:$0xff]  }
  0x2f   : > { %15251 = vmatmul.mubr.msk.bf16.gmra.mrb[4].mxu1 %vm1202_vm2, %v689_v10  ;;  %v704_v32 = vrot.slane %v702_v24, 1  ;;  %v5365_v34 = vor.u32 %v5364_v26, %v5361_v23  ;;  %v5370_v35 = vrot.slane %v5368_v27, 1  ;;  %v5373_v36 = vrot.slane %v5371_v28, 2  ;;  %v17654_v28 = vld [vmem:[%s18297_s9 + $0x60] sm:$0xff]  }
  0x30   : > { %15254 = vmatprep.mubr.msk.bf16.mxu1 %vm1202_vm2, %v697_v30  ;;  %v710_v37 = vshll.u32 %v17644_v25, 16  ;;  %v5377_v40 = vshrl.u32 %v17645_v33, 16  ;;  %v5380_v41 = vshll.u32 %v17645_v33, 16  ;;  %v714_v45 = vshrl.u32 %v17644_v25, 16 }
  0x31   : > { %v708_v39 = vor.u32 %v706_v12, %v704_v32  ;;  %v5366_v42 = vsel %vm5313_vm3, %v5356_v21, %v5365_v34  ;;  %v705_v43 = vsel %vm653_vm1, %v700_v31, %v704_v32  ;;  %v718_v50 = vshll.u32 %v17646_v38, 16  ;;  %v17655_v12 = vld [vmem:[%s18297_s9 + $0x70] sm:$0xff]   ;;  %v17656_v31 = vld [vmem:[%s18297_s9 + $0x68] sm:$0xff]  }
  0x32   : > { %v712_v44 = vrot.slane %v710_v37, 1  ;;  %15803 = vmatmul.mubr.msk.bf16.gmra.mrb[4].mxu0 %vm1202_vm2, %v5357_v29  ;;  %v5379_v48 = vrot.slane %v5377_v40, 1  ;;  %v5382_v49 = vrot.slane %v5380_v41, 2  ;;  %v722_v51 = vshrl.u32 %v17646_v38, 16  ;;  %v17657_v40 = vld [vmem:[%s18297_s9 + $0x78] sm:$0xff]  }
  0x33   : > { %15806 = vmatprep.mubr.msk.bf16.mxu0 %vm1202_vm2, %v5366_v42  ;;  %v5374_v52 = vor.u32 %v5373_v36, %v5370_v35  ;;  %v5386_v54 = vshrl.u32 %v17647_v46, 16  ;;  %v720_v57 = vrot.slane %v718_v50, 1  ;;  %v5389_v58 = vshll.u32 %v17647_v46, 16  ;;  %v17659_v50 = vld [vmem:[%s18297_s9 + $0x80] sm:$0xff]  }
  0x34   : > { %v713_v53 = vsel %vm653_vm1, %v708_v39, %v712_v44  ;;  %v5383_v56 = vor.u32 %v5382_v49, %v5379_v48  ;;  %v726_v59 = vshll.u32 %v17648_v47, 16  ;;  %v5395_v61 = vshrl.u32 %v17649_v55, 16  ;;  %v17658_v49 = vld [vmem:[%s18297_s9 + $0x70] sm:$0xff]  }
  0x35   : > { %v5388_v60 = vrot.slane %v5386_v54, 1  ;;  %v5398_v62 = vshll.u32 %v17649_v55, 16  ;;  %v716_v0 = vor.u32 %v714_v45, %v712_v44  ;;  %v5391_v1 = vrot.slane %v5389_v58, 2 }
  0x36   : > { %v5375_v4 = vsel %vm5313_vm3, %v5365_v34, %v5374_v52  ;;  %v724_v5 = vor.u32 %v722_v51, %v720_v57  ;;  %v728_v6 = vrot.slane %v726_v59, 1  ;;  %v5384_v7 = vsel %vm5313_vm3, %v5374_v52, %v5383_v56 }
  0x37   : > { %15255 = vmatmul.mubr.msk.bf16.gmra.mrb[8].mxu1 %vm1202_vm2, %v705_v43  ;;  %v5397_v8 = vrot.slane %v5395_v61, 1  ;;  %v5400_v10 = vrot.slane %v5398_v62, 2  ;;  %v734_v11 = vshll.u32 %v17650_v63, 16  ;;  %v721_v14 = vsel %vm653_vm1, %v716_v0, %v720_v57  ;;  %v17660_v62 = vld [vmem:[%s18297_s9 + $0x78] sm:$0xff]  }
  0x38   : > { %15258 = vmatprep.mubr.msk.bf16.mxu1 %vm1202_vm2, %v713_v53  ;;  %v5392_v15 = vor.u32 %v5391_v1, %v5388_v60  ;;  %v730_v16 = vshrl.u32 %v17648_v47, 16  ;;  %v5404_v17 = vshrl.u32 %v17651_v2, 16  ;;  %v729_v19 = vsel %vm653_vm1, %v724_v5, %v728_v6 }
  0x39   : > { %v5407_v21 = vshll.u32 %v17651_v2, 16  ;;  %v738_v22 = vshrl.u32 %v17650_v63, 16  ;;  %v742_v23 = vshll.u32 %v17652_v13, 16  ;;  %v5401_v24 = vor.u32 %v5400_v10, %v5397_v8 }
  0x3a   : > { %15807 = vmatmul.mubr.msk.bf16.gmra.mrb[8].mxu0 %vm1202_vm2, %v5375_v4  ;;  %v5413_v25 = vshrl.u32 %v17653_v18, 16  ;;  %v5416_v26 = vshll.u32 %v17653_v18, 16  ;;  %v736_v27 = vrot.slane %v734_v11, 1  ;;  %v732_v29 = vor.u32 %v730_v16, %v728_v6  ;;  %v17661_v4 = vld [vmem:[%s18297_s9 + $0x88] sm:$0xff]  }
  0x3b   : > { %15810 = vmatprep.mubr.msk.bf16.mxu0 %vm1202_vm2, %v5384_v7  ;;  %v5406_v30 = vrot.slane %v5404_v17, 1  ;;  %v5393_v32 = vsel %vm5313_vm3, %v5383_v56, %v5392_v15  ;;  %v5409_v33 = vrot.slane %v5407_v21, 2  ;;  %v744_v35 = vrot.slane %v742_v23, 1  ;;  %v17663_v23 = vld [vmem:[%s18297_s9 + $0x90] sm:$0xff]  }
  0x3c   : > { %v740_v34 = vor.u32 %v738_v22, %v736_v27  ;;  %v5402_v36 = vsel %vm5313_vm3, %v5392_v15, %v5401_v24  ;;  %v5415_v37 = vrot.slane %v5413_v25, 1  ;;  %v5418_v38 = vrot.slane %v5416_v26, 2  ;;  %v17662_v22 = vld [vmem:[%s18297_s9 + $0x80] sm:$0xff]  }
  0x3d   : > { %v746_v39 = vshrl.u32 %v17652_v13, 16  ;;  %v750_v41 = vshll.u32 %v17654_v28, 16  ;;  %v5422_v42 = vshrl.u32 %v17655_v12, 16  ;;  %v737_v43 = vsel %vm653_vm1, %v732_v29, %v736_v27 }
  0x3e   : > { %v5425_v44 = vshll.u32 %v17655_v12, 16  ;;  %v758_v45 = vshll.u32 %v17656_v31, 16  ;;  %v5410_v46 = vor.u32 %v5409_v33, %v5406_v30  ;;  %v745_v47 = vsel %vm653_vm1, %v740_v34, %v744_v35 }
  0x3f   : > { %15259 = vmatmul.mubr.msk.bf16.gmra.mrb[12].mxu1 %vm1202_vm2, %v721_v14  ;;  %v754_v48 = vshrl.u32 %v17654_v28, 16  ;;  %v5419_v51 = vor.u32 %v5418_v38, %v5415_v37  ;;  %v5431_v52 = vshrl.u32 %v17657_v40, 16  ;;  %v5434_v53 = vshll.u32 %v17657_v40, 16  ;;  %v17665_v28 = vld [vmem:[%s18297_s9 + $0x98] sm:$0xff]  }
  0x40   : > { %15262 = vmatprep.mubr.msk.bf16.mxu1 %vm1202_vm2, %v729_v19  ;;  %v752_v54 = vrot.slane %v750_v41, 1  ;;  %v5424_v55 = vrot.slane %v5422_v42, 1  ;;  %v748_v56 = vor.u32 %v746_v39, %v744_v35  ;;  %v5427_v57 = vrot.slane %v5425_v44, 2 }
  0x41   : > { %v760_v58 = vrot.slane %v758_v45, 1  ;;  %v5411_v59 = vsel %vm5313_vm3, %v5401_v24, %v5410_v46  ;;  %v766_v61 = vshll.u32 %v17658_v49, 16  ;;  %v5420_v63 = vsel %vm5313_vm3, %v5410_v46, %v5419_v51  ;;  %v17664_v24 = vld [vmem:[%s18297_s9 + $0x88] sm:$0xff]   ;;  %v17667_v45 = vld [vmem:[%s18297_s9 + $0xa0] sm:$0xff]  }
  0x42   : > { %15811 = vmatmul.mubr.msk.bf16.gmra.mrb[12].mxu0 %vm1202_vm2, %v5393_v32  ;;  %v756_v60 = vor.u32 %v754_v48, %v752_v54  ;;  %v5433_v0 = vrot.slane %v5431_v52, 1  ;;  %v5436_v1 = vrot.slane %v5434_v53, 2  ;;  %v5440_v2 = vshrl.u32 %v17659_v50, 16  ;;  %v17668_v53 = vld [vmem:[%s18297_s9 + $0x98] sm:$0xff]  }
  0x43   : > { %15814 = vmatprep.mubr.msk.bf16.mxu0 %vm1202_vm2, %v5402_v36  ;;  %v762_v5 = vshrl.u32 %v17656_v31, 16  ;;  %v5443_v6 = vshll.u32 %v17659_v50, 16  ;;  %v753_v7 = vsel %vm653_vm1, %v748_v56, %v752_v54  ;;  %v5428_v8 = vor.u32 %v5427_v57, %v5424_v55  ;;  %v17669_v56 = vld [vmem:[%s18297_s9 + $0xa8] sm:$0xff]  }
  0x44   : > { %v761_v10 = vsel %vm653_vm1, %v756_v60, %v760_v58  ;;  %v768_v11 = vrot.slane %v766_v61, 1  ;;  %v770_v13 = vshrl.u32 %v17658_v49, 16  ;;  %v774_v14 = vshll.u32 %v17660_v62, 16 }
  0x45   : > { %v5437_v15 = vor.u32 %v5436_v1, %v5433_v0  ;;  %v5442_v16 = vrot.slane %v5440_v2, 1  ;;  %v5449_v17 = vshrl.u32 %v17661_v4, 16  ;;  %v5452_v18 = vshll.u32 %v17661_v4, 16 }
  0x46   : > { %v764_v19 = vor.u32 %v762_v5, %v760_v58  ;;  %v5445_v21 = vrot.slane %v5443_v6, 2  ;;  %v5429_v25 = vsel %vm5313_vm3, %v5419_v51, %v5428_v8  ;;  %v772_v26 = vor.u32 %v770_v13, %v768_v11  ;;  %v17671_v13 = vld [vmem:[%s18297_s9 + $0xb0] sm:$0xff]  }
  0x47   : > { %15263 = vmatmul.mubr.msk.bf16.gmra.mrb[16].mxu1 %vm1202_vm2, %v737_v43  ;;  %v776_v27 = vrot.slane %v774_v14, 1  ;;  %v5438_v12 = vsel %vm5313_vm3, %v5428_v8, %v5437_v15  ;;  %v5451_v29 = vrot.slane %v5449_v17, 1  ;;  %v5454_v30 = vrot.slane %v5452_v18, 2  ;;  %v17666_v43 = vld [vmem:[%s18297_s9 + $0x90] sm:$0xff]   ;;  %v17672_v17 = vld [vmem:[%s18297_s9 + $0xa8] sm:$0xff]  }
  0x48   : > { %15266 = vmatprep.mubr.msk.bf16.mxu1 %vm1202_vm2, %v745_v47  ;;  %v769_v31 = vsel %vm653_vm1, %v764_v19, %v768_v11  ;;  %v5446_v32 = vor.u32 %v5445_v21, %v5442_v16  ;;  %v782_v33 = vshll.u32 %v17662_v22, 16  ;;  %v778_v34 = vshrl.u32 %v17660_v62, 16 }
  0x49   : > { %v5458_v35 = vshrl.u32 %v17663_v23, 16  ;;  %v5461_v36 = vshll.u32 %v17663_v23, 16  ;;  %v786_v37 = vshrl.u32 %v17662_v22, 16  ;;  %v777_v38 = vsel %vm653_vm1, %v772_v26, %v776_v27  ;;  %v17673_v22 = vld [vmem:[%s18297_s9 + $0xb8] sm:$0xff]  }
  0x4a   : > { %15815 = vmatmul.mubr.msk.bf16.gmra.mrb[16].mxu0 %vm1202_vm2, %v5411_v59  ;;  %v790_v39 = vshll.u32 %v17664_v24, 16  ;;  %v5467_v40 = vshrl.u32 %v17665_v28, 16  ;;  %v5455_v41 = vor.u32 %v5454_v30, %v5451_v29  ;;  %v5470_v42 = vshll.u32 %v17665_v28, 16 }
  0x4b   : > { %15818 = vmatprep.mubr.msk.bf16.mxu0 %vm1202_vm2, %v5420_v63  ;;  %v784_v44 = vrot.slane %v782_v33, 1  ;;  %v5447_v46 = vsel %vm5313_vm3, %v5437_v15, %v5446_v32  ;;  %v780_v47 = vor.u32 %v778_v34, %v776_v27  ;;  %v5460_v48 = vrot.slane %v5458_v35, 1  ;;  %v17674_v35 = vld [vmem:[%s18297_s9 + $0xb0] sm:$0xff]  }
  0x4c   : > { %v5463_v49 = vrot.slane %v5461_v36, 2  ;;  %v792_v51 = vrot.slane %v790_v39, 1  ;;  %v5469_v52 = vrot.slane %v5467_v40, 1  ;;  %v5456_v54 = vsel %vm5313_vm3, %v5446_v32, %v5455_v41 }
  0x4d   : > { %v788_v50 = vor.u32 %v786_v37, %v784_v44  ;;  %v5472_v55 = vrot.slane %v5470_v42, 2  ;;  %v794_v57 = vshrl.u32 %v17664_v24, 16  ;;  %v798_v58 = vshll.u32 %v17666_v43, 16 }
  0x4e   : > { %v5476_v59 = vshrl.u32 %v17667_v45, 16  ;;  %v785_v60 = vsel %vm653_vm1, %v780_v47, %v784_v44  ;;  %v5479_v61 = vshll.u32 %v17667_v45, 16  ;;  %v5464_v62 = vor.u32 %v5463_v49, %v5460_v48  ;;  %v17677_v47 = vld [vmem:[%s18297_s9 + $0xc8] sm:$0xff]  }
  0x4f   : > { %15267 = vmatmul.mubr.msk.bf16.gmra.mrb[20].mxu1 %vm1202_vm2, %v753_v7  ;;  %v793_v63 = vsel %vm653_vm1, %v788_v50, %v792_v51  ;;  %v802_v0 = vshrl.u32 %v17666_v43, 16  ;;  %v806_v1 = vshll.u32 %v17668_v53, 16  ;;  %v5473_v2 = vor.u32 %v5472_v55, %v5469_v52  ;;  %v17676_v43 = vld [vmem:[%s18297_s9 + $0xb8] sm:$0xff]  }
  0x50   : > { %15270 = vmatprep.mubr.msk.bf16.mxu1 %vm1202_vm2, %v761_v10  ;;  %v5485_v4 = vshrl.u32 %v17669_v56, 16  ;;  %v5488_v5 = vshll.u32 %v17669_v56, 16  ;;  %v796_v6 = vor.u32 %v794_v57, %v792_v51  ;;  %v800_v7 = vrot.slane %v798_v58, 1  ;;  %v17670_v10 = vld [vmem:[%s18297_s9 + $0xa0] sm:$0xff]  }
  0x51   : > { %v5478_v8 = vrot.slane %v5476_v59, 1  ;;  %v5481_v11 = vrot.slane %v5479_v61, 2  ;;  %v5465_v14 = vsel %vm5313_vm3, %v5455_v41, %v5464_v62  ;;  %v808_v16 = vrot.slane %v806_v1, 1  ;;  %v17678_v61 = vld [vmem:[%s18297_s9 + $0xc0] sm:$0xff]  }
  0x52   : > { %15819 = vmatmul.mubr.msk.bf16.gmra.mrb[20].mxu0 %vm1202_vm2, %v5429_v25  ;;  %v804_v15 = vor.u32 %v802_v0, %v800_v7  ;;  %v5474_v18 = vsel %vm5313_vm3, %v5464_v62, %v5473_v2  ;;  %v5487_v19 = vrot.slane %v5485_v4, 1  ;;  %v5490_v21 = vrot.slane %v5488_v5, 2  ;;  %v17679_v62 = vld [vmem:[%s18297_s9 + $0xd0] sm:$0xff]  }
  0x53   : > { %15822 = vmatprep.mubr.msk.bf16.mxu0 %vm1202_vm2, %v5438_v12  ;;  %v801_v23 = vsel %vm653_vm1, %v796_v6, %v800_v7  ;;  %v814_v24 = vshll.u32 %v17670_v10, 16  ;;  %v5482_v25 = vor.u32 %v5481_v11, %v5478_v8  ;;  %v810_v26 = vshrl.u32 %v17668_v53, 16  ;;  %v17680_v6 = vld [vmem:[%s18297_s9 + $0xc8] sm:$0xff]   ;;  %v17681_v11 = vld [vmem:[%s18297_s9 + $0xd8] sm:$0xff]  }
  0x54   : > { %v5494_v27 = vshrl.u32 %v17671_v13, 16  ;;  %v5497_v28 = vshll.u32 %v17671_v13, 16  ;;  %v809_v12 = vsel %vm653_vm1, %v804_v15, %v808_v16  ;;  %v818_v29 = vshrl.u32 %v17670_v10, 16 }
  0x55   : > { %v822_v30 = vshll.u32 %v17672_v17, 16  ;;  %v5503_v32 = vshrl.u32 %v17673_v22, 16  ;;  %v5506_v33 = vshll.u32 %v17673_v22, 16  ;;  %v816_v34 = vrot.slane %v814_v24, 1 }
  0x56   : > { %v5483_v36 = vsel %vm5313_vm3, %v5473_v2, %v5482_v25  ;;  %v812_v37 = vor.u32 %v810_v26, %v808_v16  ;;  %v5496_v39 = vrot.slane %v5494_v27, 1  ;;  %v5499_v40 = vrot.slane %v5497_v28, 2  ;;  %v17682_v28 = vld [vmem:[%s18297_s9 + $0xd0] sm:$0xff]  }
  0x57   : > { %15271 = vmatmul.mubr.msk.bf16.gmra.mrb[24].mxu1 %vm1202_vm2, %v769_v31  ;;  %v5491_v31 = vor.u32 %v5490_v21, %v5487_v19  ;;  %v820_v41 = vor.u32 %v818_v29, %v816_v34  ;;  %v824_v42 = vrot.slane %v822_v30, 1  ;;  %v5505_v45 = vrot.slane %v5503_v32, 1 }
  0x58   : > { %15274 = vmatprep.mubr.msk.bf16.mxu1 %vm1202_vm2, %v777_v38  ;;  %v17675_v38 = vld [vmem:[%s18297_s9 + $0xc0] sm:$0xff]   ;;  %v830_v48 = vshll.u32 %v17674_v35, 16  ;;  %v817_v49 = vsel %vm653_vm1, %v812_v37, %v816_v34  ;;  %v826_v50 = vshrl.u32 %v17672_v17, 16  ;;  %v5500_v53 = vor.u32 %v5499_v40, %v5496_v39 }
  0x59   : > { %v5492_v44 = vsel %vm5313_vm3, %v5482_v25, %v5491_v31  ;;  %v5512_v51 = vshrl.u32 %v17675_v38, 16  ;;  %v5515_v52 = vshll.u32 %v17675_v38, 16  ;;  %v834_v55 = vshrl.u32 %v17674_v35, 16  ;;  %v17685_v35 = vld [vmem:[%s18297_s9 + $0xe8] sm:$0xff]  }
  0x5a   : > { %15823 = vmatmul.mubr.msk.bf16.gmra.mrb[24].mxu0 %vm1202_vm2, %v5447_v46  ;;  %v5508_v46 = vrot.slane %v5506_v33, 2  ;;  %v838_v56 = vshll.u32 %v17676_v43, 16  ;;  %v5521_v58 = vshrl.u32 %v17677_v47, 16  ;;  %v5524_v59 = vshll.u32 %v17677_v47, 16 }
  0x5b   : > { %15826 = vmatprep.mubr.msk.bf16.mxu0 %vm1202_vm2, %v5456_v54  ;;  %v825_v54 = vsel %vm653_vm1, %v820_v41, %v824_v42  ;;  %v5514_v0 = vrot.slane %v5512_v51, 1  ;;  %v5517_v1 = vrot.slane %v5515_v52, 2  ;;  %v5501_v2 = vsel %vm5313_vm3, %v5491_v31, %v5500_v53  ;;  %v17684_v31 = vld [vmem:[%s18297_s9 + $0xd8] sm:$0xff]   ;;  %v17686_v52 = vld [vmem:[%s18297_s9 + $0xe0] sm:$0xff]  }
  0x5c   : > { %v5509_v57 = vor.u32 %v5508_v46, %v5505_v45  ;;  %v840_v5 = vrot.slane %v838_v56, 1  ;;  %v5523_v8 = vrot.slane %v5521_v58, 1  ;;  %v5526_v10 = vrot.slane %v5524_v59, 2 }
  0x5d   : > { %v846_v13 = vshll.u32 %v17678_v61, 16  ;;  %v842_v16 = vshrl.u32 %v17676_v43, 16  ;;  %v5533_v17 = vshll.u32 %v17679_v62, 16  ;;  %v850_v21 = vshrl.u32 %v17678_v61, 16 }
  0x5e   : > { %v5510_v7 = vsel %vm5313_vm3, %v5500_v53, %v5509_v57  ;;  %v854_v22 = vshll.u32 %v17680_v6, 16  ;;  %v5539_v24 = vshrl.u32 %v17681_v11, 16  ;;  %v5542_v25 = vshll.u32 %v17681_v11, 16  ;;  %v17687_v53 = vld [vmem:[%s18297_s9 + $0xf0] sm:$0xff]  }
  0x5f   : > { %15275 = vmatmul.mubr.msk.bf16.gmra.mrb[28].mxu1 %vm1202_vm2, %v785_v60  ;;  %v832_v60 = vrot.slane %v830_v48, 1  ;;  %v848_v26 = vrot.slane %v846_v13, 1  ;;  %v844_v29 = vor.u32 %v842_v16, %v840_v5  ;;  %v5535_v30 = vrot.slane %v5533_v17, 2 }
  0x60   : > { %15278 = vmatprep.mubr.msk.bf16.mxu1 %vm1202_vm2, %v793_v63  ;;  %v828_v63 = vor.u32 %v826_v50, %v824_v42  ;;  %v856_v34 = vrot.slane %v854_v22, 1  ;;  %v5541_v37 = vrot.slane %v5539_v24, 1  ;;  %v5544_v38 = vrot.slane %v5542_v25, 2  ;;  %v17690_v22 = vld [vmem:[%s18297_s9 + $0xf0] sm:$0xff]  }
  0x61   : > { %v836_v4 = vor.u32 %v834_v55, %v832_v60  ;;  %v852_v33 = vor.u32 %v850_v21, %v848_v26  ;;  %v858_v39 = vshrl.u32 %v17680_v6, 16  ;;  %v862_v40 = vshll.u32 %v17682_v28, 16 }
  0x62   : > { %15827 = vmatmul.mubr.msk.bf16.gmra.mrb[28].mxu0 %vm1202_vm2, %v5465_v14  ;;  %v5530_v14 = vshrl.u32 %v17679_v62, 16  ;;  %v833_v15 = vsel %vm653_vm1, %v828_v63, %v832_v60  ;;  %v849_v42 = vsel %vm653_vm1, %v844_v29, %v848_v26  ;;  %v866_v47 = vshrl.u32 %v17682_v28, 16  ;;  %v17688_v62 = vld [vmem:[%s18297_s9 + $0xe8] sm:$0xff]  }
  0x63   : > { %15830 = vmatprep.mubr.msk.bf16.mxu0 %vm1202_vm2, %v5474_v18  ;;  %v5518_v18 = vor.u32 %v5517_v1, %v5514_v0  ;;  %v841_v19 = vsel %vm653_vm1, %v836_v4, %v840_v5  ;;  %v857_v46 = vsel %vm653_vm1, %v852_v33, %v856_v34  ;;  %v5557_v48 = vshrl.u32 %v17685_v35, 16  ;;  %v17689_v1 = vld [vmem:[%s18297_s9 + $0xf8] sm:$0xff]   ;;  %v17693_v28 = vld [vmem:[%s18297_s9 + $0x108] sm:$0xff]  }
  0x64   : > { %v5532_v27 = vrot.slane %v5530_v14, 1  ;;  %v5560_v50 = vshll.u32 %v17685_v35, 16  ;;  %v864_v51 = vrot.slane %v862_v40, 1  ;;  %v860_v55 = vor.u32 %v858_v39, %v856_v34 }
  0x65   : > { %v5519_v32 = vsel %vm5313_vm3, %v5509_v57, %v5518_v18  ;;  %v5559_v61 = vrot.slane %v5557_v48, 1  ;;  %v878_v4 = vshll.u32 %v17686_v52, 16  ;;  %v5566_v5 = vshrl.u32 %v17687_v53, 16  ;;  %v17695_v48 = vld [vmem:[%s18297_s9 + $0x110] sm:$0xff]  }
  0x66   : > { %v5536_v45 = vor.u32 %v5535_v30, %v5532_v27  ;;  %v868_v60 = vor.u32 %v866_v47, %v864_v51  ;;  %v5562_v0 = vrot.slane %v5560_v50, 2  ;;  %v5569_v6 = vshll.u32 %v17687_v53, 16  ;;  %v17692_v27 = vld [vmem:[%s18297_s9 + $0xf8] sm:$0xff]   ;;  %v17696_v53 = vld [vmem:[%s18297_s9 + $0x108] sm:$0xff]  }
  0x67   : > { %15279 = vmatmul.mubr.msk.bf16.gmra.mrb[32].mxu1 %vm1202_vm2, %v801_v23  ;;  %v5527_v23 = vor.u32 %v5526_v10, %v5523_v8  ;;  %v882_v11 = vshrl.u32 %v17686_v52, 16  ;;  %v886_v13 = vshll.u32 %v17688_v62, 16  ;;  %v5578_v16 = vshll.u32 %v17689_v1, 16 }
  0x68   : > { %15282 = vmatprep.mubr.msk.bf16.mxu1 %vm1202_vm2, %v809_v12  ;;  %v17683_v12 = vld [vmem:[%s18297_s9 + $0xe0] sm:$0xff]   ;;  %v5563_v14 = vor.u32 %v5562_v0, %v5559_v61  ;;  %v5571_v21 = vrot.slane %v5569_v6, 2  ;;  %v894_v33 = vshll.u32 %v17690_v22, 16  ;;  %v890_v34 = vshrl.u32 %v17688_v62, 16 }
  0x69   : > { %v5548_v41 = vshrl.u32 %v17683_v12, 16  ;;  %v5551_v43 = vshll.u32 %v17683_v12, 16  ;;  %v5537_v59 = vsel %vm5313_vm3, %v5527_v23, %v5536_v45  ;;  %v888_v26 = vrot.slane %v886_v13, 1 }
  0x6a   : > { %15831 = vmatmul.mubr.msk.bf16.gmra.mrb[32].mxu0 %vm1202_vm2, %v5483_v36  ;;  %v5528_v36 = vsel %vm5313_vm3, %v5518_v18, %v5527_v23  ;;  %v880_v18 = vrot.slane %v878_v4, 1  ;;  %v17691_v23 = vld [vmem:[%s18297_s9 + $0x100] sm:$0xff]   ;;  %v5580_v30 = vrot.slane %v5578_v16, 2  ;;  %v902_v39 = vshll.u32 %v17692_v27, 16 }
  0x6b   : > { %15834 = vmatprep.mubr.msk.bf16.mxu0 %vm1202_vm2, %v5492_v44  ;;  %v870_v44 = vshll.u32 %v17684_v31, 16  ;;  %v5550_v56 = vrot.slane %v5548_v41, 1  ;;  %v5553_v57 = vrot.slane %v5551_v43, 2  ;;  %v5584_v35 = vshrl.u32 %v17691_v23, 16 }
  0x6c   : > { %v884_v25 = vor.u32 %v882_v11, %v880_v18  ;;  %v5593_v40 = vshrl.u32 %v17693_v28, 16  ;;  %v896_v43 = vrot.slane %v894_v33, 1  ;;  %v5602_v61 = vshrl.u32 %v17695_v48, 16  ;;  %v6854_v33 = vld [vmem:[%s18297_s9 + $0x10] sm:$0xc] }
  0x6d   : > { %v872_v58 = vrot.slane %v870_v44, 1  ;;  %v5554_v8 = vor.u32 %v5553_v57, %v5550_v56  ;;  %v17694_v44 = vld [vmem:[%s18297_s9 + $0x100] sm:$0xff]   ;;  %v5586_v47 = vrot.slane %v5584_v35, 1  ;;  %v17697_v57 = vld [vmem:[%s18297_s9 + $0x118] sm:$0xff]   ;;  %v5605_v62 = vshll.u32 %v17695_v48, 16 }
  0x6e   : > { %v5595_v52 = vrot.slane %v5593_v40, 1  ;;  %v5614_v6 = vshll.u32 %v17697_v57, 16  ;;  %v5604_v11 = vrot.slane %v5602_v61, 1 }
  0x6f   : > { %15283 = vmatmul.mubr.msk.bf16.gmra.mrb[36].mxu1 %vm1202_vm2, %v817_v49  ;;  %v5545_v49 = vor.u32 %v5544_v38, %v5541_v37  ;;  %v873_v10 = vsel %vm653_vm1, %v868_v60, %v872_v58  ;;  %v5564_v12 = vsel %vm5313_vm3, %v5554_v8, %v5563_v14  ;;  %v898_v37 = vshrl.u32 %v17690_v22, 16 }
  0x70   : > { %15286 = vmatprep.mubr.msk.bf16.mxu1 %vm1202_vm2, %v825_v54  ;;  %v18470_v54 = vld [vmem:[%s21048_s1 + $0xc] sm:$0x3]  ;;  %v889_v38 = vsel %vm653_vm1, %v884_v25, %v888_v26  ;;  %v5607_v13 = vrot.slane %v5605_v62, 2  ;;  %v5616_v22 = vrot.slane %v5614_v6, 2  ;;  %v17705_v62 = vld [vmem:[%s18297_s9 + $0x138] sm:$0xff]  }
  0x71   : > { %17583 = vmatprep.subr.msk.bf16.mxu0 %vm1407_vm0, %v18470_v54  ;;  %v5546_v63 = vsel %vm5313_vm3, %v5536_v45, %v5545_v49  ;;  %v5555_v24 = vsel %vm5313_vm3, %v5545_v49, %v5554_v8  ;;  %v900_v50 = vor.u32 %v898_v37, %v896_v43  ;;  %v17698_v8 = vld [vmem:[%s18297_s9 + $0x110] sm:$0xff]  }
  0x72   : > { %15835 = vmatmul.mubr.msk.bf16.gmra.mrb[36].mxu0 %vm1202_vm2, %v5501_v2  ;;  %v874_v2 = vshrl.u32 %v17684_v31, 16 }
  0x73   : > { %15838 = vmatprep.mubr.msk.bf16.mxu0 %vm1202_vm2, %v5510_v7  ;;  %v865_v7 = vsel %vm653_vm1, %v860_v55, %v864_v51  ;;  %v904_v51 = vrot.slane %v902_v39, 1 }
  0x74   : > { %v876_v17 = vor.u32 %v874_v2, %v872_v58  ;;  %v906_v58 = vshrl.u32 %v17692_v27, 16  ;;  %v918_v2 = vshll.u32 %v17696_v53, 16 }
  0x75   : > { %v905_v0 = vsel %vm653_vm1, %v900_v50, %v904_v51 }
  0x76   : > { %v881_v31 = vsel %vm653_vm1, %v876_v17, %v880_v18  ;;  %v920_v17 = vrot.slane %v918_v2, 1  ;;  %v17700_v18 = vld [vmem:[%s18297_s9 + $0x118] sm:$0xff]  }
  0x77   : > { %15287 = vmatmul.mubr.msk.bf16.gmra.mrb[40].mxu1 %vm1202_vm2, %v833_v15  ;;  %v5575_v15 = vshrl.u32 %v17689_v1, 16  ;;  %v914_v1 = vshrl.u32 %v17694_v44, 16 }
  0x78   : > { %15290 = vmatprep.mubr.msk.bf16.mxu1 %vm1202_vm2, %v841_v19  ;;  %v5568_v19 = vrot.slane %v5566_v5, 1  ;;  %v5611_v5 = vshrl.u32 %v17697_v57, 16  ;;  %v17704_v57 = vld [vmem:[%s18297_s9 + $0x130] sm:$0xff]  }
  0x79   : > { %v5577_v29 = vrot.slane %v5575_v15, 1 }
  0x7a   : > { %15839 = vmatmul.mubr.msk.bf16.gmra.mrb[40].mxu0 %vm1202_vm2, %v5519_v32  ;;  %v5572_v32 = vor.u32 %v5571_v21, %v5568_v19  ;;  %v5613_v21 = vrot.slane %v5611_v5, 1 }
  0x7b   : > { %15842 = vmatprep.mubr.msk.bf16.mxu0 %vm1202_vm2, %v5528_v36  ;;  %v5587_v36 = vshll.u32 %v17691_v23, 16  ;;  %v5581_v41 = vor.u32 %v5580_v30, %v5577_v29  ;;  %v922_v23 = vshrl.u32 %v17696_v53, 16  ;;  %v930_v29 = vshrl.u32 %v17698_v8, 16  ;;  %v17843_v53 = vld [vmem:[%s18297_s9 + $0x18] sm:$0xff]  }
  0x7c   : > { %v5573_v45 = vsel %vm5313_vm3, %v5563_v14, %v5572_v32  ;;  %v17699_v14 = vld [vmem:[%s18297_s9 + $0x120] sm:$0xff]   ;;  %v934_v30 = vshll.u32 %v17700_v18, 16 }
  0x7d   : > { %v5589_v49 = vrot.slane %v5587_v36, 2  ;;  %v5582_v55 = vsel %vm5313_vm3, %v5572_v32, %v5581_v41  ;;  %v5620_v27 = vshrl.u32 %v17699_v14, 16  ;;  %v924_v36 = vor.u32 %v922_v23, %v920_v17 }
  0x7e   : > { %v936_v40 = vrot.slane %v934_v30, 1  ;;  %v17847_v30 = vld [vmem:[%s18297_s9 + $0x38] sm:$0xff]  }
  0x7f   : > { %15291 = vmatmul.mubr.msk.bf16.gmra.mrb[44].mxu1 %vm1202_vm2, %v849_v42  ;;  %v5596_v42 = vshll.u32 %v17693_v28, 16  ;;  %v5623_v28 = vshll.u32 %v17699_v14, 16  ;;  %v5622_v37 = vrot.slane %v5620_v27, 1  ;;  %v17706_v14 = vld [vmem:[%s18297_s9 + $0x140] sm:$0xff]   ;;  %v970_v27 = vshrl.u32 %v17705_v62, 16 }
  0x80   : > { %15294 = vmatprep.mubr.msk.bf16.mxu1 %vm1202_vm2, %v857_v46  ;;  %v892_v46 = vor.u32 %v890_v34, %v888_v26  ;;  %v5608_v26 = vor.u32 %v5607_v13, %v5604_v11  ;;  %v17702_v34 = vld [vmem:[%s18297_s9 + $0x120] sm:$0xff]   ;;  %v974_v23 = vshll.u32 %v17706_v14, 16 }
  0x81   : > { %v5598_v56 = vrot.slane %v5596_v42, 2  ;;  %v946_v50 = vshrl.u32 %v17702_v34, 16 }
  0x82   : > { %15843 = vmatmul.mubr.msk.bf16.gmra.mrb[44].mxu0 %vm1202_vm2, %v5537_v59  ;;  %v910_v59 = vshll.u32 %v17694_v44, 16  ;;  %v897_v60 = vsel %vm653_vm1, %v892_v46, %v896_v43  ;;  %v17842_v43 = vld [vmem:[%s18297_s9 + $0x14] sm:$0xf] }
  0x83   : > { %15846 = vmatprep.mubr.msk.bf16.mxu0 %vm1202_vm2, %v5546_v63  ;;  %v5590_v63 = vor.u32 %v5589_v49, %v5586_v47  ;;  %v5599_v4 = vor.u32 %v5598_v56, %v5595_v52  ;;  %v13593_v44 = vcombine.low %v6854_v33, %v17842_v43  ;;  %v938_v47 = vshrl.u32 %v17700_v18, 16  ;;  %v17708_v33 = vld [vmem:[%s18297_s9 + $0x150] sm:$0xff]  }
  0x85   : > { %v5591_v15 = vsel %vm5313_vm3, %v5581_v41, %v5590_v63  ;;  %v5600_v19 = vsel %vm5313_vm3, %v5590_v63, %v5599_v4  ;;  %v5609_v35 = vsel %vm5313_vm3, %v5599_v4, %v5608_v26  ;;  %v17703_v41 = vld [vmem:[%s18297_s9 + $0x128] sm:$0xff]   ;;  %v6861_v52 = vrot.slane %v13593_v44, 2  ;;  %v17844_v4 = vld [vmem:[%s18297_s9 + $0x20] sm:$0xff]  }
  0x86   : > { %v954_v2 = vshrl.u32 %v17703_v41, 16  ;;  %v6864_v5 = vrot.slane %v17844_v4, 2  ;;  %v17848_v44 = vld [vmem:[%s18297_s9 + $0x40] sm:$0xff]  }
  0x87   : > { %15295 = vmatmul.mubr.msk.bf16.gmra.mrb[48].mxu1 %vm1202_vm2, %v865_v7  ;;  %v912_v7 = vrot.slane %v910_v59, 1 }
  0x88   : > { %15298 = vmatprep.mubr.msk.bf16.mxu1 %vm1202_vm2, %v873_v10  ;;  %v908_v10 = vor.u32 %v906_v58, %v904_v51  ;;  %v950_v51 = vshll.u32 %v17703_v41, 16  ;;  %v940_v58 = vor.u32 %v938_v47, %v936_v40  ;;  %v17710_v41 = vld [vmem:[%s18297_s9 + $0x160] sm:$0xff]   ;;  %v994_v47 = vshrl.u32 %v17708_v33, 16 }
  0x89   : > { %v916_v16 = vor.u32 %v914_v1, %v912_v7  ;;  %v1010_v4 = vshrl.u32 %v17710_v41, 16 }
  0x8a   : > { %15847 = vmatmul.mubr.msk.bf16.gmra.mrb[48].mxu0 %vm1202_vm2, %v5555_v24  ;;  %v926_v24 = vshll.u32 %v17698_v8, 16  ;;  %v913_v25 = vsel %vm653_vm1, %v908_v10, %v912_v7  ;;  %v952_v61 = vrot.slane %v950_v51, 1  ;;  %v962_v7 = vshrl.u32 %v17704_v57, 16  ;;  %v17845_v10 = vld [vmem:[%s18297_s9 + $0x28] sm:$0xff]  }
  0x8b   : > { %15850 = vmatprep.mubr.msk.bf16.mxu0 %vm1202_vm2, %v5564_v12  ;;  %v921_v12 = vsel %vm653_vm1, %v916_v16, %v920_v17  ;;  %v966_v8 = vshll.u32 %v17705_v62, 16  ;;  %v6866_v11 = vrot.slane %v17845_v10, 2  ;;  %v17849_v51 = vld [vmem:[%s18297_s9 + $0x48] sm:$0xff]  }
  0x8c   : > { %v928_v32 = vrot.slane %v926_v24, 1 }
  0x8d   : > { %v968_v18 = vrot.slane %v966_v8, 1  ;;  %v17852_v8 = vld [vmem:[%s18297_s9 + $0x60] sm:$0xff]  }
  0x8e   : > { %v932_v39 = vor.u32 %v930_v29, %v928_v32  ;;  %v929_v46 = vsel %vm653_vm1, %v924_v36, %v928_v32  ;;  %v976_v32 = vrot.slane %v974_v23, 1  ;;  %v6880_v10 = vrot.slane %v17852_v8, 2  ;;  %v17715_v23 = vld [vmem:[%s18297_s9 + $0x188] sm:$0xff]  }
  0x8f   : > { %15299 = vmatmul.mubr.msk.bf16.gmra.mrb[52].mxu1 %vm1202_vm2, %v881_v31  ;;  %v5617_v31 = vor.u32 %v5616_v22, %v5613_v21  ;;  %v8742_v21 = vsel %vm1407_vm0, %v18470_v54, 0  ;;  %v6867_v22 = vsel %vm6860_vm4, %v6864_v5, %v6866_v11 }
  0x90   : > { %15302 = vmatprep.mubr.msk.bf16.mxu1 %vm1202_vm2, %v889_v38  ;;  %v5625_v38 = vrot.slane %v5623_v28, 2  ;;  %v937_v49 = vsel %vm653_vm1, %v932_v39, %v936_v40  ;;  %v18560_v28 = vld [vmem:[%s21048_s1 + $0x4] sm:$0x3]  ;;  %v990_v40 = vshll.u32 %v17708_v33, 16 }
  0x91   : > { %v5618_v42 = vsel %vm5313_vm3, %v5608_v26, %v5617_v31  ;;  %17578 = vmatprep.subr.msk.bf16.mxu1 %vm1407_vm0, %v18560_v28 }
  0x92   : > { %15851 = vmatmul.mubr.msk.bf16.gmra.mrb[52].mxu0 %vm1202_vm2, %v5573_v45  ;;  %v942_v45 = vshll.u32 %v17702_v34, 16  ;;  %v18529_v48 = vor.u32 %v5625_v38, %v5622_v37  ;;  %v972_v34 = vor.u32 %v970_v27, %v968_v18  ;;  %v17709_v38 = vld [vmem:[%s18297_s9 + $0x158] sm:$0xff]  }
  0x93   : > { %15854 = vmatprep.mubr.msk.bf16.mxu0 %vm1202_vm2, %v5582_v55  ;;  %v6862_v55 = vrot.slane %v17843_v53, 2  ;;  %v17850_v53 = vld [vmem:[%s18297_s9 + $0x50] sm:$0xff]  }
  0x94   : > { %21109 = vst [vmem:[#allocation7_spill] sm:$0xff] %v18529_v48  ;;  %v944_v56 = vrot.slane %v942_v45, 1  ;;  %v5627_v59 = vsel %vm5313_vm3, %v5617_v31, %v18529_v48  ;;  %v6870_v31 = vrot.slane %v17847_v30, 2  ;;  %v6872_v45 = vrot.slane %v17848_v44, 2  ;;  %v17855_v44 = vld [vmem:[%s18297_s9 + $0x78] sm:$0xff]  }
  0x95   : > { %v6863_v63 = vsel %vm6860_vm4, %v6861_v52, %v6862_v55  ;;  %v6865_v16 = vsel %vm6860_vm4, %v6862_v55, %v6864_v5  ;;  %v6874_v52 = vrot.slane %v17849_v51, 2  ;;  %v6876_v55 = vrot.slane %v17850_v53, 2  ;;  %v19134_v48 = vld [vmem:[%s18297_s9 + $0x58] sm:$0xff]  }
  0x96   : > { %v945_v1 = vsel %vm653_vm1, %v940_v58, %v944_v56  ;;  %21114 = vst [vmem:[#allocation12_spill] sm:$0xff] %v19134_v48  ;;  %v8413_v20 = vrot.slane %v19134_v48, 2 }
  0x97   : > { %15303 = vmatmul.mubr.msk.bf16.gmra.mrb[56].mxu1 %vm1202_vm2, %v897_v60  ;;  %v948_v60 = vor.u32 %v946_v50, %v944_v56  ;;  %v17711_v50 = vld [vmem:[%s18297_s9 + $0x168] sm:$0xff]   ;;  %v992_v56 = vrot.slane %v990_v40, 1 }
  0x98   : > { %15306 = vmatprep.mubr.msk.bf16.mxu1 %vm1202_vm2, %v905_v0  ;;  %v958_v0 = vshll.u32 %v17704_v57, 16  ;;  %v1006_v57 = vshll.u32 %v17710_v41, 16  ;;  %v1014_v62 = vshll.u32 %v17711_v50, 16 }
  0x99   : > { %v953_v6 = vsel %vm653_vm1, %v948_v60, %v952_v61  ;;  %v996_v60 = vor.u32 %v994_v47, %v992_v56 }
  0x9a   : > { %15855 = vmatmul.mubr.msk.bf16.gmra.mrb[56].mxu0 %vm1202_vm2, %v5591_v15  ;;  %v960_v13 = vrot.slane %v958_v0, 1  ;;  %v956_v15 = vor.u32 %v954_v2, %v952_v61  ;;  %v17712_v0 = vld [vmem:[%s18297_s9 + $0x170] sm:$0xff]   ;;  %v1002_v2 = vshrl.u32 %v17709_v38, 16 }
  0x9b   : > { %15858 = vmatprep.mubr.msk.bf16.mxu0 %vm1202_vm2, %v5600_v19  ;;  %v17707_v19 = vld [vmem:[%s18297_s9 + $0x148] sm:$0xff]  }
  0x9c   : > { %v964_v17 = vor.u32 %v962_v7, %v960_v13  ;;  %v961_v24 = vsel %vm653_vm1, %v956_v15, %v960_v13  ;;  %v982_v29 = vshll.u32 %v17707_v19, 16  ;;  %v986_v43 = vshrl.u32 %v17707_v19, 16 }
  0x9d   : > { %v1008_v13 = vrot.slane %v1006_v57, 1  ;;  %v1022_v19 = vshll.u32 %v17712_v0, 16 }
  0x9e   : > { %v969_v54 = vsel %vm653_vm1, %v964_v17, %v968_v18  ;;  %v984_v37 = vrot.slane %v982_v29, 1  ;;  %v1018_v18 = vshrl.u32 %v17711_v50, 16  ;;  %v17854_v29 = vld [vmem:[%s18297_s9 + $0x70] sm:$0xff]  }
  0x9f   : > { %15307 = vmatmul.mubr.msk.bf16.gmra.mrb[60].mxu1 %vm1202_vm2, %v913_v25  ;;  %v17846_v25 = vld [vmem:[%s18297_s9 + $0x30] sm:$0xff]   ;;  %v1012_v17 = vor.u32 %v1010_v4, %v1008_v13  ;;  %v6884_v30 = vrot.slane %v17854_v29, 2 }
  0xa0   : > { %15310 = vmatprep.mubr.msk.bf16.mxu1 %vm1202_vm2, %v921_v12  ;;  %v6868_v26 = vrot.slane %v17846_v25, 2  ;;  %v978_v12 = vshrl.u32 %v17706_v14, 16  ;;  %v988_v58 = vor.u32 %v986_v43, %v984_v37  ;;  %v1016_v14 = vrot.slane %v1014_v62, 1  ;;  %v17858_v4 = vld [vmem:[%s18297_s9 + $0x90] sm:$0xff]  }
  0xa1   : > { %v1026_v25 = vshrl.u32 %v17712_v0, 16 }
  0xa2   : > { %15859 = vmatmul.mubr.msk.bf16.gmra.mrb[60].mxu0 %vm1202_vm2, %v5609_v35  ;;  %v6869_v35 = vsel %vm6860_vm4, %v6866_v11, %v6868_v26  ;;  %v980_v36 = vor.u32 %v978_v12, %v976_v32  ;;  %v6871_v39 = vsel %vm6860_vm4, %v6868_v26, %v6870_v31  ;;  %v17713_v11 = vld [vmem:[%s18297_s9 + $0x178] sm:$0xff]   ;;  %v1017_v27 = vsel %vm653_vm1, %v1012_v17, %v1016_v14 }
  0xa3   : > { %15862 = vmatprep.mubr.msk.bf16.mxu0 %vm1202_vm2, %v5618_v42  ;;  %v977_v42 = vsel %vm653_vm1, %v972_v34, %v976_v32  ;;  %v1030_v26 = vshll.u32 %v17713_v11, 16  ;;  %v1020_v33 = vor.u32 %v1018_v18, %v1016_v14  ;;  %v1034_v41 = vshrl.u32 %v17713_v11, 16 }
  0xa7   : > { %15311 = vmatmul.mubr.msk.bf16.gmra.mrb[64].mxu1 %vm1202_vm2, %v929_v46  ;;  %v985_v46 = vsel %vm653_vm1, %v980_v36, %v984_v37  ;;  %v1032_v36 = vrot.slane %v1030_v26, 1  ;;  %v1046_v37 = vshll.u32 %v17715_v23, 16  ;;  %v17721_v26 = vld [vmem:[%s18297_s9 + $0x1b8] sm:$0xff]  }
  0xa8   : > { %15314 = vmatprep.mubr.msk.bf16.mxu1 %vm1202_vm2, %v937_v49  ;;  %v998_v49 = vshll.u32 %v17709_v38, 16 }
  0xa9   : > { %v1048_v51 = vrot.slane %v1046_v37, 1 }
  0xaa   : > { %15863 = vmatmul.mubr.msk.bf16.gmra.mrb[64].mxu0 %vm1202_vm2, %v5627_v59  ;;  %v6873_v59 = vsel %vm6860_vm4, %v6870_v31, %v6872_v45  ;;  %v1000_v61 = vrot.slane %v998_v49, 1  ;;  %v1024_v31 = vrot.slane %v1022_v19, 1  ;;  %v17717_v49 = vld [vmem:[%s18297_s9 + $0x198] sm:$0xff]  }
  0xab   : > { %15936 = vmatprep.mubr.msk.bf16.mxu0 %vm1202_vm2, %v6863_v63  ;;  %v6875_v63 = vsel %vm6860_vm4, %v6872_v45, %v6874_v52  ;;  %v6886_v45 = vrot.slane %v17855_v44, 2  ;;  %v1066_v18 = vshrl.u32 %v17717_v49, 16 }
  0xac   : > { %v1001_v5 = vsel %vm653_vm1, %v996_v60, %v1000_v61  ;;  %v1004_v15 = vor.u32 %v1002_v2, %v1000_v61  ;;  %v1025_v40 = vsel %vm653_vm1, %v1020_v33, %v1024_v31  ;;  %v17719_v60 = vld [vmem:[%s18297_s9 + $0x1a8] sm:$0xff]   ;;  %v17722_v33 = vld [vmem:[%s18297_s9 + $0x1c0] sm:$0xff]  }
  0xad   : > { %v1078_v14 = vshll.u32 %v17719_v60, 16 }
  0xaf   : > { %15315 = vmatmul.mubr.msk.bf16.gmra.mrb[68].mxu1 %vm1202_vm2, %v945_v1  ;;  %v993_v1 = vsel %vm653_vm1, %v988_v58, %v992_v56  ;;  %v1050_v56 = vshrl.u32 %v17715_v23, 16  ;;  %v17718_v58 = vld [vmem:[%s18297_s9 + $0x1a0] sm:$0xff]  }
  0xb0   : > { %15318 = vmatprep.mubr.msk.bf16.mxu1 %vm1202_vm2, %v953_v6  ;;  %v17851_v6 = vld [vmem:[%s18297_s9 + $0x58] sm:$0xff]   ;;  %v1074_v19 = vshrl.u32 %v17718_v58, 16 }
  0xb1   : > { %v6878_v7 = vrot.slane %v17851_v6, 2  ;;  %v1052_v8 = vor.u32 %v1050_v56, %v1048_v51  ;;  %v1098_v56 = vshrl.u32 %v17721_v26, 16 }
  0xb2   : > { %15937 = vmatmul.mubr.msk.bf16.vlgmr.msra.gmra.mrb[0].mxu0 %vm1202_vm2, %v6865_v16  ;;  %v6877_v16 = vsel %vm6860_vm4, %v6874_v52, %v6876_v55  ;;  %v1036_v52 = vor.u32 %v1034_v41, %v1032_v36 }
  0xb3   : > { %16073 = vmatpush3.bf16.msra.mxu0 %v8742_v21  ;;  %15940 = vmatprep.mubr.msk.bf16.mxu0 %vm1202_vm2, %v6867_v22  ;;  %v17714_v21 = vld [vmem:[%s18297_s9 + $0x180] sm:$0xff]   ;;  %v6879_v22 = vsel %vm6860_vm4, %v6876_v55, %v6878_v7  ;;  %v6881_v34 = vsel %vm6860_vm4, %v6878_v7, %v6880_v10  ;;  %v1070_v7 = vshll.u32 %v17718_v58, 16 }
  0xb4   : > { %v1038_v32 = vshll.u32 %v17714_v21, 16 }
  0xb6   : > { %v1040_v50 = vrot.slane %v1038_v32, 1 }
  0xb7   : > { %15319 = vmatmul.mubr.msk.bf16.gmra.mrb[72].mxu1 %vm1202_vm2, %v961_v24  ;;  %v1009_v24 = vsel %vm653_vm1, %v1004_v15, %v1008_v13 }
  0xb8   : > { %15322 = vmatprep.mubr.msk.bf16.mxu1 %vm1202_vm2, %v969_v54  ;;  %v17853_v54 = vld [vmem:[%s18297_s9 + $0x68] sm:$0xff]   ;;  %v1041_v61 = vsel %vm653_vm1, %v1036_v52, %v1040_v50 }
  0xb9   : > { %v6882_v12 = vrot.slane %v17853_v54, 2  ;;  %v1080_v54 = vrot.slane %v1078_v14, 1 }
  0xba   : > { %15941 = vmatmul.mubr.msk.bf16.gmra.mrb[4].mxu0 %vm1202_vm2, %v6869_v35  ;;  %v1028_v35 = vor.u32 %v1026_v25, %v1024_v31  ;;  %v1082_v31 = vshrl.u32 %v17719_v60, 16 }
  0xbb   : > { %15944 = vmatprep.mubr.msk.bf16.mxu0 %vm1202_vm2, %v6871_v39  ;;  %v6883_v38 = vsel %vm6860_vm4, %v6880_v10, %v6882_v12  ;;  %v17716_v39 = vld [vmem:[%s18297_s9 + $0x190] sm:$0xff]   ;;  %v6885_v53 = vsel %vm6860_vm4, %v6882_v12, %v6884_v30 }
  0xbc   : > { %v1033_v43 = vsel %vm653_vm1, %v1028_v35, %v1032_v36  ;;  %v1054_v57 = vshll.u32 %v17716_v39, 16  ;;  %v1058_v62 = vshrl.u32 %v17716_v39, 16  ;;  %v17723_v35 = vld [vmem:[%s18297_s9 + $0x1c8] sm:$0xff]  }
  0xbe   : > { %v1056_v6 = vrot.slane %v1054_v57, 1  ;;  %v1106_v57 = vshrl.u32 %v17722_v33, 16 }
  0xbf   : > { %15323 = vmatmul.mubr.msk.bf16.gmra.mrb[76].mxu1 %vm1202_vm2, %v977_v42  ;;  %v1042_v42 = vshrl.u32 %v17714_v21, 16 }
  0xc0   : > { %15326 = vmatprep.mubr.msk.bf16.mxu1 %vm1202_vm2, %v985_v46  ;;  %v17856_v46 = vld [vmem:[%s18297_s9 + $0x80] sm:$0xff]   ;;  %v1060_v11 = vor.u32 %v1058_v62, %v1056_v6  ;;  %v1057_v17 = vsel %vm653_vm1, %v1052_v8, %v1056_v6  ;;  %v1114_v6 = vshrl.u32 %v17723_v35, 16 }
  0xc1   : > { %v6888_v47 = vrot.slane %v17856_v46, 2  ;;  %v1044_v55 = vor.u32 %v1042_v42, %v1040_v50  ;;  %v17862_v42 = vld [vmem:[%s18297_s9 + $0xb0] sm:$0xff]   ;;  %v1084_v46 = vor.u32 %v1082_v31, %v1080_v54 }
  0xc2   : > { %15945 = vmatmul.mubr.msk.bf16.gmra.mrb[8].mxu0 %vm1202_vm2, %v6873_v59  ;;  %v6887_v59 = vsel %vm6860_vm4, %v6884_v30, %v6886_v45 }
  0xc3   : > { %15948 = vmatprep.mubr.msk.bf16.mxu0 %vm1202_vm2, %v6875_v63  ;;  %v1062_v63 = vshll.u32 %v17717_v49, 16  ;;  %v1049_v0 = vsel %vm653_vm1, %v1044_v55, %v1048_v51  ;;  %v6889_v10 = vsel %vm6860_vm4, %v6886_v45, %v6888_v47  ;;  %v1102_v45 = vshll.u32 %v17722_v33, 16  ;;  %v17867_v33 = vld [vmem:[%s18297_s9 + $0xd8] sm:$0xff]  }
  0xc4   : > { %v1110_v51 = vshll.u32 %v17723_v35, 16 }
  0xc5   : > { %v1064_v13 = vrot.slane %v1062_v63, 1  ;;  %v18668_v63 = vld [vmem:[%s18297_s9 + $0x1d8] sm:$0xff]  }
  0xc6   : > { %v1126_v14 = vshll.u32 %v18668_v63, 16 }
  0xc7   : > { %15327 = vmatmul.mubr.msk.bf16.gmra.mrb[80].mxu1 %vm1202_vm2, %v993_v1  ;;  %v17857_v1 = vld [vmem:[%s18297_s9 + $0x88] sm:$0xff]   ;;  %v1065_v21 = vsel %vm653_vm1, %v1060_v11, %v1064_v13  ;;  %v1068_v12 = vor.u32 %v1066_v18, %v1064_v13  ;;  %v17866_v18 = vld [vmem:[%s18297_s9 + $0xd0] sm:$0xff]  }
  0xc8   : > { %15330 = vmatprep.mubr.msk.bf16.mxu1 %vm1202_vm2, %v1001_v5  ;;  %v6890_v2 = vrot.slane %v17857_v1, 2  ;;  %v6892_v5 = vrot.slane %v17858_v4, 2  ;;  %v1112_v1 = vrot.slane %v1110_v51, 1 }
  0xca   : > { %15949 = vmatmul.mubr.msk.bf16.gmra.mrb[12].mxu0 %vm1202_vm2, %v6877_v16  ;;  %v6891_v15 = vsel %vm6860_vm4, %v6888_v47, %v6890_v2  ;;  %v17720_v16 = vld [vmem:[%s18297_s9 + $0x1b0] sm:$0xff]   ;;  %v6893_v29 = vsel %vm6860_vm4, %v6890_v2, %v6892_v5 }
  0xcb   : > { %15952 = vmatprep.mubr.msk.bf16.mxu0 %vm1202_vm2, %v6879_v22  ;;  %v17859_v22 = vld [vmem:[%s18297_s9 + $0x98] sm:$0xff]   ;;  %v1086_v32 = vshll.u32 %v17720_v16, 16  ;;  %v1090_v37 = vshrl.u32 %v17720_v16, 16  ;;  %v17865_v16 = vld [vmem:[%s18297_s9 + $0xc8] sm:$0xff]  }
  0xcc   : > { %v6894_v23 = vrot.slane %v17859_v22, 2 }
  0xcd   : > { %v1088_v44 = vrot.slane %v1086_v32, 1 }
  0xcf   : > { %15331 = vmatmul.mubr.msk.bf16.gmra.mrb[84].mxu1 %vm1202_vm2, %v1009_v24  ;;  %v17860_v24 = vld [vmem:[%s18297_s9 + $0xa0] sm:$0xff]   ;;  %v1092_v49 = vor.u32 %v1090_v37, %v1088_v44  ;;  %v1089_v55 = vsel %vm653_vm1, %v1084_v46, %v1088_v44 }
  0xd0   : > { %15334 = vmatprep.mubr.msk.bf16.mxu1 %vm1202_vm2, %v1017_v27  ;;  %v6896_v25 = vrot.slane %v17860_v24, 2  ;;  %v1072_v27 = vrot.slane %v1070_v7, 1  ;;  %v1116_v24 = vor.u32 %v1114_v6, %v1112_v1  ;;  %v17868_v46 = vld [vmem:[%s18297_s9 + $0xe0] sm:$0xff]  }
  0xd2   : > { %15953 = vmatmul.mubr.msk.bf16.gmra.mrb[16].mxu0 %vm1202_vm2, %v6881_v34  ;;  %v1076_v30 = vor.u32 %v1074_v19, %v1072_v27  ;;  %v6895_v34 = vsel %vm6860_vm4, %v6892_v5, %v6894_v23  ;;  %v1073_v36 = vsel %vm653_vm1, %v1068_v12, %v1072_v27  ;;  %v6897_v47 = vsel %vm6860_vm4, %v6894_v23, %v6896_v25 }
  0xd3   : > { %15956 = vmatprep.mubr.msk.bf16.mxu0 %vm1202_vm2, %v6883_v38  ;;  %v1094_v38 = vshll.u32 %v17721_v26, 16  ;;  %v6908_v19 = vrot.slane %v17866_v18, 2  ;;  %v1130_v23 = vshrl.u32 %v18668_v63, 16  ;;  %v1128_v27 = vrot.slane %v1126_v14, 1 }
  0xd4   : > { %v1081_v39 = vsel %vm653_vm1, %v1076_v30, %v1080_v54 }
  0xd5   : > { %v1096_v50 = vrot.slane %v1094_v38, 1  ;;  %v1132_v37 = vor.u32 %v1130_v23, %v1128_v27  ;;  %v18749_v23 = vld [vmem:[%s18297_s9 + $0x218] sm:$0xff]  }
  0xd7   : > { %15335 = vmatmul.mubr.msk.bf16.gmra.mrb[88].mxu1 %vm1202_vm2, %v1025_v40  ;;  %v17861_v40 = vld [vmem:[%s18297_s9 + $0xa8] sm:$0xff]   ;;  %v1097_v58 = vsel %vm653_vm1, %v1092_v49, %v1096_v50  ;;  %v1100_v2 = vor.u32 %v1098_v56, %v1096_v50 }
  0xd8   : > { %15338 = vmatprep.mubr.msk.bf16.mxu1 %vm1202_vm2, %v1033_v43  ;;  %v6898_v41 = vrot.slane %v17861_v40, 2  ;;  %v6900_v43 = vrot.slane %v17862_v42, 2 }
  0xda   : > { %15957 = vmatmul.mubr.msk.bf16.gmra.mrb[20].mxu0 %vm1202_vm2, %v6885_v53  ;;  %v6899_v52 = vsel %vm6860_vm4, %v6896_v25, %v6898_v41  ;;  %v18659_v53 = vld [vmem:[%s18297_s9 + $0x1d0] sm:$0xff]   ;;  %v6901_v4 = vsel %vm6860_vm4, %v6898_v41, %v6900_v43  ;;  %v18709_v41 = vld [vmem:[%s18297_s9 + $0x1f8] sm:$0xff]  }
  0xdb   : > { %15960 = vmatprep.mubr.msk.bf16.mxu0 %vm1202_vm2, %v6887_v59  ;;  %v17863_v59 = vld [vmem:[%s18297_s9 + $0xb8] sm:$0xff]   ;;  %v1118_v7 = vshll.u32 %v18659_v53, 16  ;;  %v1122_v13 = vshrl.u32 %v18659_v53, 16  ;;  %v1158_v51 = vshll.u32 %v18709_v41, 16 }
  0xdc   : > { %v6902_v60 = vrot.slane %v17863_v59, 2 }
  0xdd   : > { %v1120_v22 = vrot.slane %v1118_v7, 1 }
  0xde   : > { %v6903_v8 = vsel %vm6860_vm4, %v6900_v43, %v6902_v60 }
  0xdf   : > { %15339 = vmatmul.mubr.msk.bf16.gmra.mrb[92].mxu1 %vm1202_vm2, %v1041_v61  ;;  %v17864_v61 = vld [vmem:[%s18297_s9 + $0xc0] sm:$0xff]   ;;  %v1124_v26 = vor.u32 %v1122_v13, %v1120_v22  ;;  %v17871_v13 = vld [vmem:[%s18297_s9 + $0xf8] sm:$0xff]  }
  0xe0   : > { %15342 = vmatprep.mubr.msk.bf16.mxu1 %vm1202_vm2, %v1049_v0  ;;  %v6904_v62 = vrot.slane %v17864_v61, 2  ;;  %v1104_v0 = vrot.slane %v1102_v45, 1  ;;  %v1160_v61 = vrot.slane %v1158_v51, 1  ;;  %v6918_v14 = vrot.slane %v17871_v13, 2  ;;  %v18795_v13 = vld [vmem:[%s18297_s9 + $0x8] sm:$0xff]  }
  0xe1   : > { %v1129_v32 = vsel %vm653_vm1, %v1124_v26, %v1128_v27 }
  0xe2   : > { %15961 = vmatmul.mubr.msk.bf16.gmra.mrb[24].mxu0 %vm1202_vm2, %v6889_v10  ;;  %v1108_v5 = vor.u32 %v1106_v57, %v1104_v0  ;;  %v18676_v10 = vld [vmem:[%s18297_s9 + $0x1e0] sm:$0xff]   ;;  %v1105_v11 = vsel %vm653_vm1, %v1100_v2, %v1104_v0  ;;  %v6905_v25 = vsel %vm6860_vm4, %v6902_v60, %v6904_v62 }
  0xe3   : > { %15964 = vmatprep.mubr.msk.bf16.mxu0 %vm1202_vm2, %v6891_v15  ;;  %v1134_v54 = vshll.u32 %v18676_v10, 16  ;;  %v1138_v30 = vshrl.u32 %v18676_v10, 16  ;;  %v18724_v57 = vld [vmem:[%s18297_s9 + $0x200] sm:$0xff]  }
  0xe4   : > { %v1113_v15 = vsel %vm653_vm1, %v1108_v5, %v1112_v1  ;;  %v1166_v1 = vshll.u32 %v18724_v57, 16  ;;  %v17870_v5 = vld [vmem:[%s18297_s9 + $0xf0] sm:$0xff]  }
  0xe5   : > { %v1136_v35 = vrot.slane %v1134_v54, 1  ;;  %v6916_v6 = vrot.slane %v17870_v5, 2  ;;  %v17872_v54 = vld [vmem:[%s18297_s9 + $0x100] sm:$0xff]  }
  0xe7   : > { %15343 = vmatmul.mubr.msk.bf16.gmra.mrb[96].mxu1 %vm1202_vm2, %v1057_v17  ;;  %v6906_v17 = vrot.slane %v17865_v16, 2  ;;  %v1137_v44 = vsel %vm653_vm1, %v1132_v37, %v1136_v35  ;;  %v18744_v16 = vld [vmem:[%s18297_s9 + $0x210] sm:$0xff]   ;;  %v17734_v37 = vld [vmem:[%s18297_s9 + $0x220] ss:$0 sps:$4 sm:$0x11]  }
  0xe8   : > { %15346 = vmatprep.mubr.msk.bf16.mxu1 %vm1202_vm2, %v1065_v21  ;;  %v18687_v21 = vld [vmem:[%s18297_s9 + $0x1e8] sm:$0xff]  }
  0xe9   : > { %v6907_v12 = vsel %vm6860_vm4, %v6904_v62, %v6906_v17  ;;  %v1142_v31 = vshll.u32 %v18687_v21, 16  ;;  %v6909_v38 = vsel %vm6860_vm4, %v6906_v17, %v6908_v19  ;;  %v1146_v45 = vshrl.u32 %v18687_v21, 16  ;;  %v18729_v62 = vld [vmem:[%s18297_s9 + $0x208] sm:$0xff]  }
  0xea   : > { %15965 = vmatmul.mubr.msk.bf16.gmra.mrb[28].mxu0 %vm1202_vm2, %v6893_v29  ;;  %v1121_v29 = vsel %vm653_vm1, %v1116_v24, %v1120_v22  ;;  %v6919_v24 = vsel %vm6860_vm4, %v6916_v6, %v6918_v14  ;;  %v1178_v27 = vshrl.u32 %v18729_v62, 16 }
  0xeb   : > { %15968 = vmatprep.mubr.msk.bf16.mxu0 %vm1202_vm2, %v6895_v34  ;;  %v6910_v34 = vrot.slane %v17867_v33, 2  ;;  %v1144_v40 = vrot.slane %v1142_v31, 1  ;;  %v1190_v31 = vshll.u32 %v18749_v23, 16 }
  0xed   : > { %v6911_v42 = vsel %vm6860_vm4, %v6908_v19, %v6910_v34 }
  0xef   : > { %15347 = vmatmul.mubr.msk.bf16.gmra.mrb[100].mxu1 %vm1202_vm2, %v1073_v36  ;;  %v18704_v36 = vld [vmem:[%s18297_s9 + $0x1f0] sm:$0xff]  }
  0xf0   : > { %15350 = vmatprep.mubr.msk.bf16.mxu1 %vm1202_vm2, %v1081_v39  ;;  %v1140_v39 = vor.u32 %v1138_v30, %v1136_v35  ;;  %v1150_v43 = vshll.u32 %v18704_v36, 16  ;;  %v1154_v50 = vshrl.u32 %v18704_v36, 16  ;;  %v1186_v30 = vshrl.u32 %v18744_v16, 16 }
  0xf2   : > { %15969 = vmatmul.mubr.msk.bf16.gmra.mrb[32].mxu0 %vm1202_vm2, %v6897_v47  ;;  %v6912_v47 = vrot.slane %v17868_v46, 2  ;;  %v1145_v49 = vsel %vm653_vm1, %v1140_v39, %v1144_v40  ;;  %v1152_v56 = vrot.slane %v1150_v43, 1  ;;  %v17874_v46 = vld [vmem:[%s18297_s9 + $0x110] sm:$0xff]  }
  0xf3   : > { %15972 = vmatprep.mubr.msk.bf16.mxu0 %vm1202_vm2, %v6899_v52  ;;  %v17869_v52 = vld [vmem:[%s18297_s9 + $0xe8] sm:$0xff]  }
  0xf4   : > { %v6913_v59 = vsel %vm6860_vm4, %v6910_v34, %v6912_v47  ;;  %v1156_v60 = vor.u32 %v1154_v50, %v1152_v56  ;;  %v17875_v50 = vld [vmem:[%s18297_s9 + $0x118] sm:$0xff]  }
  0xf5   : > { %v6926_v51 = vrot.slane %v17875_v50, 2  ;;  %v18866_v50 = vld [vmem:[%s18297_s9 + $0x48] sm:$0xff]  }
  0xf6   : > { %v1161_v7 = vsel %vm653_vm1, %v1156_v60, %v1160_v61 }
  0xf7   : > { %15351 = vmatmul.mubr.msk.bf16.gmra.mrb[104].mxu1 %vm1202_vm2, %v1089_v55  ;;  %v6914_v55 = vrot.slane %v17869_v52, 2 }
  0xf8   : > { %15354 = vmatprep.mubr.msk.bf16.mxu1 %vm1202_vm2, %v1097_v58  ;;  %v1148_v58 = vor.u32 %v1146_v45, %v1144_v40  ;;  %v1192_v40 = vrot.slane %v1190_v31, 1  ;;  %v1198_v45 = vshll.u32 %v17734_v37, 16  ;;  %v18834_v31 = vld [vmem:[%s18297_s9 + $0x28] sm:$0xff]  }
  0xf9   : > { %v6915_v0 = vsel %vm6860_vm4, %v6912_v47, %v6914_v55  ;;  %v6917_v18 = vsel %vm6860_vm4, %v6914_v55, %v6916_v6  ;;  %v6924_v47 = vrot.slane %v17874_v46, 2  ;;  %v17737_v6 = vld [vmem:[%s18297_s9 + $0x138] sm:$0xff]   ;;  %v17743_v37 = vld [vmem:[%s18297_s9 + $0x168] sm:$0xff]  }
  0xfa   : > { %15973 = vmatmul.mubr.msk.bf16.gmra.mrb[36].mxu0 %vm1202_vm2, %v6901_v4  ;;  %v1153_v2 = vsel %vm653_vm1, %v1148_v58, %v1152_v56  ;;  %v1162_v4 = vshrl.u32 %v18709_v41, 16  ;;  %v1200_v55 = vrot.slane %v1198_v45, 1  ;;  %v17745_v46 = vld [vmem:[%s18297_s9 + $0x178] sm:$0xff]  }
  0xfb   : > { %15976 = vmatprep.mubr.msk.bf16.mxu0 %vm1202_vm2, %v6903_v8  ;;  %v1170_v8 = vshrl.u32 %v18724_v57, 16  ;;  %v6927_v58 = vsel %vm6860_vm4, %v6924_v47, %v6926_v51 }
  0xfc   : > { %v1164_v17 = vor.u32 %v1162_v4, %v1160_v61  ;;  %v17876_v61 = vld [vmem:[%s18297_s9 + $0x120] sm:$0xff]   ;;  %v17736_v4 = vld [vmem:[%s18297_s9 + $0x130] sm:$0xff]  }
  0xff   : > { %15355 = vmatmul.mubr.msk.bf16.gmra.mrb[108].mxu1 %vm1202_vm2, %v1105_v11  ;;  %v1174_v11 = vshll.u32 %v18729_v62, 16 }
 0x100   : > { %15358 = vmatprep.mubr.msk.bf16.mxu1 %vm1202_vm2, %v1113_v15  ;;  %v1168_v15 = vrot.slane %v1166_v1, 1 }
 0x101   : > { %v1176_v22 = vrot.slane %v1174_v11, 1  ;;  %v6934_v11 = vrot.slane %v17737_v6, 2 }
 0x102   : > { %15977 = vmatmul.mubr.msk.bf16.gmra.mrb[40].mxu0 %vm1202_vm2, %v6905_v25  ;;  %v1172_v19 = vor.u32 %v1170_v8, %v1168_v15  ;;  %v1182_v25 = vshll.u32 %v18744_v16, 16  ;;  %v1169_v26 = vsel %vm653_vm1, %v1164_v17, %v1168_v15  ;;  %v6932_v8 = vrot.slane %v17736_v4, 2  ;;  %v17738_v15 = vld [vmem:[%s18297_s9 + $0x140] sm:$0xff]   ;;  %v17739_v17 = vld [vmem:[%s18297_s9 + $0x148] sm:$0xff]  }
 0x103   : > { %15980 = vmatprep.mubr.msk.bf16.mxu0 %vm1202_vm2, %v6907_v12  ;;  %v6920_v12 = vrot.slane %v17872_v54, 2  ;;  %v1180_v35 = vor.u32 %v1178_v27, %v1176_v22  ;;  %v17740_v27 = vld [vmem:[%s18297_s9 + $0x150] sm:$0xff]  }
 0x104   : > { %v1184_v34 = vrot.slane %v1182_v25, 1  ;;  %v18823_v25 = vld [vmem:[%s18297_s9 + $0x20] sm:$0xff]  }
 0x106   : > { %v1188_v39 = vor.u32 %v1186_v30, %v1184_v34  ;;  %v1185_v43 = vsel %vm653_vm1, %v1180_v35, %v1184_v34  ;;  %v17742_v34 = vld [vmem:[%s18297_s9 + $0x160] sm:$0xff]  }
 0x107   : > { %15359 = vmatmul.mubr.msk.bf16.gmra.mrb[112].mxu1 %vm1202_vm2, %v1121_v29  ;;  %v1177_v29 = vsel %vm653_vm1, %v1172_v19, %v1176_v22  ;;  %v18813_v19 = vld [vmem:[%s21048_s1 + $0xe] sm:$0x3]  ;;  %v6938_v22 = vrot.slane %v17739_v17, 2 }
 0x108   : > { %15362 = vmatprep.mubr.msk.bf16.mxu1 %vm1202_vm2, %v1129_v32  ;;  %v17873_v32 = vld [vmem:[%s18297_s9 + $0x108] sm:$0xff]   ;;  %17584 = vmatprep.subr.msk.bf16.mxu0 %vm1407_vm0, %v18813_v19 }
 0x109   : > { %v6922_v33 = vrot.slane %v17873_v32, 2  ;;  %v18839_v32 = vld [vmem:[%s18297_s9 + $0x30] sm:$0xff]   ;;  %v17751_v17 = vld [vmem:[%s18297_s9 + $0x1a8] sm:$0xff]  }
 0x10a   : > { %15981 = vmatmul.mubr.msk.bf16.gmra.mrb[44].mxu0 %vm1202_vm2, %v6909_v38  ;;  %v6921_v38 = vsel %vm6860_vm4, %v6918_v14, %v6920_v12 }
 0x10b   : > { %15984 = vmatprep.mubr.msk.bf16.mxu0 %vm1202_vm2, %v6911_v42  ;;  %v6923_v42 = vsel %vm6860_vm4, %v6920_v12, %v6922_v33  ;;  %v6925_v56 = vsel %vm6860_vm4, %v6922_v33, %v6924_v47  ;;  %v17741_v12 = vld [vmem:[%s18297_s9 + $0x158] sm:$0xff]  }
 0x10c   : > { %v6942_v30 = vrot.slane %v17741_v12, 2  ;;  %v17752_v12 = vld [vmem:[%s18297_s9 + $0x1b0] sm:$0xff]  }
 0x10f   : > { %15363 = vmatmul.mubr.msk.bf16.gmra.mrb[116].mxu1 %vm1202_vm2, %v1137_v44  ;;  %v1194_v44 = vshrl.u32 %v18749_v23, 16 }
 0x110   : > { %15366 = vmatprep.mubr.msk.bf16.mxu1 %vm1202_vm2, %v1145_v49  ;;  %v1193_v49 = vsel %vm653_vm1, %v1188_v39, %v1192_v40  ;;  %v6946_v39 = vrot.slane %v17743_v37, 2  ;;  %v18935_v37 = vld [vmem:[%s18297_s9 + $0x90] sm:$0xff]  }
 0x111   : > { %v1196_v52 = vor.u32 %v1194_v44, %v1192_v40  ;;  %v18850_v40 = vld [vmem:[%s18297_s9 + $0x38] sm:$0xff]   ;;  %v17744_v44 = vld [vmem:[%s18297_s9 + $0x170] sm:$0xff]  }
 0x112   : > { %15985 = vmatmul.mubr.msk.bf16.gmra.mrb[48].mxu0 %vm1202_vm2, %v6913_v59  ;;  %v17735_v59 = vld [vmem:[%s18297_s9 + $0x128] sm:$0xff]   ;;  %v6948_v47 = vrot.slane %v17744_v44, 2 }
 0x113   : > { %15988 = vmatprep.mubr.msk.bf16.mxu0 %vm1202_vm2, %v6915_v0  ;;  %v1201_v60 = vsel %vm653_vm1, %v1196_v52, %v1200_v55  ;;  %v6928_v0 = vrot.slane %v17876_v61, 2  ;;  %v6930_v1 = vrot.slane %v17735_v59, 2  ;;  %v17746_v55 = vld [vmem:[%s18297_s9 + $0x180] sm:$0xff]   ;;  %v18882_v61 = vld [vmem:[%s18297_s9 + $0x58] sm:$0xff]   ;;  %v17755_v44 = vld [vmem:[%s18297_s9 + $0x1c8] sm:$0xff]  }
 0x114   : > { %v6949_v52 = vsel %vm6860_vm4, %v6946_v39, %v6948_v47  ;;  %v6952_v59 = vrot.slane %v17746_v55, 2  ;;  %v17756_v55 = vld [vmem:[%s18297_s9 + $0x1d0] sm:$0xff]  }
 0x115   : > { %v6931_v5 = vsel %vm6860_vm4, %v6928_v0, %v6930_v1  ;;  %v6933_v14 = vsel %vm6860_vm4, %v6930_v1, %v6932_v8 }
 0x117   : > { %15367 = vmatmul.mubr.msk.bf16.gmra.mrb[120].mxu1 %vm1202_vm2, %v1153_v2  ;;  %v6929_v2 = vsel %vm6860_vm4, %v6926_v51, %v6928_v0  ;;  %v18871_v51 = vld [vmem:[%s18297_s9 + $0x50] sm:$0xff]   ;;  %v18887_v0 = vld [vmem:[%s18297_s9 + $0x60] sm:$0xff]  }
 0x118   : > { %15370 = vmatprep.mubr.msk.bf16.mxu1 %vm1202_vm2, %v1161_v7  ;;  %v3053_v7 = vsel %vm1407_vm0, %v18560_v28, 0  ;;  %v6935_v28 = vsel %vm6860_vm4, %v6932_v8, %v6934_v11  ;;  %v18898_v8 = vld [vmem:[%s18297_s9 + $0x68] sm:$0xff]  }
 0x11a   : > { %15989 = vmatmul.mubr.msk.bf16.gmra.mrb[52].mxu0 %vm1202_vm2, %v6917_v18  ;;  %v6936_v18 = vrot.slane %v17738_v15, 2  ;;  %v17750_v15 = vld [vmem:[%s18297_s9 + $0x1a0] sm:$0xff]  }
 0x11b   : > { %15992 = vmatprep.mubr.msk.bf16.mxu0 %vm1202_vm2, %v6919_v24  ;;  %v18818_v24 = vld [vmem:[%s18297_s9 + $0x18] sm:$0xff]  }
 0x11c   : > { %v6939_v54 = vsel %vm6860_vm4, %v6936_v18, %v6938_v22 }
 0x11f   : > { %15371 = vmatmul.mubr.msk.bf16.gmra.mrb[124].mxu1 %vm1202_vm2, %v1169_v26  ;;  %v6937_v26 = vsel %vm6860_vm4, %v6934_v11, %v6936_v18  ;;  %v18903_v11 = vld [vmem:[%s18297_s9 + $0x70] sm:$0xff]   ;;  %v6960_v18 = vrot.slane %v17750_v15, 2 }
 0x120   : > { %15374 = vmatprep.mubr.msk.bf16.mxu1 %vm1202_vm2, %v1177_v29  ;;  %v6940_v29 = vrot.slane %v17740_v27, 2  ;;  %v18919_v27 = vld [vmem:[%s18297_s9 + $0x80] sm:$0xff]  }
 0x122   : > { %15993 = vmatmul.mubr.msk.bf16.gmra.mrb[56].mxu0 %vm1202_vm2, %v6921_v38  ;;  %v6941_v33 = vsel %vm6860_vm4, %v6938_v22, %v6940_v29  ;;  %v6943_v35 = vsel %vm6860_vm4, %v6940_v29, %v6942_v30  ;;  %v6944_v38 = vrot.slane %v17742_v34, 2  ;;  %v6962_v22 = vrot.slane %v17751_v17, 2  ;;  %v18983_v17 = vld [vmem:[%s18297_s9 + $0xc0] sm:$0xff]  }
 0x123   : > { %15996 = vmatprep.mubr.msk.bf16.mxu0 %vm1202_vm2, %v6923_v42  ;;  %v18855_v42 = vld [vmem:[%s18297_s9 + $0x40] sm:$0xff]  }
 0x124   : > { %v6947_v45 = vsel %vm6860_vm4, %v6944_v38, %v6946_v39  ;;  %v6963_v29 = vsel %vm6860_vm4, %v6960_v18, %v6962_v22  ;;  %v17754_v39 = vld [vmem:[%s18297_s9 + $0x1c0] sm:$0xff]  }
 0x127   : > { %15375 = vmatmul.mubr.msk.bf16.gmra.mrb[128].mxu1 %vm1202_vm2, %v1185_v43  ;;  %v6945_v43 = vsel %vm6860_vm4, %v6942_v30, %v6944_v38  ;;  %v17753_v30 = vld [vmem:[%s18297_s9 + $0x1b8] sm:$0xff]  }
 0x128   : > { %15378 = vmatprep.mubr.msk.bf16.mxu1 %vm1202_vm2, %v1193_v49  ;;  %v6950_v49 = vrot.slane %v17745_v46, 2  ;;  %v6966_v34 = vrot.slane %v17753_v30, 2  ;;  %v6970_v46 = vrot.slane %v17755_v44, 2  ;;  %v17763_v44 = vld [vmem:[%s18297_s9 + $0x208] sm:$0xff]  }
 0x12a   : > { %15997 = vmatmul.mubr.msk.bf16.gmra.mrb[60].mxu0 %vm1202_vm2, %v6925_v56  ;;  %v6951_v56 = vsel %vm6860_vm4, %v6948_v47, %v6950_v49  ;;  %v6953_v1 = vsel %vm6860_vm4, %v6950_v49, %v6952_v59  ;;  %v18946_v47 = vld [vmem:[%s18297_s9 + $0x98] sm:$0xff]   ;;  %v18951_v49 = vld [vmem:[%s18297_s9 + $0xa0] sm:$0xff]  }
 0x12b   : > { %16000 = vmatprep.mubr.msk.bf16.mxu0 %vm1202_vm2, %v6927_v58  ;;  %v17747_v58 = vld [vmem:[%s18297_s9 + $0x188] sm:$0xff]  }
 0x12f   : > { %15379 = vmatmul.mubr.msk.bf16.gmra.mrb[132].mxu1 %vm1202_vm2, %v1201_v60  ;;  %v6954_v60 = vrot.slane %v17747_v58, 2  ;;  %v17757_v58 = vld [vmem:[%s18297_s9 + $0x1d8] sm:$0xff]  }
 0x130   : > { %15384 = vmatprep.mubr.msk.bf16.mxu1 %vm1202_vm2, %v18302_v9  ;;  %v18800_v9 = vld [vmem:[%s18297_s9 + $0x10] sm:$0xff]  }
 0x131   : > { %v6955_v4 = vsel %vm6860_vm4, %v6952_v59, %v6954_v60  ;;  %v6972_v59 = vrot.slane %v17756_v55, 2  ;;  %v19015_v55 = vld [vmem:[%s18297_s9 + $0xe0] sm:$0xff]  }
 0x132   : > { %16001 = vmatmul.mubr.msk.bf16.gmra.mrb[64].mxu0 %vm1202_vm2, %v6929_v2  ;;  %v17748_v2 = vld [vmem:[%s18297_s9 + $0x190] sm:$0xff]  }
 0x133   : > { %16004 = vmatprep.mubr.msk.bf16.mxu0 %vm1202_vm2, %v6931_v5  ;;  %v17749_v5 = vld [vmem:[%s18297_s9 + $0x198] sm:$0xff]   ;;  %v6956_v6 = vrot.slane %v17748_v2, 2  ;;  %v18967_v2 = vld [vmem:[%s18297_s9 + $0xb0] sm:$0xff]  }
 0x137   : > { %15385 = vmatmul.mubr.msk.bf16.vlgmr.msra.gmra.mrb[0].mxu1 %vm1202_vm2, %v18795_v13 }
 0x138   : > { %15521 = vmatpush3.bf16.msra.mxu1 %v3053_v7  ;;  %15388 = vmatprep.mubr.msk.bf16.mxu1 %vm1202_vm2, %v18800_v9  ;;  %v6958_v7 = vrot.slane %v17749_v5, 2  ;;  %v17758_v5 = vld [vmem:[%s18297_s9 + $0x1e0] sm:$0xff]  }
 0x13a   : > { %16005 = vmatmul.mubr.msk.bf16.gmra.mrb[68].mxu0 %vm1202_vm2, %v6933_v14  ;;  %v6957_v14 = vsel %vm6860_vm4, %v6954_v60, %v6956_v6  ;;  %v6974_v60 = vrot.slane %v17757_v58, 2  ;;  %v17764_v58 = vld [vmem:[%s18297_s9 + $0x210] sm:$0xff]  }
 0x13b   : > { %16008 = vmatprep.mubr.msk.bf16.mxu0 %vm1202_vm2, %v6935_v28  ;;  %v6959_v28 = vsel %vm6860_vm4, %v6956_v6, %v6958_v7 }
 0x13c   : > { %v6975_v6 = vsel %vm6860_vm4, %v6972_v59, %v6974_v60 }
 0x13f   : > { %15389 = vmatmul.mubr.msk.bf16.gmra.mrb[4].mxu1 %vm1202_vm2, %v18818_v24 }
 0x140   : > { %15392 = vmatprep.mubr.msk.bf16.mxu1 %vm1202_vm2, %v18823_v25 }
 0x142   : > { %16009 = vmatmul.mubr.msk.bf16.gmra.mrb[72].mxu0 %vm1202_vm2, %v6937_v26  ;;  %v18914_v26 = vld [vmem:[%s18297_s9 + $0x78] sm:$0xff]  }
 0x143   : > { %16012 = vmatprep.mubr.msk.bf16.mxu0 %vm1202_vm2, %v6939_v54  ;;  %v6961_v54 = vsel %vm6860_vm4, %v6958_v7, %v6960_v18  ;;  %v17759_v7 = vld [vmem:[%s18297_s9 + $0x1e8] sm:$0xff]  }
 0x144   : > { %v6978_v15 = vrot.slane %v17759_v7, 2  ;;  %v19031_v7 = vld [vmem:[%s18297_s9 + $0xf0] sm:$0xff]  }
 0x147   : > { %15393 = vmatmul.mubr.msk.bf16.gmra.mrb[8].mxu1 %vm1202_vm2, %v18834_v31 }
 0x148   : > { %15396 = vmatprep.mubr.msk.bf16.mxu1 %vm1202_vm2, %v18839_v32 }
 0x14a   : > { %16013 = vmatmul.mubr.msk.bf16.gmra.mrb[76].mxu0 %vm1202_vm2, %v6941_v33  ;;  %v6964_v33 = vrot.slane %v17752_v12, 2  ;;  %v17761_v12 = vld [vmem:[%s18297_s9 + $0x1f8] sm:$0xff]  }
 0x14b   : > { %16016 = vmatprep.mubr.msk.bf16.mxu0 %vm1202_vm2, %v6943_v35  ;;  %v18930_v35 = vld [vmem:[%s18297_s9 + $0x88] sm:$0xff]   ;;  %v6982_v30 = vrot.slane %v17761_v12, 2 }
 0x14c   : > { %v6965_v38 = vsel %vm6860_vm4, %v6962_v22, %v6964_v33  ;;  %v17760_v22 = vld [vmem:[%s18297_s9 + $0x1f0] sm:$0xff]  }
 0x14f   : > { %15397 = vmatmul.mubr.msk.bf16.gmra.mrb[12].mxu1 %vm1202_vm2, %v18850_v40 }
 0x150   : > { %15400 = vmatprep.mubr.msk.bf16.mxu1 %vm1202_vm2, %v18855_v42 }
 0x152   : > { %16017 = vmatmul.mubr.msk.bf16.gmra.mrb[80].mxu0 %vm1202_vm2, %v6945_v43  ;;  %v6967_v43 = vsel %vm6860_vm4, %v6964_v33, %v6966_v34  ;;  %v18994_v33 = vld [vmem:[%s18297_s9 + $0xc8] sm:$0xff]  }
 0x153   : > { %16020 = vmatprep.mubr.msk.bf16.mxu0 %vm1202_vm2, %v6947_v45  ;;  %v6968_v45 = vrot.slane %v17754_v39, 2  ;;  %v17762_v39 = vld [vmem:[%s18297_s9 + $0x200] sm:$0xff]  }
 0x157   : > { %15401 = vmatmul.mubr.msk.bf16.gmra.mrb[16].mxu1 %vm1202_vm2, %v18866_v50 }
 0x158   : > { %15404 = vmatprep.mubr.msk.bf16.mxu1 %vm1202_vm2, %v18871_v51 }
 0x15a   : > { %16021 = vmatmul.mubr.msk.bf16.gmra.mrb[84].mxu0 %vm1202_vm2, %v6949_v52  ;;  %v6969_v52 = vsel %vm6860_vm4, %v6966_v34, %v6968_v45  ;;  %v18999_v34 = vld [vmem:[%s18297_s9 + $0xd0] sm:$0xff]  }
 0x15b   : > { %16024 = vmatprep.mubr.msk.bf16.mxu0 %vm1202_vm2, %v6951_v56  ;;  %v6971_v56 = vsel %vm6860_vm4, %v6968_v45, %v6970_v46  ;;  %v6984_v45 = vrot.slane %v17762_v39, 2  ;;  %v19049_v39 = vld [vmem:[%s18297_s9 + $0x100] sm:$0xff]  }
 0x15f   : > { %15405 = vmatmul.mubr.msk.bf16.gmra.mrb[20].mxu1 %vm1202_vm2, %v18882_v61 }
 0x160   : > { %15408 = vmatprep.mubr.msk.bf16.mxu1 %vm1202_vm2, %v18887_v0 }
 0x162   : > { %16025 = vmatmul.mubr.msk.bf16.gmra.mrb[88].mxu0 %vm1202_vm2, %v6953_v1  ;;  %v18962_v1 = vld [vmem:[%s18297_s9 + $0xa8] sm:$0xff]  }
 0x163   : > { %16028 = vmatprep.mubr.msk.bf16.mxu0 %vm1202_vm2, %v6955_v4  ;;  %v6973_v4 = vsel %vm6860_vm4, %v6970_v46, %v6972_v59  ;;  %v6986_v46 = vrot.slane %v17763_v44, 2  ;;  %v17768_v44 = vld [vmem:[%s18297_s9 + $0x230] ss:$0 sps:$4 sm:$0x33]  }
 0x165   : > { %v6987_v59 = vsel %vm6860_vm4, %v6984_v45, %v6986_v46 }
 0x167   : > { %15409 = vmatmul.mubr.msk.bf16.gmra.mrb[24].mxu1 %vm1202_vm2, %v18898_v8 }
 0x168   : > { %15412 = vmatprep.mubr.msk.bf16.mxu1 %vm1202_vm2, %v18903_v11 }
 0x16a   : > { %16029 = vmatmul.mubr.msk.bf16.gmra.mrb[92].mxu0 %vm1202_vm2, %v6957_v14  ;;  %v6976_v14 = vrot.slane %v17758_v5, 2 }
 0x16b   : > { %16032 = vmatprep.mubr.msk.bf16.mxu0 %vm1202_vm2, %v6959_v28  ;;  %v18978_v28 = vld [vmem:[%s18297_s9 + $0xb8] sm:$0xff]  }
 0x16c   : > { %v6977_v18 = vsel %vm6860_vm4, %v6974_v60, %v6976_v14  ;;  %v17765_v60 = vld [vmem:[%s18297_s9 + $0x218] sm:$0xff]  }
 0x16d   : > { %v6990_v5 = vrot.slane %v17765_v60, 2 }
 0x16f   : > { %15413 = vmatmul.mubr.msk.bf16.gmra.mrb[28].mxu1 %vm1202_vm2, %v18914_v26 }
 0x170   : > { %15416 = vmatprep.mubr.msk.bf16.mxu1 %vm1202_vm2, %v18919_v27 }
 0x172   : > { %16033 = vmatmul.mubr.msk.bf16.gmra.mrb[96].mxu0 %vm1202_vm2, %v6961_v54  ;;  %v6979_v54 = vsel %vm6860_vm4, %v6976_v14, %v6978_v15 }
 0x173   : > { %16036 = vmatprep.mubr.msk.bf16.mxu0 %vm1202_vm2, %v6963_v29  ;;  %v6980_v29 = vrot.slane %v17760_v22, 2  ;;  %v17767_v22 = vld [vmem:[%s18297_s9 + $0x228] sm:$0xff]  }
 0x174   : > { %v6994_v12 = vrot.slane %v17767_v22, 2  ;;  %v19081_v22 = vld [vmem:[%s18297_s9 + $0x38] sm:$0xff]  }
 0x177   : > { %15417 = vmatmul.mubr.msk.bf16.gmra.mrb[32].mxu1 %vm1202_vm2, %v18930_v35 }
 0x178   : > { %15420 = vmatprep.mubr.msk.bf16.mxu1 %vm1202_vm2, %v18935_v37 }
 0x17a   : > { %16037 = vmatmul.mubr.msk.bf16.gmra.mrb[100].mxu0 %vm1202_vm2, %v6965_v38  ;;  %v6981_v38 = vsel %vm6860_vm4, %v6978_v15, %v6980_v29  ;;  %v17766_v15 = vld [vmem:[%s18297_s9 + $0x220] sm:$0xff]  }
 0x17b   : > { %16040 = vmatprep.mubr.msk.bf16.mxu0 %vm1202_vm2, %v6967_v43  ;;  %v6983_v43 = vsel %vm6860_vm4, %v6980_v29, %v6982_v30  ;;  %v19042_v29 = vld [vmem:[%s18297_s9 + $0xf8] sm:$0xff]  }
 0x17f   : > { %15421 = vmatmul.mubr.msk.bf16.gmra.mrb[36].mxu1 %vm1202_vm2, %v18946_v47 }
 0x180   : > { %15424 = vmatprep.mubr.msk.bf16.mxu1 %vm1202_vm2, %v18951_v49 }
 0x182   : > { %16041 = vmatmul.mubr.msk.bf16.gmra.mrb[104].mxu0 %vm1202_vm2, %v6969_v52  ;;  %v19010_v52 = vld [vmem:[%s18297_s9 + $0xd8] sm:$0xff]  }
 0x183   : > { %16044 = vmatprep.mubr.msk.bf16.mxu0 %vm1202_vm2, %v6971_v56  ;;  %v6985_v56 = vsel %vm6860_vm4, %v6982_v30, %v6984_v45  ;;  %v7918_v30 = vld [vmem:[%s18297_s9 + $0x20] sm:$0xc] }
 0x187   : > { %15425 = vmatmul.mubr.msk.bf16.gmra.mrb[40].mxu1 %vm1202_vm2, %v18962_v1 }
 0x188   : > { %15428 = vmatprep.mubr.msk.bf16.mxu1 %vm1202_vm2, %v18967_v2 }
 0x18a   : > { %16045 = vmatmul.mubr.msk.bf16.gmra.mrb[108].mxu0 %vm1202_vm2, %v6973_v4  ;;  %v6988_v4 = vrot.slane %v17764_v58, 2  ;;  %v6996_v58 = vrot.slane %v17768_v44, 2  ;;  %v19099_v44 = vld [vmem:[%s18297_s9 + $0x40] sm:$0xff]  }
 0x18b   : > { %16048 = vmatprep.mubr.msk.bf16.mxu0 %vm1202_vm2, %v6975_v6  ;;  %v19026_v6 = vld [vmem:[%s18297_s9 + $0xe8] sm:$0xff]   ;;  %21110 = vst [vmem:[#allocation8_spill] sm:$0xff] %v19099_v44 }
 0x18c   : > { %v6989_v14 = vsel %vm6860_vm4, %v6986_v46, %v6988_v4 }
 0x18f   : > { %15429 = vmatmul.mubr.msk.bf16.gmra.mrb[44].mxu1 %vm1202_vm2, %v18978_v28 }
 0x190   : > { %15432 = vmatprep.mubr.msk.bf16.mxu1 %vm1202_vm2, %v18983_v17 }
 0x192   : > { %16049 = vmatmul.mubr.msk.bf16.gmra.mrb[112].mxu0 %vm1202_vm2, %v6977_v18  ;;  %v6991_v18 = vsel %vm6860_vm4, %v6988_v4, %v6990_v5  ;;  %v19066_v4 = vld [vmem:[%s18297_s9 + $0x108] sm:$0xff]  }
 0x193   : > { %16052 = vmatprep.mubr.msk.bf16.mxu0 %vm1202_vm2, %v6979_v54  ;;  %v6992_v54 = vrot.slane %v17766_v15, 2  ;;  %v19077_v15 = vld [vmem:[%s18297_s9 + $0x30] sm:$0xff]  }
 0x195   : > { %v6995_v45 = vsel %vm6860_vm4, %v6992_v54, %v6994_v12 }
 0x197   : > { %15433 = vmatmul.mubr.msk.bf16.gmra.mrb[48].mxu1 %vm1202_vm2, %v18994_v33 }
 0x198   : > { %15436 = vmatprep.mubr.msk.bf16.mxu1 %vm1202_vm2, %v18999_v34 }
 0x19a   : > { %16053 = vmatmul.mubr.msk.bf16.gmra.mrb[116].mxu0 %vm1202_vm2, %v6981_v38  ;;  %v7919_v38 = vld [vmem:[%s18297_s9 + $0x24] sm:$0xf] }
 0x19b   : > { %16056 = vmatprep.mubr.msk.bf16.mxu0 %vm1202_vm2, %v6983_v43  ;;  %v6993_v43 = vsel %vm6860_vm4, %v6990_v5, %v6992_v54  ;;  %v19056_v46 = vcombine.low %v7918_v30, %v7919_v38  ;;  %v19071_v5 = vld [vmem:[%s18297_s9 + $0x110] sm:$0xff]   ;;  %v8403_v54 = vrot.slane %v19077_v15, 2  ;;  %v8405_v30 = vrot.slane %v19081_v22, 2  ;;  %v19088_v38 = vld [vmem:[%s18297_s9 + $0x118] sm:$0xff]  }
 0x19f   : > { %15437 = vmatmul.mubr.msk.bf16.gmra.mrb[52].mxu1 %vm1202_vm2, %v19010_v52 }
 0x1a0   : > { %15440 = vmatprep.mubr.msk.bf16.mxu1 %vm1202_vm2, %v19015_v55 }
 0x1a2   : > { %16057 = vmatmul.mubr.msk.bf16.gmra.mrb[120].mxu0 %vm1202_vm2, %v6985_v56  ;;  %v19059_v56 = vld [vmem:[%s18297_s9 + $0x28] sm:$0xff]  }
 0x1a3   : > { %16060 = vmatprep.mubr.msk.bf16.mxu0 %vm1202_vm2, %v6987_v59  ;;  %v8400_v59 = vrot.slane %v19056_v46, 2  ;;  %v8401_v60 = vrot.slane %v19059_v56, 2 }
 0x1a7   : > { %15441 = vmatmul.mubr.msk.bf16.gmra.mrb[56].mxu1 %vm1202_vm2, %v19026_v6 }
 0x1a8   : > { %15444 = vmatprep.mubr.msk.bf16.mxu1 %vm1202_vm2, %v19031_v7 }
 0x1aa   : > { %16061 = vmatmul.mubr.msk.bf16.gmra.mrb[124].mxu0 %vm1202_vm2, %v6989_v14  ;;  %v6997_v14 = vsel %vm6860_vm4, %v6994_v12, %v6996_v58  ;;  %v19093_v12 = vld [vmem:[%s18297_s9 + $0x120] sm:$0xff]   ;;  %v8406_v58 = vsel %vm6860_vm4, %v8403_v54, %v8405_v30 }
 0x1ab   : > { %16064 = vmatprep.mubr.msk.bf16.mxu0 %vm1202_vm2, %v6991_v18  ;;  %v8402_v18 = vsel %vm6860_vm4, %v8400_v59, %v8401_v60  ;;  %v19105_v59 = vld [vmem:[%s18297_s9 + $0x48] sm:$0xff]  }
 0x1ac   : > { %21111 = vst [vmem:[#allocation9_spill] sm:$0xff] %v19105_v59 }
 0x1af   : > { %15445 = vmatmul.mubr.msk.bf16.gmra.mrb[60].mxu1 %vm1202_vm2, %v19042_v29 }
 0x1b0   : > { %15448 = vmatprep.mubr.msk.bf16.mxu1 %vm1202_vm2, %v19049_v39 }
 0x1b2   : > { %16065 = vmatmul.mubr.msk.bf16.gmra.mrb[128].mxu0 %vm1202_vm2, %v6993_v43  ;;  %v8404_v43 = vsel %vm6860_vm4, %v8401_v60, %v8403_v54  ;;  %v8407_v60 = vrot.slane %v19099_v44, 2  ;;  %v19124_v54 = vld [vmem:[%s18297_s9 + $0x130] sm:$0xff]   ;;  %v17792_v44 = vld [vmem:[%s18297_s9 + $0xd8] sm:$0xff]  }
 0x1b3   : > { %16068 = vmatprep.mubr.msk.bf16.mxu0 %vm1202_vm2, %v6995_v45  ;;  %v10289_v45 = vsel %vm1407_vm0, %v18813_v19, 0  ;;  %v8409_v19 = vrot.slane %v19105_v59, 2  ;;  %21112 = vst [vmem:[#allocation10_spill] sm:$0xff] %v19124_v54  ;;  %v19289_v59 = vld [vmem:[%s18297_s9 + $0x1a8] sm:$0xff]  }
 0x1b4   : > { %21141 = vst [vmem:[#allocation39_spill] sm:$0xff] %v19289_v59 }
 0x1b7   : > { %15449 = vmatmul.mubr.msk.bf16.gmra.mrb[64].mxu1 %vm1202_vm2, %v19066_v4 }
 0x1b8   : > { %15452 = vmatprep.mubr.msk.bf16.mxu1 %vm1202_vm2, %v19071_v5 }
 0x1ba   : > { %16069 = vmatmul.mubr.msk.bf16.gmra.mrb[132].mxu0 %vm1202_vm2, %v6997_v14  ;;  %v19111_v14 = vld [vmem:[%s21048_s1 + $0x6] sm:$0x3] }
 0x1bb   : > { %16074 = vmatprep.mubr.msk.bf16.mxu0 %vm1202_vm2, %v8402_v18  ;;  %17579 = vmatprep.subr.msk.bf16.mxu1 %vm1407_vm0, %v19111_v14  ;;  %v19119_v18 = vld [vmem:[%s18297_s9 + $0x128] sm:$0xff]  }
 0x1bf   : > { %15453 = vmatmul.mubr.msk.bf16.gmra.mrb[68].mxu1 %vm1202_vm2, %v19088_v38 }
 0x1c0   : > { %15456 = vmatprep.mubr.msk.bf16.mxu1 %vm1202_vm2, %v19093_v12 }
 0x1c2   : > { %16075 = vmatmul.mubr.msk.bf16.vlgmr.msra.gmra.mrb[0].mxu0 %vm1202_vm2, %v8404_v43  ;;  %v8408_v43 = vsel %vm6860_vm4, %v8405_v30, %v8407_v60  ;;  %v19146_v30 = vld [vmem:[%s18297_s9 + $0x140] sm:$0xff]  }
 0x1c3   : > { %16211 = vmatpush3.bf16.msra.mxu0 %v10289_v45  ;;  %16078 = vmatprep.mubr.msk.bf16.mxu0 %vm1202_vm2, %v8406_v58  ;;  %v19130_v45 = vld [vmem:[%s18297_s9 + $0x50] sm:$0xff]   ;;  %v8410_v58 = vsel %vm6860_vm4, %v8407_v60, %v8409_v19  ;;  %21116 = vst [vmem:[#allocation14_spill] sm:$0xff] %v19146_v30 }
 0x1c4   : > { %21113 = vst [vmem:[#allocation11_spill] sm:$0xff] %v19130_v45  ;;  %v8411_v3 = vrot.slane %v19130_v45, 2  ;;  %v19156_v45 = vld [vmem:[%s18297_s9 + $0x68] sm:$0xff]  }
 0x1c5   : > { %21118 = vst [vmem:[#allocation16_spill] sm:$0xff] %v19156_v45 }
 0x1c6   : > { %v8412_v60 = vsel %vm6860_vm4, %v8409_v19, %v8411_v3  ;;  %v19168_v19 = vld [vmem:[%s18297_s9 + $0x150] sm:$0xff]  }
 0x1c7   : > { %15457 = vmatmul.mubr.msk.bf16.gmra.mrb[72].mxu1 %vm1202_vm2, %v19119_v18  ;;  %21120 = vst [vmem:[#allocation18_spill] sm:$0xff] %v19168_v19 }
 0x1c8   : > { %15460 = vmatprep.mubr.msk.bf16.mxu1 %vm1202_vm2, %v19124_v54  ;;  %v19141_v54 = vld [vmem:[%s18297_s9 + $0x138] sm:$0xff]  }
 0x1c9   : > { %21115 = vst [vmem:[#allocation13_spill] sm:$0xff] %v19141_v54 }
 0x1ca   : > { %16079 = vmatmul.mubr.msk.bf16.gmra.mrb[4].mxu0 %vm1202_vm2, %v8408_v43  ;;  %v19152_v43 = vld [vmem:[%s18297_s9 + $0x60] sm:$0xff]  }
 0x1cb   : > { %16082 = vmatprep.mubr.msk.bf16.mxu0 %vm1202_vm2, %v8410_v58  ;;  %21117 = vst [vmem:[#allocation15_spill] sm:$0xff] %v19152_v43  ;;  %v8414_v58 = vsel %vm6860_vm4, %v8411_v3, %v8413_v20  ;;  %v8415_v48 = vrot.slane %v19152_v43, 2  ;;  %v19178_v43 = vld [vmem:[%s18297_s9 + $0x78] sm:$0xff]  }
 0x1cc   : > { %21122 = vst [vmem:[#allocation20_spill] sm:$0xff] %v19178_v43 }
 0x1cd   : > { %v8416_v3 = vsel %vm6860_vm4, %v8413_v20, %v8415_v48  ;;  %v19190_v20 = vld [vmem:[%s18297_s9 + $0x160] sm:$0xff]  }
 0x1ce   : > { %21124 = vst [vmem:[#allocation22_spill] sm:$0xff] %v19190_v20 }
 0x1cf   : > { %15461 = vmatmul.mubr.msk.bf16.gmra.mrb[76].mxu1 %vm1202_vm2, %v19141_v54  ;;  %v8417_v54 = vrot.slane %v19156_v45, 2 }
 0x1d0   : > { %15464 = vmatprep.mubr.msk.bf16.mxu1 %vm1202_vm2, %v19146_v30  ;;  %v19163_v30 = vld [vmem:[%s18297_s9 + $0x148] sm:$0xff]  }
 0x1d1   : > { %21119 = vst [vmem:[#allocation17_spill] sm:$0xff] %v19163_v30 }
 0x1d2   : > { %16083 = vmatmul.mubr.msk.bf16.gmra.mrb[8].mxu0 %vm1202_vm2, %v8412_v60  ;;  %v19174_v60 = vld [vmem:[%s18297_s9 + $0x70] sm:$0xff]  }
 0x1d3   : > { %16086 = vmatprep.mubr.msk.bf16.mxu0 %vm1202_vm2, %v8414_v58  ;;  %21121 = vst [vmem:[#allocation19_spill] sm:$0xff] %v19174_v60  ;;  %v8418_v58 = vsel %vm6860_vm4, %v8415_v48, %v8417_v54  ;;  %v8419_v45 = vrot.slane %v19174_v60, 2  ;;  %v19200_v60 = vld [vmem:[%s18297_s9 + $0x88] sm:$0xff]  }
 0x1d4   : > { %21126 = vst [vmem:[#allocation24_spill] sm:$0xff] %v19200_v60 }
 0x1d5   : > { %v8420_v48 = vsel %vm6860_vm4, %v8417_v54, %v8419_v45  ;;  %v19212_v54 = vld [vmem:[%s18297_s9 + $0x170] sm:$0xff]  }
 0x1d6   : > { %21128 = vst [vmem:[#allocation26_spill] sm:$0xff] %v19212_v54 }
 0x1d7   : > { %15465 = vmatmul.mubr.msk.bf16.gmra.mrb[80].mxu1 %vm1202_vm2, %v19163_v30  ;;  %v8421_v30 = vrot.slane %v19178_v43, 2 }
 0x1d8   : > { %15468 = vmatprep.mubr.msk.bf16.mxu1 %vm1202_vm2, %v19168_v19  ;;  %v19185_v19 = vld [vmem:[%s18297_s9 + $0x158] sm:$0xff]  }
 0x1d9   : > { %21123 = vst [vmem:[#allocation21_spill] sm:$0xff] %v19185_v19 }
 0x1da   : > { %16087 = vmatmul.mubr.msk.bf16.gmra.mrb[12].mxu0 %vm1202_vm2, %v8416_v3  ;;  %v19196_v3 = vld [vmem:[%s18297_s9 + $0x80] sm:$0xff]  }
 0x1db   : > { %16090 = vmatprep.mubr.msk.bf16.mxu0 %vm1202_vm2, %v8418_v58  ;;  %21125 = vst [vmem:[#allocation23_spill] sm:$0xff] %v19196_v3  ;;  %v8422_v58 = vsel %vm6860_vm4, %v8419_v45, %v8421_v30  ;;  %v8423_v43 = vrot.slane %v19196_v3, 2  ;;  %v19222_v3 = vld [vmem:[%s18297_s9 + $0x98] sm:$0xff]  }
 0x1dc   : > { %21130 = vst [vmem:[#allocation28_spill] sm:$0xff] %v19222_v3 }
 0x1dd   : > { %v8424_v45 = vsel %vm6860_vm4, %v8421_v30, %v8423_v43  ;;  %v19234_v30 = vld [vmem:[%s18297_s9 + $0x180] sm:$0xff]  }
 0x1de   : > { %21132 = vst [vmem:[#allocation30_spill] sm:$0xff] %v19234_v30 }
 0x1df   : > { %15469 = vmatmul.mubr.msk.bf16.gmra.mrb[84].mxu1 %vm1202_vm2, %v19185_v19  ;;  %v8425_v19 = vrot.slane %v19200_v60, 2 }
 0x1e0   : > { %15472 = vmatprep.mubr.msk.bf16.mxu1 %vm1202_vm2, %v19190_v20  ;;  %v19207_v20 = vld [vmem:[%s18297_s9 + $0x168] sm:$0xff]  }
 0x1e1   : > { %21127 = vst [vmem:[#allocation25_spill] sm:$0xff] %v19207_v20 }
 0x1e2   : > { %16091 = vmatmul.mubr.msk.bf16.gmra.mrb[16].mxu0 %vm1202_vm2, %v8420_v48  ;;  %v19218_v48 = vld [vmem:[%s18297_s9 + $0x90] sm:$0xff]  }
 0x1e3   : > { %16094 = vmatprep.mubr.msk.bf16.mxu0 %vm1202_vm2, %v8422_v58  ;;  %21129 = vst [vmem:[#allocation27_spill] sm:$0xff] %v19218_v48  ;;  %v8426_v58 = vsel %vm6860_vm4, %v8423_v43, %v8425_v19  ;;  %v8427_v60 = vrot.slane %v19218_v48, 2  ;;  %v19244_v48 = vld [vmem:[%s18297_s9 + $0xa8] sm:$0xff]  }
 0x1e4   : > { %21134 = vst [vmem:[#allocation32_spill] sm:$0xff] %v19244_v48 }
 0x1e5   : > { %v8428_v43 = vsel %vm6860_vm4, %v8425_v19, %v8427_v60  ;;  %v19256_v19 = vld [vmem:[%s18297_s9 + $0x190] sm:$0xff]  }
 0x1e6   : > { %21136 = vst [vmem:[#allocation34_spill] sm:$0xff] %v19256_v19 }
 0x1e7   : > { %15473 = vmatmul.mubr.msk.bf16.gmra.mrb[88].mxu1 %vm1202_vm2, %v19207_v20  ;;  %v8429_v20 = vrot.slane %v19222_v3, 2 }
 0x1e8   : > { %15476 = vmatprep.mubr.msk.bf16.mxu1 %vm1202_vm2, %v19212_v54  ;;  %v19229_v54 = vld [vmem:[%s18297_s9 + $0x178] sm:$0xff]  }
 0x1e9   : > { %21131 = vst [vmem:[#allocation29_spill] sm:$0xff] %v19229_v54 }
 0x1ea   : > { %16095 = vmatmul.mubr.msk.bf16.gmra.mrb[20].mxu0 %vm1202_vm2, %v8424_v45  ;;  %v19240_v45 = vld [vmem:[%s18297_s9 + $0xa0] sm:$0xff]  }
 0x1eb   : > { %16098 = vmatprep.mubr.msk.bf16.mxu0 %vm1202_vm2, %v8426_v58  ;;  %21133 = vst [vmem:[#allocation31_spill] sm:$0xff] %v19240_v45  ;;  %v8430_v58 = vsel %vm6860_vm4, %v8427_v60, %v8429_v20  ;;  %v8431_v3 = vrot.slane %v19240_v45, 2  ;;  %v19266_v45 = vld [vmem:[%s18297_s9 + $0xb8] sm:$0xff]  }
 0x1ec   : > { %21138 = vst [vmem:[#allocation36_spill] sm:$0xff] %v19266_v45 }
 0x1ed   : > { %v8432_v60 = vsel %vm6860_vm4, %v8429_v20, %v8431_v3  ;;  %v19278_v20 = vld [vmem:[%s18297_s9 + $0x1a0] sm:$0xff]  }
 0x1ee   : > { %21140 = vst [vmem:[#allocation38_spill] sm:$0xff] %v19278_v20 }
 0x1ef   : > { %15477 = vmatmul.mubr.msk.bf16.gmra.mrb[92].mxu1 %vm1202_vm2, %v19229_v54  ;;  %v8433_v54 = vrot.slane %v19244_v48, 2 }
 0x1f0   : > { %15480 = vmatprep.mubr.msk.bf16.mxu1 %vm1202_vm2, %v19234_v30  ;;  %v19251_v30 = vld [vmem:[%s18297_s9 + $0x188] sm:$0xff]  }
 0x1f1   : > { %21135 = vst [vmem:[#allocation33_spill] sm:$0xff] %v19251_v30 }
 0x1f2   : > { %16099 = vmatmul.mubr.msk.bf16.gmra.mrb[24].mxu0 %vm1202_vm2, %v8428_v43  ;;  %v19262_v43 = vld [vmem:[%s18297_s9 + $0xb0] sm:$0xff]  }
 0x1f3   : > { %16102 = vmatprep.mubr.msk.bf16.mxu0 %vm1202_vm2, %v8430_v58  ;;  %21137 = vst [vmem:[#allocation35_spill] sm:$0xff] %v19262_v43  ;;  %v8434_v58 = vsel %vm6860_vm4, %v8431_v3, %v8433_v54  ;;  %v8435_v48 = vrot.slane %v19262_v43, 2  ;;  %v17790_v43 = vld [vmem:[%s18297_s9 + $0xc8] sm:$0xff]  }
 0x1f5   : > { %v8436_v3 = vsel %vm6860_vm4, %v8433_v54, %v8435_v48 }
 0x1f7   : > { %15481 = vmatmul.mubr.msk.bf16.gmra.mrb[96].mxu1 %vm1202_vm2, %v19251_v30  ;;  %v8437_v30 = vrot.slane %v19266_v45, 2 }
 0x1f8   : > { %15484 = vmatprep.mubr.msk.bf16.mxu1 %vm1202_vm2, %v19256_v19  ;;  %v19273_v19 = vld [vmem:[%s18297_s9 + $0x198] sm:$0xff]  }
 0x1f9   : > { %21139 = vst [vmem:[#allocation37_spill] sm:$0xff] %v19273_v19 }
 0x1fa   : > { %16103 = vmatmul.mubr.msk.bf16.gmra.mrb[28].mxu0 %vm1202_vm2, %v8432_v60  ;;  %v17789_v60 = vld [vmem:[%s18297_s9 + $0xc0] sm:$0xff]  }
 0x1fb   : > { %16106 = vmatprep.mubr.msk.bf16.mxu0 %vm1202_vm2, %v8434_v58  ;;  %v8438_v58 = vsel %vm6860_vm4, %v8435_v48, %v8437_v30  ;;  %v8439_v45 = vrot.slane %v17789_v60, 2  ;;  %v17791_v48 = vld [vmem:[%s18297_s9 + $0xd0] sm:$0xff]   ;;  %v8445_v60 = vrot.slane %v17792_v44, 2 }
 0x1fd   : > { %v8440_v54 = vsel %vm6860_vm4, %v8437_v30, %v8439_v45 }
 0x1ff   : > { %15485 = vmatmul.mubr.msk.bf16.gmra.mrb[100].mxu1 %vm1202_vm2, %v19273_v19  ;;  %v8441_v19 = vrot.slane %v17790_v43, 2  ;;  %v8443_v43 = vrot.slane %v17791_v48, 2 }
 0x200   : > { %15488 = vmatprep.mubr.msk.bf16.mxu1 %vm1202_vm2, %v19278_v20  ;;  %v17930_v20 = vld [vmem:[%s18297_s9 + $0x1b0] sm:$0xff]  }
 0x201   : > { %v8444_v30 = vsel %vm6860_vm4, %v8441_v19, %v8443_v43 }
 0x202   : > { %16107 = vmatmul.mubr.msk.bf16.gmra.mrb[32].mxu0 %vm1202_vm2, %v8436_v3  ;;  %v8442_v3 = vsel %vm6860_vm4, %v8439_v45, %v8441_v19  ;;  %v17793_v45 = vld [vmem:[%s18297_s9 + $0xe0] sm:$0xff]  }
 0x203   : > { %16110 = vmatprep.mubr.msk.bf16.mxu0 %vm1202_vm2, %v8438_v58  ;;  %v19302_v58 = vld [vmem:[%s18297_s9 + $0x1b8] sm:$0xff]   ;;  %v8447_v44 = vrot.slane %v17793_v45, 2 }
 0x204   : > { %21142 = vst [vmem:[#allocation40_spill] sm:$0xff] %v19302_v58 }
 0x205   : > { %v8448_v19 = vsel %vm6860_vm4, %v8445_v60, %v8447_v44 }
 0x207   : > { %15489 = vmatmul.mubr.msk.bf16.gmra.mrb[104].mxu1 %vm1202_vm2, %v19289_v59  ;;  %v17794_v59 = vld [vmem:[%s18297_s9 + $0xe8] sm:$0xff]  }
 0x208   : > { %15492 = vmatprep.mubr.msk.bf16.mxu1 %vm1202_vm2, %v17930_v20  ;;  %v17932_v20 = vld [vmem:[%s18297_s9 + $0x1c0] sm:$0xff]   ;;  %v8449_v48 = vrot.slane %v17794_v59, 2 }
 0x20a   : > { %16111 = vmatmul.mubr.msk.bf16.gmra.mrb[36].mxu0 %vm1202_vm2, %v8440_v54  ;;  %v8446_v54 = vsel %vm6860_vm4, %v8443_v43, %v8445_v60  ;;  %v8450_v43 = vsel %vm6860_vm4, %v8447_v44, %v8449_v48  ;;  %v17797_v60 = vld [vmem:[%s18297_s9 + $0x100] sm:$0xff]  }
 0x20b   : > { %16114 = vmatprep.mubr.msk.bf16.mxu0 %vm1202_vm2, %v8442_v3  ;;  %v17933_v3 = vld [vmem:[%s18297_s9 + $0x1c8] sm:$0xff]   ;;  %v8455_v44 = vrot.slane %v17797_v60, 2  ;;  %v17934_v60 = vld [vmem:[%s18297_s9 + $0x4] sm:$0xf] }
 0x20f   : > { %15493 = vmatmul.mubr.msk.bf16.gmra.mrb[108].mxu1 %vm1202_vm2, %v19302_v58  ;;  %v17796_v58 = vld [vmem:[%s18297_s9 + $0xf8] sm:$0xff]  }
 0x210   : > { %15496 = vmatprep.mubr.msk.bf16.mxu1 %vm1202_vm2, %v17932_v20  ;;  %v17795_v20 = vld [vmem:[%s18297_s9 + $0xf0] sm:$0xff]   ;;  %v8453_v59 = vrot.slane %v17796_v58, 2 }
 0x212   : > { %16115 = vmatmul.mubr.msk.bf16.gmra.mrb[40].mxu0 %vm1202_vm2, %v8444_v30  ;;  %v8451_v30 = vrot.slane %v17795_v20, 2 }
 0x213   : > { %16118 = vmatprep.mubr.msk.bf16.mxu0 %vm1202_vm2, %v8446_v54  ;;  %v17798_v54 = vld [vmem:[%s18297_s9 + $0x108] sm:$0xff]  }
 0x214   : > { %v8454_v45 = vsel %vm6860_vm4, %v8451_v30, %v8453_v59  ;;  %v8457_v58 = vrot.slane %v17798_v54, 2  ;;  %v17803_v54 = vld [vmem:[%s18297_s9 + $0x130] sm:$0xff]  }
 0x217   : > { %15497 = vmatmul.mubr.msk.bf16.gmra.mrb[112].mxu1 %vm1202_vm2, %v17933_v3  ;;  %v17800_v3 = vld [vmem:[%s18297_s9 + $0x118] sm:$0xff]  }
 0x218   : > { %15500 = vmatprep.mubr.msk.bf16.mxu1 %vm1202_vm2, %v18659_v53  ;;  %v8452_v53 = vsel %vm6860_vm4, %v8449_v48, %v8451_v30  ;;  %v8458_v48 = vsel %vm6860_vm4, %v8455_v44, %v8457_v58  ;;  %v8461_v20 = vrot.slane %v17800_v3, 2  ;;  %v17802_v30 = vld [vmem:[%s18297_s9 + $0x128] sm:$0xff]  }
 0x21a   : > { %16119 = vmatmul.mubr.msk.bf16.gmra.mrb[44].mxu0 %vm1202_vm2, %v8448_v19 }
 0x21b   : > { %16122 = vmatprep.mubr.msk.bf16.mxu0 %vm1202_vm2, %v8450_v43 }
 0x21f   : > { %15501 = vmatmul.mubr.msk.bf16.gmra.mrb[116].mxu1 %vm1202_vm2, %v18668_v63  ;;  %v8456_v63 = vsel %vm6860_vm4, %v8453_v59, %v8455_v44  ;;  %v2704_v59 = vld [vmem:[%s18297_s9] sm:$0xe] }
 0x220   : > { %15504 = vmatprep.mubr.msk.bf16.mxu1 %vm1202_vm2, %v18676_v10  ;;  %v17799_v10 = vld [vmem:[%s18297_s9 + $0x110] sm:$0xff]  }
 0x221   : > { %v8459_v19 = vrot.slane %v17799_v10, 2  ;;  %v17805_v10 = vld [vmem:[%s18297_s9 + $0x138] sm:$0xff]  }
 0x222   : > { %16123 = vmatmul.mubr.msk.bf16.gmra.mrb[48].mxu0 %vm1202_vm2, %v8452_v53 }
 0x223   : > { %16126 = vmatprep.mubr.msk.bf16.mxu0 %vm1202_vm2, %v8454_v45  ;;  %v8462_v43 = vsel %vm6860_vm4, %v8459_v19, %v8461_v20  ;;  %v13315_v45 = vcombine.low %v2704_v59, %v17934_v60  ;;  %v17808_v60 = vld [vmem:[%s18297_s9 + $0x150] sm:$0xff]  }
 0x225   : > { %v2711_v44 = vrot.slane %v13315_v45, 1  ;;  %v2720_v45 = vrot.slane %v18834_v31, 1 }
 0x227   : > { %15505 = vmatmul.mubr.msk.bf16.gmra.mrb[120].mxu1 %vm1202_vm2, %v18687_v21  ;;  %v8460_v21 = vsel %vm6860_vm4, %v8457_v58, %v8459_v19  ;;  %v2712_v58 = vrot.slane %v18795_v13, 1  ;;  %v2714_v13 = vrot.slane %v18800_v9, 1  ;;  %v17806_v19 = vld [vmem:[%s18297_s9 + $0x140] sm:$0xff]  }
 0x228   : > { %15508 = vmatprep.mubr.msk.bf16.mxu1 %vm1202_vm2, %v18704_v36  ;;  %v17801_v36 = vld [vmem:[%s18297_s9 + $0x120] sm:$0xff]   ;;  %v8471_v9 = vrot.slane %v17806_v19, 2 }
 0x229   : > { %v8463_v53 = vrot.slane %v17801_v36, 2  ;;  %v17807_v36 = vld [vmem:[%s18297_s9 + $0x148] sm:$0xff]  }
 0x22a   : > { %16127 = vmatmul.mubr.msk.bf16.gmra.mrb[52].mxu0 %vm1202_vm2, %v8456_v63  ;;  %v8473_v59 = vrot.slane %v17807_v36, 2  ;;  %v17812_v36 = vld [vmem:[%s18297_s9 + $0x170] sm:$0xff]  }
 0x22b   : > { %16130 = vmatprep.mubr.msk.bf16.mxu0 %vm1202_vm2, %v8458_v48  ;;  %v2713_v48 = vsel %vm2710_vm5, %v2711_v44, %v2712_v58  ;;  %v19402_v44 = vld [vmem:[%s21048_s1 + $0x10] sm:$0x3] }
 0x22c   : > { %17585 = vmatprep.subr.msk.bf16.mxu0 %vm1407_vm0, %v19402_v44 }
 0x22f   : > { %15509 = vmatmul.mubr.msk.bf16.gmra.mrb[124].mxu1 %vm1202_vm2, %v18709_v41  ;;  %v8465_v41 = vrot.slane %v17802_v30, 2 }
 0x230   : > { %15512 = vmatprep.mubr.msk.bf16.mxu1 %vm1202_vm2, %v18724_v57  ;;  %v8464_v57 = vsel %vm6860_vm4, %v8461_v20, %v8463_v53  ;;  %v2716_v20 = vrot.slane %v18818_v24, 1  ;;  %v2718_v24 = vrot.slane %v18823_v25, 1 }
 0x231   : > { %v8466_v63 = vsel %vm6860_vm4, %v8463_v53, %v8465_v41 }
 0x232   : > { %16131 = vmatmul.mubr.msk.bf16.gmra.mrb[56].mxu0 %vm1202_vm2, %v8460_v21  ;;  %v2717_v30 = vsel %vm2710_vm5, %v2714_v13, %v2716_v20  ;;  %v2719_v25 = vsel %vm2710_vm5, %v2716_v20, %v2718_v24  ;;  %v2721_v31 = vsel %vm2710_vm5, %v2718_v24, %v2720_v45 }
 0x233   : > { %16134 = vmatprep.mubr.msk.bf16.mxu0 %vm1202_vm2, %v8462_v43  ;;  %v2715_v43 = vsel %vm2710_vm5, %v2712_v58, %v2714_v13  ;;  %v17811_v13 = vld [vmem:[%s18297_s9 + $0x168] sm:$0xff]  }
 0x237   : > { %15513 = vmatmul.mubr.msk.bf16.gmra.mrb[128].mxu1 %vm1202_vm2, %v18729_v62  ;;  %v8467_v62 = vrot.slane %v17803_v54, 2  ;;  %v8475_v54 = vrot.slane %v17808_v60, 2  ;;  %v17814_v60 = vld [vmem:[%s18297_s9 + $0x180] sm:$0xff]  }
 0x238   : > { %15516 = vmatprep.mubr.msk.bf16.mxu1 %vm1202_vm2, %v18744_v16  ;;  %v8469_v16 = vrot.slane %v17805_v10, 2 }
 0x239   : > { %v8468_v3 = vsel %vm6860_vm4, %v8465_v41, %v8467_v62  ;;  %v8474_v41 = vsel %vm6860_vm4, %v8471_v9, %v8473_v59  ;;  %v8476_v10 = vsel %vm6860_vm4, %v8473_v59, %v8475_v54  ;;  %v8483_v59 = vrot.slane %v17812_v36, 2 }
 0x23a   : > { %16135 = vmatmul.mubr.msk.bf16.gmra.mrb[60].mxu0 %vm1202_vm2, %v8464_v57  ;;  %v8470_v21 = vsel %vm6860_vm4, %v8467_v62, %v8469_v16  ;;  %v8472_v53 = vsel %vm6860_vm4, %v8469_v16, %v8471_v9  ;;  %v17809_v57 = vld [vmem:[%s18297_s9 + $0x158] sm:$0xff]   ;;  %v17810_v62 = vld [vmem:[%s18297_s9 + $0x160] sm:$0xff]  }
 0x23b   : > { %16138 = vmatprep.mubr.msk.bf16.mxu0 %vm1202_vm2, %v8466_v63  ;;  %v8477_v58 = vrot.slane %v17809_v57, 2  ;;  %v2722_v63 = vrot.slane %v18839_v32, 1  ;;  %v8479_v19 = vrot.slane %v17810_v62, 2  ;;  %v8481_v32 = vrot.slane %v17811_v13, 2  ;;  %v17813_v9 = vld [vmem:[%s18297_s9 + $0x178] sm:$0xff]  }
 0x23c   : > { %v17817_v62 = vld [vmem:[%s18297_s9 + $0x198] sm:$0xff]  }
 0x23d   : > { %v8478_v16 = vsel %vm6860_vm4, %v8475_v54, %v8477_v58 }
 0x23f   : > { %15517 = vmatmul.mubr.msk.bf16.gmra.mrb[132].mxu1 %vm1202_vm2, %v18749_v23  ;;  %v4592_v23 = vsel %vm1407_vm0, %v19111_v14, 0  ;;  %v17935_v14 = vld [vmem:[%s21048_s1 + $0x8] sm:$0x3] }
 0x240   : > { %15522 = vmatprep.mubr.msk.bf16.mxu1 %vm1202_vm2, %v2713_v48  ;;  %v2724_v48 = vrot.slane %v18850_v40, 1  ;;  %v2726_v40 = vrot.slane %v18855_v42, 1  ;;  %v8485_v42 = vrot.slane %v17813_v9, 2  ;;  %v17820_v9 = vld [vmem:[%s18297_s9 + $0x1b0] sm:$0xff]  }
 0x242   : > { %16139 = vmatmul.mubr.msk.bf16.gmra.mrb[64].mxu0 %vm1202_vm2, %v8468_v3  ;;  %v2723_v3 = vsel %vm2710_vm5, %v2720_v45, %v2722_v63  ;;  %v2725_v20 = vsel %vm2710_vm5, %v2722_v63, %v2724_v48  ;;  %v2732_v45 = vrot.slane %v18882_v61, 1  ;;  %v2734_v61 = vrot.slane %v18887_v0, 1 }
 0x243   : > { %16142 = vmatprep.mubr.msk.bf16.mxu0 %vm1202_vm2, %v8470_v21  ;;  %v8480_v21 = vsel %vm6860_vm4, %v8477_v58, %v8479_v19  ;;  %v17816_v58 = vld [vmem:[%s18297_s9 + $0x190] sm:$0xff]   ;;  %v2736_v63 = vrot.slane %v18898_v8, 1  ;;  %v8493_v0 = vrot.slane %v17817_v62, 2  ;;  %v2738_v8 = vrot.slane %v18903_v11, 1 }
 0x245   : > { %v2737_v13 = vsel %vm2710_vm5, %v2734_v61, %v2736_v63 }
 0x247   : > { %15523 = vmatmul.mubr.msk.bf16.vlgmr.msra.gmra.mrb[0].mxu1 %vm1202_vm2, %v2715_v43  ;;  %v2728_v43 = vrot.slane %v18866_v50, 1  ;;  %v2730_v50 = vrot.slane %v18871_v51, 1 }
 0x248   : > { %15659 = vmatpush3.bf16.msra.mxu1 %v4592_v23  ;;  %15526 = vmatprep.mubr.msk.bf16.mxu1 %vm1202_vm2, %v2717_v30  ;;  %v8482_v23 = vsel %vm6860_vm4, %v8479_v19, %v8481_v32  ;;  %v2727_v30 = vsel %vm2710_vm5, %v2724_v48, %v2726_v40  ;;  %v2735_v48 = vsel %vm2710_vm5, %v2732_v45, %v2734_v61  ;;  %v17818_v19 = vld [vmem:[%s18297_s9 + $0x1a0] sm:$0xff]  }
 0x249   : > { %17581 = vmatprep.subr.msk.bf16.mxu1 %vm1407_vm0, %v17935_v14  ;;  %v2729_v24 = vsel %vm2710_vm5, %v2726_v40, %v2728_v43  ;;  %v8486_v14 = vsel %vm6860_vm4, %v8483_v59, %v8485_v42  ;;  %v2731_v57 = vsel %vm2710_vm5, %v2728_v43, %v2730_v50  ;;  %v2733_v54 = vsel %vm2710_vm5, %v2730_v50, %v2732_v45  ;;  %v17819_v40 = vld [vmem:[%s18297_s9 + $0x1a8] sm:$0xff]   ;;  %v17822_v45 = vld [vmem:[%s18297_s9 + $0x1c0] sm:$0xff]  }
 0x24a   : > { %16143 = vmatmul.mubr.msk.bf16.gmra.mrb[68].mxu0 %vm1202_vm2, %v8472_v53  ;;  %v8484_v53 = vsel %vm6860_vm4, %v8481_v32, %v8483_v59  ;;  %v8495_v36 = vrot.slane %v17818_v19, 2  ;;  %v8497_v11 = vrot.slane %v17819_v40, 2  ;;  %v8499_v50 = vrot.slane %v17820_v9, 2  ;;  %v17827_v19 = vld [vmem:[%s18297_s9 + $0x1e8] sm:$0xff]  }
 0x24b   : > { %16146 = vmatprep.mubr.msk.bf16.mxu0 %vm1202_vm2, %v8474_v41  ;;  %v17815_v41 = vld [vmem:[%s18297_s9 + $0x188] sm:$0xff]  }
 0x24c   : > { %v8489_v51 = vrot.slane %v17815_v41, 2  ;;  %v8498_v59 = vsel %vm6860_vm4, %v8495_v36, %v8497_v11 }
 0x24f   : > { %15527 = vmatmul.mubr.msk.bf16.gmra.mrb[4].mxu1 %vm1202_vm2, %v2719_v25  ;;  %v8487_v25 = vrot.slane %v17814_v60, 2  ;;  %v8500_v60 = vsel %vm6860_vm4, %v8497_v11, %v8499_v50 }
 0x250   : > { %15530 = vmatprep.mubr.msk.bf16.mxu1 %vm1202_vm2, %v2721_v31 }
 0x251   : > { %v8488_v31 = vsel %vm6860_vm4, %v8485_v42, %v8487_v25 }
 0x252   : > { %16147 = vmatmul.mubr.msk.bf16.gmra.mrb[72].mxu0 %vm1202_vm2, %v8476_v10  ;;  %v8490_v10 = vsel %vm6860_vm4, %v8487_v25, %v8489_v51 }
 0x253   : > { %16150 = vmatprep.mubr.msk.bf16.mxu0 %vm1202_vm2, %v8478_v16  ;;  %v8491_v16 = vrot.slane %v17816_v58, 2  ;;  %v2752_v58 = vrot.slane %v18962_v1, 1  ;;  %v2754_v1 = vrot.slane %v18967_v2, 1  ;;  %v8513_v2 = vrot.slane %v17827_v19, 2 }
 0x255   : > { %v8494_v32 = vsel %vm6860_vm4, %v8491_v16, %v8493_v0 }
 0x257   : > { %15531 = vmatmul.mubr.msk.bf16.gmra.mrb[8].mxu1 %vm1202_vm2, %v2723_v3  ;;  %v8492_v3 = vsel %vm6860_vm4, %v8489_v51, %v8491_v16 }
 0x258   : > { %15534 = vmatprep.mubr.msk.bf16.mxu1 %vm1202_vm2, %v2725_v20  ;;  %v2740_v20 = vrot.slane %v18914_v26, 1  ;;  %v2742_v26 = vrot.slane %v18919_v27, 1 }
 0x25a   : > { %16151 = vmatmul.mubr.msk.bf16.gmra.mrb[76].mxu0 %vm1202_vm2, %v8480_v21  ;;  %v2739_v21 = vsel %vm2710_vm5, %v2736_v63, %v2738_v8  ;;  %v2741_v43 = vsel %vm2710_vm5, %v2738_v8, %v2740_v20  ;;  %v2743_v42 = vsel %vm2710_vm5, %v2740_v20, %v2742_v26  ;;  %v2756_v8 = vrot.slane %v18978_v28, 1 }
 0x25b   : > { %16154 = vmatprep.mubr.msk.bf16.mxu0 %vm1202_vm2, %v8482_v23  ;;  %v8496_v23 = vsel %vm6860_vm4, %v8493_v0, %v8495_v36  ;;  %v17826_v0 = vld [vmem:[%s18297_s9 + $0x1e0] sm:$0xff]   ;;  %v2755_v20 = vsel %vm2710_vm5, %v2752_v58, %v2754_v1  ;;  %v2758_v28 = vrot.slane %v18983_v17, 1  ;;  %v17828_v36 = vld [vmem:[%s18297_s9 + $0x1f0] sm:$0xff]  }
 0x25c   : > { %v2757_v40 = vsel %vm2710_vm5, %v2754_v1, %v2756_v8  ;;  %v8515_v9 = vrot.slane %v17828_v36, 2  ;;  %v2776_v1 = vrot.slane %v19066_v4, 1  ;;  %v9473_v4 = vshrl.u32 %v19059_v56, 16  ;;  %v17838_v36 = vld [vmem:[%s18297_s9 + $0x240] ss:$0 sps:$4 sm:$0x33]  }
 0x25f   : > { %15535 = vmatmul.mubr.msk.bf16.gmra.mrb[12].mxu1 %vm1202_vm2, %v2727_v30  ;;  %v2744_v30 = vrot.slane %v18930_v35, 1  ;;  %v2746_v35 = vrot.slane %v18935_v37, 1 }
 0x260   : > { %15538 = vmatprep.mubr.msk.bf16.mxu1 %vm1202_vm2, %v2729_v24  ;;  %v17821_v24 = vld [vmem:[%s18297_s9 + $0x1b8] sm:$0xff]  }
 0x261   : > { %v8501_v27 = vrot.slane %v17821_v24, 2  ;;  %v2747_v25 = vsel %vm2710_vm5, %v2744_v30, %v2746_v35  ;;  %v17830_v24 = vld [vmem:[%s18297_s9 + $0x200] sm:$0xff]  }
 0x262   : > { %16155 = vmatmul.mubr.msk.bf16.gmra.mrb[80].mxu0 %vm1202_vm2, %v8484_v53  ;;  %v2745_v53 = vsel %vm2710_vm5, %v2742_v26, %v2744_v30  ;;  %v17829_v26 = vld [vmem:[%s18297_s9 + $0x1f8] sm:$0xff]  }
 0x263   : > { %16158 = vmatprep.mubr.msk.bf16.mxu0 %vm1202_vm2, %v8486_v14  ;;  %v2748_v14 = vrot.slane %v18946_v47, 1  ;;  %v8502_v41 = vsel %vm6860_vm4, %v8499_v50, %v8501_v27  ;;  %v2750_v47 = vrot.slane %v18951_v49, 1  ;;  %v8517_v17 = vrot.slane %v17829_v26, 2 }
 0x265   : > { %v2749_v51 = vsel %vm2710_vm5, %v2746_v35, %v2748_v14  ;;  %v2751_v62 = vsel %vm2710_vm5, %v2748_v14, %v2750_v47  ;;  %v2753_v16 = vsel %vm2710_vm5, %v2750_v47, %v2752_v58  ;;  %v8518_v50 = vsel %vm6860_vm4, %v8515_v9, %v8517_v17  ;;  %v17832_v14 = vld [vmem:[%s18297_s9 + $0x210] sm:$0xff]  }
 0x266   : > { %v8519_v35 = vrot.slane %v17830_v24, 2  ;;  %v9494_v24 = vshll.u32 %v19081_v22, 16 }
 0x267   : > { %15539 = vmatmul.mubr.msk.bf16.gmra.mrb[16].mxu1 %vm1202_vm2, %v2731_v57  ;;  %v17823_v57 = vld [vmem:[%s18297_s9 + $0x1c8] sm:$0xff]  }
 0x268   : > { %15542 = vmatprep.mubr.msk.bf16.mxu1 %vm1202_vm2, %v2733_v54  ;;  %v8503_v54 = vrot.slane %v17822_v45, 2  ;;  %v8505_v37 = vrot.slane %v17823_v57, 2  ;;  %v8520_v45 = vsel %vm6860_vm4, %v8517_v17, %v8519_v35  ;;  %v9485_v17 = vshll.u32 %v19077_v15, 16 }
 0x26a   : > { %16159 = vmatmul.mubr.msk.bf16.gmra.mrb[84].mxu0 %vm1202_vm2, %v8488_v31  ;;  %v8504_v61 = vsel %vm6860_vm4, %v8501_v27, %v8503_v54  ;;  %v17824_v31 = vld [vmem:[%s18297_s9 + $0x1d0] sm:$0xff]   ;;  %v8506_v63 = vsel %vm6860_vm4, %v8503_v54, %v8505_v37 }
 0x26b   : > { %16162 = vmatprep.mubr.msk.bf16.mxu0 %vm1202_vm2, %v8490_v10  ;;  %v17825_v10 = vld [vmem:[%s18297_s9 + $0x1d8] sm:$0xff]  }
 0x26c   : > { %v8509_v49 = vrot.slane %v17825_v10, 2 }
 0x26f   : > { %15543 = vmatmul.mubr.msk.bf16.gmra.mrb[20].mxu1 %vm1202_vm2, %v2735_v48  ;;  %v8507_v48 = vrot.slane %v17824_v31, 2  ;;  %v2772_v31 = vrot.slane %v19042_v29, 1 }
 0x270   : > { %15546 = vmatprep.mubr.msk.bf16.mxu1 %vm1202_vm2, %v2737_v13 }
 0x271   : > { %v8508_v13 = vsel %vm6860_vm4, %v8505_v37, %v8507_v48 }
 0x272   : > { %16163 = vmatmul.mubr.msk.bf16.gmra.mrb[88].mxu0 %vm1202_vm2, %v8492_v3  ;;  %v8510_v3 = vsel %vm6860_vm4, %v8507_v48, %v8509_v49 }
 0x273   : > { %16166 = vmatprep.mubr.msk.bf16.mxu0 %vm1202_vm2, %v8494_v32  ;;  %v8511_v32 = vrot.slane %v17826_v0, 2 }
 0x275   : > { %v8514_v11 = vsel %vm6860_vm4, %v8511_v32, %v8513_v2 }
 0x277   : > { %15547 = vmatmul.mubr.msk.bf16.gmra.mrb[24].mxu1 %vm1202_vm2, %v2739_v21  ;;  %v8512_v21 = vsel %vm6860_vm4, %v8509_v49, %v8511_v32  ;;  %v17836_v49 = vld [vmem:[%s18297_s9 + $0x230] sm:$0xff]   ;;  %v9468_v32 = vshll.u32 %v19056_v46, 16 }
 0x278   : > { %15550 = vmatprep.mubr.msk.bf16.mxu1 %vm1202_vm2, %v2741_v43  ;;  %v2760_v43 = vrot.slane %v18994_v33, 1  ;;  %v2762_v33 = vrot.slane %v18999_v34, 1 }
 0x279   : > { %v9470_v26 = vrot.slane %v9468_v32, 3 }
 0x27a   : > { %16167 = vmatmul.mubr.msk.bf16.gmra.mrb[92].mxu0 %vm1202_vm2, %v8496_v23  ;;  %v2759_v23 = vsel %vm2710_vm5, %v2756_v8, %v2758_v28  ;;  %v2761_v30 = vsel %vm2710_vm5, %v2758_v28, %v2760_v43  ;;  %v2763_v27 = vsel %vm2710_vm5, %v2760_v43, %v2762_v33  ;;  %v2780_v43 = vrot.slane %v19088_v38, 1 }
 0x27b   : > { %16170 = vmatprep.mubr.msk.bf16.mxu0 %vm1202_vm2, %v8498_v59  ;;  %v8516_v59 = vsel %vm6860_vm4, %v8513_v2, %v8515_v9  ;;  %v2778_v2 = vrot.slane %v19071_v5, 1  ;;  %v8535_v9 = vrot.slane %v17838_v36, 2  ;;  %v9491_v38 = vshrl.u32 %v19081_v22, 16 }
 0x27d   : > { %v2781_v5 = vsel %vm2710_vm5, %v2778_v2, %v2780_v43 }
 0x27f   : > { %15551 = vmatmul.mubr.msk.bf16.gmra.mrb[28].mxu1 %vm1202_vm2, %v2743_v42  ;;  %v2764_v42 = vrot.slane %v19010_v52, 1  ;;  %v2766_v52 = vrot.slane %v19015_v55, 1 }
 0x280   : > { %15554 = vmatprep.mubr.msk.bf16.mxu1 %vm1202_vm2, %v2745_v53  ;;  %v17831_v53 = vld [vmem:[%s18297_s9 + $0x208] sm:$0xff]  }
 0x281   : > { %v8521_v34 = vrot.slane %v17831_v53, 2  ;;  %v2767_v54 = vsel %vm2710_vm5, %v2764_v42, %v2766_v52 }
 0x282   : > { %16171 = vmatmul.mubr.msk.bf16.gmra.mrb[96].mxu0 %vm1202_vm2, %v8500_v60  ;;  %v2765_v60 = vsel %vm2710_vm5, %v2762_v33, %v2764_v42  ;;  %v2782_v42 = vrot.slane %v19093_v12, 1  ;;  %v21143_v12 = vld [vmem:[#allocation8_spill] sm:$0xff] }
 0x283   : > { %16174 = vmatprep.mubr.msk.bf16.mxu0 %vm1202_vm2, %v8502_v41  ;;  %v2768_v41 = vrot.slane %v19026_v6, 1  ;;  %v8522_v57 = vsel %vm6860_vm4, %v8519_v35, %v8521_v34  ;;  %v2770_v6 = vrot.slane %v19031_v7, 1  ;;  %v2784_v35 = vrot.slane %v19119_v18, 1 }
 0x284   : > { %v2783_v22 = vsel %vm2710_vm5, %v2780_v43, %v2782_v42 }
 0x285   : > { %v2769_v37 = vsel %vm2710_vm5, %v2766_v52, %v2768_v41  ;;  %v2771_v10 = vsel %vm2710_vm5, %v2768_v41, %v2770_v6  ;;  %v2773_v48 = vsel %vm2710_vm5, %v2770_v6, %v2772_v31  ;;  %v9503_v41 = vshll.u32 %v21143_v12, 16 }
 0x287   : > { %15555 = vmatmul.mubr.msk.bf16.gmra.mrb[32].mxu1 %vm1202_vm2, %v2747_v25  ;;  %v17833_v25 = vld [vmem:[%s18297_s9 + $0x218] sm:$0xff]  }
 0x288   : > { %15558 = vmatprep.mubr.msk.bf16.mxu1 %vm1202_vm2, %v2749_v51  ;;  %v8523_v51 = vrot.slane %v17832_v14, 2  ;;  %v8525_v55 = vrot.slane %v17833_v25, 2  ;;  %v9500_v14 = vshrl.u32 %v21143_v12, 16  ;;  %v21144_v25 = vld [vmem:[#allocation9_spill] sm:$0xff] }
 0x289   : > { %v9509_v18 = vshrl.u32 %v21144_v25, 16 }
 0x28a   : > { %16175 = vmatmul.mubr.msk.bf16.gmra.mrb[100].mxu0 %vm1202_vm2, %v8504_v61  ;;  %v8524_v47 = vsel %vm6860_vm4, %v8521_v34, %v8523_v51  ;;  %v17834_v61 = vld [vmem:[%s18297_s9 + $0x220] sm:$0xff]   ;;  %v8526_v58 = vsel %vm6860_vm4, %v8523_v51, %v8525_v55  ;;  %v9496_v34 = vrot.slane %v9494_v24, 3  ;;  %v21145_v51 = vld [vmem:[#allocation10_spill] sm:$0xff]  ;;  %v9502_v6 = vrot.slane %v9500_v14, 2 }
 0x28b   : > { %16178 = vmatprep.mubr.msk.bf16.mxu0 %vm1202_vm2, %v8506_v63  ;;  %v17835_v63 = vld [vmem:[%s18297_s9 + $0x228] sm:$0xff]   ;;  %v21156_v14 = vld [vmem:[#allocation20_spill] sm:$0xff] }
 0x28c   : > { %v8529_v7 = vrot.slane %v17835_v63, 2 }
 0x28f   : > { %15559 = vmatmul.mubr.msk.bf16.gmra.mrb[36].mxu1 %vm1202_vm2, %v2751_v62  ;;  %v8527_v62 = vrot.slane %v17834_v61, 2  ;;  %v21146_v61 = vld [vmem:[#allocation13_spill] sm:$0xff] }
 0x290   : > { %15562 = vmatprep.mubr.msk.bf16.mxu1 %vm1202_vm2, %v2753_v16  ;;  %v2774_v16 = vrot.slane %v19049_v39, 1  ;;  %v9465_v39 = vshrl.u32 %v19056_v46, 16  ;;  %v9475_v46 = vrot.slane %v9473_v4, 2  ;;  %v21150_v4 = vld [vmem:[#allocation17_spill] sm:$0xff] }
 0x291   : > { %v8528_v29 = vsel %vm6860_vm4, %v8525_v55, %v8527_v62  ;;  %v8530_v0 = vsel %vm6860_vm4, %v8527_v62, %v8529_v7 }
 0x292   : > { %16179 = vmatmul.mubr.msk.bf16.gmra.mrb[104].mxu0 %vm1202_vm2, %v8508_v13  ;;  %v17837_v13 = vld [vmem:[%s18297_s9 + $0x238] sm:$0xff]   ;;  %v2775_v8 = vsel %vm2710_vm5, %v2772_v31, %v2774_v16  ;;  %v2777_v19 = vsel %vm2710_vm5, %v2774_v16, %v2776_v1  ;;  %v2788_v31 = vrot.slane %v21146_v61, 1 }
 0x293   : > { %16182 = vmatprep.mubr.msk.bf16.mxu0 %vm1202_vm2, %v8510_v3  ;;  %v8531_v3 = vrot.slane %v17836_v49, 2 }
 0x295   : > { %v8532_v28 = vsel %vm6860_vm4, %v8529_v7, %v8531_v3 }
 0x297   : > { %15563 = vmatmul.mubr.msk.bf16.gmra.mrb[40].mxu1 %vm1202_vm2, %v2755_v20  ;;  %v8533_v20 = vrot.slane %v17837_v13, 2 }
 0x298   : > { %15566 = vmatprep.mubr.msk.bf16.mxu1 %vm1202_vm2, %v2757_v40  ;;  %v9476_v40 = vshll.u32 %v19059_v56, 16  ;;  %v2779_v56 = vsel %vm2710_vm5, %v2776_v1, %v2778_v2 }
 0x29a   : > { %16183 = vmatmul.mubr.msk.bf16.gmra.mrb[108].mxu0 %vm1202_vm2, %v8512_v21  ;;  %v8534_v21 = vsel %vm6860_vm4, %v8531_v3, %v8533_v20  ;;  %v21149_v3 = vld [vmem:[#allocation14_spill] sm:$0xff] }
 0x29b   : > { %16186 = vmatprep.mubr.msk.bf16.mxu0 %vm1202_vm2, %v8514_v11  ;;  %v9467_v11 = vrot.slane %v9465_v39, 2 }
 0x29d   : > { %v9471_v33 = vor.u32 %v9470_v26, %v9467_v11  ;;  %v21151_v26 = vld [vmem:[#allocation15_spill] sm:$0xff] }
 0x29f   : > { %15567 = vmatmul.mubr.msk.bf16.gmra.mrb[44].mxu1 %vm1202_vm2, %v2759_v23  ;;  %v9478_v23 = vrot.slane %v9476_v40, 3  ;;  %v2792_v40 = vrot.slane %v21150_v4, 1 }
 0x2a0   : > { %15570 = vmatprep.mubr.msk.bf16.mxu1 %vm1202_vm2, %v2761_v30  ;;  %v9482_v30 = vshrl.u32 %v19077_v15, 16 }
 0x2a2   : > { %16187 = vmatmul.mubr.msk.bf16.gmra.mrb[112].mxu0 %vm1202_vm2, %v8516_v59  ;;  %v9479_v59 = vor.u32 %v9478_v23, %v9475_v46  ;;  %v9484_v53 = vrot.slane %v9482_v30, 2  ;;  %v9536_v46 = vshrl.u32 %v21151_v26, 16  ;;  %v9539_v23 = vshll.u32 %v21151_v26, 16  ;;  %v21164_v26 = vld [vmem:[#allocation28_spill] sm:$0xff] }
 0x2a3   : > { %16190 = vmatprep.mubr.msk.bf16.mxu0 %vm1202_vm2, %v8518_v50  ;;  %v8536_v50 = vsel %vm6860_vm4, %v8533_v20, %v8535_v9  ;;  %v21152_v9 = vld [vmem:[#allocation16_spill] sm:$0xff] }
 0x2a4   : > { %v9480_v15 = vsel %vm9463_vm6, %v9471_v33, %v9479_v59  ;;  %v9548_v30 = vshll.u32 %v21152_v9, 16  ;;  %v9541_v24 = vrot.slane %v9539_v23, 3  ;;  %v9602_v23 = vshll.u32 %v21164_v26, 16 }
 0x2a7   : > { %15571 = vmatmul.mubr.msk.bf16.gmra.mrb[48].mxu1 %vm1202_vm2, %v2763_v27  ;;  %v9487_v27 = vrot.slane %v9485_v17, 3  ;;  %v21153_v17 = vld [vmem:[#allocation18_spill] sm:$0xff] }
 0x2a8   : > { %15574 = vmatprep.mubr.msk.bf16.mxu1 %vm1202_vm2, %v2765_v60  ;;  %v9493_v60 = vrot.slane %v9491_v38, 2  ;;  %v2794_v33 = vrot.slane %v21153_v17, 1  ;;  %v9538_v38 = vrot.slane %v9536_v46, 2  ;;  %v9599_v46 = vshrl.u32 %v21164_v26, 16 }
 0x2a9   : > { %v9488_v52 = vor.u32 %v9487_v27, %v9484_v53 }
 0x2aa   : > { %16191 = vmatmul.mubr.msk.bf16.gmra.mrb[116].mxu0 %vm1202_vm2, %v8520_v45  ;;  %v2785_v45 = vsel %vm2710_vm5, %v2782_v42, %v2784_v35  ;;  %v21154_v42 = vld [vmem:[#allocation21_spill] sm:$0xff] }
 0x2ab   : > { %16194 = vmatprep.mubr.msk.bf16.mxu0 %vm1202_vm2, %v8522_v57  ;;  %v9497_v57 = vor.u32 %v9496_v34, %v9493_v60  ;;  %v9489_v55 = vsel %vm9463_vm6, %v9479_v59, %v9488_v52  ;;  %v9542_v60 = vor.u32 %v9541_v24, %v9538_v38  ;;  %v9601_v24 = vrot.slane %v9599_v46, 2 }
 0x2ad   : > { %v9498_v63 = vsel %vm9463_vm6, %v9488_v52, %v9497_v57 }
 0x2af   : > { %15575 = vmatmul.mubr.msk.bf16.gmra.mrb[52].mxu1 %vm1202_vm2, %v2767_v54  ;;  %v9512_v54 = vshll.u32 %v21144_v25, 16  ;;  %v21157_v25 = vld [vmem:[#allocation22_spill] sm:$0xff] }
 0x2b0   : > { %15578 = vmatprep.mubr.msk.bf16.mxu1 %vm1202_vm2, %v2769_v37  ;;  %v2786_v37 = vrot.slane %v21145_v51, 1 }
 0x2b1   : > { %v9514_v62 = vrot.slane %v9512_v54, 3 }
 0x2b2   : > { %16195 = vmatmul.mubr.msk.bf16.gmra.mrb[120].mxu0 %vm1202_vm2, %v8524_v47  ;;  %v9505_v47 = vrot.slane %v9503_v41, 3  ;;  %v2789_v16 = vsel %vm2710_vm5, %v2786_v37, %v2788_v31  ;;  %v9563_v41 = vshrl.u32 %v21156_v14, 16 }
 0x2b3   : > { %16198 = vmatprep.mubr.msk.bf16.mxu0 %vm1202_vm2, %v8526_v58  ;;  %v11353_v58 = vsel %vm1407_vm0, %v19402_v44, 0  ;;  %v21148_v44 = vld [vmem:[#allocation12_spill] sm:$0xff] }
 0x2b4   : > { %v9506_v7 = vor.u32 %v9505_v47, %v9502_v6  ;;  %v9565_v61 = vrot.slane %v9563_v41, 2 }
 0x2b6   : > { %v9507_v20 = vsel %vm9463_vm6, %v9497_v57, %v9506_v7  ;;  %v9566_v57 = vshll.u32 %v21156_v14, 16 }
 0x2b7   : > { %15579 = vmatmul.mubr.msk.bf16.gmra.mrb[56].mxu1 %vm1202_vm2, %v2771_v10  ;;  %v9511_v10 = vrot.slane %v9509_v18, 2  ;;  %v2798_v18 = vrot.slane %v21157_v25, 1 }
 0x2b8   : > { %15582 = vmatprep.mubr.msk.bf16.mxu1 %vm1202_vm2, %v2773_v48  ;;  %v2787_v48 = vsel %vm2710_vm5, %v2784_v35, %v2786_v37  ;;  %v9550_v35 = vrot.slane %v9548_v30, 3 }
 0x2b9   : > { %v9515_v13 = vor.u32 %v9514_v62, %v9511_v10  ;;  %v21159_v62 = vld [vmem:[#allocation23_spill] sm:$0xff] }
 0x2ba   : > { %16199 = vmatmul.mubr.msk.bf16.gmra.mrb[124].mxu0 %vm1202_vm2, %v8528_v29  ;;  %v21147_v29 = vld [vmem:[#allocation11_spill] sm:$0xff] }
 0x2bb   : > { %16202 = vmatprep.mubr.msk.bf16.mxu0 %vm1202_vm2, %v8530_v0  ;;  %v9518_v49 = vshrl.u32 %v21147_v29, 16  ;;  %v9521_v1 = vshll.u32 %v21147_v29, 16  ;;  %v9527_v0 = vshrl.u32 %v21148_v44, 16  ;;  %v9516_v2 = vsel %vm9463_vm6, %v9506_v7, %v9515_v13  ;;  %v21160_v29 = vld [vmem:[#allocation24_spill] sm:$0xff] }
 0x2bc   : > { %v9575_v7 = vshll.u32 %v21159_v62, 16 }
 0x2bd   : > { %v9520_v39 = vrot.slane %v9518_v49, 2  ;;  %v9523_v32 = vrot.slane %v9521_v1, 3  ;;  %v9581_v49 = vshrl.u32 %v21160_v29, 16  ;;  %v9584_v1 = vshll.u32 %v21160_v29, 16 }
 0x2bf   : > { %15583 = vmatmul.mubr.msk.bf16.gmra.mrb[60].mxu1 %vm1202_vm2, %v2775_v8  ;;  %v9530_v8 = vshll.u32 %v21148_v44, 16  ;;  %v9524_v43 = vor.u32 %v9523_v32, %v9520_v39  ;;  %v9583_v32 = vrot.slane %v9581_v49, 2  ;;  %v9586_v4 = vrot.slane %v9584_v1, 3 }
 0x2c0   : > { %15586 = vmatprep.mubr.msk.bf16.mxu1 %vm1202_vm2, %v2777_v19  ;;  %v2790_v19 = vrot.slane %v21149_v3, 1  ;;  %v9577_v3 = vrot.slane %v9575_v7, 3 }
 0x2c1   : > { %v9525_v59 = vsel %vm9463_vm6, %v9515_v13, %v9524_v43  ;;  %v21161_v13 = vld [vmem:[#allocation26_spill] sm:$0xff] }
 0x2c2   : > { %16203 = vmatmul.mubr.msk.bf16.gmra.mrb[128].mxu0 %vm1202_vm2, %v8532_v28  ;;  %v9529_v28 = vrot.slane %v9527_v0, 2  ;;  %v2791_v36 = vsel %vm2710_vm5, %v2788_v31, %v2790_v19  ;;  %v2793_v11 = vsel %vm2710_vm5, %v2790_v19, %v2792_v40  ;;  %v9568_v31 = vrot.slane %v9566_v57, 3  ;;  %v21162_v19 = vld [vmem:[#allocation29_spill] sm:$0xff] }
 0x2c3   : > { %16206 = vmatprep.mubr.msk.bf16.mxu0 %vm1202_vm2, %v8534_v21  ;;  %v9532_v21 = vrot.slane %v9530_v8, 3  ;;  %v2802_v44 = vrot.slane %v21161_v13, 1 }
 0x2c7   : > { %15587 = vmatmul.mubr.msk.bf16.gmra.mrb[64].mxu1 %vm1202_vm2, %v2779_v56  ;;  %v9533_v56 = vor.u32 %v9532_v21, %v9529_v28  ;;  %v21163_v21 = vld [vmem:[#allocation27_spill] sm:$0xff] }
 0x2c8   : > { %15590 = vmatprep.mubr.msk.bf16.mxu1 %vm1202_vm2, %v2781_v5  ;;  %v9545_v5 = vshrl.u32 %v21152_v9, 16 }
 0x2c9   : > { %v9534_v53 = vsel %vm9463_vm6, %v9524_v43, %v9533_v56  ;;  %v9543_v54 = vsel %vm9463_vm6, %v9533_v56, %v9542_v60  ;;  %v9593_v43 = vshll.u32 %v21163_v21, 16  ;;  %v21165_v56 = vld [vmem:[#allocation30_spill] sm:$0xff] }
 0x2ca   : > { %16207 = vmatmul.mubr.msk.bf16.gmra.mrb[132].mxu0 %vm1202_vm2, %v8536_v50  ;;  %v2796_v50 = vrot.slane %v21154_v42, 1  ;;  %v9547_v27 = vrot.slane %v9545_v5, 2  ;;  %v2806_v9 = vrot.slane %v21165_v56, 1  ;;  %v9604_v42 = vrot.slane %v9602_v23, 3 }
 0x2cb   : > { %16212 = vmatprep.mubr.msk.bf16.mxu0 %vm1202_vm2, %v9480_v15  ;;  %v2795_v15 = vsel %vm2710_vm5, %v2792_v40, %v2794_v33  ;;  %v9595_v17 = vrot.slane %v9593_v43, 3 }
 0x2cc   : > { %v2797_v34 = vsel %vm2710_vm5, %v2794_v33, %v2796_v50  ;;  %v9551_v12 = vor.u32 %v9550_v35, %v9547_v27  ;;  %v21166_v33 = vld [vmem:[#allocation33_spill] sm:$0xff]  ;;  %v21167_v35 = vld [vmem:[#allocation31_spill] sm:$0xff] }
 0x2ce   : > { %v9552_v47 = vsel %vm9463_vm6, %v9542_v60, %v9551_v12  ;;  %v9611_v60 = vshll.u32 %v21167_v35, 16 }
 0x2cf   : > { %15591 = vmatmul.mubr.msk.bf16.gmra.mrb[68].mxu1 %vm1202_vm2, %v2783_v22  ;;  %v21155_v22 = vld [vmem:[#allocation19_spill] sm:$0xff] }
 0x2d0   : > { %15594 = vmatprep.mubr.msk.bf16.mxu1 %vm1202_vm2, %v2785_v45  ;;  %v9554_v52 = vshrl.u32 %v21155_v22, 16  ;;  %v9557_v45 = vshll.u32 %v21155_v22, 16  ;;  %v21168_v22 = vld [vmem:[#allocation32_spill] sm:$0xff]  ;;  %v9613_v25 = vrot.slane %v9611_v60, 3 }
 0x2d2   : > { %16213 = vmatmul.mubr.msk.bf16.vlgmr.msra.gmra.mrb[0].mxu0 %vm1202_vm2, %v9489_v55  ;;  %v9556_v51 = vrot.slane %v9554_v52, 2  ;;  %v9559_v37 = vrot.slane %v9557_v45, 3  ;;  %v21158_v55 = vld [vmem:[#allocation25_spill] sm:$0xff]  ;;  %v9617_v52 = vshrl.u32 %v21168_v22, 16  ;;  %v9620_v45 = vshll.u32 %v21168_v22, 16 }
 0x2d3   : > { %16349 = vmatpush3.bf16.msra.mxu0 %v11353_v58  ;;  %16216 = vmatprep.mubr.msk.bf16.mxu0 %vm1202_vm2, %v9498_v63  ;;  %v2800_v6 = vrot.slane %v21158_v55, 1  ;;  %v2799_v58 = vsel %vm2710_vm5, %v2796_v50, %v2798_v18 }
 0x2d4   : > { %v9560_v63 = vor.u32 %v9559_v37, %v9556_v51  ;;  %v9619_v37 = vrot.slane %v9617_v52, 2  ;;  %v9622_v55 = vrot.slane %v9620_v45, 3 }
 0x2d5   : > { %v2801_v10 = vsel %vm2710_vm5, %v2798_v18, %v2800_v6  ;;  %v2803_v40 = vsel %vm2710_vm5, %v2800_v6, %v2802_v44  ;;  %v21170_v18 = vld [vmem:[#allocation37_spill] sm:$0xff] }
 0x2d6   : > { %v9561_v0 = vsel %vm9463_vm6, %v9551_v12, %v9560_v63  ;;  %v21169_v12 = vld [vmem:[#allocation34_spill] sm:$0xff] }
 0x2d7   : > { %15595 = vmatmul.mubr.msk.bf16.gmra.mrb[72].mxu1 %vm1202_vm2, %v2787_v48  ;;  %v9572_v48 = vshrl.u32 %v21159_v62, 16  ;;  %v2810_v14 = vrot.slane %v21169_v12, 1  ;;  %v21172_v62 = vld [vmem:[#allocation36_spill] sm:$0xff] }
 0x2d8   : > { %15598 = vmatprep.mubr.msk.bf16.mxu1 %vm1202_vm2, %v2789_v16  ;;  %v9569_v16 = vor.u32 %v9568_v31, %v9565_v61  ;;  %v21171_v31 = vld [vmem:[#allocation35_spill] sm:$0xff]  ;;  %v9638_v7 = vshll.u32 %v21172_v62, 16 }
 0x2d9   : > { %v9574_v8 = vrot.slane %v9572_v48, 2  ;;  %v9635_v48 = vshrl.u32 %v21172_v62, 16 }
 0x2da   : > { %16217 = vmatmul.mubr.msk.bf16.gmra.mrb[4].mxu0 %vm1202_vm2, %v9507_v20  ;;  %v2804_v20 = vrot.slane %v21162_v19, 1  ;;  %v9570_v39 = vsel %vm9463_vm6, %v9560_v63, %v9569_v16  ;;  %v9629_v63 = vshll.u32 %v21171_v31, 16  ;;  %v9640_v19 = vrot.slane %v9638_v7, 3 }
 0x2db   : > { %16220 = vmatprep.mubr.msk.bf16.mxu0 %vm1202_vm2, %v9516_v2  ;;  %v9578_v2 = vor.u32 %v9577_v3, %v9574_v8  ;;  %v9637_v3 = vrot.slane %v9635_v48, 2 }
 0x2dc   : > { %v2805_v28 = vsel %vm2710_vm5, %v2802_v44, %v2804_v20  ;;  %v2807_v50 = vsel %vm2710_vm5, %v2804_v20, %v2806_v9  ;;  %v9631_v13 = vrot.slane %v9629_v63, 3  ;;  %v21174_v44 = vld [vmem:[#allocation39_spill] sm:$0xff] }
 0x2dd   : > { %v9579_v5 = vsel %vm9463_vm6, %v9569_v16, %v9578_v2  ;;  %v21173_v16 = vld [vmem:[#allocation38_spill] sm:$0xff] }
 0x2de   : > { %v2814_v29 = vrot.slane %v21173_v16, 1 }
 0x2df   : > { %15599 = vmatmul.mubr.msk.bf16.gmra.mrb[76].mxu1 %vm1202_vm2, %v2791_v36  ;;  %v9590_v36 = vshrl.u32 %v21163_v21, 16  ;;  %v17937_v21 = vld [vmem:[%s18297_s9 + $0xc8] sm:$0xff]  }
 0x2e0   : > { %15602 = vmatprep.mubr.msk.bf16.mxu1 %vm1202_vm2, %v2793_v11  ;;  %v9587_v11 = vor.u32 %v9586_v4, %v9583_v32  ;;  %v17936_v4 = vld [vmem:[%s18297_s9 + $0xc0] sm:$0xff]   ;;  %v9656_v43 = vshll.u32 %v17937_v21, 16 }
 0x2e1   : > { %v9592_v30 = vrot.slane %v9590_v36, 2  ;;  %v9653_v36 = vshrl.u32 %v17937_v21, 16 }
 0x2e2   : > { %16221 = vmatmul.mubr.msk.bf16.gmra.mrb[8].mxu0 %vm1202_vm2, %v9525_v59  ;;  %v2808_v59 = vrot.slane %v21166_v33, 1  ;;  %v9588_v38 = vsel %vm9463_vm6, %v9578_v2, %v9587_v11  ;;  %v9647_v2 = vshll.u32 %v17936_v4, 16  ;;  %v9658_v33 = vrot.slane %v9656_v43, 3 }
 0x2e3   : > { %16224 = vmatprep.mubr.msk.bf16.mxu0 %vm1202_vm2, %v9534_v53  ;;  %v9596_v53 = vor.u32 %v9595_v17, %v9592_v30  ;;  %v9655_v17 = vrot.slane %v9653_v36, 2 }
 0x2e4   : > { %v2809_v27 = vsel %vm2710_vm5, %v2806_v9, %v2808_v59  ;;  %v2811_v6 = vsel %vm2710_vm5, %v2808_v59, %v2810_v14  ;;  %v9649_v56 = vrot.slane %v9647_v2, 3  ;;  %v21175_v9 = vld [vmem:[#allocation40_spill] sm:$0xff] }
 0x2e5   : > { %v9597_v41 = vsel %vm9463_vm6, %v9587_v11, %v9596_v53  ;;  %v17938_v11 = vld [vmem:[%s18297_s9 + $0x1b0] sm:$0xff]  }
 0x2e6   : > { %v2818_v26 = vrot.slane %v17938_v11, 1 }
 0x2e7   : > { %15603 = vmatmul.mubr.msk.bf16.gmra.mrb[80].mxu1 %vm1202_vm2, %v2795_v15  ;;  %v9608_v15 = vshrl.u32 %v21167_v35, 16  ;;  %v17940_v35 = vld [vmem:[%s18297_s9 + $0xd8] sm:$0xff]  }
 0x2e8   : > { %15606 = vmatprep.mubr.msk.bf16.mxu1 %vm1202_vm2, %v2797_v34  ;;  %v9605_v34 = vor.u32 %v9604_v42, %v9601_v24  ;;  %v17939_v42 = vld [vmem:[%s18297_s9 + $0xd0] sm:$0xff]   ;;  %v9674_v60 = vshll.u32 %v17940_v35, 16 }
 0x2e9   : > { %v9610_v57 = vrot.slane %v9608_v15, 2  ;;  %v9671_v15 = vshrl.u32 %v17940_v35, 16 }
 0x2ea   : > { %16225 = vmatmul.mubr.msk.bf16.gmra.mrb[12].mxu0 %vm1202_vm2, %v9543_v54  ;;  %v2812_v54 = vrot.slane %v21170_v18, 1  ;;  %v9606_v51 = vsel %vm9463_vm6, %v9596_v53, %v9605_v34  ;;  %v9665_v53 = vshll.u32 %v17939_v42, 16  ;;  %v9676_v18 = vrot.slane %v9674_v60, 3 }
 0x2eb   : > { %16228 = vmatprep.mubr.msk.bf16.mxu0 %vm1202_vm2, %v9552_v47  ;;  %v9614_v47 = vor.u32 %v9613_v25, %v9610_v57  ;;  %v9673_v25 = vrot.slane %v9671_v15, 2 }
 0x2ec   : > { %v2813_v61 = vsel %vm2710_vm5, %v2810_v14, %v2812_v54  ;;  %v2815_v20 = vsel %vm2710_vm5, %v2812_v54, %v2814_v29  ;;  %v9667_v12 = vrot.slane %v9665_v53, 3  ;;  %v17942_v14 = vld [vmem:[%s18297_s9 + $0x1c8] sm:$0xff]  }
 0x2ed   : > { %v9615_v49 = vsel %vm9463_vm6, %v9605_v34, %v9614_v47  ;;  %v17941_v34 = vld [vmem:[%s18297_s9 + $0x1c0] sm:$0xff]  }
 0x2ee   : > { %v2822_v22 = vrot.slane %v17941_v34, 1 }
 0x2ef   : > { %15607 = vmatmul.mubr.msk.bf16.gmra.mrb[84].mxu1 %vm1202_vm2, %v2799_v58  ;;  %v9626_v58 = vshrl.u32 %v21171_v31, 16  ;;  %v17944_v31 = vld [vmem:[%s18297_s9 + $0xe8] sm:$0xff]  }
 0x2f0   : > { %15610 = vmatprep.mubr.msk.bf16.mxu1 %vm1202_vm2, %v2801_v10  ;;  %v9623_v10 = vor.u32 %v9622_v55, %v9619_v37  ;;  %v17943_v55 = vld [vmem:[%s18297_s9 + $0xe0] sm:$0xff]   ;;  %v9692_v63 = vshll.u32 %v17944_v31, 16 }
 0x2f1   : > { %v9628_v1 = vrot.slane %v9626_v58, 2  ;;  %v9689_v58 = vshrl.u32 %v17944_v31, 16 }
 0x2f2   : > { %16229 = vmatmul.mubr.msk.bf16.gmra.mrb[16].mxu0 %vm1202_vm2, %v9561_v0  ;;  %v2816_v0 = vrot.slane %v21174_v44, 1  ;;  %v9624_v8 = vsel %vm9463_vm6, %v9614_v47, %v9623_v10  ;;  %v9683_v47 = vshll.u32 %v17943_v55, 16  ;;  %v9694_v44 = vrot.slane %v9692_v63, 3 }
 0x2f3   : > { %16232 = vmatprep.mubr.msk.bf16.mxu0 %vm1202_vm2, %v9570_v39  ;;  %v9632_v39 = vor.u32 %v9631_v13, %v9628_v1  ;;  %v9691_v13 = vrot.slane %v9689_v58, 2 }
 0x2f4   : > { %v2817_v32 = vsel %vm2710_vm5, %v2814_v29, %v2816_v0  ;;  %v2819_v59 = vsel %vm2710_vm5, %v2816_v0, %v2818_v26  ;;  %v9685_v16 = vrot.slane %v9683_v47, 3  ;;  %v17946_v29 = vld [vmem:[%s18297_s9 + $0x1d8] sm:$0xff]  }
 0x2f5   : > { %v9633_v46 = vsel %vm9463_vm6, %v9623_v10, %v9632_v39  ;;  %v17945_v10 = vld [vmem:[%s18297_s9 + $0x1d0] sm:$0xff]  }
 0x2f6   : > { %v2826_v62 = vrot.slane %v17945_v10, 1 }
 0x2f7   : > { %15611 = vmatmul.mubr.msk.bf16.gmra.mrb[88].mxu1 %vm1202_vm2, %v2803_v40  ;;  %v9644_v40 = vshrl.u32 %v17936_v4, 16  ;;  %v17948_v4 = vld [vmem:[%s18297_s9 + $0xf8] sm:$0xff]  }
 0x2f8   : > { %15614 = vmatprep.mubr.msk.bf16.mxu1 %vm1202_vm2, %v2805_v28  ;;  %v9641_v28 = vor.u32 %v9640_v19, %v9637_v3  ;;  %v17947_v19 = vld [vmem:[%s18297_s9 + $0xf0] sm:$0xff]   ;;  %v9710_v2 = vshll.u32 %v17948_v4, 16 }
 0x2f9   : > { %v9646_v23 = vrot.slane %v9644_v40, 2  ;;  %v9707_v40 = vshrl.u32 %v17948_v4, 16 }
 0x2fa   : > { %16233 = vmatmul.mubr.msk.bf16.gmra.mrb[20].mxu0 %vm1202_vm2, %v9579_v5  ;;  %v2820_v5 = vrot.slane %v21175_v9, 1  ;;  %v9642_v30 = vsel %vm9463_vm6, %v9632_v39, %v9641_v28  ;;  %v9701_v39 = vshll.u32 %v17947_v19, 16  ;;  %v9712_v9 = vrot.slane %v9710_v2, 3 }
 0x2fb   : > { %16236 = vmatprep.mubr.msk.bf16.mxu0 %vm1202_vm2, %v9588_v38  ;;  %v9650_v38 = vor.u32 %v9649_v56, %v9646_v23  ;;  %v9709_v56 = vrot.slane %v9707_v40, 2 }
 0x2fc   : > { %v2821_v24 = vsel %vm2710_vm5, %v2818_v26, %v2820_v5  ;;  %v2823_v54 = vsel %vm2710_vm5, %v2820_v5, %v2822_v22  ;;  %v9703_v11 = vrot.slane %v9701_v39, 3  ;;  %v17950_v26 = vld [vmem:[%s18297_s9 + $0x1e8] sm:$0xff]  }
 0x2fd   : > { %v9651_v52 = vsel %vm9463_vm6, %v9641_v28, %v9650_v38  ;;  %v17949_v28 = vld [vmem:[%s18297_s9 + $0x1e0] sm:$0xff]  }
 0x2fe   : > { %v2830_v21 = vrot.slane %v17949_v28, 1 }
 0x2ff   : > { %15615 = vmatmul.mubr.msk.bf16.gmra.mrb[92].mxu1 %vm1202_vm2, %v2807_v50  ;;  %v9662_v50 = vshrl.u32 %v17939_v42, 16  ;;  %v17952_v42 = vld [vmem:[%s18297_s9 + $0x108] sm:$0xff]  }
 0x300   : > { %15618 = vmatprep.mubr.msk.bf16.mxu1 %vm1202_vm2, %v2809_v27  ;;  %v9659_v27 = vor.u32 %v9658_v33, %v9655_v17  ;;  %v17951_v33 = vld [vmem:[%s18297_s9 + $0x100] sm:$0xff]   ;;  %v9728_v53 = vshll.u32 %v17952_v42, 16 }
 0x301   : > { %v9664_v45 = vrot.slane %v9662_v50, 2  ;;  %v9725_v50 = vshrl.u32 %v17952_v42, 16  ;;  %v17965_v42 = vld [vmem:[%s18297_s9 + $0x220] ss:$0 sps:$4 sm:$0x11]  }
 0x302   : > { %16237 = vmatmul.mubr.msk.bf16.gmra.mrb[24].mxu0 %vm1202_vm2, %v9597_v41  ;;  %v2824_v41 = vrot.slane %v17942_v14, 1  ;;  %v9660_v57 = vsel %vm9463_vm6, %v9650_v38, %v9659_v27  ;;  %v9719_v38 = vshll.u32 %v17951_v33, 16  ;;  %v9730_v14 = vrot.slane %v9728_v53, 3 }
 0x303   : > { %16240 = vmatprep.mubr.msk.bf16.mxu0 %vm1202_vm2, %v9606_v51  ;;  %v9668_v51 = vor.u32 %v9667_v12, %v9664_v45  ;;  %v9727_v12 = vrot.slane %v9725_v50, 2  ;;  %v2846_v50 = vrot.slane %v17965_v42, 1 }
 0x304   : > { %v2825_v37 = vsel %vm2710_vm5, %v2822_v22, %v2824_v41  ;;  %v2827_v0 = vsel %vm2710_vm5, %v2824_v41, %v2826_v62  ;;  %v9721_v34 = vrot.slane %v9719_v38, 3  ;;  %v17954_v22 = vld [vmem:[%s18297_s9 + $0x1f8] sm:$0xff]  }
 0x305   : > { %v9669_v48 = vsel %vm9463_vm6, %v9659_v27, %v9668_v51  ;;  %v17953_v27 = vld [vmem:[%s18297_s9 + $0x1f0] sm:$0xff]  }
 0x306   : > { %v2834_v35 = vrot.slane %v17953_v27, 1 }
 0x307   : > { %15619 = vmatmul.mubr.msk.bf16.gmra.mrb[96].mxu1 %vm1202_vm2, %v2811_v6  ;;  %v9680_v6 = vshrl.u32 %v17943_v55, 16  ;;  %v17956_v55 = vld [vmem:[%s18297_s9 + $0x118] sm:$0xff]  }
 0x308   : > { %15622 = vmatprep.mubr.msk.bf16.mxu1 %vm1202_vm2, %v2813_v61  ;;  %v9677_v61 = vor.u32 %v9676_v18, %v9673_v25  ;;  %v17955_v18 = vld [vmem:[%s18297_s9 + $0x110] sm:$0xff]   ;;  %v9746_v47 = vshll.u32 %v17956_v55, 16 }
 0x309   : > { %v9682_v7 = vrot.slane %v9680_v6, 2  ;;  %v9743_v6 = vshrl.u32 %v17956_v55, 16 }
 0x30a   : > { %16241 = vmatmul.mubr.msk.bf16.gmra.mrb[28].mxu0 %vm1202_vm2, %v9615_v49  ;;  %v2828_v49 = vrot.slane %v17946_v29, 1  ;;  %v9678_v1 = vsel %vm9463_vm6, %v9668_v51, %v9677_v61  ;;  %v9737_v51 = vshll.u32 %v17955_v18, 16  ;;  %v9748_v29 = vrot.slane %v9746_v47, 3 }
 0x30b   : > { %16244 = vmatprep.mubr.msk.bf16.mxu0 %vm1202_vm2, %v9624_v8  ;;  %v9686_v8 = vor.u32 %v9685_v16, %v9682_v7  ;;  %v9745_v16 = vrot.slane %v9743_v6, 2  ;;  %v17969_v6 = vld [vmem:[%s18297_s9 + $0x20] sm:$0xff]  }
 0x30c   : > { %v2829_v3 = vsel %vm2710_vm5, %v2826_v62, %v2828_v49  ;;  %v2831_v5 = vsel %vm2710_vm5, %v2828_v49, %v2830_v21  ;;  %v9739_v10 = vrot.slane %v9737_v51, 3  ;;  %v17958_v62 = vld [vmem:[%s18297_s9 + $0x208] sm:$0xff]   ;;  %v4253_v47 = vrot.slane %v17969_v6, 1 }
 0x30d   : > { %v9687_v36 = vsel %vm9463_vm6, %v9677_v61, %v9686_v8  ;;  %v17957_v61 = vld [vmem:[%s18297_s9 + $0x200] sm:$0xff]   ;;  %v17968_v51 = vld [vmem:[%s18297_s9 + $0x148] sm:$0xff]  }
 0x30e   : > { %v2838_v31 = vrot.slane %v17957_v61, 1  ;;  %v9800_v55 = vshll.u32 %v17968_v51, 16 }
 0x30f   : > { %15623 = vmatmul.mubr.msk.bf16.gmra.mrb[100].mxu1 %vm1202_vm2, %v2815_v20  ;;  %v9698_v20 = vshrl.u32 %v17947_v19, 16  ;;  %v17960_v19 = vld [vmem:[%s18297_s9 + $0x128] sm:$0xff]  }
 0x310   : > { %15626 = vmatprep.mubr.msk.bf16.mxu1 %vm1202_vm2, %v2817_v32  ;;  %v9695_v32 = vor.u32 %v9694_v44, %v9691_v13  ;;  %v9764_v39 = vshll.u32 %v17960_v19, 16 }
 0x311   : > { %v9700_v43 = vrot.slane %v9698_v20, 2  ;;  %v9761_v20 = vshrl.u32 %v17960_v19, 16 }
 0x312   : > { %16245 = vmatmul.mubr.msk.bf16.gmra.mrb[32].mxu0 %vm1202_vm2, %v9633_v46  ;;  %v2832_v46 = vrot.slane %v17950_v26, 1  ;;  %v9696_v23 = vsel %vm9463_vm6, %v9686_v8, %v9695_v32  ;;  %v9766_v26 = vrot.slane %v9764_v39, 3  ;;  %v17973_v39 = vld [vmem:[%s18297_s9 + $0x30] sm:$0xff]  }
 0x313   : > { %16248 = vmatprep.mubr.msk.bf16.mxu0 %vm1202_vm2, %v9642_v30  ;;  %v9704_v30 = vor.u32 %v9703_v11, %v9700_v43  ;;  %v9763_v11 = vrot.slane %v9761_v20, 2  ;;  %v21177_v20 = vld [vmem:[#allocation5_spill] sm:$0xff] }
 0x314   : > { %v2833_v17 = vsel %vm2710_vm5, %v2830_v21, %v2832_v46  ;;  %v2835_v41 = vsel %vm2710_vm5, %v2832_v46, %v2834_v35  ;;  %v17962_v21 = vld [vmem:[%s18297_s9 + $0x218] sm:$0xff]  }
 0x315   : > { %v9705_v15 = vsel %vm9463_vm6, %v9695_v32, %v9704_v30  ;;  %v17961_v32 = vld [vmem:[%s18297_s9 + $0x210] sm:$0xff]  }
 0x316   : > { %v2842_v4 = vrot.slane %v17961_v32, 1  ;;  %v4257_v32 = vrot.slane %v17973_v39, 1 }
 0x317   : > { %15627 = vmatmul.mubr.msk.bf16.gmra.mrb[104].mxu1 %vm1202_vm2, %v2819_v59  ;;  %v9716_v59 = vshrl.u32 %v17951_v33, 16  ;;  %v17964_v33 = vld [vmem:[%s18297_s9 + $0x138] sm:$0xff]  }
 0x318   : > { %15630 = vmatprep.mubr.msk.bf16.mxu1 %vm1202_vm2, %v2821_v24  ;;  %v9713_v24 = vor.u32 %v9712_v9, %v9709_v56  ;;  %v17963_v9 = vld [vmem:[%s18297_s9 + $0x130] sm:$0xff]   ;;  %v9782_v38 = vshll.u32 %v17964_v33, 16 }
 0x319   : > { %v9718_v60 = vrot.slane %v9716_v59, 2  ;;  %v9779_v59 = vshrl.u32 %v17964_v33, 16 }
 0x31a   : > { %16249 = vmatmul.mubr.msk.bf16.gmra.mrb[36].mxu0 %vm1202_vm2, %v9651_v52  ;;  %v2836_v52 = vrot.slane %v17954_v22, 1  ;;  %v9714_v45 = vsel %vm9463_vm6, %v9704_v30, %v9713_v24  ;;  %v9773_v30 = vshll.u32 %v17963_v9, 16 }
 0x31b   : > { %16252 = vmatprep.mubr.msk.bf16.mxu0 %vm1202_vm2, %v9660_v57  ;;  %v9722_v57 = vor.u32 %v9721_v34, %v9718_v60  ;;  %v17966_v60 = vld [vmem:[%s18297_s9 + $0x18] sm:$0xff]  }
 0x31c   : > { %v2837_v25 = vsel %vm2710_vm5, %v2834_v35, %v2836_v52  ;;  %v2839_v49 = vsel %vm2710_vm5, %v2836_v52, %v2838_v31  ;;  %v9775_v27 = vrot.slane %v9773_v30, 3  ;;  %v21176_v35 = vld [vmem:[#allocation6_spill] sm:$0xff]  ;;  %v4251_v34 = vrot.slane %v17966_v60, 1 }
 0x31d   : > { %v9723_v58 = vsel %vm9463_vm6, %v9713_v24, %v9722_v57  ;;  %v9781_v52 = vrot.slane %v9779_v59, 2 }
 0x31f   : > { %15631 = vmatmul.mubr.msk.bf16.gmra.mrb[108].mxu1 %vm1202_vm2, %v2823_v54  ;;  %v9734_v54 = vshrl.u32 %v17955_v18, 16 }
 0x320   : > { %15634 = vmatprep.mubr.msk.bf16.mxu1 %vm1202_vm2, %v2825_v37  ;;  %v9731_v37 = vor.u32 %v9730_v14, %v9727_v12 }
 0x321   : > { %v9736_v63 = vrot.slane %v9734_v54, 2 }
 0x322   : > { %16253 = vmatmul.mubr.msk.bf16.gmra.mrb[40].mxu0 %vm1202_vm2, %v9669_v48  ;;  %v2840_v48 = vrot.slane %v17958_v62, 1  ;;  %v9732_v7 = vsel %vm9463_vm6, %v9722_v57, %v9731_v37  ;;  %v17967_v57 = vld [vmem:[%s18297_s9 + $0x140] sm:$0xff]  }
 0x323   : > { %16256 = vmatprep.mubr.msk.bf16.mxu0 %vm1202_vm2, %v9678_v1  ;;  %v17959_v1 = vld [vmem:[%s18297_s9 + $0x120] sm:$0xff]   ;;  %v9791_v18 = vshll.u32 %v17967_v57, 16 }
 0x324   : > { %v9752_v13 = vshrl.u32 %v17959_v1, 16  ;;  %v9755_v44 = vshll.u32 %v17959_v1, 16  ;;  %v2841_v8 = vsel %vm2710_vm5, %v2838_v31, %v2840_v48  ;;  %v2843_v46 = vsel %vm2710_vm5, %v2840_v48, %v2842_v4  ;;  %v17971_v1 = vld [vmem:[%s18297_s9 + $0x150] sm:$0xff]  }
 0x326   : > { %v9754_v40 = vrot.slane %v9752_v13, 2  ;;  %v9757_v2 = vrot.slane %v9755_v44, 3  ;;  %v9806_v13 = vshrl.u32 %v17971_v1, 16  ;;  %v9809_v44 = vshll.u32 %v17971_v1, 16 }
 0x327   : > { %15635 = vmatmul.mubr.msk.bf16.gmra.mrb[112].mxu1 %vm1202_vm2, %v2827_v0  ;;  %v9740_v0 = vor.u32 %v9739_v10, %v9736_v63  ;;  %v17970_v63 = vld [vmem:[%s18297_s9 + $0x28] sm:$0xff]  }
 0x328   : > { %15638 = vmatprep.mubr.msk.bf16.mxu1 %vm1202_vm2, %v2829_v3  ;;  %v9749_v3 = vor.u32 %v9748_v29, %v9745_v16  ;;  %v4255_v10 = vrot.slane %v17970_v63, 1  ;;  %v4254_v16 = vsel %vm2710_vm5, %v4251_v34, %v4253_v47 }
 0x329   : > { %v9741_v28 = vsel %vm9463_vm6, %v9731_v37, %v9740_v0  ;;  %v9797_v37 = vshrl.u32 %v17968_v51, 16  ;;  %v17981_v51 = vld [vmem:[%s18297_s9 + $0x50] sm:$0xff]  }
 0x32a   : > { %16257 = vmatmul.mubr.msk.bf16.gmra.mrb[44].mxu0 %vm1202_vm2, %v9687_v36  ;;  %v2844_v36 = vrot.slane %v17962_v21, 1  ;;  %v9750_v43 = vsel %vm9463_vm6, %v9740_v0, %v9749_v3 }
 0x32b   : > { %16260 = vmatprep.mubr.msk.bf16.mxu0 %vm1202_vm2, %v9696_v23  ;;  %v9758_v23 = vor.u32 %v9757_v2, %v9754_v40  ;;  %v9799_v48 = vrot.slane %v9797_v37, 2  ;;  %v9808_v40 = vrot.slane %v9806_v13, 2  ;;  %v9811_v2 = vrot.slane %v9809_v44, 3  ;;  %v17984_v13 = vld [vmem:[%s18297_s9 + $0x188] sm:$0xff]  }
 0x32c   : > { %v2845_v56 = vsel %vm2710_vm5, %v2842_v4, %v2844_v36  ;;  %v2847_v12 = vsel %vm2710_vm5, %v2844_v36, %v2846_v50  ;;  %v4265_v37 = vrot.slane %v17981_v51, 1  ;;  %v9869_v44 = vshrl.u32 %v17984_v13, 16 }
 0x32d   : > { %v9759_v24 = vsel %vm9463_vm6, %v9749_v3, %v9758_v23 }
 0x32f   : > { %15639 = vmatmul.mubr.msk.bf16.gmra.mrb[116].mxu1 %vm1202_vm2, %v2831_v5  ;;  %v9770_v5 = vshrl.u32 %v17963_v9, 16 }
 0x330   : > { %15642 = vmatprep.mubr.msk.bf16.mxu1 %vm1202_vm2, %v2833_v17  ;;  %v9767_v17 = vor.u32 %v9766_v26, %v9763_v11  ;;  %v4258_v26 = vsel %vm2710_vm5, %v4255_v10, %v4257_v32 }
 0x331   : > { %v9772_v53 = vrot.slane %v9770_v5, 2 }
 0x332   : > { %16261 = vmatmul.mubr.msk.bf16.gmra.mrb[48].mxu0 %vm1202_vm2, %v9705_v15  ;;  %v4250_v15 = vrot.slane %v21176_v35, 1  ;;  %v9768_v22 = vsel %vm9463_vm6, %v9758_v23, %v9767_v17 }
 0x333   : > { %16264 = vmatprep.mubr.msk.bf16.mxu0 %vm1202_vm2, %v9714_v45  ;;  %v9784_v45 = vrot.slane %v9782_v38, 3  ;;  %v9776_v14 = vor.u32 %v9775_v27, %v9772_v53  ;;  %v17977_v38 = vld [vmem:[%s18297_s9 + $0x40] sm:$0xff]   ;;  %v17978_v27 = vld [vmem:[%s18297_s9 + $0x48] sm:$0xff]  }
 0x334   : > { %v4263_v35 = vrot.slane %v17978_v27, 1 }
 0x335   : > { %v9785_v54 = vor.u32 %v9784_v45, %v9781_v52  ;;  %v9777_v61 = vsel %vm9463_vm6, %v9767_v17, %v9776_v14  ;;  %v17976_v17 = vld [vmem:[%s18297_s9 + $0x168] sm:$0xff]  }
 0x336   : > { %v9833_v33 = vshrl.u32 %v17976_v17, 16  ;;  %v9836_v59 = vshll.u32 %v17976_v17, 16 }
 0x337   : > { %15643 = vmatmul.mubr.msk.bf16.gmra.mrb[120].mxu1 %vm1202_vm2, %v2835_v41  ;;  %v4252_v41 = vsel %vm2710_vm5, %v4250_v15, %v4251_v34  ;;  %v9786_v62 = vsel %vm9463_vm6, %v9776_v14, %v9785_v54 }
 0x338   : > { %15646 = vmatprep.mubr.msk.bf16.mxu1 %vm1202_vm2, %v2837_v25  ;;  %v9788_v25 = vshrl.u32 %v17967_v57, 16  ;;  %v9835_v60 = vrot.slane %v9833_v33, 2  ;;  %v9838_v34 = vrot.slane %v9836_v59, 3 }
 0x33a   : > { %16265 = vmatmul.mubr.msk.bf16.gmra.mrb[52].mxu0 %vm1202_vm2, %v9723_v58  ;;  %v9790_v31 = vrot.slane %v9788_v25, 2  ;;  %v9793_v58 = vrot.slane %v9791_v18, 3  ;;  %v9839_v57 = vor.u32 %v9838_v34, %v9835_v60  ;;  %v17980_v25 = vld [vmem:[%s18297_s9 + $0x178] sm:$0xff]   ;;  %v17991_v34 = vld [vmem:[%s18297_s9 + $0x1a0] sm:$0xff]  }
 0x33b   : > { %16268 = vmatprep.mubr.msk.bf16.mxu0 %vm1202_vm2, %v9732_v7  ;;  %v9802_v7 = vrot.slane %v9800_v55, 3  ;;  %v9851_v18 = vshrl.u32 %v17980_v25, 16 }
 0x33c   : > { %v9794_v29 = vor.u32 %v9793_v58, %v9790_v31 }
 0x33d   : > { %v9803_v0 = vor.u32 %v9802_v7, %v9799_v48  ;;  %v9853_v63 = vrot.slane %v9851_v18, 2 }
 0x33e   : > { %v9795_v4 = vsel %vm9463_vm6, %v9785_v54, %v9794_v29  ;;  %v9854_v54 = vshll.u32 %v17980_v25, 16 }
 0x33f   : > { %15647 = vmatmul.mubr.msk.bf16.gmra.mrb[124].mxu1 %vm1202_vm2, %v2839_v49  ;;  %v4256_v49 = vsel %vm2710_vm5, %v4253_v47, %v4255_v10  ;;  %v9804_v36 = vsel %vm9463_vm6, %v9794_v29, %v9803_v0 }
 0x340   : > { %15650 = vmatprep.mubr.msk.bf16.mxu1 %vm1202_vm2, %v2841_v8  ;;  %v17972_v8 = vld [vmem:[%s18297_s9 + $0x158] sm:$0xff]   ;;  %v9856_v10 = vrot.slane %v9854_v54, 3 }
 0x341   : > { %v9815_v3 = vshrl.u32 %v17972_v8, 16  ;;  %v9818_v19 = vshll.u32 %v17972_v8, 16  ;;  %v17985_v8 = vld [vmem:[%s18297_s9 + $0x60] sm:$0xff]  }
 0x342   : > { %16269 = vmatmul.mubr.msk.bf16.gmra.mrb[56].mxu0 %vm1202_vm2, %v9741_v28  ;;  %v17974_v28 = vld [vmem:[%s18297_s9 + $0x38] sm:$0xff]   ;;  %v9857_v1 = vor.u32 %v9856_v10, %v9853_v63  ;;  %v17995_v10 = vld [vmem:[%s18297_s9 + $0x1b0] sm:$0xff]  }
 0x343   : > { %16272 = vmatprep.mubr.msk.bf16.mxu0 %vm1202_vm2, %v9750_v43  ;;  %v4259_v21 = vrot.slane %v17974_v28, 1  ;;  %v9817_v43 = vrot.slane %v9815_v3, 2  ;;  %v9820_v11 = vrot.slane %v9818_v19, 3  ;;  %v4269_v3 = vrot.slane %v17985_v8, 1 }
 0x345   : > { %v4260_v23 = vsel %vm2710_vm5, %v4257_v32, %v4259_v21  ;;  %v9821_v30 = vor.u32 %v9820_v11, %v9817_v43  ;;  %v17986_v32 = vld [vmem:[%s18297_s9 + $0x68] sm:$0xff]   ;;  %v17987_v11 = vld [vmem:[%s18297_s9 + $0x190] sm:$0xff]  }
 0x347   : > { %15651 = vmatmul.mubr.msk.bf16.gmra.mrb[128].mxu1 %vm1202_vm2, %v2843_v46  ;;  %v9812_v46 = vor.u32 %v9811_v2, %v9808_v40  ;;  %v9871_v2 = vrot.slane %v9869_v44, 2 }
 0x348   : > { %15654 = vmatprep.mubr.msk.bf16.mxu1 %vm1202_vm2, %v2845_v56  ;;  %v17975_v56 = vld [vmem:[%s18297_s9 + $0x160] sm:$0xff]  }
 0x349   : > { %v9824_v9 = vshrl.u32 %v17975_v56, 16  ;;  %v9827_v5 = vshll.u32 %v17975_v56, 16  ;;  %v9813_v42 = vsel %vm9463_vm6, %v9803_v0, %v9812_v46  ;;  %v9822_v15 = vsel %vm9463_vm6, %v9812_v46, %v9821_v30  ;;  %v17988_v56 = vld [vmem:[%s18297_s9 + $0x198] sm:$0xff]  }
 0x34a   : > { %16273 = vmatmul.mubr.msk.bf16.gmra.mrb[60].mxu0 %vm1202_vm2, %v9759_v24  ;;  %v4261_v24 = vrot.slane %v17977_v38, 1  ;;  %v9872_v0 = vshll.u32 %v17984_v13, 16  ;;  %v9881_v46 = vshll.u32 %v17987_v11, 16 }
 0x34b   : > { %16276 = vmatprep.mubr.msk.bf16.mxu0 %vm1202_vm2, %v9768_v22  ;;  %v9826_v50 = vrot.slane %v9824_v9, 2  ;;  %v9829_v53 = vrot.slane %v9827_v5, 3  ;;  %v9887_v9 = vshrl.u32 %v17988_v56, 16  ;;  %v9890_v5 = vshll.u32 %v17988_v56, 16 }
 0x34c   : > { %v4262_v22 = vsel %vm2710_vm5, %v4259_v21, %v4261_v24  ;;  %v4264_v45 = vsel %vm2710_vm5, %v4261_v24, %v4263_v35  ;;  %v9874_v28 = vrot.slane %v9872_v0, 3  ;;  %v9883_v38 = vrot.slane %v9881_v46, 3  ;;  %v17990_v24 = vld [vmem:[%s18297_s9 + $0x78] sm:$0xff]  }
 0x34d   : > { %v9830_v52 = vor.u32 %v9829_v53, %v9826_v50  ;;  %v9889_v53 = vrot.slane %v9887_v9, 2  ;;  %v9892_v27 = vrot.slane %v9890_v5, 3 }
 0x34f   : > { %15655 = vmatmul.mubr.msk.bf16.gmra.mrb[132].mxu1 %vm1202_vm2, %v2847_v12  ;;  %v17979_v12 = vld [vmem:[%s18297_s9 + $0x170] sm:$0xff]   ;;  %v9831_v55 = vsel %vm9463_vm6, %v9821_v30, %v9830_v52  ;;  %v9840_v58 = vsel %vm9463_vm6, %v9830_v52, %v9839_v57  ;;  %v9899_v52 = vshll.u32 %v17991_v34, 16 }
 0x350   : > { %15660 = vmatprep.mubr.msk.bf16.mxu1 %vm1202_vm2, %v4252_v41  ;;  %v9842_v14 = vshrl.u32 %v17979_v12, 16  ;;  %v9845_v41 = vshll.u32 %v17979_v12, 16  ;;  %v17989_v30 = vld [vmem:[%s18297_s9 + $0x70] sm:$0xff]   ;;  %v17992_v12 = vld [vmem:[%s18297_s9 + $0x1a8] sm:$0xff]  }
 0x351   : > { %v4273_v17 = vrot.slane %v17989_v30, 1  ;;  %v9901_v51 = vrot.slane %v9899_v52, 3 }
 0x352   : > { %16277 = vmatmul.mubr.msk.bf16.gmra.mrb[64].mxu0 %vm1202_vm2, %v9777_v61  ;;  %v9844_v6 = vrot.slane %v9842_v14, 2  ;;  %v9847_v47 = vrot.slane %v9845_v41, 3  ;;  %v17982_v61 = vld [vmem:[%s18297_s9 + $0x58] sm:$0xff]   ;;  %v9905_v14 = vshrl.u32 %v17992_v12, 16  ;;  %v9908_v41 = vshll.u32 %v17992_v12, 16 }
 0x353   : > { %16280 = vmatprep.mubr.msk.bf16.mxu0 %vm1202_vm2, %v9786_v62  ;;  %v4267_v31 = vrot.slane %v17982_v61, 1  ;;  %v4266_v62 = vsel %vm2710_vm5, %v4263_v35, %v4265_v37 }
 0x354   : > { %v9848_v48 = vor.u32 %v9847_v47, %v9844_v6  ;;  %v9907_v47 = vrot.slane %v9905_v14, 2  ;;  %v9910_v61 = vrot.slane %v9908_v41, 3 }
 0x355   : > { %v4268_v7 = vsel %vm2710_vm5, %v4265_v37, %v4267_v31  ;;  %v4270_v21 = vsel %vm2710_vm5, %v4267_v31, %v4269_v3  ;;  %v17994_v37 = vld [vmem:[%s18297_s9 + $0x88] sm:$0xff]  }
 0x356   : > { %v9849_v19 = vsel %vm9463_vm6, %v9839_v57, %v9848_v48  ;;  %v9858_v40 = vsel %vm9463_vm6, %v9848_v48, %v9857_v1  ;;  %v17993_v57 = vld [vmem:[%s18297_s9 + $0x80] sm:$0xff]   ;;  %v9917_v48 = vshll.u32 %v17995_v10, 16 }
 0x357   : > { %15661 = vmatmul.mubr.msk.bf16.vlgmr.msra.gmra.mrb[0].mxu1 %vm1202_vm2, %v4254_v16  ;;  %v17983_v16 = vld [vmem:[%s18297_s9 + $0x180] sm:$0xff]   ;;  %v4277_v25 = vrot.slane %v17993_v57, 1 }
 0x358   : > { %16487 = vmatpush3.bf16.msra.mxu1 %v21177_v20  ;;  %15664 = vmatprep.mubr.msk.bf16.mxu1 %vm1202_vm2, %v4256_v49  ;;  %v9860_v29 = vshrl.u32 %v17983_v16, 16  ;;  %v9863_v49 = vshll.u32 %v17983_v16, 16  ;;  %v17996_v16 = vld [vmem:[%s18297_s9 + $0x1b8] sm:$0xff]   ;;  %v9919_v8 = vrot.slane %v9917_v48, 3 }
 0x35a   : > { %16281 = vmatmul.mubr.msk.bf16.gmra.mrb[68].mxu0 %vm1202_vm2, %v9795_v4  ;;  %v9862_v20 = vrot.slane %v9860_v29, 2  ;;  %v9865_v39 = vrot.slane %v9863_v49, 3  ;;  %v4271_v4 = vrot.slane %v17986_v32, 1  ;;  %v9923_v29 = vshrl.u32 %v17996_v16, 16 }
 0x35b   : > { %16284 = vmatprep.mubr.msk.bf16.mxu0 %vm1202_vm2, %v9804_v36  ;;  %v9926_v49 = vshll.u32 %v17996_v16, 16 }
 0x35c   : > { %v9866_v36 = vor.u32 %v9865_v39, %v9862_v20  ;;  %v4272_v43 = vsel %vm2710_vm5, %v4269_v3, %v4271_v4  ;;  %v4274_v35 = vsel %vm2710_vm5, %v4271_v4, %v4273_v17  ;;  %v17998_v3 = vld [vmem:[%s18297_s9 + $0x98] sm:$0xff]   ;;  %v9925_v39 = vrot.slane %v9923_v29, 2 }
 0x35d   : > { %v9928_v32 = vrot.slane %v9926_v49, 3 }
 0x35e   : > { %v9867_v33 = vsel %vm9463_vm6, %v9857_v1, %v9866_v36  ;;  %v17997_v1 = vld [vmem:[%s18297_s9 + $0x90] sm:$0xff]  }
 0x35f   : > { %15665 = vmatmul.mubr.msk.bf16.gmra.mrb[4].mxu1 %vm1202_vm2, %v4258_v26  ;;  %v9878_v26 = vshrl.u32 %v17987_v11, 16  ;;  %v4281_v13 = vrot.slane %v17997_v1, 1  ;;  %v18000_v11 = vld [vmem:[%s18297_s9 + $0x1c8] sm:$0xff]  }
 0x360   : > { %15668 = vmatprep.mubr.msk.bf16.mxu1 %vm1202_vm2, %v4260_v23  ;;  %v9875_v23 = vor.u32 %v9874_v28, %v9871_v2  ;;  %v17999_v28 = vld [vmem:[%s18297_s9 + $0x1c0] sm:$0xff]   ;;  %v9944_v46 = vshll.u32 %v18000_v11, 16 }
 0x361   : > { %v9880_v59 = vrot.slane %v9878_v26, 2  ;;  %v9941_v26 = vshrl.u32 %v18000_v11, 16 }
 0x362   : > { %16285 = vmatmul.mubr.msk.bf16.gmra.mrb[72].mxu0 %vm1202_vm2, %v9813_v42  ;;  %v4275_v42 = vrot.slane %v17990_v24, 1  ;;  %v9876_v50 = vsel %vm9463_vm6, %v9866_v36, %v9875_v23  ;;  %v9935_v36 = vshll.u32 %v17999_v28, 16  ;;  %v9946_v24 = vrot.slane %v9944_v46, 3 }
 0x363   : > { %16288 = vmatprep.mubr.msk.bf16.mxu0 %vm1202_vm2, %v9822_v15  ;;  %v9884_v15 = vor.u32 %v9883_v38, %v9880_v59  ;;  %v9943_v38 = vrot.slane %v9941_v26, 2 }
 0x364   : > { %v4276_v60 = vsel %vm2710_vm5, %v4273_v17, %v4275_v42  ;;  %v4278_v31 = vsel %vm2710_vm5, %v4275_v42, %v4277_v25  ;;  %v9937_v30 = vrot.slane %v9935_v36, 3  ;;  %v18002_v17 = vld [vmem:[%s18297_s9 + $0xa8] sm:$0xff]  }
 0x365   : > { %v9885_v18 = vsel %vm9463_vm6, %v9875_v23, %v9884_v15  ;;  %v18001_v23 = vld [vmem:[%s18297_s9 + $0xa0] sm:$0xff]  }
 0x366   : > { %v4285_v56 = vrot.slane %v18001_v23, 1 }
 0x367   : > { %15669 = vmatmul.mubr.msk.bf16.gmra.mrb[8].mxu1 %vm1202_vm2, %v4262_v22  ;;  %v9896_v22 = vshrl.u32 %v17991_v34, 16  ;;  %v18004_v34 = vld [vmem:[%s18297_s9 + $0x1d8] sm:$0xff]  }
 0x368   : > { %15672 = vmatprep.mubr.msk.bf16.mxu1 %vm1202_vm2, %v4264_v45  ;;  %v9893_v45 = vor.u32 %v9892_v27, %v9889_v53  ;;  %v18003_v27 = vld [vmem:[%s18297_s9 + $0x1d0] sm:$0xff]   ;;  %v9962_v52 = vshll.u32 %v18004_v34, 16 }
 0x369   : > { %v9898_v54 = vrot.slane %v9896_v22, 2  ;;  %v9959_v22 = vshrl.u32 %v18004_v34, 16 }
 0x36a   : > { %16289 = vmatmul.mubr.msk.bf16.gmra.mrb[76].mxu0 %vm1202_vm2, %v9831_v55  ;;  %v4279_v55 = vrot.slane %v17994_v37, 1  ;;  %v9894_v6 = vsel %vm9463_vm6, %v9884_v15, %v9893_v45  ;;  %v9953_v15 = vshll.u32 %v18003_v27, 16  ;;  %v9964_v37 = vrot.slane %v9962_v52, 3 }
 0x36b   : > { %16292 = vmatprep.mubr.msk.bf16.mxu0 %vm1202_vm2, %v9840_v58  ;;  %v9902_v58 = vor.u32 %v9901_v51, %v9898_v54  ;;  %v9961_v51 = vrot.slane %v9959_v22, 2 }
 0x36c   : > { %v4280_v63 = vsel %vm2710_vm5, %v4277_v25, %v4279_v55  ;;  %v4282_v4 = vsel %vm2710_vm5, %v4279_v55, %v4281_v13  ;;  %v9955_v57 = vrot.slane %v9953_v15, 3  ;;  %v18006_v25 = vld [vmem:[%s18297_s9 + $0xb8] sm:$0xff]  }
 0x36d   : > { %v9903_v44 = vsel %vm9463_vm6, %v9893_v45, %v9902_v58  ;;  %v18005_v45 = vld [vmem:[%s18297_s9 + $0xb0] sm:$0xff]  }
 0x36e   : > { %v4289_v12 = vrot.slane %v18005_v45, 1 }
 0x36f   : > { %15673 = vmatmul.mubr.msk.bf16.gmra.mrb[12].mxu1 %vm1202_vm2, %v4266_v62  ;;  %v9914_v62 = vshrl.u32 %v17995_v10, 16  ;;  %v18008_v10 = vld [vmem:[%s18297_s9 + $0x1e8] sm:$0xff]  }
 0x370   : > { %15676 = vmatprep.mubr.msk.bf16.mxu1 %vm1202_vm2, %v4268_v7  ;;  %v9911_v7 = vor.u32 %v9910_v61, %v9907_v47  ;;  %v18007_v61 = vld [vmem:[%s18297_s9 + $0x1e0] sm:$0xff]   ;;  %v9980_v48 = vshll.u32 %v18008_v10, 16 }
 0x371   : > { %v9916_v0 = vrot.slane %v9914_v62, 2  ;;  %v9977_v62 = vshrl.u32 %v18008_v10, 16 }
 0x372   : > { %16293 = vmatmul.mubr.msk.bf16.gmra.mrb[80].mxu0 %vm1202_vm2, %v9849_v19  ;;  %v4283_v19 = vrot.slane %v17998_v3, 1  ;;  %v9912_v20 = vsel %vm9463_vm6, %v9902_v58, %v9911_v7  ;;  %v9971_v58 = vshll.u32 %v18007_v61, 16  ;;  %v9982_v3 = vrot.slane %v9980_v48, 3 }
 0x373   : > { %16296 = vmatprep.mubr.msk.bf16.mxu0 %vm1202_vm2, %v9858_v40  ;;  %v9920_v40 = vor.u32 %v9919_v8, %v9916_v0  ;;  %v9979_v8 = vrot.slane %v9977_v62, 2 }
 0x374   : > { %v4284_v2 = vsel %vm2710_vm5, %v4281_v13, %v4283_v19  ;;  %v4286_v42 = vsel %vm2710_vm5, %v4283_v19, %v4285_v56  ;;  %v9973_v1 = vrot.slane %v9971_v58, 3  ;;  %v18010_v13 = vld [vmem:[%s18297_s9 + $0xc8] sm:$0xff]  }
 0x375   : > { %v9921_v9 = vsel %vm9463_vm6, %v9911_v7, %v9920_v40  ;;  %v18009_v7 = vld [vmem:[%s18297_s9 + $0xc0] sm:$0xff]  }
 0x376   : > { %v4293_v16 = vrot.slane %v18009_v7, 1 }
 0x377   : > { %15677 = vmatmul.mubr.msk.bf16.gmra.mrb[16].mxu1 %vm1202_vm2, %v4270_v21  ;;  %v9932_v21 = vshrl.u32 %v17999_v28, 16  ;;  %v18012_v28 = vld [vmem:[%s18297_s9 + $0x1f8] sm:$0xff]  }
 0x378   : > { %15680 = vmatprep.mubr.msk.bf16.mxu1 %vm1202_vm2, %v4272_v43  ;;  %v9929_v43 = vor.u32 %v9928_v32, %v9925_v39  ;;  %v18011_v32 = vld [vmem:[%s18297_s9 + $0x1f0] sm:$0xff]   ;;  %v9998_v36 = vshll.u32 %v18012_v28, 16 }
 0x379   : > { %v9934_v5 = vrot.slane %v9932_v21, 2  ;;  %v9995_v21 = vshrl.u32 %v18012_v28, 16 }
 0x37a   : > { %16297 = vmatmul.mubr.msk.bf16.gmra.mrb[84].mxu0 %vm1202_vm2, %v9867_v33  ;;  %v4287_v33 = vrot.slane %v18002_v17, 1  ;;  %v9930_v59 = vsel %vm9463_vm6, %v9920_v40, %v9929_v43  ;;  %v9989_v40 = vshll.u32 %v18011_v32, 16  ;;  %v10000_v17 = vrot.slane %v9998_v36, 3 }
 0x37b   : > { %16300 = vmatprep.mubr.msk.bf16.mxu0 %vm1202_vm2, %v9876_v50  ;;  %v9938_v50 = vor.u32 %v9937_v30, %v9934_v5  ;;  %v9997_v30 = vrot.slane %v9995_v21, 2 }
 0x37c   : > { %v4288_v53 = vsel %vm2710_vm5, %v4285_v56, %v4287_v33  ;;  %v4290_v55 = vsel %vm2710_vm5, %v4287_v33, %v4289_v12  ;;  %v9991_v23 = vrot.slane %v9989_v40, 3  ;;  %v18014_v56 = vld [vmem:[%s18297_s9 + $0xd8] sm:$0xff]  }
 0x37d   : > { %v9939_v14 = vsel %vm9463_vm6, %v9929_v43, %v9938_v50  ;;  %v18013_v43 = vld [vmem:[%s18297_s9 + $0xd0] sm:$0xff]  }
 0x37e   : > { %v4297_v11 = vrot.slane %v18013_v43, 1 }
 0x37f   : > { %15681 = vmatmul.mubr.msk.bf16.gmra.mrb[20].mxu1 %vm1202_vm2, %v4274_v35  ;;  %v9950_v35 = vshrl.u32 %v18003_v27, 16  ;;  %v18016_v27 = vld [vmem:[%s18297_s9 + $0x208] sm:$0xff]  }
 0x380   : > { %15684 = vmatprep.mubr.msk.bf16.mxu1 %vm1202_vm2, %v4276_v60  ;;  %v9947_v60 = vor.u32 %v9946_v24, %v9943_v38  ;;  %v18015_v24 = vld [vmem:[%s18297_s9 + $0x200] sm:$0xff]   ;;  %v10016_v15 = vshll.u32 %v18016_v27, 16 }
 0x381   : > { %v9952_v41 = vrot.slane %v9950_v35, 2  ;;  %v10013_v35 = vshrl.u32 %v18016_v27, 16 }
 0x382   : > { %16301 = vmatmul.mubr.msk.bf16.gmra.mrb[88].mxu0 %vm1202_vm2, %v9885_v18  ;;  %v4291_v18 = vrot.slane %v18006_v25, 1  ;;  %v9948_v54 = vsel %vm9463_vm6, %v9938_v50, %v9947_v60  ;;  %v10007_v50 = vshll.u32 %v18015_v24, 16  ;;  %v10018_v25 = vrot.slane %v10016_v15, 3 }
 0x383   : > { %16304 = vmatprep.mubr.msk.bf16.mxu0 %vm1202_vm2, %v9894_v6  ;;  %v9956_v6 = vor.u32 %v9955_v57, %v9952_v41  ;;  %v10015_v57 = vrot.slane %v10013_v35, 2 }
 0x384   : > { %v4292_v47 = vsel %vm2710_vm5, %v4289_v12, %v4291_v18  ;;  %v4294_v19 = vsel %vm2710_vm5, %v4291_v18, %v4293_v16  ;;  %v10009_v45 = vrot.slane %v10007_v50, 3  ;;  %v18018_v12 = vld [vmem:[%s18297_s9 + $0xe8] sm:$0xff]  }
 0x385   : > { %v9957_v29 = vsel %vm9463_vm6, %v9947_v60, %v9956_v6  ;;  %v18017_v60 = vld [vmem:[%s18297_s9 + $0xe0] sm:$0xff]  }
 0x386   : > { %v4301_v34 = vrot.slane %v18017_v60, 1 }
 0x387   : > { %15685 = vmatmul.mubr.msk.bf16.gmra.mrb[24].mxu1 %vm1202_vm2, %v4278_v31  ;;  %v9968_v31 = vshrl.u32 %v18007_v61, 16  ;;  %v18020_v61 = vld [vmem:[%s18297_s9 + $0x218] sm:$0xff]  }
 0x388   : > { %15688 = vmatprep.mubr.msk.bf16.mxu1 %vm1202_vm2, %v4280_v63  ;;  %v9965_v63 = vor.u32 %v9964_v37, %v9961_v51  ;;  %v18019_v37 = vld [vmem:[%s18297_s9 + $0x210] sm:$0xff]   ;;  %v10034_v58 = vshll.u32 %v18020_v61, 16 }
 0x389   : > { %v9970_v49 = vrot.slane %v9968_v31, 2  ;;  %v10031_v31 = vshrl.u32 %v18020_v61, 16 }
 0x38a   : > { %16305 = vmatmul.mubr.msk.bf16.gmra.mrb[92].mxu0 %vm1202_vm2, %v9903_v44  ;;  %v4295_v44 = vrot.slane %v18010_v13, 1  ;;  %v9966_v0 = vsel %vm9463_vm6, %v9956_v6, %v9965_v63  ;;  %v10025_v6 = vshll.u32 %v18019_v37, 16  ;;  %v10036_v13 = vrot.slane %v10034_v58, 3  ;;  %v20014_v58 = vld [vmem:[%s18297_s9 + $0x128] sm:$0xff]  }
 0x38b   : > { %16308 = vmatprep.mubr.msk.bf16.mxu0 %vm1202_vm2, %v9912_v20  ;;  %v9974_v20 = vor.u32 %v9973_v1, %v9970_v49  ;;  %v10033_v1 = vrot.slane %v10031_v31, 2 }
 0x38c   : > { %v4296_v39 = vsel %vm2710_vm5, %v4293_v16, %v4295_v44  ;;  %v4298_v33 = vsel %vm2710_vm5, %v4295_v44, %v4297_v11  ;;  %v10027_v7 = vrot.slane %v10025_v6, 3  ;;  %v18022_v16 = vld [vmem:[%s18297_s9 + $0xf8] sm:$0xff]  }
 0x38d   : > { %v9975_v26 = vsel %vm9463_vm6, %v9965_v63, %v9974_v20  ;;  %v18021_v63 = vld [vmem:[%s18297_s9 + $0xf0] sm:$0xff]  }
 0x38e   : > { %v4305_v10 = vrot.slane %v18021_v63, 1  ;;  %v4319_v63 = vrot.slane %v20014_v58, 1 }
 0x38f   : > { %15689 = vmatmul.mubr.msk.bf16.gmra.mrb[28].mxu1 %vm1202_vm2, %v4282_v4  ;;  %v9986_v4 = vshrl.u32 %v18011_v32, 16  ;;  %v18024_v32 = vld [vmem:[%s18297_s9 + $0x228] sm:$0xff]  }
 0x390   : > { %15692 = vmatprep.mubr.msk.bf16.mxu1 %vm1202_vm2, %v4284_v2  ;;  %v9983_v2 = vor.u32 %v9982_v3, %v9979_v8  ;;  %v18023_v3 = vld [vmem:[%s18297_s9 + $0x220] sm:$0xff]   ;;  %v10052_v40 = vshll.u32 %v18024_v32, 16 }
 0x391   : > { %v9988_v46 = vrot.slane %v9986_v4, 2  ;;  %v10049_v4 = vshrl.u32 %v18024_v32, 16  ;;  %v18037_v32 = vld [vmem:[%s18297_s9 + $0x30] sm:$0xff]  }
 0x392   : > { %16309 = vmatmul.mubr.msk.bf16.gmra.mrb[96].mxu0 %vm1202_vm2, %v9921_v9  ;;  %v4299_v9 = vrot.slane %v18014_v56, 1  ;;  %v9984_v5 = vsel %vm9463_vm6, %v9974_v20, %v9983_v2  ;;  %v10043_v20 = vshll.u32 %v18023_v3, 16  ;;  %v10054_v56 = vrot.slane %v10052_v40, 3 }
 0x393   : > { %16312 = vmatprep.mubr.msk.bf16.mxu0 %vm1202_vm2, %v9930_v59  ;;  %v9992_v59 = vor.u32 %v9991_v23, %v9988_v46  ;;  %v10051_v23 = vrot.slane %v10049_v4, 2  ;;  %v11014_v4 = vrot.slane %v18037_v32, 3 }
 0x394   : > { %v4300_v38 = vsel %vm2710_vm5, %v4297_v11, %v4299_v9  ;;  %v4302_v18 = vsel %vm2710_vm5, %v4299_v9, %v4301_v34  ;;  %v10045_v43 = vrot.slane %v10043_v20, 3  ;;  %v18026_v11 = vld [vmem:[%s18297_s9 + $0x108] sm:$0xff]  }
 0x395   : > { %v9993_v22 = vsel %vm9463_vm6, %v9983_v2, %v9992_v59  ;;  %v18025_v2 = vld [vmem:[%s18297_s9 + $0x100] sm:$0xff]  }
 0x396   : > { %v4309_v28 = vrot.slane %v18025_v2, 1  ;;  %v18038_v2 = vld [vmem:[%s18297_s9 + $0x38] sm:$0xff]  }
 0x397   : > { %15693 = vmatmul.mubr.msk.bf16.gmra.mrb[32].mxu1 %vm1202_vm2, %v4286_v42  ;;  %v10004_v42 = vshrl.u32 %v18015_v24, 16  ;;  %v18028_v24 = vld [vmem:[%s18297_s9 + $0x238] sm:$0xff]  }
 0x398   : > { %15696 = vmatprep.mubr.msk.bf16.mxu1 %vm1202_vm2, %v4288_v53  ;;  %v10001_v53 = vor.u32 %v10000_v17, %v9997_v30  ;;  %v18027_v17 = vld [vmem:[%s18297_s9 + $0x230] sm:$0xff]   ;;  %v10070_v50 = vshll.u32 %v18028_v24, 16 }
 0x399   : > { %v10006_v52 = vrot.slane %v10004_v42, 2  ;;  %v10067_v42 = vshrl.u32 %v18028_v24, 16  ;;  %v20068_v24 = vld [vmem:[%s18297_s9 + $0x158] sm:$0xff]  }
 0x39a   : > { %16313 = vmatmul.mubr.msk.bf16.gmra.mrb[100].mxu0 %vm1202_vm2, %v9939_v14  ;;  %v4303_v14 = vrot.slane %v18018_v12, 1  ;;  %v10002_v41 = vsel %vm9463_vm6, %v9992_v59, %v10001_v53  ;;  %v10061_v59 = vshll.u32 %v18027_v17, 16 }
 0x39b   : > { %16316 = vmatprep.mubr.msk.bf16.mxu0 %vm1202_vm2, %v9948_v54  ;;  %v10010_v54 = vor.u32 %v10009_v45, %v10006_v52  ;;  %v17839_v52 = vld [vmem:[%s18297_s9 + $0x240] ss:$0 sps:$4 sm:$0x77]   ;;  %v10069_v12 = vrot.slane %v10067_v42, 2  ;;  %v4331_v42 = vrot.slane %v20068_v24, 1 }
 0x39c   : > { %v4304_v51 = vsel %vm2710_vm5, %v4301_v34, %v4303_v14  ;;  %v4306_v44 = vsel %vm2710_vm5, %v4303_v14, %v4305_v10  ;;  %v10063_v60 = vrot.slane %v10061_v59, 3  ;;  %v18030_v34 = vld [vmem:[%s18297_s9 + $0x118] sm:$0xff]   ;;  %v10072_v14 = vrot.slane %v10070_v50, 3 }
 0x39d   : > { %v10011_v62 = vsel %vm9463_vm6, %v10001_v53, %v10010_v54  ;;  %v18029_v53 = vld [vmem:[%s18297_s9 + $0x110] sm:$0xff]  }
 0x39e   : > { %v4313_v27 = vrot.slane %v18029_v53, 1 }
 0x39f   : > { %15697 = vmatmul.mubr.msk.bf16.gmra.mrb[36].mxu1 %vm1202_vm2, %v4290_v55  ;;  %v10022_v55 = vshrl.u32 %v18019_v37, 16  ;;  %v11004_v37 = vld [vmem:[%s18297_s9 + $0x20] sm:$0x8] }
 0x3a0   : > { %15700 = vmatprep.mubr.msk.bf16.mxu1 %vm1202_vm2, %v4292_v47  ;;  %v10019_v47 = vor.u32 %v10018_v25, %v10015_v57 }
 0x3a1   : > { %v10024_v48 = vrot.slane %v10022_v55, 2  ;;  %v18031_v55 = vld [vmem:[%s18297_s9 + $0x120] sm:$0xff]  }
 0x3a2   : > { %16317 = vmatmul.mubr.msk.bf16.gmra.mrb[104].mxu0 %vm1202_vm2, %v9957_v29  ;;  %v4307_v29 = vrot.slane %v18022_v16, 1  ;;  %v10020_v49 = vsel %vm9463_vm6, %v10010_v54, %v10019_v47  ;;  %v10079_v54 = vshll.u32 %v17839_v52, 16  ;;  %v4317_v6 = vrot.slane %v18031_v55, 1  ;;  %v20099_v55 = vld [vmem:[%s18297_s9 + $0x170] sm:$0xff]  }
 0x3a3   : > { %16320 = vmatprep.mubr.msk.bf16.mxu0 %vm1202_vm2, %v9966_v0  ;;  %v10028_v0 = vor.u32 %v10027_v7, %v10024_v48 }
 0x3a4   : > { %v4308_v8 = vsel %vm2710_vm5, %v4305_v10, %v4307_v29  ;;  %v4310_v9 = vsel %vm2710_vm5, %v4307_v29, %v4309_v28  ;;  %v10081_v31 = vrot.slane %v10079_v54, 3  ;;  %v4320_v29 = vsel %vm2710_vm5, %v4317_v6, %v4319_v63 }
 0x3a5   : > { %v10029_v21 = vsel %vm9463_vm6, %v10019_v47, %v10028_v0 }
 0x3a7   : > { %15701 = vmatmul.mubr.msk.bf16.gmra.mrb[40].mxu1 %vm1202_vm2, %v4294_v19  ;;  %v10040_v19 = vshrl.u32 %v18023_v3, 16  ;;  %v20032_v3 = vld [vmem:[%s18297_s9 + $0x138] sm:$0xff]  }
 0x3a8   : > { %15704 = vmatprep.mubr.msk.bf16.mxu1 %vm1202_vm2, %v4296_v39  ;;  %v10037_v39 = vor.u32 %v10036_v13, %v10033_v1  ;;  %v18034_v1 = vld [vmem:[%s18297_s9 + $0x28] sm:$0xff]  }
 0x3a9   : > { %v10042_v36 = vrot.slane %v10040_v19, 2  ;;  %v11012_v13 = vrot.slane %v18034_v1, 3  ;;  %v4323_v19 = vrot.slane %v20032_v3, 1 }
 0x3aa   : > { %16321 = vmatmul.mubr.msk.bf16.gmra.mrb[108].mxu0 %vm1202_vm2, %v9975_v26  ;;  %v4311_v26 = vrot.slane %v18026_v11, 1  ;;  %v10038_v46 = vsel %vm9463_vm6, %v10028_v0, %v10037_v39  ;;  %v20050_v11 = vld [vmem:[%s18297_s9 + $0x148] sm:$0xff]  }
 0x3ab   : > { %16324 = vmatprep.mubr.msk.bf16.mxu0 %vm1202_vm2, %v9984_v5  ;;  %v10046_v5 = vor.u32 %v10045_v43, %v10042_v36  ;;  %v11015_v43 = vsel %vm11010_vm7, %v11012_v13, %v11014_v4 }
 0x3ac   : > { %v4312_v30 = vsel %vm2710_vm5, %v4309_v28, %v4311_v26  ;;  %v11016_v28 = vrot.slane %v18038_v2, 3 }
 0x3ad   : > { %v10047_v35 = vsel %vm9463_vm6, %v10037_v39, %v10046_v5 }
 0x3af   : > { %15705 = vmatmul.mubr.msk.bf16.gmra.mrb[44].mxu1 %vm1202_vm2, %v4298_v33  ;;  %v10058_v33 = vshrl.u32 %v18027_v17, 16 }
 0x3b0   : > { %15708 = vmatprep.mubr.msk.bf16.mxu1 %vm1202_vm2, %v4300_v38  ;;  %v10055_v38 = vor.u32 %v10054_v56, %v10051_v23  ;;  %v18041_v56 = vld [vmem:[%s18297_s9 + $0x40] sm:$0xff]  }
 0x3b1   : > { %v10060_v15 = vrot.slane %v10058_v33, 2  ;;  %v20063_v33 = vld [vmem:[%s18297_s9 + $0x150] sm:$0xff]  }
 0x3b2   : > { %16325 = vmatmul.mubr.msk.bf16.gmra.mrb[112].mxu0 %vm1202_vm2, %v9993_v22  ;;  %v4315_v22 = vrot.slane %v18030_v34, 1  ;;  %v10056_v45 = vsel %vm9463_vm6, %v10046_v5, %v10055_v38  ;;  %v4329_v59 = vrot.slane %v20063_v33, 1 }
 0x3b3   : > { %16328 = vmatprep.mubr.msk.bf16.mxu0 %vm1202_vm2, %v10002_v41  ;;  %v4314_v41 = vsel %vm2710_vm5, %v4311_v26, %v4313_v27  ;;  %v10064_v57 = vor.u32 %v10063_v60, %v10060_v15  ;;  %v4327_v26 = vrot.slane %v20050_v11, 1  ;;  %v18046_v60 = vld [vmem:[%s18297_s9 + $0x58] sm:$0xff]  }
 0x3b4   : > { %v4316_v25 = vsel %vm2710_vm5, %v4313_v27, %v4315_v22  ;;  %v4318_v7 = vsel %vm2710_vm5, %v4315_v22, %v4317_v6  ;;  %v18045_v27 = vld [vmem:[%s18297_s9 + $0x50] sm:$0xff]   ;;  %v4332_v15 = vsel %vm2710_vm5, %v4329_v59, %v4331_v42  ;;  %v11024_v34 = vrot.slane %v18046_v60, 3  ;;  %v20081_v22 = vld [vmem:[%s18297_s9 + $0x160] sm:$0xff]  }
 0x3b5   : > { %v10065_v47 = vsel %vm9463_vm6, %v10055_v38, %v10064_v57  ;;  %v4330_v53 = vsel %vm2710_vm5, %v4327_v26, %v4329_v59  ;;  %v4337_v6 = vrot.slane %v20099_v55, 1  ;;  %v18065_v60 = vld [vmem:[%s18297_s9 + $0xa0] sm:$0xff]  }
 0x3b7   : > { %15709 = vmatmul.mubr.msk.bf16.gmra.mrb[48].mxu1 %vm1202_vm2, %v4302_v18  ;;  %v10076_v18 = vshrl.u32 %v17839_v52, 16  ;;  %v4333_v52 = vrot.slane %v20081_v22, 1 }
 0x3b8   : > { %15712 = vmatprep.mubr.msk.bf16.mxu1 %vm1202_vm2, %v4304_v51  ;;  %v10073_v51 = vor.u32 %v10072_v14, %v10069_v12  ;;  %v20086_v12 = vld [vmem:[%s18297_s9 + $0x168] sm:$0xff]  }
 0x3b9   : > { %v10078_v61 = vrot.slane %v10076_v18, 2  ;;  %v4335_v14 = vrot.slane %v20086_v12, 1 }
 0x3ba   : > { %16329 = vmatmul.mubr.msk.bf16.gmra.mrb[116].mxu0 %vm1202_vm2, %v10011_v62  ;;  %v10074_v10 = vsel %vm9463_vm6, %v10064_v57, %v10073_v51  ;;  %v18033_v62 = vld [vmem:[%s18297_s9 + $0x24] sm:$0xf]  ;;  %v4334_v57 = vsel %vm2710_vm5, %v4331_v42, %v4333_v52 }
 0x3bb   : > { %16332 = vmatprep.mubr.msk.bf16.mxu0 %vm1202_vm2, %v10020_v49  ;;  %v13871_v48 = vcombine.low %v11004_v37, %v18033_v62  ;;  %v10082_v16 = vor.u32 %v10081_v31, %v10078_v61  ;;  %v4336_v54 = vsel %vm2710_vm5, %v4333_v52, %v4335_v14  ;;  %v20104_v61 = vld [vmem:[%s18297_s9 + $0x178] sm:$0xff]   ;;  %v18053_v62 = vld [vmem:[%s18297_s9 + $0x70] sm:$0xff]  }
 0x3bc   : > { %v4339_v31 = vrot.slane %v20104_v61, 1 }
 0x3bd   : > { %v11011_v49 = vrot.slane %v13871_v48, 3  ;;  %v11030_v48 = vrot.slane %v18053_v62, 3  ;;  %v20189_v62 = vld [vmem:[%s18297_s9 + $0x1c0] sm:$0xff]  }
 0x3bf   : > { %15713 = vmatmul.mubr.msk.bf16.gmra.mrb[52].mxu1 %vm1202_vm2, %v4306_v44  ;;  %v20027_v44 = vld [vmem:[%s18297_s9 + $0x130] sm:$0xff]   ;;  %v11013_v20 = vsel %vm11010_vm7, %v11011_v49, %v11012_v13  ;;  %v20117_v49 = vld [vmem:[%s18297_s9 + $0x180] sm:$0xff]  }
 0x3c0   : > { %15716 = vmatprep.mubr.msk.bf16.mxu1 %vm1202_vm2, %v4308_v8  ;;  %v4321_v0 = vrot.slane %v20027_v44, 1  ;;  %v10083_v8 = vsel %vm9463_vm6, %v10073_v51, %v10082_v16  ;;  %v18050_v51 = vld [vmem:[%s18297_s9 + $0x68] sm:$0xff]   ;;  %v18054_v16 = vld [vmem:[%s18297_s9 + $0x78] sm:$0xff]   ;;  %v4341_v1 = vrot.slane %v20117_v49, 1 }
 0x3c1   : > { %v11028_v37 = vrot.slane %v18050_v51, 3 }
 0x3c2   : > { %16333 = vmatmul.mubr.msk.bf16.gmra.mrb[120].mxu0 %vm1202_vm2, %v10029_v21  ;;  %v4322_v39 = vsel %vm2710_vm5, %v4319_v63, %v4321_v0  ;;  %v4324_v40 = vsel %vm2710_vm5, %v4321_v0, %v4323_v19  ;;  %v20045_v21 = vld [vmem:[%s18297_s9 + $0x140] sm:$0xff]   ;;  %v20122_v0 = vld [vmem:[%s18297_s9 + $0x188] sm:$0xff]  }
 0x3c3   : > { %16336 = vmatprep.mubr.msk.bf16.mxu0 %vm1202_vm2, %v10038_v46  ;;  %v4325_v36 = vrot.slane %v20045_v21, 1  ;;  %v11017_v46 = vsel %vm11010_vm7, %v11014_v4, %v11016_v28  ;;  %v11031_v13 = vsel %vm11010_vm7, %v11028_v37, %v11030_v48 }
 0x3c5   : > { %v4326_v23 = vsel %vm2710_vm5, %v4323_v19, %v4325_v36  ;;  %v4328_v5 = vsel %vm2710_vm5, %v4325_v36, %v4327_v26  ;;  %v20140_v26 = vld [vmem:[%s18297_s9 + $0x198] sm:$0xff]  }
 0x3c7   : > { %15717 = vmatmul.mubr.msk.bf16.gmra.mrb[56].mxu1 %vm1202_vm2, %v4310_v9  ;;  %v11018_v9 = vrot.slane %v18041_v56, 3 }
 0x3c8   : > { %15720 = vmatprep.mubr.msk.bf16.mxu1 %vm1202_vm2, %v4312_v30  ;;  %v18042_v30 = vld [vmem:[%s18297_s9 + $0x48] sm:$0xff]  }
 0x3c9   : > { %v11020_v17 = vrot.slane %v18042_v30, 3  ;;  %v11019_v38 = vsel %vm11010_vm7, %v11016_v28, %v11018_v9  ;;  %v20135_v28 = vld [vmem:[%s18297_s9 + $0x190] sm:$0xff]  }
 0x3ca   : > { %16337 = vmatmul.mubr.msk.bf16.gmra.mrb[124].mxu0 %vm1202_vm2, %v10047_v35  ;;  %v11022_v35 = vrot.slane %v18045_v27, 3  ;;  %v4345_v36 = vrot.slane %v20135_v28, 1 }
 0x3cb   : > { %16340 = vmatprep.mubr.msk.bf16.mxu0 %vm1202_vm2, %v10056_v45  ;;  %v11021_v50 = vsel %vm11010_vm7, %v11018_v9, %v11020_v17  ;;  %v18061_v9 = vld [vmem:[%s18297_s9 + $0x90] sm:$0xff]  }
 0x3cc   : > { %v11023_v45 = vsel %vm11010_vm7, %v11020_v17, %v11022_v35  ;;  %v18062_v17 = vld [vmem:[%s18297_s9 + $0x98] sm:$0xff]  }
 0x3cd   : > { %v11040_v59 = vrot.slane %v18062_v17, 3  ;;  %v18077_v17 = vld [vmem:[%s18297_s9 + $0xd0] sm:$0xff]  }
 0x3cf   : > { %15721 = vmatmul.mubr.msk.bf16.gmra.mrb[60].mxu1 %vm1202_vm2, %v4314_v41  ;;  %v11025_v41 = vsel %vm11010_vm7, %v11022_v35, %v11024_v34 }
 0x3d0   : > { %15724 = vmatprep.mubr.msk.bf16.mxu1 %vm1202_vm2, %v4316_v25  ;;  %v18049_v25 = vld [vmem:[%s18297_s9 + $0x60] sm:$0xff]  }
 0x3d1   : > { %v11026_v18 = vrot.slane %v18049_v25, 3 }
 0x3d2   : > { %16341 = vmatmul.mubr.msk.bf16.gmra.mrb[128].mxu0 %vm1202_vm2, %v10065_v47 }
 0x3d3   : > { %16344 = vmatprep.mubr.msk.bf16.mxu0 %vm1202_vm2, %v10074_v10  ;;  %v11027_v47 = vsel %vm11010_vm7, %v11024_v34, %v11026_v18  ;;  %v11029_v63 = vsel %vm11010_vm7, %v11026_v18, %v11028_v37  ;;  %v4338_v10 = vsel %vm2710_vm5, %v4335_v14, %v4337_v6  ;;  %v11042_v34 = vrot.slane %v18065_v60, 3  ;;  %v20176_v18 = vld [vmem:[%s18297_s9 + $0x1b8] sm:$0xff]  }
 0x3d5   : > { %v11043_v25 = vsel %vm11010_vm7, %v11040_v59, %v11042_v34 }
 0x3d7   : > { %15725 = vmatmul.mubr.msk.bf16.gmra.mrb[64].mxu1 %vm1202_vm2, %v4318_v7  ;;  %v4340_v7 = vsel %vm2710_vm5, %v4337_v6, %v4339_v31  ;;  %v18069_v6 = vld [vmem:[%s18297_s9 + $0xb0] sm:$0xff]  }
 0x3d8   : > { %15728 = vmatprep.mubr.msk.bf16.mxu1 %vm1202_vm2, %v4320_v29  ;;  %v11032_v29 = vrot.slane %v18054_v16, 3  ;;  %v20194_v16 = vld [vmem:[%s18297_s9 + $0x1c8] sm:$0xff]  }
 0x3da   : > { %16345 = vmatmul.mubr.msk.bf16.gmra.mrb[132].mxu0 %vm1202_vm2, %v10083_v8  ;;  %v4343_v8 = vrot.slane %v20122_v0, 1  ;;  %v11033_v19 = vsel %vm11010_vm7, %v11030_v48, %v11032_v29  ;;  %v4357_v48 = vrot.slane %v20189_v62, 1 }
 0x3db   : > { %16350 = vmatprep.mubr.msk.bf16.mxu0 %vm1202_vm2, %v11013_v20  ;;  %v4342_v20 = vsel %vm2710_vm5, %v4339_v31, %v4341_v1 }
 0x3dc   : > { %v4344_v4 = vsel %vm2710_vm5, %v4341_v1, %v4343_v8  ;;  %v4346_v56 = vsel %vm2710_vm5, %v4343_v8, %v4345_v36  ;;  %v18073_v8 = vld [vmem:[%s18297_s9 + $0xc0] sm:$0xff]  }
 0x3df   : > { %15729 = vmatmul.mubr.msk.bf16.gmra.mrb[68].mxu1 %vm1202_vm2, %v4322_v39  ;;  %v18057_v39 = vld [vmem:[%s18297_s9 + $0x80] sm:$0xff]  }
 0x3e0   : > { %15732 = vmatprep.mubr.msk.bf16.mxu1 %vm1202_vm2, %v4324_v40  ;;  %v11034_v32 = vrot.slane %v18057_v39, 3  ;;  %v18058_v40 = vld [vmem:[%s18297_s9 + $0x88] sm:$0xff]  }
 0x3e1   : > { %v11036_v2 = vrot.slane %v18058_v40, 3  ;;  %v18074_v39 = vld [vmem:[%s18297_s9 + $0xc8] sm:$0xff]  }
 0x3e2   : > { %16351 = vmatmul.mubr.msk.bf16.vlgmr.msra.gmra.mrb[0].mxu0 %vm1202_vm2, %v11015_v43  ;;  %v11035_v43 = vsel %vm11010_vm7, %v11032_v29, %v11034_v32  ;;  %v4359_v29 = vrot.slane %v20194_v16, 1 }
 0x3e3   : > { %16354 = vmatprep.mubr.msk.bf16.mxu0 %vm1202_vm2, %v11017_v46  ;;  %v4347_v46 = vrot.slane %v20140_v26, 1 }
 0x3e5   : > { %v4348_v30 = vsel %vm2710_vm5, %v4345_v36, %v4347_v46  ;;  %v20212_v36 = vld [vmem:[%s18297_s9 + $0x1d8] sm:$0xff]  }
 0x3e7   : > { %15733 = vmatmul.mubr.msk.bf16.gmra.mrb[72].mxu1 %vm1202_vm2, %v4326_v23  ;;  %v11037_v23 = vsel %vm11010_vm7, %v11034_v32, %v11036_v2  ;;  %v11052_v32 = vrot.slane %v18074_v39, 3 }
 0x3e8   : > { %15736 = vmatprep.mubr.msk.bf16.mxu1 %vm1202_vm2, %v4328_v5  ;;  %v11038_v5 = vrot.slane %v18061_v9, 3 }
 0x3ea   : > { %16355 = vmatmul.mubr.msk.bf16.gmra.mrb[4].mxu0 %vm1202_vm2, %v11019_v38  ;;  %v20153_v38 = vld [vmem:[%s18297_s9 + $0x1a0] sm:$0xff]   ;;  %v11041_v35 = vsel %vm11010_vm7, %v11038_v5, %v11040_v59  ;;  %v11054_v59 = vrot.slane %v18077_v17, 3 }
 0x3eb   : > { %16358 = vmatprep.mubr.msk.bf16.mxu0 %vm1202_vm2, %v11021_v50  ;;  %v4349_v42 = vrot.slane %v20153_v38, 1  ;;  %v11039_v50 = vsel %vm11010_vm7, %v11036_v2, %v11038_v5  ;;  %v20285_v17 = vld [vmem:[%s18297_s9 + $0x200] sm:$0xff]  }
 0x3ec   : > { %v11055_v60 = vsel %vm11010_vm7, %v11052_v32, %v11054_v59 }
 0x3ef   : > { %15737 = vmatmul.mubr.msk.bf16.gmra.mrb[76].mxu1 %vm1202_vm2, %v4330_v53  ;;  %v20158_v53 = vld [vmem:[%s18297_s9 + $0x1a8] sm:$0xff]  }
 0x3f0   : > { %15740 = vmatprep.mubr.msk.bf16.mxu1 %vm1202_vm2, %v4332_v15  ;;  %v4351_v27 = vrot.slane %v20158_v53, 1  ;;  %v4350_v15 = vsel %vm2710_vm5, %v4347_v46, %v4349_v42 }
 0x3f2   : > { %16359 = vmatmul.mubr.msk.bf16.gmra.mrb[8].mxu0 %vm1202_vm2, %v11023_v45  ;;  %v4352_v52 = vsel %vm2710_vm5, %v4349_v42, %v4351_v27  ;;  %v18066_v45 = vld [vmem:[%s18297_s9 + $0xa8] sm:$0xff]  }
 0x3f3   : > { %16362 = vmatprep.mubr.msk.bf16.mxu0 %vm1202_vm2, %v11025_v41  ;;  %v11044_v14 = vrot.slane %v18066_v45, 3  ;;  %v20171_v41 = vld [vmem:[%s18297_s9 + $0x1b0] sm:$0xff]  }
 0x3f5   : > { %v11045_v51 = vsel %vm11010_vm7, %v11042_v34, %v11044_v14  ;;  %v20238_v34 = vld [vmem:[%s18297_s9 + $0x1e8] sm:$0xff]  }
 0x3f7   : > { %15741 = vmatmul.mubr.msk.bf16.gmra.mrb[80].mxu1 %vm1202_vm2, %v4334_v57  ;;  %v4353_v57 = vrot.slane %v20171_v41, 1 }
 0x3f8   : > { %15744 = vmatprep.mubr.msk.bf16.mxu1 %vm1202_vm2, %v4336_v54  ;;  %v4355_v54 = vrot.slane %v20176_v18, 1 }
 0x3f9   : > { %v4354_v37 = vsel %vm2710_vm5, %v4351_v27, %v4353_v57 }
 0x3fa   : > { %16363 = vmatmul.mubr.msk.bf16.gmra.mrb[12].mxu0 %vm1202_vm2, %v11027_v47  ;;  %v11046_v47 = vrot.slane %v18069_v6, 3  ;;  %v4356_v31 = vsel %vm2710_vm5, %v4353_v57, %v4355_v54 }
 0x3fb   : > { %16366 = vmatprep.mubr.msk.bf16.mxu0 %vm1202_vm2, %v11029_v63  ;;  %v18070_v63 = vld [vmem:[%s18297_s9 + $0xb8] sm:$0xff]  }
 0x3ff   : > { %15745 = vmatmul.mubr.msk.bf16.gmra.mrb[84].mxu1 %vm1202_vm2, %v4338_v10  ;;  %v11048_v10 = vrot.slane %v18070_v63, 3 }
 0x400   : > { %15748 = vmatprep.mubr.msk.bf16.mxu1 %vm1202_vm2, %v4340_v7  ;;  %v11047_v7 = vsel %vm11010_vm7, %v11044_v14, %v11046_v47 }
 0x401   : > { %v11049_v1 = vsel %vm11010_vm7, %v11046_v47, %v11048_v10 }
 0x402   : > { %16367 = vmatmul.mubr.msk.bf16.gmra.mrb[16].mxu0 %vm1202_vm2, %v11031_v13  ;;  %v4358_v13 = vsel %vm2710_vm5, %v4355_v54, %v4357_v48 }
 0x403   : > { %16370 = vmatprep.mubr.msk.bf16.mxu0 %vm1202_vm2, %v11033_v19  ;;  %v11050_v19 = vrot.slane %v18073_v8, 3 }
 0x405   : > { %v11051_v2 = vsel %vm11010_vm7, %v11048_v10, %v11050_v19  ;;  %v20259_v10 = vld [vmem:[%s18297_s9 + $0x1f0] sm:$0xff]  }
 0x407   : > { %15749 = vmatmul.mubr.msk.bf16.gmra.mrb[88].mxu1 %vm1202_vm2, %v4342_v20  ;;  %v4360_v20 = vsel %vm2710_vm5, %v4357_v48, %v4359_v29  ;;  %v4369_v48 = vrot.slane %v20259_v10, 1 }
 0x408   : > { %15752 = vmatprep.mubr.msk.bf16.mxu1 %vm1202_vm2, %v4344_v4  ;;  %v20207_v4 = vld [vmem:[%s18297_s9 + $0x1d0] sm:$0xff]  }
 0x409   : > { %v4361_v40 = vrot.slane %v20207_v4, 1 }
 0x40a   : > { %16371 = vmatmul.mubr.msk.bf16.gmra.mrb[20].mxu0 %vm1202_vm2, %v11035_v43  ;;  %v4363_v43 = vrot.slane %v20212_v36, 1 }
 0x40b   : > { %16374 = vmatprep.mubr.msk.bf16.mxu0 %vm1202_vm2, %v11037_v23  ;;  %v11053_v23 = vsel %vm11010_vm7, %v11050_v19, %v11052_v32  ;;  %v4362_v5 = vsel %vm2710_vm5, %v4359_v29, %v4361_v40  ;;  %v20264_v29 = vld [vmem:[%s18297_s9 + $0x1f8] sm:$0xff]  }
 0x40c   : > { %v4364_v42 = vsel %vm2710_vm5, %v4361_v40, %v4363_v43  ;;  %v18085_v40 = vld [vmem:[%s18297_s9 + $0xf0] sm:$0xff]  }
 0x40f   : > { %15753 = vmatmul.mubr.msk.bf16.gmra.mrb[92].mxu1 %vm1202_vm2, %v4346_v56 }
 0x410   : > { %15756 = vmatprep.mubr.msk.bf16.mxu1 %vm1202_vm2, %v4348_v30 }
 0x412   : > { %16375 = vmatmul.mubr.msk.bf16.gmra.mrb[24].mxu0 %vm1202_vm2, %v11039_v50  ;;  %v18078_v50 = vld [vmem:[%s18297_s9 + $0xd8] sm:$0xff]  }
 0x413   : > { %16378 = vmatprep.mubr.msk.bf16.mxu0 %vm1202_vm2, %v11041_v35  ;;  %v11056_v27 = vrot.slane %v18078_v50, 3  ;;  %v20233_v35 = vld [vmem:[%s18297_s9 + $0x1e0] sm:$0xff]   ;;  %v20290_v50 = vld [vmem:[%s18297_s9 + $0x208] sm:$0xff]  }
 0x415   : > { %v11057_v14 = vsel %vm11010_vm7, %v11054_v59, %v11056_v27  ;;  %v4373_v59 = vrot.slane %v20285_v17, 1 }
 0x417   : > { %15757 = vmatmul.mubr.msk.bf16.gmra.mrb[96].mxu1 %vm1202_vm2, %v4350_v15  ;;  %v4365_v15 = vrot.slane %v20233_v35, 1 }
 0x418   : > { %15760 = vmatprep.mubr.msk.bf16.mxu1 %vm1202_vm2, %v4352_v52  ;;  %v4367_v52 = vrot.slane %v20238_v34, 1 }
 0x419   : > { %v4366_v54 = vsel %vm2710_vm5, %v4363_v43, %v4365_v15 }
 0x41a   : > { %16379 = vmatmul.mubr.msk.bf16.gmra.mrb[28].mxu0 %vm1202_vm2, %v11043_v25  ;;  %v4368_v47 = vsel %vm2710_vm5, %v4365_v15, %v4367_v52  ;;  %v4370_v39 = vsel %vm2710_vm5, %v4367_v52, %v4369_v48 }
 0x41b   : > { %16382 = vmatprep.mubr.msk.bf16.mxu0 %vm1202_vm2, %v11045_v51 }
 0x41f   : > { %15761 = vmatmul.mubr.msk.bf16.gmra.mrb[100].mxu1 %vm1202_vm2, %v4354_v37  ;;  %v18081_v37 = vld [vmem:[%s18297_s9 + $0xe0] sm:$0xff]  }
 0x420   : > { %15764 = vmatprep.mubr.msk.bf16.mxu1 %vm1202_vm2, %v4356_v31  ;;  %v11058_v6 = vrot.slane %v18081_v37, 3  ;;  %v18082_v31 = vld [vmem:[%s18297_s9 + $0xe8] sm:$0xff]  }
 0x421   : > { %v11060_v63 = vrot.slane %v18082_v31, 3 }
 0x422   : > { %16383 = vmatmul.mubr.msk.bf16.gmra.mrb[32].mxu0 %vm1202_vm2, %v11047_v7  ;;  %v11059_v7 = vsel %vm11010_vm7, %v11056_v27, %v11058_v6  ;;  %v4375_v27 = vrot.slane %v20290_v50, 1 }
 0x423   : > { %16386 = vmatprep.mubr.msk.bf16.mxu0 %vm1202_vm2, %v11049_v1  ;;  %v4371_v1 = vrot.slane %v20264_v29, 1  ;;  %v11061_v8 = vsel %vm11010_vm7, %v11058_v6, %v11060_v63  ;;  %v18089_v6 = vld [vmem:[%s18297_s9 + $0x100] sm:$0xff]  }
 0x424   : > { %v4376_v31 = vsel %vm2710_vm5, %v4373_v59, %v4375_v27 }
 0x425   : > { %v4372_v43 = vsel %vm2710_vm5, %v4369_v48, %v4371_v1 }
 0x427   : > { %15765 = vmatmul.mubr.msk.bf16.gmra.mrb[104].mxu1 %vm1202_vm2, %v4358_v13 }
 0x428   : > { %15768 = vmatprep.mubr.msk.bf16.mxu1 %vm1202_vm2, %v4360_v20 }
 0x42a   : > { %v20215_v46 = vpop.f32.mrb[0].mxu1  ;;  %16387 = vmatmul.mubr.msk.bf16.gmra.mrb[36].mxu0 %vm1202_vm2, %v11051_v2  ;;  %v11062_v2 = vrot.slane %v18085_v40, 3 }
 0x42b   : > { %v20218_v56 = vpop.f32.mrb[1].mxu1  ;;  %16390 = vmatprep.mubr.msk.bf16.mxu0 %vm1202_vm2, %v11053_v23  ;;  %v18086_v23 = vld [vmem:[%s18297_s9 + $0xf8] sm:$0xff]  }
 0x42c   : > { %v20221_v9 = vpop.f32.mrb[2].mxu1 }
 0x42d   : > { %v20224_v30 = vpop.f32.mrb[3].mxu1 }
 0x42f   : > { %15769 = vmatmul.mubr.msk.bf16.gmra.mrb[108].mxu1 %vm1202_vm2, %v4362_v5  ;;  %v11064_v5 = vrot.slane %v18086_v23, 3 }
 0x430   : > { %15772 = vmatprep.mubr.msk.bf16.mxu1 %vm1202_vm2, %v4364_v42  ;;  %v11063_v42 = vsel %vm11010_vm7, %v11060_v63, %v11062_v2  ;;  %v18090_v63 = vld [vmem:[%s18297_s9 + $0x108] sm:$0xff]  }
 0x431   : > { %v11068_v48 = vrot.slane %v18090_v63, 3 }
 0x432   : > { %v20241_v45 = vpop.f32.mrb[4].mxu1  ;;  %16391 = vmatmul.mubr.msk.bf16.gmra.mrb[40].mxu0 %vm1202_vm2, %v11055_v60  ;;  %v11065_v60 = vsel %vm11010_vm7, %v11062_v2, %v11064_v5 }
 0x433   : > { %v20244_v57 = vpop.f32.mrb[5].mxu1  ;;  %16394 = vmatprep.mubr.msk.bf16.mxu0 %vm1202_vm2, %v11057_v14 }
 0x434   : > { %v20247_v25 = vpop.f32.mrb[6].mxu1 }
 0x435   : > { %v20250_v51 = vpop.f32.mrb[7].mxu1 }
 0x437   : > { %15773 = vmatmul.mubr.msk.bf16.gmra.mrb[112].mxu1 %vm1202_vm2, %v4366_v54  ;;  %v4374_v54 = vsel %vm2710_vm5, %v4371_v1, %v4373_v59 }
 0x438   : > { %15776 = vmatprep.mubr.msk.bf16.mxu1 %vm1202_vm2, %v4368_v47  ;;  %v11066_v47 = vrot.slane %v18089_v6, 3 }
 0x43a   : > { %v20267_v13 = vpop.f32.mrb[8].mxu1  ;;  %16395 = vmatmul.mubr.msk.bf16.gmra.mrb[44].mxu0 %vm1202_vm2, %v11059_v7  ;;  %v20311_v7 = vld [vmem:[%s18297_s9 + $0x210] sm:$0xff]  }
 0x43b   : > { %v20270_v19 = vpop.f32.mrb[9].mxu1  ;;  %16398 = vmatprep.mubr.msk.bf16.mxu0 %vm1202_vm2, %v11061_v8  ;;  %v4377_v1 = vrot.slane %v20311_v7, 1  ;;  %v11067_v8 = vsel %vm11010_vm7, %v11064_v5, %v11066_v47  ;;  %v18093_v5 = vld [vmem:[%s18297_s9 + $0x110] sm:$0xff]  }
 0x43c   : > { %v20273_v20 = vpop.f32.mrb[10].mxu1 }
 0x43d   : > { %v20276_v32 = vpop.f32.mrb[11].mxu1 }
 0x43f   : > { %15777 = vmatmul.mubr.msk.bf16.gmra.mrb[116].mxu1 %vm1202_vm2, %v4370_v39  ;;  %v20316_v39 = vld [vmem:[%s18297_s9 + $0x218] sm:$0xff]  }
 0x440   : > { %15780 = vmatprep.mubr.msk.bf16.mxu1 %vm1202_vm2, %v4372_v43  ;;  %v4379_v40 = vrot.slane %v20316_v39, 1  ;;  %v11069_v43 = vsel %vm11010_vm7, %v11066_v47, %v11068_v48  ;;  %v20337_v47 = vld [vmem:[%s18297_s9 + $0x220] sm:$0xff]  }
 0x442   : > { %v20293_v15 = vpop.f32.mrb[12].mxu1  ;;  %16399 = vmatmul.mubr.msk.bf16.gmra.mrb[48].mxu0 %vm1202_vm2, %v11063_v42  ;;  %v4378_v42 = vsel %vm2710_vm5, %v4375_v27, %v4377_v1  ;;  %v4380_v6 = vsel %vm2710_vm5, %v4377_v1, %v4379_v40  ;;  %v4381_v27 = vrot.slane %v20337_v47, 1  ;;  %v5629_v1 = vshrl.u32 %v20014_v58, 16 }
 0x443   : > { %21178 = vst [vmem:[#allocation8_spill] sm:$0xff] %v20293_v15  ;;  %v20296_v52 = vpop.f32.mrb[13].mxu1  ;;  %16402 = vmatprep.mubr.msk.bf16.mxu0 %vm1202_vm2, %v11065_v60 }
 0x444   : > { %21179 = vst [vmem:[#allocation9_spill] sm:$0xff] %v20296_v52  ;;  %v20299_v14 = vpop.f32.mrb[14].mxu1 }
 0x445   : > { %21180 = vst [vmem:[#allocation10_spill] sm:$0xff] %v20299_v14  ;;  %v20302_v37 = vpop.f32.mrb[15].mxu1 }
 0x446   : > { %21181 = vst [vmem:[#allocation13_spill] sm:$0xff] %v20302_v37  ;;  %v18097_v37 = vld [vmem:[%s18297_s9 + $0x120] sm:$0xff]  }
 0x447   : > { %15781 = vmatmul.mubr.msk.bf16.gmra.mrb[120].mxu1 %vm1202_vm2, %v4374_v54  ;;  %v11070_v54 = vrot.slane %v18093_v5, 3  ;;  %v5632_v5 = vshll.u32 %v20014_v58, 16  ;;  %v11074_v14 = vrot.slane %v18097_v37, 3  ;;  %v5647_v37 = vshrl.u32 %v20032_v3, 16 }
 0x448   : > { %15784 = vmatprep.mubr.msk.bf16.mxu1 %vm1202_vm2, %v4376_v31  ;;  %v18094_v31 = vld [vmem:[%s18297_s9 + $0x118] sm:$0xff]  }
 0x449   : > { %v11072_v63 = vrot.slane %v18094_v31, 3 }
 0x44a   : > { %v20319_v2 = vpop.f32.mrb[16].mxu1  ;;  %16403 = vmatmul.mubr.msk.bf16.gmra.mrb[52].mxu0 %vm1202_vm2, %v11067_v8  ;;  %v11071_v8 = vsel %vm11010_vm7, %v11068_v48, %v11070_v54  ;;  %v4382_v48 = vsel %vm2710_vm5, %v4379_v40, %v4381_v27  ;;  %v5638_v40 = vshrl.u32 %v20027_v44, 16 }
 0x44b   : > { %21182 = vst [vmem:[#allocation11_spill] sm:$0xff] %v20319_v2  ;;  %v20322_v23 = vpop.f32.mrb[17].mxu1  ;;  %16406 = vmatprep.mubr.msk.bf16.mxu0 %vm1202_vm2, %v11069_v43 }
 0x44c   : > { %21183 = vst [vmem:[#allocation12_spill] sm:$0xff] %v20322_v23  ;;  %v20325_v59 = vpop.f32.mrb[18].mxu1  ;;  %v17841_v23 = vld [vmem:[%s18297_s9 + $0x230] ss:$0 sps:$4 sm:$0x11]  }
 0x44d   : > { %21184 = vst [vmem:[#allocation14_spill] sm:$0xff] %v20325_v59  ;;  %v20328_v60 = vpop.f32.mrb[19].mxu1 }
 0x44e   : > { %21185 = vst [vmem:[#allocation17_spill] sm:$0xff] %v20328_v60  ;;  %v20342_v60 = vld [vmem:[%s18297_s9 + $0x228] sm:$0xff]  }
 0x44f   : > { %15785 = vmatmul.mubr.msk.bf16.gmra.mrb[124].mxu1 %vm1202_vm2, %v4378_v42  ;;  %21186 = vst [vmem:[#allocation15_spill] sm:$0xff] %v20342_v60  ;;  %v4383_v43 = vrot.slane %v20342_v60, 1  ;;  %v11073_v42 = vsel %vm11010_vm7, %v11070_v54, %v11072_v63  ;;  %v5634_v60 = vrot.slane %v5632_v5, 2  ;;  %v18098_v54 = vld [vmem:[%s18297_s9 + $0x128] sm:$0xff]  }
 0x450   : > { %15788 = vmatprep.mubr.msk.bf16.mxu1 %vm1202_vm2, %v4380_v6  ;;  %v11076_v52 = vrot.slane %v18098_v54, 3  ;;  %v21193_v54 = vld [vmem:[#allocation7_spill] sm:$0xff] }
 0x451   : > { %v4384_v58 = vsel %vm2710_vm5, %v4381_v27, %v4383_v43  ;;  %v5650_v27 = vshll.u32 %v20032_v3, 16  ;;  %v18099_v3 = vld [vmem:[%s18297_s9 + $0x130] sm:$0xff]  }
 0x452   : > { %v20347_v31 = vpop.f32.mrb[20].mxu1  ;;  %16407 = vmatmul.mubr.msk.bf16.gmra.mrb[56].mxu0 %vm1202_vm2, %v11071_v8  ;;  %v4385_v8 = vrot.slane %v17841_v23, 1  ;;  %v11077_v5 = vsel %vm11010_vm7, %v11074_v14, %v11076_v52 }
 0x453   : > { %21187 = vst [vmem:[#allocation16_spill] sm:$0xff] %v20347_v31  ;;  %v20350_v6 = vpop.f32.mrb[21].mxu1  ;;  %16410 = vmatprep.mubr.msk.bf16.mxu0 %vm1202_vm2, %v11073_v42  ;;  %v5631_v31 = vrot.slane %v5629_v1, 1  ;;  %v11075_v42 = vsel %vm11010_vm7, %v11072_v63, %v11074_v14  ;;  %v5649_v14 = vrot.slane %v5647_v37, 1  ;;  %v5668_v37 = vshll.u32 %v20050_v11, 16 }
 0x454   : > { %21188 = vst [vmem:[#allocation18_spill] sm:$0xff] %v20350_v6  ;;  %v20353_v59 = vpop.f32.mrb[22].mxu1  ;;  %v5652_v6 = vrot.slane %v5650_v27, 2 }
 0x455   : > { %21189 = vst [vmem:[#allocation21_spill] sm:$0xff] %v20353_v59  ;;  %v20357_v2 = vpop.f32.mrb[23].mxu1  ;;  %v5635_v59 = vor.u32 %v5634_v60, %v5631_v31  ;;  %v11078_v31 = vrot.slane %v18099_v3, 3 }
 0x456   : > { %21190 = vst [vmem:[#allocation19_spill] sm:$0xff] %v20357_v2  ;;  %v5641_v2 = vshll.u32 %v20027_v44, 16  ;;  %v4386_v44 = vsel %vm2710_vm5, %v4383_v43, %v4385_v8  ;;  %v5659_v8 = vshll.u32 %v20045_v21, 16 }
 0x457   : > { %15789 = vmatmul.mubr.msk.bf16.gmra.mrb[128].mxu1 %vm1202_vm2, %v4382_v48 }
 0x458   : > { %15792 = vmatprep.mubr.msk.bf16.mxu1 %vm1202_vm2, %v4384_v58  ;;  %v5640_v58 = vrot.slane %v5638_v40, 1  ;;  %v5643_v63 = vrot.slane %v5641_v2, 2  ;;  %v5656_v2 = vshrl.u32 %v20045_v21, 16  ;;  %v11079_v40 = vsel %vm11010_vm7, %v11076_v52, %v11078_v31 }
 0x459   : > { %v5661_v52 = vrot.slane %v5659_v8, 2 }
 0x45a   : > { %v20370_v1 = vpop.f32.mrb[24].mxu1  ;;  %16411 = vmatmul.mubr.msk.bf16.gmra.mrb[60].mxu0 %vm1202_vm2, %v11075_v42  ;;  %v5644_v43 = vor.u32 %v5643_v63, %v5640_v58  ;;  %v5653_v42 = vor.u32 %v5652_v6, %v5649_v14  ;;  %v5658_v58 = vrot.slane %v5656_v2, 1  ;;  %v18102_v14 = vld [vmem:[%s18297_s9 + $0x148] sm:$0xff]   ;;  %v5677_v2 = vshll.u32 %v20063_v33, 16 }
 0x45b   : > { %21191 = vst [vmem:[#allocation20_spill] sm:$0xff] %v20370_v1  ;;  %v20373_v48 = vpop.f32.mrb[25].mxu1  ;;  %16414 = vmatprep.mubr.msk.bf16.mxu0 %vm1202_vm2, %v11077_v5  ;;  %v5636_v1 = vsel %vm5313_vm3, %v21193_v54, %v5635_v59  ;;  %v5665_v5 = vshrl.u32 %v20050_v11, 16  ;;  %v18101_v11 = vld [vmem:[%s18297_s9 + $0x140] sm:$0xff]  }
 0x45c   : > { %21192 = vst [vmem:[#allocation22_spill] sm:$0xff] %v20373_v48  ;;  %v20376_v23 = vpop.f32.mrb[26].mxu1  ;;  %v18100_v48 = vld [vmem:[%s18297_s9 + $0x138] sm:$0xff]   ;;  %v5645_v21 = vsel %vm5313_vm3, %v5635_v59, %v5644_v43  ;;  %v11082_v63 = vrot.slane %v18101_v11, 3  ;;  %v5654_v3 = vsel %vm5313_vm3, %v5644_v43, %v5653_v42  ;;  %v5674_v59 = vshrl.u32 %v20063_v33, 16 }
 0x45d   : > { %v20379_v60 = vpop.f32.mrb[27].mxu1  ;;  %v11080_v15 = vrot.slane %v18100_v48, 3  ;;  %v5667_v54 = vrot.slane %v5665_v5, 1  ;;  %v5683_v11 = vshrl.u32 %v20068_v24, 16  ;;  %v5686_v43 = vshll.u32 %v20068_v24, 16  ;;  %v18103_v24 = vld [vmem:[%s18297_s9 + $0x150] sm:$0xff]  }
 0x45f   : > { %15793 = vmatmul.mubr.msk.bf16.gmra.mrb[132].mxu1 %vm1202_vm2, %v4386_v44  ;;  %v11081_v48 = vsel %vm11010_vm7, %v11078_v31, %v11080_v15  ;;  %v5670_v31 = vrot.slane %v5668_v37, 2  ;;  %v11083_v8 = vsel %vm11010_vm7, %v11080_v15, %v11082_v63  ;;  %v5679_v15 = vrot.slane %v5677_v2, 2 }
 0x460   : > { %15866 = vmatprep.mubr.msk.bf16.mxu1 %vm1202_vm2, %v5636_v1 }
 0x462   : > { %v20393_v27 = vpop.f32.mrb[28].mxu1  ;;  %16415 = vmatmul.mubr.msk.bf16.gmra.mrb[64].mxu0 %vm1202_vm2, %v11079_v40  ;;  %v5662_v40 = vor.u32 %v5661_v52, %v5658_v58  ;;  %v5676_v52 = vrot.slane %v5674_v59, 1  ;;  %v5695_v59 = vshll.u32 %v20081_v22, 16 }
 0x463   : > { %v20396_v44 = vpop.f32.mrb[29].mxu1  ;;  %16418 = vmatprep.mubr.msk.bf16.mxu0 %vm1202_vm2, %v11081_v48  ;;  %v5671_v48 = vor.u32 %v5670_v31, %v5667_v54  ;;  %v11086_v54 = vrot.slane %v18103_v24, 3  ;;  %v5701_v24 = vshrl.u32 %v20086_v12, 16 }
 0x464   : > { %21194 = vst [vmem:[#allocation25_spill] sm:$0xff] %v20396_v44  ;;  %v20399_v1 = vpop.f32.mrb[30].mxu1  ;;  %v11084_v44 = vrot.slane %v18102_v14, 3  ;;  %v5663_v33 = vsel %vm5313_vm3, %v5653_v42, %v5662_v40  ;;  %v5685_v14 = vrot.slane %v5683_v11, 1  ;;  %v5692_v42 = vshrl.u32 %v20081_v22, 16 }
 0x465   : > { %v20402_v6 = vpop.f32.mrb[31].mxu1  ;;  %v5672_v31 = vsel %vm5313_vm3, %v5662_v40, %v5671_v48  ;;  %v5704_v40 = vshll.u32 %v20086_v12, 16  ;;  %v18105_v12 = vld [vmem:[%s18297_s9 + $0x160] sm:$0xff]  }
 0x466   : > { %v11085_v37 = vsel %vm11010_vm7, %v11082_v63, %v11084_v44  ;;  %v5688_v63 = vrot.slane %v5686_v43, 2  ;;  %v11087_v2 = vsel %vm11010_vm7, %v11084_v44, %v11086_v54  ;;  %v5697_v44 = vrot.slane %v5695_v59, 2 }
 0x467   : > { %15867 = vmatmul.mubr.msk.bf16.vlgmr.msra.gmra.mrb[68].mxu1 %vm1202_vm2, %v5645_v21 }
 0x468   : > { %15870 = vmatprep.mubr.msk.bf16.mxu1 %vm1202_vm2, %v5654_v3 }
 0x46a   : > { %v20415_v5 = vpop.f32.mrb[32].mxu1  ;;  %16419 = vmatmul.mubr.msk.bf16.gmra.mrb[68].mxu0 %vm1202_vm2, %v11083_v8  ;;  %v5680_v8 = vor.u32 %v5679_v15, %v5676_v52  ;;  %v5694_v52 = vrot.slane %v5692_v42, 1  ;;  %v5713_v42 = vshll.u32 %v20099_v55, 16 }
 0x46b   : > { %21195 = vst [vmem:[#allocation23_spill] sm:$0xff] %v20415_v5  ;;  %v20418_v21 = vpop.f32.mrb[33].mxu1  ;;  %16422 = vmatprep.mubr.msk.bf16.mxu0 %vm1202_vm2, %v11085_v37  ;;  %v18104_v5 = vld [vmem:[%s18297_s9 + $0x158] sm:$0xff]   ;;  %v5689_v37 = vor.u32 %v5688_v63, %v5685_v14  ;;  %v5703_v63 = vrot.slane %v5701_v24, 1 }
 0x46c   : > { %21196 = vst [vmem:[#allocation24_spill] sm:$0xff] %v20418_v21  ;;  %v20421_v58 = vpop.f32.mrb[34].mxu1  ;;  %v11088_v21 = vrot.slane %v18104_v5, 3  ;;  %v5681_v22 = vsel %vm5313_vm3, %v5671_v48, %v5680_v8  ;;  %v5710_v48 = vshrl.u32 %v20099_v55, 16 }
 0x46d   : > { %v20424_v3 = vpop.f32.mrb[35].mxu1  ;;  %v5690_v14 = vsel %vm5313_vm3, %v5680_v8, %v5689_v37  ;;  %v5722_v8 = vshll.u32 %v20104_v61, 16 }
 0x46e   : > { %v11089_v43 = vsel %vm11010_vm7, %v11086_v54, %v11088_v21  ;;  %v5706_v54 = vrot.slane %v5704_v40, 2 }
 0x46f   : > { %15871 = vmatmul.mubr.msk.bf16.gmra.mrb[72].mxu1 %vm1202_vm2, %v5663_v33 }
 0x470   : > { %15874 = vmatprep.mubr.msk.bf16.mxu1 %vm1202_vm2, %v5672_v31  ;;  %v11090_v31 = vrot.slane %v18105_v12, 3  ;;  %v5719_v12 = vshrl.u32 %v20104_v61, 16  ;;  %v18107_v61 = vld [vmem:[%s18297_s9 + $0x170] sm:$0xff]  }
 0x472   : > { %v20437_v11 = vpop.f32.mrb[36].mxu1  ;;  %16423 = vmatmul.mubr.msk.bf16.gmra.mrb[72].mxu0 %vm1202_vm2, %v11087_v2  ;;  %v5698_v2 = vor.u32 %v5697_v44, %v5694_v52  ;;  %v11091_v59 = vsel %vm11010_vm7, %v11088_v21, %v11090_v31  ;;  %v5712_v52 = vrot.slane %v5710_v48, 1  ;;  %v5715_v21 = vrot.slane %v5713_v42, 2 }
 0x473   : > { %21197 = vst [vmem:[#allocation26_spill] sm:$0xff] %v20437_v11  ;;  %v20440_v5 = vpop.f32.mrb[37].mxu1  ;;  %16426 = vmatprep.mubr.msk.bf16.mxu0 %vm1202_vm2, %v11089_v43  ;;  %v18106_v11 = vld [vmem:[%s18297_s9 + $0x168] sm:$0xff]   ;;  %v5707_v43 = vor.u32 %v5706_v54, %v5703_v63  ;;  %v5721_v54 = vrot.slane %v5719_v12, 1  ;;  %v5731_v48 = vshll.u32 %v20117_v49, 16 }
 0x474   : > { %21198 = vst [vmem:[#allocation29_spill] sm:$0xff] %v20440_v5  ;;  %v20443_v33 = vpop.f32.mrb[38].mxu1  ;;  %v11092_v5 = vrot.slane %v18106_v11, 3  ;;  %v5699_v55 = vsel %vm5313_vm3, %v5689_v37, %v5698_v2  ;;  %v5728_v37 = vshrl.u32 %v20117_v49, 16 }
 0x475   : > { %v20446_v15 = vpop.f32.mrb[39].mxu1  ;;  %v5708_v63 = vsel %vm5313_vm3, %v5698_v2, %v5707_v43  ;;  %v5740_v2 = vshll.u32 %v20122_v0, 16 }
 0x476   : > { %v11093_v40 = vsel %vm11010_vm7, %v11090_v31, %v11092_v5  ;;  %v5724_v31 = vrot.slane %v5722_v8, 2 }
 0x477   : > { %15875 = vmatmul.mubr.msk.bf16.gmra.mrb[76].mxu1 %vm1202_vm2, %v5681_v22 }
 0x478   : > { %15878 = vmatprep.mubr.msk.bf16.mxu1 %vm1202_vm2, %v5690_v14  ;;  %v11094_v14 = vrot.slane %v18107_v61, 3  ;;  %v5737_v61 = vshrl.u32 %v20122_v0, 16  ;;  %v18109_v0 = vld [vmem:[%s18297_s9 + $0x180] sm:$0xff]  }
 0x47a   : > { %v20459_v24 = vpop.f32.mrb[40].mxu1  ;;  %16427 = vmatmul.mubr.msk.bf16.gmra.mrb[76].mxu0 %vm1202_vm2, %v11091_v59  ;;  %v5716_v59 = vor.u32 %v5715_v21, %v5712_v52  ;;  %v11095_v42 = vsel %vm11010_vm7, %v11092_v5, %v11094_v14  ;;  %v5730_v52 = vrot.slane %v5728_v37, 1  ;;  %v5733_v5 = vrot.slane %v5731_v48, 2 }
 0x47b   : > { %21199 = vst [vmem:[#allocation27_spill] sm:$0xff] %v20459_v24  ;;  %v20462_v11 = vpop.f32.mrb[41].mxu1  ;;  %16430 = vmatprep.mubr.msk.bf16.mxu0 %vm1202_vm2, %v11093_v40  ;;  %v18108_v24 = vld [vmem:[%s18297_s9 + $0x178] sm:$0xff]   ;;  %v5725_v40 = vor.u32 %v5724_v31, %v5721_v54  ;;  %v5739_v31 = vrot.slane %v5737_v61, 1  ;;  %v5749_v37 = vshll.u32 %v20135_v28, 16 }
 0x47c   : > { %21200 = vst [vmem:[#allocation28_spill] sm:$0xff] %v20462_v11  ;;  %v20465_v22 = vpop.f32.mrb[42].mxu1  ;;  %v11096_v11 = vrot.slane %v18108_v24, 3  ;;  %v5717_v49 = vsel %vm5313_vm3, %v5707_v43, %v5716_v59  ;;  %v5746_v43 = vshrl.u32 %v20135_v28, 16 }
 0x47d   : > { %v20468_v44 = vpop.f32.mrb[43].mxu1  ;;  %v5726_v54 = vsel %vm5313_vm3, %v5716_v59, %v5725_v40  ;;  %v5758_v59 = vshll.u32 %v20140_v26, 16 }
 0x47e   : > { %v11097_v8 = vsel %vm11010_vm7, %v11094_v14, %v11096_v11  ;;  %v5742_v14 = vrot.slane %v5740_v2, 2 }
 0x47f   : > { %15879 = vmatmul.mubr.msk.bf16.gmra.mrb[80].mxu1 %vm1202_vm2, %v5699_v55 }
 0x480   : > { %15882 = vmatprep.mubr.msk.bf16.mxu1 %vm1202_vm2, %v5708_v63  ;;  %v11098_v63 = vrot.slane %v18109_v0, 3  ;;  %v5755_v0 = vshrl.u32 %v20140_v26, 16  ;;  %v18111_v26 = vld [vmem:[%s18297_s9 + $0x190] sm:$0xff]  }
 0x482   : > { %v20481_v12 = vpop.f32.mrb[44].mxu1  ;;  %16431 = vmatmul.mubr.msk.bf16.gmra.mrb[80].mxu0 %vm1202_vm2, %v11095_v42  ;;  %v5734_v42 = vor.u32 %v5733_v5, %v5730_v52  ;;  %v11099_v48 = vsel %vm11010_vm7, %v11096_v11, %v11098_v63  ;;  %v5748_v52 = vrot.slane %v5746_v43, 1  ;;  %v5751_v11 = vrot.slane %v5749_v37, 2 }
 0x483   : > { %21201 = vst [vmem:[#allocation30_spill] sm:$0xff] %v20481_v12  ;;  %v20484_v24 = vpop.f32.mrb[45].mxu1  ;;  %16434 = vmatprep.mubr.msk.bf16.mxu0 %vm1202_vm2, %v11097_v8  ;;  %v18110_v12 = vld [vmem:[%s18297_s9 + $0x188] sm:$0xff]   ;;  %v5743_v8 = vor.u32 %v5742_v14, %v5739_v31  ;;  %v5757_v14 = vrot.slane %v5755_v0, 1  ;;  %v5767_v43 = vshll.u32 %v20153_v38, 16 }
 0x484   : > { %21202 = vst [vmem:[#allocation33_spill] sm:$0xff] %v20484_v24  ;;  %v20487_v55 = vpop.f32.mrb[46].mxu1  ;;  %v11100_v24 = vrot.slane %v18110_v12, 3  ;;  %v5735_v28 = vsel %vm5313_vm3, %v5725_v40, %v5734_v42  ;;  %v5764_v40 = vshrl.u32 %v20153_v38, 16 }
 0x485   : > { %v20490_v21 = vpop.f32.mrb[47].mxu1  ;;  %v5744_v31 = vsel %vm5313_vm3, %v5734_v42, %v5743_v8  ;;  %v5776_v42 = vshll.u32 %v20158_v53, 16 }
 0x486   : > { %v11101_v2 = vsel %vm11010_vm7, %v11098_v63, %v11100_v24  ;;  %v5760_v63 = vrot.slane %v5758_v59, 2 }
 0x487   : > { %15883 = vmatmul.mubr.msk.bf16.gmra.mrb[84].mxu1 %vm1202_vm2, %v5717_v49 }
 0x488   : > { %15886 = vmatprep.mubr.msk.bf16.mxu1 %vm1202_vm2, %v5726_v54  ;;  %v11102_v54 = vrot.slane %v18111_v26, 3  ;;  %v5773_v26 = vshrl.u32 %v20158_v53, 16  ;;  %v18113_v53 = vld [vmem:[%s18297_s9 + $0x1a0] sm:$0xff]  }
 0x48a   : > { %v20503_v61 = vpop.f32.mrb[48].mxu1  ;;  %16435 = vmatmul.mubr.msk.bf16.gmra.mrb[84].mxu0 %vm1202_vm2, %v11099_v48  ;;  %v5752_v48 = vor.u32 %v5751_v11, %v5748_v52  ;;  %v11103_v37 = vsel %vm11010_vm7, %v11100_v24, %v11102_v54  ;;  %v5766_v52 = vrot.slane %v5764_v40, 1  ;;  %v5769_v24 = vrot.slane %v5767_v43, 2 }
 0x48b   : > { %21203 = vst [vmem:[#allocation31_spill] sm:$0xff] %v20503_v61  ;;  %v20506_v12 = vpop.f32.mrb[49].mxu1  ;;  %16438 = vmatprep.mubr.msk.bf16.mxu0 %vm1202_vm2, %v11101_v2  ;;  %v18112_v61 = vld [vmem:[%s18297_s9 + $0x198] sm:$0xff]   ;;  %v5761_v2 = vor.u32 %v5760_v63, %v5757_v14  ;;  %v5775_v63 = vrot.slane %v5773_v26, 1  ;;  %v5785_v40 = vshll.u32 %v20171_v41, 16 }
 0x48c   : > { %21204 = vst [vmem:[#allocation32_spill] sm:$0xff] %v20506_v12  ;;  %v20509_v49 = vpop.f32.mrb[50].mxu1  ;;  %v11104_v12 = vrot.slane %v18112_v61, 3  ;;  %v5753_v38 = vsel %vm5313_vm3, %v5743_v8, %v5752_v48  ;;  %v5782_v8 = vshrl.u32 %v20171_v41, 16 }
 0x48d   : > { %v20512_v5 = vpop.f32.mrb[51].mxu1  ;;  %v5762_v14 = vsel %vm5313_vm3, %v5752_v48, %v5761_v2  ;;  %v5794_v48 = vshll.u32 %v20176_v18, 16 }
 0x48e   : > { %v11105_v59 = vsel %vm11010_vm7, %v11102_v54, %v11104_v12  ;;  %v5778_v54 = vrot.slane %v5776_v42, 2 }
 0x48f   : > { %15887 = vmatmul.mubr.msk.bf16.gmra.mrb[88].mxu1 %vm1202_vm2, %v5735_v28 }
 0x490   : > { %15890 = vmatprep.mubr.msk.bf16.mxu1 %vm1202_vm2, %v5744_v31  ;;  %v11106_v31 = vrot.slane %v18113_v53, 3  ;;  %v5791_v53 = vshrl.u32 %v20176_v18, 16  ;;  %v18115_v18 = vld [vmem:[%s18297_s9 + $0x1b0] sm:$0xff]  }
 0x492   : > { %v20525_v0 = vpop.f32.mrb[52].mxu1  ;;  %16439 = vmatmul.mubr.msk.bf16.gmra.mrb[88].mxu0 %vm1202_vm2, %v11103_v37  ;;  %v5770_v37 = vor.u32 %v5769_v24, %v5766_v52  ;;  %v11107_v43 = vsel %vm11010_vm7, %v11104_v12, %v11106_v31  ;;  %v5784_v52 = vrot.slane %v5782_v8, 1  ;;  %v5787_v12 = vrot.slane %v5785_v40, 2 }
 0x493   : > { %21205 = vst [vmem:[#allocation34_spill] sm:$0xff] %v20525_v0  ;;  %v20528_v61 = vpop.f32.mrb[53].mxu1  ;;  %16442 = vmatprep.mubr.msk.bf16.mxu0 %vm1202_vm2, %v11105_v59  ;;  %v18114_v0 = vld [vmem:[%s18297_s9 + $0x1a8] sm:$0xff]   ;;  %v5779_v59 = vor.u32 %v5778_v54, %v5775_v63  ;;  %v5793_v54 = vrot.slane %v5791_v53, 1  ;;  %v5803_v8 = vshll.u32 %v20189_v62, 16 }
 0x494   : > { %21206 = vst [vmem:[#allocation37_spill] sm:$0xff] %v20528_v61  ;;  %v20531_v28 = vpop.f32.mrb[54].mxu1  ;;  %v11108_v61 = vrot.slane %v18114_v0, 3  ;;  %v5771_v41 = vsel %vm5313_vm3, %v5761_v2, %v5770_v37  ;;  %v5800_v2 = vshrl.u32 %v20189_v62, 16 }
 0x495   : > { %v20534_v11 = vpop.f32.mrb[55].mxu1  ;;  %v5780_v63 = vsel %vm5313_vm3, %v5770_v37, %v5779_v59  ;;  %v5812_v37 = vshll.u32 %v20194_v16, 16 }
 0x496   : > { %v11109_v42 = vsel %vm11010_vm7, %v11106_v31, %v11108_v61  ;;  %v5796_v31 = vrot.slane %v5794_v48, 2 }
 0x497   : > { %15891 = vmatmul.mubr.msk.bf16.gmra.mrb[92].mxu1 %vm1202_vm2, %v5753_v38 }
 0x498   : > { %15894 = vmatprep.mubr.msk.bf16.mxu1 %vm1202_vm2, %v5762_v14  ;;  %v11110_v14 = vrot.slane %v18115_v18, 3  ;;  %v5809_v18 = vshrl.u32 %v20194_v16, 16  ;;  %v18117_v16 = vld [vmem:[%s18297_s9 + $0x1c0] sm:$0xff]  }
 0x49a   : > { %v20547_v26 = vpop.f32.mrb[56].mxu1  ;;  %16443 = vmatmul.mubr.msk.bf16.gmra.mrb[92].mxu0 %vm1202_vm2, %v11107_v43  ;;  %v5788_v43 = vor.u32 %v5787_v12, %v5784_v52  ;;  %v11111_v40 = vsel %vm11010_vm7, %v11108_v61, %v11110_v14  ;;  %v5802_v52 = vrot.slane %v5800_v2, 1  ;;  %v5805_v61 = vrot.slane %v5803_v8, 2 }
 0x49b   : > { %21207 = vst [vmem:[#allocation35_spill] sm:$0xff] %v20547_v26  ;;  %v20550_v0 = vpop.f32.mrb[57].mxu1  ;;  %16446 = vmatprep.mubr.msk.bf16.mxu0 %vm1202_vm2, %v11109_v42  ;;  %v18116_v26 = vld [vmem:[%s18297_s9 + $0x1b8] sm:$0xff]   ;;  %v5797_v42 = vor.u32 %v5796_v31, %v5793_v54  ;;  %v5811_v31 = vrot.slane %v5809_v18, 1  ;;  %v5821_v2 = vshll.u32 %v20207_v4, 16 }
 0x49c   : > { %21208 = vst [vmem:[#allocation36_spill] sm:$0xff] %v20550_v0  ;;  %v20553_v38 = vpop.f32.mrb[58].mxu1  ;;  %v11112_v0 = vrot.slane %v18116_v26, 3  ;;  %v5789_v62 = vsel %vm5313_vm3, %v5779_v59, %v5788_v43  ;;  %v5818_v59 = vshrl.u32 %v20207_v4, 16 }
 0x49d   : > { %v20556_v24 = vpop.f32.mrb[59].mxu1  ;;  %v5798_v54 = vsel %vm5313_vm3, %v5788_v43, %v5797_v42  ;;  %v5830_v43 = vshll.u32 %v20212_v36, 16 }
 0x49e   : > { %v11113_v48 = vsel %vm11010_vm7, %v11110_v14, %v11112_v0  ;;  %v5814_v14 = vrot.slane %v5812_v37, 2 }
 0x49f   : > { %15895 = vmatmul.mubr.msk.bf16.gmra.mrb[96].mxu1 %vm1202_vm2, %v5771_v41 }
 0x4a0   : > { %15898 = vmatprep.mubr.msk.bf16.mxu1 %vm1202_vm2, %v5780_v63  ;;  %v11114_v63 = vrot.slane %v18117_v16, 3  ;;  %v5827_v16 = vshrl.u32 %v20212_v36, 16  ;;  %v18119_v36 = vld [vmem:[%s18297_s9 + $0x1d0] sm:$0xff]  }
 0x4a2   : > { %v20569_v53 = vpop.f32.mrb[60].mxu1  ;;  %16447 = vmatmul.mubr.msk.bf16.gmra.mrb[96].mxu0 %vm1202_vm2, %v11111_v40  ;;  %v5806_v40 = vor.u32 %v5805_v61, %v5802_v52  ;;  %v11115_v8 = vsel %vm11010_vm7, %v11112_v0, %v11114_v63  ;;  %v5820_v52 = vrot.slane %v5818_v59, 1  ;;  %v5823_v0 = vrot.slane %v5821_v2, 2 }
 0x4a3   : > { %21209 = vst [vmem:[#allocation38_spill] sm:$0xff] %v20569_v53  ;;  %v20572_v26 = vpop.f32.mrb[61].mxu1  ;;  %16450 = vmatprep.mubr.msk.bf16.mxu0 %vm1202_vm2, %v11113_v48  ;;  %v18118_v53 = vld [vmem:[%s18297_s9 + $0x1c8] sm:$0xff]   ;;  %v5815_v48 = vor.u32 %v5814_v14, %v5811_v31  ;;  %v5829_v14 = vrot.slane %v5827_v16, 1  ;;  %v5848_v16 = vshll.u32 %v20238_v34, 16 }
 0x4a4   : > { %21210 = vst [vmem:[#allocation39_spill] sm:$0xff] %v20572_v26  ;;  %v20575_v41 = vpop.f32.mrb[62].mxu1  ;;  %v11116_v26 = vrot.slane %v18118_v53, 3  ;;  %v5807_v4 = vsel %vm5313_vm3, %v5797_v42, %v5806_v40  ;;  %v5824_v42 = vor.u32 %v5823_v0, %v5820_v52 }
 0x4a5   : > { %v20578_v12 = vpop.f32.mrb[63].mxu1  ;;  %v5816_v31 = vsel %vm5313_vm3, %v5806_v40, %v5815_v48  ;;  %v5845_v40 = vshrl.u32 %v20238_v34, 16 }
 0x4a6   : > { %v11117_v37 = vsel %vm11010_vm7, %v11114_v63, %v11116_v26  ;;  %v5832_v63 = vrot.slane %v5830_v43, 2 }
 0x4a7   : > { %15899 = vmatmul.mubr.msk.bf16.gmra.mrb[100].mxu1 %vm1202_vm2, %v5789_v62  ;;  %v5847_v0 = vrot.slane %v5845_v40, 1  ;;  %v5866_v40 = vshll.u32 %v20264_v29, 16 }
 0x4a8   : > { %15902 = vmatprep.mubr.msk.bf16.mxu1 %vm1202_vm2, %v5798_v54  ;;  %v11118_v54 = vrot.slane %v18119_v36, 3  ;;  %v5833_v2 = vor.u32 %v5832_v63, %v5829_v14  ;;  %v5850_v36 = vrot.slane %v5848_v16, 2  ;;  %v5857_v63 = vshll.u32 %v20259_v10, 16 }
 0x4aa   : > { %v20591_v18 = vpop.f32.mrb[64].mxu1  ;;  %16451 = vmatmul.mubr.msk.bf16.gmra.mrb[100].mxu0 %vm1202_vm2, %v11115_v8  ;;  %v5836_v8 = vshrl.u32 %v20233_v35, 16  ;;  %v11119_v59 = vsel %vm11010_vm7, %v11116_v26, %v11118_v54  ;;  %v5834_v26 = vsel %vm5313_vm3, %v5824_v42, %v5833_v2 }
 0x4ab   : > { %21211 = vst [vmem:[#allocation40_spill] sm:$0xff] %v20591_v18  ;;  %v20594_v53 = vpop.f32.mrb[65].mxu1  ;;  %16454 = vmatprep.mubr.msk.bf16.mxu0 %vm1202_vm2, %v11117_v37  ;;  %v18120_v18 = vld [vmem:[%s18297_s9 + $0x1d8] sm:$0xff]  }
 0x4ac   : > { %21212 = vst [vmem:[#allocation6_spill] sm:$0xff] %v20594_v53  ;;  %v20597_v62 = vpop.f32.mrb[66].mxu1  ;;  %v11120_v53 = vrot.slane %v18120_v18, 3  ;;  %v5838_v18 = vrot.slane %v5836_v8, 1 }
 0x4ad   : > { %21213 = vst [vmem:[#allocation5_spill] sm:$0xff] %v20597_v62  ;;  %v20600_v61 = vpop.f32.mrb[67].mxu1  ;;  %v5839_v62 = vshll.u32 %v20233_v35, 16  ;;  %v5825_v35 = vsel %vm5313_vm3, %v5815_v48, %v5824_v42  ;;  %v5854_v48 = vshrl.u32 %v20259_v10, 16  ;;  %v5851_v10 = vor.u32 %v5850_v36, %v5847_v0  ;;  %v20649_v36 = vld [vmem:[%s18297_s9 + $0x1f8] sm:$0xff]  }
 0x4ae   : > { %v11121_v43 = vsel %vm11010_vm7, %v11118_v54, %v11120_v53 }
 0x4af   : > { %15903 = vmatmul.mubr.msk.bf16.gmra.mrb[104].mxu1 %vm1202_vm2, %v5807_v4  ;;  %v5841_v37 = vrot.slane %v5839_v62, 2  ;;  %v18121_v4 = vld [vmem:[%s18297_s9 + $0x1e0] sm:$0xff]  }
 0x4b0   : > { %15906 = vmatprep.mubr.msk.bf16.mxu1 %vm1202_vm2, %v5816_v31  ;;  %v11122_v52 = vrot.slane %v18121_v4, 3  ;;  %v18122_v31 = vld [vmem:[%s18297_s9 + $0x1e8] sm:$0xff]   ;;  %v20623_v62 = vld [vmem:[%s21049_s2] ss:$0 sm:$0xff] }
 0x4b1   : > { %v11124_v14 = vrot.slane %v18122_v31, 3  ;;  %v5842_v34 = vor.u32 %v5841_v37, %v5838_v18  ;;  %v18123_v37 = vld [vmem:[%s18297_s9 + $0x1f0] sm:$0xff]  }
 0x4b2   : > { %16455 = vmatmul.mubr.msk.bf16.gmra.mrb[104].mxu0 %vm1202_vm2, %v11119_v59  ;;  %v5863_v59 = vshrl.u32 %v20264_v29, 16  ;;  %v11123_v18 = vsel %vm11010_vm7, %v11120_v53, %v11122_v52  ;;  %v5856_v53 = vrot.slane %v5854_v48, 1  ;;  %v5872_v48 = vshrl.u32 %v20285_v17, 16 }
 0x4b3   : > { %16458 = vmatprep.mubr.msk.bf16.mxu0 %vm1202_vm2, %v11121_v43 }
 0x4b5   : > { %v16352_v54 = vpop.f32.mrb[0].mxu0 }
 0x4b6   : > { %v16488_v8 = vadd.f32 %v16352_v54, %v20215_v46  ;;  %v11389_v42 = vpop.f32.mrb[1].mxu0  ;;  %v5843_v54 = vsel %vm5313_vm3, %v5833_v2, %v5842_v34 }
 0x4b7   : > { %15907 = vmatmul.mubr.msk.bf16.gmra.mrb[108].mxu1 %vm1202_vm2, %v5825_v35  ;;  %v16489_v16 = vadd.f32 %v11389_v42, %v20218_v56  ;;  %v16353_v43 = vpop.f32.mrb[2].mxu0  ;;  %v11126_v35 = vrot.slane %v18123_v37, 3  ;;  %v5859_v42 = vrot.slane %v5857_v63, 2  ;;  %v5875_v63 = vshll.u32 %v20285_v17, 16 }
 0x4b8   : > { %15910 = vmatprep.mubr.msk.bf16.mxu1 %vm1202_vm2, %v5834_v26  ;;  %v12077_v46 = vadd.f32 %v16488_v8, %v20623_v62  ;;  %v16490_v4 = vadd.f32 %v16353_v43, %v20221_v9  ;;  %v11392_v31 = vpop.f32.mrb[3].mxu0  ;;  %v11125_v26 = vsel %vm11010_vm7, %v11122_v52, %v11124_v14  ;;  %v11128_v9 = vrot.slane %v20649_v36, 3 }
 0x4b9   : > { %v12075_v29 = vadd.f32 %v16489_v16, %v20623_v62  ;;  %v16491_v56 = vadd.f32 %v11392_v31, %v20224_v30  ;;  %v5865_v52 = vrot.slane %v5863_v59, 1  ;;  %v5868_v8 = vrot.slane %v5866_v40, 2 }
 0x4ba   : > { %v12078_v0 = vadd.f32 %v16490_v4, %v20623_v62  ;;  %16459 = vmatmul.mubr.msk.bf16.gmra.mrb[108].mxu0 %vm1202_vm2, %v11123_v18  ;;  %v5852_v16 = vsel %vm5313_vm3, %v5842_v34, %v5851_v10  ;;  %v12213_v43 = vmax.f32 %v12077_v46, 0.0  ;;  %v11127_v59 = vsel %vm11010_vm7, %v11124_v14, %v11126_v35 }
 0x4bb   : > { %v12076_v2 = vadd.f32 %v16491_v56, %v20623_v62  ;;  %16462 = vmatprep.mubr.msk.bf16.mxu0 %vm1202_vm2, %v11125_v26  ;;  %v12211_v37 = vmax.f32 %v12075_v29, 0.0  ;;  %v5860_v40 = vor.u32 %v5859_v42, %v5856_v53  ;;  %v11129_v34 = vsel %vm11010_vm7, %v11126_v35, %v11128_v9 }
 0x4bc   : > { %v12214_v30 = vmax.f32 %v12078_v0, 0.0  ;;  %v5869_v17 = vor.u32 %v5868_v8, %v5865_v52  ;;  %v5884_v14 = vshll.u32 %v20290_v50, 16  ;;  %v5874_v42 = vrot.slane %v5872_v48, 1 }
 0x4bd   : > { %v12212_v18 = vmax.f32 %v12076_v2, 0.0  ;;  %v16356_v4 = vpop.f32.mrb[4].mxu0  ;;  %v5877_v52 = vrot.slane %v5875_v63, 2  ;;  %v5861_v2 = vsel %vm5313_vm3, %v5851_v10, %v5860_v40  ;;  %v5890_v10 = vshrl.u32 %v20311_v7, 16 }
 0x4be   : > { %v14224_v31 = vpack.c.bf16 %v12214_v30, %v12213_v43  ;;  %v16492_v26 = vadd.f32 %v16356_v4, %v20241_v45  ;;  %v11405_v56 = vpop.f32.mrb[5].mxu0  ;;  %v5886_v63 = vrot.slane %v5884_v14, 2  ;;  %v18126_v4 = vld [vmem:[%s18297_s9 + $0x208] sm:$0xff]  }
 0x4bf   : > { %15911 = vmatmul.mubr.msk.bf16.gmra.mrb[112].mxu1 %vm1202_vm2, %v5843_v54  ;;  %v14219_v46 = vpack.c.bf16 %v12212_v18, %v12211_v37  ;;  %v16493_v29 = vadd.f32 %v11405_v56, %v20244_v57  ;;  %v16357_v0 = vpop.f32.mrb[6].mxu0  ;;  %v5881_v54 = vshrl.u32 %v20290_v50, 16 }
 0x4c0   : > { %15914 = vmatprep.mubr.msk.bf16.mxu1 %vm1202_vm2, %v5852_v16  ;;  %14556 = vst [vmem:[%s20668_s8 + $0x8] sm:$0xff] %v14224_v31   ;;  %v12081_v45 = vadd.f32 %v16492_v26, %v20623_v62  ;;  %v16494_v53 = vadd.f32 %v16357_v0, %v20247_v25  ;;  %v11408_v35 = vpop.f32.mrb[7].mxu0  ;;  %v18125_v16 = vld [vmem:[%s18297_s9 + $0x200] sm:$0xff]   ;;  %v5870_v25 = vsel %vm5313_vm3, %v5860_v40, %v5869_v17  ;;  %v5899_v0 = vshrl.u32 %v20316_v39, 16 }
 0x4c1   : > { %14220 = vst [vmem:[%s20668_s8] sm:$0xff] %v14219_v46   ;;  %v12079_v57 = vadd.f32 %v16493_v29, %v20623_v62  ;;  %v16495_v8 = vadd.f32 %v11408_v35, %v20250_v51  ;;  %v11130_v43 = vrot.slane %v18125_v16, 3  ;;  %v5883_v48 = vrot.slane %v5881_v54, 1 }
 0x4c2   : > { %v12082_v50 = vadd.f32 %v16494_v53, %v20623_v62  ;;  %16463 = vmatmul.mubr.msk.bf16.gmra.mrb[112].mxu0 %vm1202_vm2, %v11127_v59  ;;  %v12217_v37 = vmax.f32 %v12081_v45, 0.0  ;;  %v11132_v51 = vrot.slane %v18126_v4, 3  ;;  %v5878_v31 = vor.u32 %v5877_v52, %v5874_v42 }
 0x4c3   : > { %v12080_v30 = vadd.f32 %v16495_v8, %v20623_v62  ;;  %16466 = vmatprep.mubr.msk.bf16.mxu0 %vm1202_vm2, %v11129_v34  ;;  %v12215_v26 = vmax.f32 %v12079_v57, 0.0  ;;  %v5893_v46 = vshll.u32 %v20311_v7, 16  ;;  %v5902_v54 = vshll.u32 %v20316_v39, 16  ;;  %v18127_v8 = vld [vmem:[%s18297_s9 + $0x210] sm:$0xff]  }
 0x4c4   : > { %v12218_v18 = vmax.f32 %v12082_v50, 0.0  ;;  %v11131_v7 = vsel %vm11010_vm7, %v11128_v9, %v11130_v43  ;;  %v5887_v35 = vor.u32 %v5886_v63, %v5883_v48  ;;  %v11133_v57 = vsel %vm11010_vm7, %v11130_v43, %v11132_v51 }
 0x4c5   : > { %v12216_v56 = vmax.f32 %v12080_v30, 0.0  ;;  %v16360_v59 = vpop.f32.mrb[8].mxu0  ;;  %v11134_v50 = vrot.slane %v18127_v8, 3  ;;  %v5879_v36 = vsel %vm5313_vm3, %v5869_v17, %v5878_v31  ;;  %v5892_v9 = vrot.slane %v5890_v10, 1 }
 0x4c6   : > { %v14234_v34 = vpack.c.bf16 %v12218_v18, %v12217_v37  ;;  %v16496_v40 = vadd.f32 %v16360_v59, %v20267_v13  ;;  %v11421_v29 = vpop.f32.mrb[9].mxu0  ;;  %v5895_v16 = vrot.slane %v5893_v46, 2  ;;  %v5904_v30 = vrot.slane %v5902_v54, 2  ;;  %v18128_v37 = vld [vmem:[%s18297_s9 + $0x218] sm:$0xff]   ;;  %v21214_v46 = vld [vmem:[#allocation8_spill] sm:$0xff] }
 0x4c7   : > { %15915 = vmatmul.mubr.msk.bf16.gmra.mrb[116].mxu1 %vm1202_vm2, %v5861_v2  ;;  %v14229_v14 = vpack.c.bf16 %v12216_v56, %v12215_v26  ;;  %v16497_v45 = vadd.f32 %v11421_v29, %v20270_v19  ;;  %v16361_v53 = vpop.f32.mrb[10].mxu0  ;;  %v11136_v17 = vrot.slane %v18128_v37, 3  ;;  %v5908_v56 = vshrl.u32 %v20337_v47, 16 }
 0x4c8   : > { %15918 = vmatprep.mubr.msk.bf16.mxu1 %vm1202_vm2, %v5870_v25  ;;  %14558 = vst [vmem:[%s20668_s8 + $0x18] sm:$0xff] %v14234_v34   ;;  %v12085_v13 = vadd.f32 %v16496_v40, %v20623_v62  ;;  %v16498_v42 = vadd.f32 %v16361_v53, %v20273_v20  ;;  %v11424_v52 = vpop.f32.mrb[11].mxu0  ;;  %v5901_v20 = vrot.slane %v5899_v0, 1  ;;  %v5888_v25 = vsel %vm5313_vm3, %v5878_v31, %v5887_v35  ;;  %v21215_v0 = vld [vmem:[#allocation9_spill] sm:$0xff] }
 0x4c9   : > { %14557 = vst [vmem:[%s20668_s8 + $0x10] sm:$0xff] %v14229_v14   ;;  %v12083_v19 = vadd.f32 %v16497_v45, %v20623_v62  ;;  %v16499_v39 = vadd.f32 %v11424_v52, %v20276_v32  ;;  %v11135_v32 = vsel %vm11010_vm7, %v11132_v51, %v11134_v50  ;;  %v5911_v59 = vshll.u32 %v20337_v47, 16  ;;  %v21216_v45 = vld [vmem:[#allocation15_spill] sm:$0xff] }
 0x4ca   : > { %v12086_v2 = vadd.f32 %v16498_v42, %v20623_v62  ;;  %16467 = vmatmul.mubr.msk.bf16.gmra.mrb[116].mxu0 %vm1202_vm2, %v11131_v7  ;;  %v12221_v48 = vmax.f32 %v12085_v13, 0.0  ;;  %v5896_v51 = vor.u32 %v5895_v16, %v5892_v9  ;;  %v5905_v40 = vor.u32 %v5904_v30, %v5901_v20  ;;  %v21217_v13 = vld [vmem:[#allocation10_spill] sm:$0xff]  ;;  %v18129_v20 = vld [vmem:[%s18297_s9 + $0x220] sm:$0xff]  }
 0x4cb   : > { %v12084_v43 = vadd.f32 %v16499_v39, %v20623_v62  ;;  %16470 = vmatprep.mubr.msk.bf16.mxu0 %vm1202_vm2, %v11133_v57  ;;  %v12219_v18 = vmax.f32 %v12083_v19, 0.0  ;;  %v5917_v53 = vshrl.u32 %v21216_v45, 16  ;;  %v5920_v7 = vshll.u32 %v21216_v45, 16  ;;  %v21218_v19 = vld [vmem:[#allocation13_spill] sm:$0xff] }
 0x4cc   : > { %v12222_v63 = vmax.f32 %v12086_v2, 0.0  ;;  %v11137_v57 = vsel %vm11010_vm7, %v11134_v50, %v11136_v17  ;;  %v5913_v9 = vrot.slane %v5911_v59, 2  ;;  %v5897_v16 = vsel %vm5313_vm3, %v5887_v35, %v5896_v51 }
 0x4cd   : > { %v12220_v4 = vmax.f32 %v12084_v43, 0.0  ;;  %v16364_v26 = vpop.f32.mrb[12].mxu0  ;;  %v11138_v30 = vrot.slane %v18129_v20, 3  ;;  %v5906_v50 = vsel %vm5313_vm3, %v5896_v51, %v5905_v40  ;;  %v18132_v20 = vld [vmem:[%s18297_s9 + $0x230] sm:$0xff]  }
 0x4ce   : > { %v14244_v10 = vpack.c.bf16 %v12222_v63, %v12221_v48  ;;  %v16500_v31 = vadd.f32 %v16364_v26, %v21214_v46  ;;  %v11437_v34 = vpop.f32.mrb[13].mxu0  ;;  %v5922_v48 = vrot.slane %v5920_v7, 2 }
 0x4cf   : > { %15919 = vmatmul.mubr.msk.bf16.gmra.mrb[120].mxu1 %vm1202_vm2, %v5879_v36  ;;  %v14239_v29 = vpack.c.bf16 %v12220_v4, %v12219_v18  ;;  %v16501_v54 = vadd.f32 %v11437_v34, %v21215_v0  ;;  %v16365_v14 = vpop.f32.mrb[14].mxu0  ;;  %v5910_v36 = vrot.slane %v5908_v56, 1  ;;  %v18130_v18 = vld [vmem:[%s18297_s9 + $0x228] sm:$0xff]   ;;  %v18131_v34 = vld [vmem:[%s18297_s9 + $0x230] ss:$0 sps:$4 sm:$0x33]  }
 0x4d0   : > { %15922 = vmatprep.mubr.msk.bf16.mxu1 %vm1202_vm2, %v5888_v25  ;;  %14560 = vst [vmem:[%s20668_s8 + $0x28] sm:$0xff] %v14244_v10   ;;  %v12089_v47 = vadd.f32 %v16500_v31, %v20623_v62  ;;  %v16502_v42 = vadd.f32 %v16365_v14, %v21217_v13  ;;  %v11440_v52 = vpop.f32.mrb[15].mxu0  ;;  %v5919_v25 = vrot.slane %v5917_v53, 1  ;;  %v11140_v4 = vrot.slane %v18130_v18, 3  ;;  %v21219_v10 = vld [vmem:[#allocation11_spill] sm:$0xff]  ;;  %v21221_v13 = vld [vmem:[#allocation14_spill] sm:$0xff] }
 0x4d1   : > { %14559 = vst [vmem:[%s20668_s8 + $0x20] sm:$0xff] %v14239_v29   ;;  %v12087_v8 = vadd.f32 %v16501_v54, %v20623_v62  ;;  %v16503_v39 = vadd.f32 %v11440_v52, %v21218_v19  ;;  %v5914_v35 = vor.u32 %v5913_v9, %v5910_v36  ;;  %v5926_v51 = vshrl.u32 %v18131_v34, 16  ;;  %v21220_v54 = vld [vmem:[#allocation12_spill] sm:$0xff]  ;;  %v21222_v19 = vld [vmem:[#allocation17_spill] sm:$0xff] }
 0x4d2   : > { %v12090_v2 = vadd.f32 %v16502_v42, %v20623_v62  ;;  %16471 = vmatmul.mubr.msk.bf16.gmra.mrb[120].mxu0 %vm1202_vm2, %v11135_v32  ;;  %v12225_v63 = vmax.f32 %v12089_v47, 0.0  ;;  %v5929_v29 = vshll.u32 %v18131_v34, 16  ;;  %v11139_v53 = vsel %vm11010_vm7, %v11136_v17, %v11138_v30 }
 0x4d3   : > { %v12088_v43 = vadd.f32 %v16503_v39, %v20623_v62  ;;  %16474 = vmatprep.mubr.msk.bf16.mxu0 %vm1202_vm2, %v11137_v57  ;;  %v12223_v26 = vmax.f32 %v12087_v8, 0.0  ;;  %v5923_v7 = vor.u32 %v5922_v48, %v5919_v25  ;;  %v11141_v57 = vsel %vm11010_vm7, %v11138_v30, %v11140_v4  ;;  %v18133_v48 = vld [vmem:[%s18297_s9 + $0x238] sm:$0xff]  }
 0x4d4   : > { %v12226_v37 = vmax.f32 %v12090_v2, 0.0  ;;  %v5915_v17 = vsel %vm5313_vm3, %v5905_v40, %v5914_v35  ;;  %v5928_v9 = vrot.slane %v5926_v51, 1  ;;  %v5931_v2 = vrot.slane %v5929_v29, 2 }
 0x4d5   : > { %v12224_v56 = vmax.f32 %v12088_v43, 0.0  ;;  %v16368_v32 = vpop.f32.mrb[16].mxu0  ;;  %v11142_v30 = vrot.slane %v18132_v20, 3  ;;  %v5924_v43 = vsel %vm5313_vm3, %v5914_v35, %v5923_v7  ;;  %v21224_v35 = vld [vmem:[#allocation18_spill] sm:$0xff] }
 0x4d6   : > { %v14254_v59 = vpack.c.bf16 %v12226_v37, %v12225_v63  ;;  %v16504_v46 = vadd.f32 %v16368_v32, %v21219_v10  ;;  %v11453_v31 = vpop.f32.mrb[17].mxu0  ;;  %v11144_v63 = vrot.slane %v18133_v48, 3  ;;  %v5932_v10 = vor.u32 %v5931_v2, %v5928_v9 }
 0x4d7   : > { %15923 = vmatmul.mubr.msk.bf16.gmra.mrb[124].mxu1 %vm1202_vm2, %v5897_v16  ;;  %v14249_v0 = vpack.c.bf16 %v12224_v56, %v12223_v26  ;;  %v16505_v14 = vadd.f32 %v11453_v31, %v21220_v54  ;;  %v16369_v45 = vpop.f32.mrb[18].mxu0  ;;  %v21223_v56 = vld [vmem:[#allocation16_spill] sm:$0xff]  ;;  %v11143_v51 = vsel %vm11010_vm7, %v11140_v4, %v11142_v30 }
 0x4d8   : > { %15926 = vmatprep.mubr.msk.bf16.mxu1 %vm1202_vm2, %v5906_v50  ;;  %14562 = vst [vmem:[%s20668_s8 + $0x38] sm:$0xff] %v14254_v59   ;;  %v12093_v47 = vadd.f32 %v16504_v46, %v20623_v62  ;;  %v16506_v42 = vadd.f32 %v16369_v45, %v21221_v13  ;;  %v11456_v52 = vpop.f32.mrb[19].mxu0  ;;  %v11145_v45 = vsel %vm11010_vm7, %v11142_v30, %v11144_v63 }
 0x4d9   : > { %14561 = vst [vmem:[%s20668_s8 + $0x30] sm:$0xff] %v14249_v0   ;;  %v12091_v8 = vadd.f32 %v16505_v14, %v20623_v62  ;;  %v16507_v39 = vadd.f32 %v11456_v52, %v21222_v19  ;;  %v21225_v0 = vld [vmem:[#allocation21_spill] sm:$0xff]  ;;  %v5933_v52 = vsel %vm5313_vm3, %v5923_v7, %v5932_v10 }
 0x4da   : > { %v12094_v36 = vadd.f32 %v16506_v42, %v20623_v62  ;;  %16475 = vmatmul.mubr.msk.bf16.gmra.mrb[124].mxu0 %vm1202_vm2, %v11139_v53  ;;  %v12229_v50 = vmax.f32 %v12093_v47, 0.0  ;;  %v21226_v47 = vld [vmem:[#allocation19_spill] sm:$0xff] }
 0x4db   : > { %v12092_v16 = vadd.f32 %v16507_v39, %v20623_v62  ;;  %16478 = vmatprep.mubr.msk.bf16.mxu0 %vm1202_vm2, %v11141_v57  ;;  %v12227_v37 = vmax.f32 %v12091_v8, 0.0  ;;  %v18134_v57 = vld [vmem:[%s18297_s9 + $0x240] ss:$0 sps:$4 sm:$0x77]  }
 0x4dc   : > { %v12230_v25 = vmax.f32 %v12094_v36, 0.0  ;;  %v11146_v8 = vrot.slane %v18134_v57, 3 }
 0x4dd   : > { %v12228_v18 = vmax.f32 %v12092_v16, 0.0  ;;  %v16372_v26 = vpop.f32.mrb[20].mxu0  ;;  %v21227_v16 = vld [vmem:[#allocation20_spill] sm:$0xff] }
 0x4de   : > { %v14264_v40 = vpack.c.bf16 %v12230_v25, %v12229_v50  ;;  %v16508_v32 = vadd.f32 %v16372_v26, %v21223_v56  ;;  %v11469_v59 = vpop.f32.mrb[21].mxu0  ;;  %v11147_v48 = vsel %vm11010_vm7, %v11144_v63, %v11146_v8 }
 0x4df   : > { %15927 = vmatmul.mubr.msk.bf16.gmra.mrb[128].mxu1 %vm1202_vm2, %v5915_v17  ;;  %v14259_v46 = vpack.c.bf16 %v12228_v18, %v12227_v37  ;;  %v16509_v31 = vadd.f32 %v11469_v59, %v21224_v35  ;;  %v16373_v34 = vpop.f32.mrb[22].mxu0 }
 0x4e0   : > { %15930 = vmatprep.mubr.msk.bf16.mxu1 %vm1202_vm2, %v5924_v43  ;;  %14564 = vst [vmem:[%s20668_s8 + $0x48] sm:$0xff] %v14264_v40   ;;  %v12097_v29 = vadd.f32 %v16508_v32, %v20623_v62  ;;  %v16510_v54 = vadd.f32 %v16373_v34, %v21225_v0  ;;  %v11472_v14 = vpop.f32.mrb[23].mxu0  ;;  %v21228_v43 = vld [vmem:[#allocation22_spill] sm:$0xff]  ;;  %v21229_v0 = vld [vmem:[#allocation25_spill] sm:$0xff] }
 0x4e1   : > { %14563 = vst [vmem:[%s20668_s8 + $0x40] sm:$0xff] %v14259_v46   ;;  %v12095_v53 = vadd.f32 %v16509_v31, %v20623_v62  ;;  %v16511_v13 = vadd.f32 %v11472_v14, %v21226_v47 }
 0x4e2   : > { %v12098_v42 = vadd.f32 %v16510_v54, %v20623_v62  ;;  %16479 = vmatmul.mubr.msk.bf16.gmra.mrb[128].mxu0 %vm1202_vm2, %v11143_v51  ;;  %v12233_v19 = vmax.f32 %v12097_v29, 0.0 }
 0x4e3   : > { %v12096_v4 = vadd.f32 %v16511_v13, %v20623_v62  ;;  %16482 = vmatprep.mubr.msk.bf16.mxu0 %vm1202_vm2, %v11145_v45  ;;  %v12231_v36 = vmax.f32 %v12095_v53, 0.0 }
 0x4e4   : > { %v12234_v39 = vmax.f32 %v12098_v42, 0.0 }
 0x4e5   : > { %v12232_v17 = vmax.f32 %v12096_v4, 0.0  ;;  %v16376_v9 = vpop.f32.mrb[24].mxu0 }
 0x4e6   : > { %v14274_v2 = vpack.c.bf16 %v12234_v39, %v12233_v19  ;;  %v16512_v20 = vadd.f32 %v16376_v9, %v21227_v16  ;;  %v11485_v30 = vpop.f32.mrb[25].mxu0 }
 0x4e7   : > { %15931 = vmatmul.mubr.msk.bf16.gmra.mrb[132].mxu1 %vm1202_vm2, %v5933_v52  ;;  %v14269_v7 = vpack.c.bf16 %v12232_v17, %v12231_v36  ;;  %v16513_v50 = vadd.f32 %v11485_v30, %v21228_v43  ;;  %v16377_v25 = vpop.f32.mrb[26].mxu0  ;;  %v21230_v36 = vld [vmem:[#allocation23_spill] sm:$0xff] }
 0x4e8   : > { %14566 = vst [vmem:[%s20668_s8 + $0x58] sm:$0xff] %v14274_v2   ;;  %v12101_v37 = vadd.f32 %v16512_v20, %v20623_v62  ;;  %v16514_v18 = vadd.f32 %v16377_v25, %v20376_v23  ;;  %v11488_v26 = vpop.f32.mrb[27].mxu0  ;;  %v21231_v2 = vld [vmem:[#allocation24_spill] sm:$0xff] }
 0x4e9   : > { %14565 = vst [vmem:[%s20668_s8 + $0x50] sm:$0xff] %v14269_v7   ;;  %v12099_v40 = vadd.f32 %v16513_v50, %v20623_v62  ;;  %v16515_v56 = vadd.f32 %v11488_v26, %v20379_v60 }
 0x4ea   : > { %v12102_v32 = vadd.f32 %v16514_v18, %v20623_v62  ;;  %16483 = vmatmul.mubr.msk.bf16.gmra.mrb[132].mxu0 %vm1202_vm2, %v11147_v48  ;;  %v12237_v63 = vmax.f32 %v12101_v37, 0.0 }
 0x4eb   : > { %v12100_v59 = vadd.f32 %v16515_v56, %v20623_v62  ;;  %v12235_v46 = vmax.f32 %v12099_v40, 0.0 }
 0x4ec   : > { %v12238_v10 = vmax.f32 %v12102_v32, 0.0 }
 0x4ed   : > { %v12236_v35 = vmax.f32 %v12100_v59, 0.0  ;;  %v16380_v31 = vpop.f32.mrb[28].mxu0  ;;  %v21232_v59 = vld [vmem:[#allocation26_spill] sm:$0xff] }
 0x4ee   : > { %v14284_v23 = vpack.c.bf16 %v12238_v10, %v12237_v63  ;;  %v16516_v34 = vadd.f32 %v16380_v31, %v20393_v27  ;;  %v11501_v51 = vpop.f32.mrb[29].mxu0 }
 0x4ef   : > { %v14279_v29 = vpack.c.bf16 %v12236_v35, %v12235_v46  ;;  %v16517_v54 = vadd.f32 %v11501_v51, %v21229_v0  ;;  %v16381_v60 = vpop.f32.mrb[30].mxu0  ;;  %v21233_v46 = vld [vmem:[#allocation29_spill] sm:$0xff] }
 0x4f0   : > { %14568 = vst [vmem:[%s20668_s8 + $0x68] sm:$0xff] %v14284_v23   ;;  %v12105_v14 = vadd.f32 %v16516_v34, %v20623_v62  ;;  %v16518_v45 = vadd.f32 %v16381_v60, %v20399_v1  ;;  %v11504_v53 = vpop.f32.mrb[31].mxu0 }
 0x4f1   : > { %14567 = vst [vmem:[%s20668_s8 + $0x60] sm:$0xff] %v14279_v29   ;;  %v12103_v47 = vadd.f32 %v16517_v54, %v20623_v62  ;;  %v16519_v13 = vadd.f32 %v11504_v53, %v20402_v6 }
 0x4f2   : > { %v12106_v42 = vadd.f32 %v16518_v45, %v20623_v62  ;;  %v12241_v52 = vmax.f32 %v12105_v14, 0.0 }
 0x4f3   : > { %v12104_v27 = vadd.f32 %v16519_v13, %v20623_v62  ;;  %v12239_v57 = vmax.f32 %v12103_v47, 0.0 }
 0x4f4   : > { %v12242_v4 = vmax.f32 %v12106_v42, 0.0  ;;  %v21234_v42 = vld [vmem:[#allocation27_spill] sm:$0xff] }
 0x4f5   : > { %v12240_v8 = vmax.f32 %v12104_v27, 0.0  ;;  %v16384_v19 = vpop.f32.mrb[32].mxu0 }
 0x4f6   : > { %v14294_v39 = vpack.c.bf16 %v12242_v4, %v12241_v52  ;;  %v16520_v1 = vadd.f32 %v16384_v19, %v21230_v36  ;;  %v11517_v17 = vpop.f32.mrb[33].mxu0  ;;  %v21235_v4 = vld [vmem:[#allocation28_spill] sm:$0xff] }
 0x4f7   : > { %v14289_v9 = vpack.c.bf16 %v12240_v8, %v12239_v57  ;;  %v16521_v16 = vadd.f32 %v11517_v17, %v21231_v2  ;;  %v16385_v20 = vpop.f32.mrb[34].mxu0 }
 0x4f8   : > { %14570 = vst [vmem:[%s20668_s8 + $0x78] sm:$0xff] %v14294_v39   ;;  %v12109_v6 = vadd.f32 %v16520_v1, %v20623_v62  ;;  %v16522_v30 = vadd.f32 %v16385_v20, %v20421_v58  ;;  %v11520_v7 = vpop.f32.mrb[35].mxu0 }
 0x4f9   : > { %14569 = vst [vmem:[%s20668_s8 + $0x70] sm:$0xff] %v14289_v9   ;;  %v12107_v43 = vadd.f32 %v16521_v16, %v20623_v62  ;;  %v16523_v50 = vadd.f32 %v11520_v7, %v20424_v3 }
 0x4fa   : > { %v12110_v25 = vadd.f32 %v16522_v30, %v20623_v62  ;;  %v12245_v37 = vmax.f32 %v12109_v6, 0.0 }
 0x4fb   : > { %v12108_v48 = vadd.f32 %v16523_v50, %v20623_v62  ;;  %v12243_v26 = vmax.f32 %v12107_v43, 0.0  ;;  %v21236_v43 = vld [vmem:[#allocation30_spill] sm:$0xff] }
 0x4fc   : > { %v12246_v18 = vmax.f32 %v12110_v25, 0.0 }
 0x4fd   : > { %v12244_v40 = vmax.f32 %v12108_v48, 0.0  ;;  %v16388_v56 = vpop.f32.mrb[36].mxu0  ;;  %v21237_v48 = vld [vmem:[#allocation33_spill] sm:$0xff] }
 0x4fe   : > { %v14304_v32 = vpack.c.bf16 %v12246_v18, %v12245_v37  ;;  %v16524_v58 = vadd.f32 %v16388_v56, %v21232_v59  ;;  %v11533_v63 = vpop.f32.mrb[37].mxu0 }
 0x4ff   : > { %v14299_v10 = vpack.c.bf16 %v12244_v40, %v12243_v26  ;;  %v16525_v35 = vadd.f32 %v11533_v63, %v21233_v46  ;;  %v16389_v31 = vpop.f32.mrb[38].mxu0 }
 0x500   : > { %14572 = vst [vmem:[%s20668_s8 + $0x88] sm:$0xff] %v14304_v32   ;;  %v12113_v3 = vadd.f32 %v16524_v58, %v20623_v62  ;;  %v16526_v23 = vadd.f32 %v16389_v31, %v20443_v33  ;;  %v11536_v34 = vpop.f32.mrb[39].mxu0 }
 0x501   : > { %14571 = vst [vmem:[%s20668_s8 + $0x80] sm:$0xff] %v14299_v10   ;;  %v12111_v51 = vadd.f32 %v16525_v35, %v20623_v62  ;;  %v16527_v29 = vadd.f32 %v11536_v34, %v20446_v15 }
 0x502   : > { %v12114_v0 = vadd.f32 %v16526_v23, %v20623_v62  ;;  %v12249_v60 = vmax.f32 %v12113_v3, 0.0  ;;  %v21238_v23 = vld [vmem:[#allocation31_spill] sm:$0xff] }
 0x503   : > { %v12112_v54 = vadd.f32 %v16527_v29, %v20623_v62  ;;  %v12247_v45 = vmax.f32 %v12111_v51, 0.0  ;;  %v21239_v29 = vld [vmem:[#allocation32_spill] sm:$0xff] }
 0x504   : > { %v12250_v14 = vmax.f32 %v12114_v0, 0.0 }
 0x505   : > { %v12248_v53 = vmax.f32 %v12112_v54, 0.0  ;;  %v16392_v47 = vpop.f32.mrb[40].mxu0 }
 0x506   : > { %v14314_v13 = vpack.c.bf16 %v12250_v14, %v12249_v60  ;;  %v16528_v33 = vadd.f32 %v16392_v47, %v21234_v42  ;;  %v11549_v27 = vpop.f32.mrb[41].mxu0 }
 0x507   : > { %v14309_v52 = vpack.c.bf16 %v12248_v53, %v12247_v45  ;;  %v16529_v57 = vadd.f32 %v11549_v27, %v21235_v4  ;;  %v16393_v8 = vpop.f32.mrb[42].mxu0 }
 0x508   : > { %14574 = vst [vmem:[%s20668_s8 + $0x98] sm:$0xff] %v14314_v13   ;;  %v12117_v15 = vadd.f32 %v16528_v33, %v20623_v62  ;;  %v16530_v19 = vadd.f32 %v16393_v8, %v20465_v22  ;;  %v11552_v39 = vpop.f32.mrb[43].mxu0  ;;  %v21240_v8 = vld [vmem:[#allocation34_spill] sm:$0xff] }
 0x509   : > { %14573 = vst [vmem:[%s20668_s8 + $0x90] sm:$0xff] %v14309_v52   ;;  %v12115_v36 = vadd.f32 %v16529_v57, %v20623_v62  ;;  %v16531_v1 = vadd.f32 %v11552_v39, %v20468_v44  ;;  %v21241_v39 = vld [vmem:[#allocation37_spill] sm:$0xff] }
 0x50a   : > { %v12118_v17 = vadd.f32 %v16530_v19, %v20623_v62  ;;  %v12253_v2 = vmax.f32 %v12117_v15, 0.0 }
 0x50b   : > { %v12116_v9 = vadd.f32 %v16531_v1, %v20623_v62  ;;  %v12251_v20 = vmax.f32 %v12115_v36, 0.0 }
 0x50c   : > { %v12254_v16 = vmax.f32 %v12118_v17, 0.0 }
 0x50d   : > { %v12252_v6 = vmax.f32 %v12116_v9, 0.0  ;;  %v16396_v30 = vpop.f32.mrb[44].mxu0 }
 0x50e   : > { %v14324_v7 = vpack.c.bf16 %v12254_v16, %v12253_v2  ;;  %v16532_v22 = vadd.f32 %v16396_v30, %v21236_v43  ;;  %v11565_v50 = vpop.f32.mrb[45].mxu0 }
 0x50f   : > { %v14319_v25 = vpack.c.bf16 %v12252_v6, %v12251_v20  ;;  %v16533_v37 = vadd.f32 %v11565_v50, %v21237_v48  ;;  %v16397_v18 = vpop.f32.mrb[46].mxu0  ;;  %v21242_v48 = vld [vmem:[#allocation35_spill] sm:$0xff] }
 0x510   : > { %14576 = vst [vmem:[%s20668_s8 + $0xa8] sm:$0xff] %v14324_v7   ;;  %v12121_v44 = vadd.f32 %v16532_v22, %v20623_v62  ;;  %v16534_v26 = vadd.f32 %v16397_v18, %v20487_v55  ;;  %v11568_v40 = vpop.f32.mrb[47].mxu0 }
 0x511   : > { %14575 = vst [vmem:[%s20668_s8 + $0xa0] sm:$0xff] %v14319_v25   ;;  %v12119_v56 = vadd.f32 %v16533_v37, %v20623_v62  ;;  %v16535_v32 = vadd.f32 %v11568_v40, %v20490_v21 }
 0x512   : > { %v12122_v59 = vadd.f32 %v16534_v26, %v20623_v62  ;;  %v12257_v63 = vmax.f32 %v12121_v44, 0.0  ;;  %v21243_v44 = vld [vmem:[#allocation36_spill] sm:$0xff] }
 0x513   : > { %v12120_v58 = vadd.f32 %v16535_v32, %v20623_v62  ;;  %v12255_v46 = vmax.f32 %v12119_v56, 0.0 }
 0x514   : > { %v12258_v10 = vmax.f32 %v12122_v59, 0.0 }
 0x515   : > { %v12256_v35 = vmax.f32 %v12120_v58, 0.0  ;;  %v16400_v31 = vpop.f32.mrb[48].mxu0 }
 0x516   : > { %v14334_v3 = vpack.c.bf16 %v12258_v10, %v12257_v63  ;;  %v16536_v55 = vadd.f32 %v16400_v31, %v21238_v23  ;;  %v11581_v34 = vpop.f32.mrb[49].mxu0 }
 0x517   : > { %v14329_v51 = vpack.c.bf16 %v12256_v35, %v12255_v46  ;;  %v16537_v0 = vadd.f32 %v11581_v34, %v21239_v29  ;;  %v16401_v54 = vpop.f32.mrb[50].mxu0  ;;  %v21244_v34 = vld [vmem:[#allocation38_spill] sm:$0xff] }
 0x518   : > { %14578 = vst [vmem:[%s20668_s8 + $0xb8] sm:$0xff] %v14334_v3   ;;  %v12125_v21 = vadd.f32 %v16536_v55, %v20623_v62  ;;  %v16538_v60 = vadd.f32 %v16401_v54, %v20509_v49  ;;  %v11584_v14 = vpop.f32.mrb[51].mxu0 }
 0x519   : > { %14577 = vst [vmem:[%s20668_s8 + $0xb0] sm:$0xff] %v14329_v51   ;;  %v12123_v45 = vadd.f32 %v16537_v0, %v20623_v62  ;;  %v16539_v53 = vadd.f32 %v11584_v14, %v20512_v5  ;;  %v21245_v0 = vld [vmem:[#allocation39_spill] sm:$0xff] }
 0x51a   : > { %v12126_v47 = vadd.f32 %v16538_v60, %v20623_v62  ;;  %v12261_v42 = vmax.f32 %v12125_v21, 0.0 }
 0x51b   : > { %v12124_v13 = vadd.f32 %v16539_v53, %v20623_v62  ;;  %v12259_v27 = vmax.f32 %v12123_v45, 0.0 }
 0x51c   : > { %v12262_v33 = vmax.f32 %v12126_v47, 0.0 }
 0x51d   : > { %v12260_v52 = vmax.f32 %v12124_v13, 0.0  ;;  %v16404_v4 = vpop.f32.mrb[52].mxu0 }
 0x51e   : > { %v14344_v57 = vpack.c.bf16 %v12262_v33, %v12261_v42  ;;  %v16540_v49 = vadd.f32 %v16404_v4, %v21240_v8  ;;  %v11597_v15 = vpop.f32.mrb[53].mxu0  ;;  %v21246_v8 = vld [vmem:[#allocation40_spill] sm:$0xff] }
 0x51f   : > { %v14339_v19 = vpack.c.bf16 %v12260_v52, %v12259_v27  ;;  %v16541_v36 = vadd.f32 %v11597_v15, %v21241_v39  ;;  %v16405_v1 = vpop.f32.mrb[54].mxu0 }
 0x520   : > { %14580 = vst [vmem:[%s20668_s8 + $0xc8] sm:$0xff] %v14344_v57   ;;  %v12129_v5 = vadd.f32 %v16540_v49, %v20623_v62  ;;  %v16542_v17 = vadd.f32 %v16405_v1, %v20531_v28  ;;  %v11600_v9 = vpop.f32.mrb[55].mxu0  ;;  %v21248_v1 = vld [vmem:[#allocation5_spill] sm:$0xff] }
 0x521   : > { %14579 = vst [vmem:[%s20668_s8 + $0xc0] sm:$0xff] %v14339_v19   ;;  %v12127_v2 = vadd.f32 %v16541_v36, %v20623_v62  ;;  %v16543_v16 = vadd.f32 %v11600_v9, %v20534_v11  ;;  %v21247_v19 = vld [vmem:[#allocation6_spill] sm:$0xff] }
 0x522   : > { %v12130_v20 = vadd.f32 %v16542_v17, %v20623_v62  ;;  %v12265_v30 = vmax.f32 %v12129_v5, 0.0 }
 0x523   : > { %v12128_v6 = vadd.f32 %v16543_v16, %v20623_v62  ;;  %v12263_v43 = vmax.f32 %v12127_v2, 0.0 }
 0x524   : > { %v12266_v7 = vmax.f32 %v12130_v20, 0.0 }
 0x525   : > { %v12264_v22 = vmax.f32 %v12128_v6, 0.0  ;;  %v16408_v50 = vpop.f32.mrb[56].mxu0 }
 0x526   : > { %v14354_v25 = vpack.c.bf16 %v12266_v7, %v12265_v30  ;;  %v16544_v28 = vadd.f32 %v16408_v50, %v21242_v48  ;;  %v11613_v37 = vpop.f32.mrb[57].mxu0 }
 0x527   : > { %v14349_v18 = vpack.c.bf16 %v12264_v22, %v12263_v43  ;;  %v16545_v26 = vadd.f32 %v11613_v37, %v21243_v44  ;;  %v16409_v40 = vpop.f32.mrb[58].mxu0 }
 0x528   : > { %14582 = vst [vmem:[%s20668_s8 + $0xd8] sm:$0xff] %v14354_v25   ;;  %v12133_v11 = vadd.f32 %v16544_v28, %v20623_v62  ;;  %v16546_v56 = vadd.f32 %v16409_v40, %v20553_v38  ;;  %v11616_v32 = vpop.f32.mrb[59].mxu0 }
 0x529   : > { %14581 = vst [vmem:[%s20668_s8 + $0xd0] sm:$0xff] %v14349_v18   ;;  %v12131_v59 = vadd.f32 %v16545_v26, %v20623_v62  ;;  %v16547_v58 = vadd.f32 %v11616_v32, %v20556_v24 }
 0x52a   : > { %v12134_v63 = vadd.f32 %v16546_v56, %v20623_v62  ;;  %v12269_v46 = vmax.f32 %v12133_v11, 0.0 }
 0x52b   : > { %v12132_v10 = vadd.f32 %v16547_v58, %v20623_v62  ;;  %v12267_v31 = vmax.f32 %v12131_v59, 0.0 }
 0x52c   : > { %v12270_v35 = vmax.f32 %v12134_v63, 0.0 }
 0x52d   : > { %v12268_v3 = vmax.f32 %v12132_v10, 0.0  ;;  %v16412_v23 = vpop.f32.mrb[60].mxu0 }
 0x52e   : > { %v14364_v55 = vpack.c.bf16 %v12270_v35, %v12269_v46  ;;  %v16548_v38 = vadd.f32 %v16412_v23, %v21244_v34  ;;  %v11629_v51 = vpop.f32.mrb[61].mxu0 }
 0x52f   : > { %v14359_v29 = vpack.c.bf16 %v12268_v3, %v12267_v31  ;;  %v16549_v54 = vadd.f32 %v11629_v51, %v21245_v0  ;;  %v16413_v21 = vpop.f32.mrb[62].mxu0 }
 0x530   : > { %14584 = vst [vmem:[%s20668_s8 + $0xe8] sm:$0xff] %v14364_v55   ;;  %v12137_v24 = vadd.f32 %v16548_v38, %v20623_v62  ;;  %v16550_v60 = vadd.f32 %v16413_v21, %v20575_v41  ;;  %v11632_v14 = vpop.f32.mrb[63].mxu0 }
 0x531   : > { %14583 = vst [vmem:[%s20668_s8 + $0xe0] sm:$0xff] %v14359_v29   ;;  %v12135_v45 = vadd.f32 %v16549_v54, %v20623_v62  ;;  %v16551_v53 = vadd.f32 %v11632_v14, %v20578_v12 }
 0x532   : > { %v12138_v47 = vadd.f32 %v16550_v60, %v20623_v62  ;;  %v12273_v42 = vmax.f32 %v12137_v24, 0.0 }
 0x533   : > { %v12136_v13 = vadd.f32 %v16551_v53, %v20623_v62  ;;  %v12271_v27 = vmax.f32 %v12135_v45, 0.0 }
 0x534   : > { %v12274_v33 = vmax.f32 %v12138_v47, 0.0 }
 0x535   : > { %v12272_v52 = vmax.f32 %v12136_v13, 0.0  ;;  %v16416_v4 = vpop.f32.mrb[64].mxu0 }
 0x536   : > { %v14374_v57 = vpack.c.bf16 %v12274_v33, %v12273_v42  ;;  %v16552_v41 = vadd.f32 %v16416_v4, %v21246_v8  ;;  %v11645_v49 = vpop.f32.mrb[65].mxu0 }
 0x537   : > { %v14369_v15 = vpack.c.bf16 %v12272_v52, %v12271_v27  ;;  %v16553_v39 = vadd.f32 %v11645_v49, %v21247_v19  ;;  %v16417_v36 = vpop.f32.mrb[66].mxu0 }
 0x538   : > { %14586 = vst [vmem:[%s20668_s8 + $0xf8] sm:$0xff] %v14374_v57   ;;  %v12141_v12 = vadd.f32 %v16552_v41, %v20623_v62  ;;  %v16554_v5 = vadd.f32 %v16417_v36, %v21248_v1  ;;  %v11648_v17 = vpop.f32.mrb[67].mxu0 }
 0x539   : > { %14585 = vst [vmem:[%s20668_s8 + $0xf0] sm:$0xff] %v14369_v15   ;;  %v12139_v2 = vadd.f32 %v16553_v39, %v20623_v62  ;;  %v16555_v16 = vadd.f32 %v11648_v17, %v20600_v61 }
 0x53a   : > { %v15868_v9 = vpop.f32.mrb[68].mxu1  ;;  %v12142_v6 = vadd.f32 %v16554_v5, %v20623_v62  ;;  %v12277_v22 = vmax.f32 %v12141_v12, 0.0 }
 0x53b   : > { %v6447_v20 = vpop.f32.mrb[69].mxu1  ;;  %v12140_v7 = vadd.f32 %v16555_v16, %v20623_v62  ;;  %v12275_v25 = vmax.f32 %v12139_v2, 0.0 }
 0x53c   : > { %v15869_v30 = vpop.f32.mrb[70].mxu1  ;;  %v12278_v50 = vmax.f32 %v12142_v6, 0.0 }
 0x53d   : > { %v6450_v43 = vpop.f32.mrb[71].mxu1  ;;  %v12276_v48 = vmax.f32 %v12140_v7, 0.0  ;;  %v16420_v28 = vpop.f32.mrb[68].mxu0 }
 0x53e   : > { %v14384_v37 = vpack.c.bf16 %v12278_v50, %v12277_v22  ;;  %v16556_v18 = vadd.f32 %v16420_v28, %v15868_v9  ;;  %v11661_v44 = vpop.f32.mrb[69].mxu0 }
 0x53f   : > { %v14379_v26 = vpack.c.bf16 %v12276_v48, %v12275_v25  ;;  %v16557_v40 = vadd.f32 %v11661_v44, %v6447_v20  ;;  %v16421_v61 = vpop.f32.mrb[70].mxu0 }
 0x540   : > { %14588 = vst [vmem:[%s20668_s8 + $0x108] sm:$0xff] %v14384_v37   ;;  %v12145_v11 = vadd.f32 %v16556_v18, %v20623_v62  ;;  %v16558_v56 = vadd.f32 %v16421_v61, %v15869_v30  ;;  %v11664_v32 = vpop.f32.mrb[71].mxu0 }
 0x541   : > { %14587 = vst [vmem:[%s20668_s8 + $0x100] sm:$0xff] %v14379_v26   ;;  %v12143_v58 = vadd.f32 %v16557_v40, %v20623_v62  ;;  %v16559_v63 = vadd.f32 %v11664_v32, %v6450_v43  ;;  %v20905_v43 = vld [vmem:[%s21049_s2] ss:$0 sm:$0xff] }
 0x542   : > { %v15872_v59 = vpop.f32.mrb[72].mxu1  ;;  %v12146_v46 = vadd.f32 %v16558_v56, %v20623_v62  ;;  %v12281_v23 = vmax.f32 %v12145_v11, 0.0 }
 0x543   : > { %v6463_v10 = vpop.f32.mrb[73].mxu1  ;;  %v12144_v31 = vadd.f32 %v16559_v63, %v20623_v62  ;;  %v12279_v34 = vmax.f32 %v12143_v58, 0.0 }
 0x544   : > { %v15873_v35 = vpop.f32.mrb[74].mxu1  ;;  %v12282_v55 = vmax.f32 %v12146_v46, 0.0 }
 0x545   : > { %v6466_v3 = vpop.f32.mrb[75].mxu1  ;;  %v12280_v38 = vmax.f32 %v12144_v31, 0.0  ;;  %v16424_v51 = vpop.f32.mrb[72].mxu0 }
 0x546   : > { %v14394_v29 = vpack.c.bf16 %v12282_v55, %v12281_v23  ;;  %v16560_v0 = vadd.f32 %v16424_v51, %v15872_v59  ;;  %v11677_v54 = vpop.f32.mrb[73].mxu0 }
 0x547   : > { %v14389_v21 = vpack.c.bf16 %v12280_v38, %v12279_v34  ;;  %v16561_v24 = vadd.f32 %v11677_v54, %v6463_v10  ;;  %v16425_v60 = vpop.f32.mrb[74].mxu0 }
 0x548   : > { %14590 = vst [vmem:[%s20668_s8 + $0x118] sm:$0xff] %v14394_v29   ;;  %v12149_v14 = vadd.f32 %v16560_v0, %v20623_v62  ;;  %v16562_v45 = vadd.f32 %v16425_v60, %v15873_v35  ;;  %v11680_v53 = vpop.f32.mrb[75].mxu0 }
 0x549   : > { %14589 = vst [vmem:[%s20668_s8 + $0x110] sm:$0xff] %v14389_v21   ;;  %v12147_v13 = vadd.f32 %v16561_v24, %v20623_v62  ;;  %v16563_v42 = vadd.f32 %v11680_v53, %v6466_v3 }
 0x54a   : > { %v15876_v47 = vpop.f32.mrb[76].mxu1  ;;  %v12150_v27 = vadd.f32 %v16562_v45, %v20623_v62  ;;  %v12285_v8 = vmax.f32 %v12149_v14, 0.0 }
 0x54b   : > { %v6479_v33 = vpop.f32.mrb[77].mxu1  ;;  %v12148_v4 = vadd.f32 %v16563_v42, %v20623_v62  ;;  %v12283_v49 = vmax.f32 %v12147_v13, 0.0 }
 0x54c   : > { %v15877_v52 = vpop.f32.mrb[78].mxu1  ;;  %v12286_v41 = vmax.f32 %v12150_v27, 0.0 }
 0x54d   : > { %v6482_v57 = vpop.f32.mrb[79].mxu1  ;;  %v12284_v15 = vmax.f32 %v12148_v4, 0.0  ;;  %v16428_v19 = vpop.f32.mrb[76].mxu0 }
 0x54e   : > { %v14404_v39 = vpack.c.bf16 %v12286_v41, %v12285_v8  ;;  %v16564_v36 = vadd.f32 %v16428_v19, %v15876_v47  ;;  %v11693_v12 = vpop.f32.mrb[77].mxu0 }
 0x54f   : > { %v14399_v1 = vpack.c.bf16 %v12284_v15, %v12283_v49  ;;  %v16565_v5 = vadd.f32 %v11693_v12, %v6479_v33  ;;  %v16429_v17 = vpop.f32.mrb[78].mxu0 }
 0x550   : > { %14592 = vst [vmem:[%s20668_s8 + $0x128] sm:$0xff] %v14404_v39   ;;  %v12153_v9 = vadd.f32 %v16564_v36, %v20623_v62  ;;  %v16566_v2 = vadd.f32 %v16429_v17, %v15877_v52  ;;  %v11696_v16 = vpop.f32.mrb[79].mxu0 }
 0x551   : > { %14591 = vst [vmem:[%s20668_s8 + $0x120] sm:$0xff] %v14399_v1   ;;  %v12151_v6 = vadd.f32 %v16565_v5, %v20623_v62  ;;  %v16567_v30 = vadd.f32 %v11696_v16, %v6482_v57 }
 0x552   : > { %v15880_v20 = vpop.f32.mrb[80].mxu1  ;;  %v12154_v22 = vadd.f32 %v20905_v43, %v16566_v2  ;;  %v12289_v28 = vmax.f32 %v12153_v9, 0.0 }
 0x553   : > { %v6495_v7 = vpop.f32.mrb[81].mxu1  ;;  %v12152_v25 = vadd.f32 %v20905_v43, %v16567_v30  ;;  %v12287_v18 = vmax.f32 %v12151_v6, 0.0 }
 0x554   : > { %v15881_v50 = vpop.f32.mrb[82].mxu1  ;;  %v12290_v37 = vmax.f32 %v12154_v22, 0.0 }
 0x555   : > { %v6498_v48 = vpop.f32.mrb[83].mxu1  ;;  %v12288_v44 = vmax.f32 %v12152_v25, 0.0  ;;  %v16432_v62 = vpop.f32.mrb[80].mxu0 }
 0x556   : > { %v14414_v26 = vpack.c.bf16 %v12290_v37, %v12289_v28  ;;  %v16568_v40 = vadd.f32 %v16432_v62, %v15880_v20  ;;  %v11709_v61 = vpop.f32.mrb[81].mxu0 }
 0x557   : > { %v14409_v11 = vpack.c.bf16 %v12288_v44, %v12287_v18  ;;  %v16569_v56 = vadd.f32 %v11709_v61, %v6495_v7  ;;  %v16433_v32 = vpop.f32.mrb[82].mxu0 }
 0x558   : > { %14594 = vst [vmem:[%s20668_s8 + $0x138] sm:$0xff] %v14414_v26   ;;  %v12157_v59 = vadd.f32 %v20905_v43, %v16568_v40  ;;  %v16570_v58 = vadd.f32 %v16433_v32, %v15881_v50  ;;  %v11712_v63 = vpop.f32.mrb[83].mxu0 }
 0x559   : > { %14593 = vst [vmem:[%s20668_s8 + $0x130] sm:$0xff] %v14409_v11   ;;  %v12155_v46 = vadd.f32 %v20905_v43, %v16569_v56  ;;  %v16571_v35 = vadd.f32 %v11712_v63, %v6498_v48 }
 0x55a   : > { %v15884_v10 = vpop.f32.mrb[84].mxu1  ;;  %v12158_v3 = vadd.f32 %v20905_v43, %v16570_v58  ;;  %v12293_v38 = vmax.f32 %v12157_v59, 0.0 }
 0x55b   : > { %v6511_v31 = vpop.f32.mrb[85].mxu1  ;;  %v12156_v55 = vadd.f32 %v20905_v43, %v16571_v35  ;;  %v12291_v29 = vmax.f32 %v12155_v46, 0.0 }
 0x55c   : > { %v15885_v23 = vpop.f32.mrb[86].mxu1  ;;  %v12294_v51 = vmax.f32 %v12158_v3, 0.0 }
 0x55d   : > { %v6514_v34 = vpop.f32.mrb[87].mxu1  ;;  %v12292_v0 = vmax.f32 %v12156_v55, 0.0  ;;  %v16436_v54 = vpop.f32.mrb[84].mxu0 }
 0x55e   : > { %v14424_v21 = vpack.c.bf16 %v12294_v51, %v12293_v38  ;;  %v16572_v24 = vadd.f32 %v16436_v54, %v15884_v10  ;;  %v11725_v60 = vpop.f32.mrb[85].mxu0 }
 0x55f   : > { %v14419_v14 = vpack.c.bf16 %v12292_v0, %v12291_v29  ;;  %v16573_v45 = vadd.f32 %v11725_v60, %v6511_v31  ;;  %v16437_v53 = vpop.f32.mrb[86].mxu0 }
 0x560   : > { %14596 = vst [vmem:[%s20668_s8 + $0x148] sm:$0xff] %v14424_v21   ;;  %v12161_v47 = vadd.f32 %v20905_v43, %v16572_v24  ;;  %v16574_v13 = vadd.f32 %v16437_v53, %v15885_v23  ;;  %v11728_v42 = vpop.f32.mrb[87].mxu0 }
 0x561   : > { %14595 = vst [vmem:[%s20668_s8 + $0x140] sm:$0xff] %v14419_v14   ;;  %v12159_v27 = vadd.f32 %v20905_v43, %v16573_v45  ;;  %v16575_v52 = vadd.f32 %v11728_v42, %v6514_v34 }
 0x562   : > { %v15888_v33 = vpop.f32.mrb[88].mxu1  ;;  %v12162_v57 = vadd.f32 %v20905_v43, %v16574_v13  ;;  %v12297_v15 = vmax.f32 %v12161_v47, 0.0 }
 0x563   : > { %v6527_v4 = vpop.f32.mrb[89].mxu1  ;;  %v12160_v41 = vadd.f32 %v20905_v43, %v16575_v52  ;;  %v12295_v39 = vmax.f32 %v12159_v27, 0.0 }
 0x564   : > { %v15889_v8 = vpop.f32.mrb[90].mxu1  ;;  %v12298_v19 = vmax.f32 %v12162_v57, 0.0 }
 0x565   : > { %v6530_v49 = vpop.f32.mrb[91].mxu1  ;;  %v12296_v36 = vmax.f32 %v12160_v41, 0.0  ;;  %v16440_v12 = vpop.f32.mrb[88].mxu0 }
 0x566   : > { %v14434_v1 = vpack.c.bf16 %v12298_v19, %v12297_v15  ;;  %v16576_v5 = vadd.f32 %v16440_v12, %v15888_v33  ;;  %v11741_v17 = vpop.f32.mrb[89].mxu0 }
 0x567   : > { %v14429_v9 = vpack.c.bf16 %v12296_v36, %v12295_v39  ;;  %v16577_v2 = vadd.f32 %v11741_v17, %v6527_v4  ;;  %v16441_v16 = vpop.f32.mrb[90].mxu0 }
 0x568   : > { %14598 = vst [vmem:[%s20668_s8 + $0x158] sm:$0xff] %v14434_v1   ;;  %v12165_v20 = vadd.f32 %v20905_v43, %v16576_v5  ;;  %v16578_v6 = vadd.f32 %v16441_v16, %v15889_v8  ;;  %v11744_v30 = vpop.f32.mrb[91].mxu0 }
 0x569   : > { %14597 = vst [vmem:[%s20668_s8 + $0x150] sm:$0xff] %v14429_v9   ;;  %v12163_v22 = vadd.f32 %v20905_v43, %v16577_v2  ;;  %v16579_v50 = vadd.f32 %v11744_v30, %v6530_v49 }
 0x56a   : > { %v15892_v7 = vpop.f32.mrb[92].mxu1  ;;  %v12166_v48 = vadd.f32 %v20905_v43, %v16578_v6  ;;  %v12301_v44 = vmax.f32 %v12165_v20, 0.0 }
 0x56b   : > { %v6543_v25 = vpop.f32.mrb[93].mxu1  ;;  %v12164_v37 = vadd.f32 %v20905_v43, %v16579_v50  ;;  %v12299_v26 = vmax.f32 %v12163_v22, 0.0 }
 0x56c   : > { %v15893_v28 = vpop.f32.mrb[94].mxu1  ;;  %v12302_v62 = vmax.f32 %v12166_v48, 0.0 }
 0x56d   : > { %v6546_v18 = vpop.f32.mrb[95].mxu1  ;;  %v12300_v40 = vmax.f32 %v12164_v37, 0.0  ;;  %v16444_v61 = vpop.f32.mrb[92].mxu0 }
 0x56e   : > { %v14444_v11 = vpack.c.bf16 %v12302_v62, %v12301_v44  ;;  %v16580_v56 = vadd.f32 %v16444_v61, %v15892_v7  ;;  %v11757_v32 = vpop.f32.mrb[93].mxu0 }
 0x56f   : > { %v14439_v59 = vpack.c.bf16 %v12300_v40, %v12299_v26  ;;  %v16581_v58 = vadd.f32 %v11757_v32, %v6543_v25  ;;  %v16445_v63 = vpop.f32.mrb[94].mxu0 }
 0x570   : > { %14600 = vst [vmem:[%s20668_s8 + $0x168] sm:$0xff] %v14444_v11   ;;  %v12169_v10 = vadd.f32 %v20905_v43, %v16580_v56  ;;  %v16582_v46 = vadd.f32 %v16445_v63, %v15893_v28  ;;  %v11760_v35 = vpop.f32.mrb[95].mxu0 }
 0x571   : > { %14599 = vst [vmem:[%s20668_s8 + $0x160] sm:$0xff] %v14439_v59   ;;  %v12167_v3 = vadd.f32 %v20905_v43, %v16581_v58  ;;  %v16583_v23 = vadd.f32 %v11760_v35, %v6546_v18 }
 0x572   : > { %v15896_v31 = vpop.f32.mrb[96].mxu1  ;;  %v12170_v34 = vadd.f32 %v20905_v43, %v16582_v46  ;;  %v12305_v0 = vmax.f32 %v12169_v10, 0.0 }
 0x573   : > { %v6559_v55 = vpop.f32.mrb[97].mxu1  ;;  %v12168_v51 = vadd.f32 %v20905_v43, %v16583_v23  ;;  %v12303_v21 = vmax.f32 %v12167_v3, 0.0 }
 0x574   : > { %v15897_v38 = vpop.f32.mrb[98].mxu1  ;;  %v12306_v54 = vmax.f32 %v12170_v34, 0.0 }
 0x575   : > { %v6562_v29 = vpop.f32.mrb[99].mxu1  ;;  %v12304_v24 = vmax.f32 %v12168_v51, 0.0  ;;  %v16448_v60 = vpop.f32.mrb[96].mxu0 }
 0x576   : > { %v14454_v14 = vpack.c.bf16 %v12306_v54, %v12305_v0  ;;  %v16584_v45 = vadd.f32 %v16448_v60, %v15896_v31  ;;  %v11773_v53 = vpop.f32.mrb[97].mxu0 }
 0x577   : > { %v14449_v47 = vpack.c.bf16 %v12304_v24, %v12303_v21  ;;  %v16585_v13 = vadd.f32 %v11773_v53, %v6559_v55  ;;  %v16449_v42 = vpop.f32.mrb[98].mxu0 }
 0x578   : > { %14602 = vst [vmem:[%s20668_s8 + $0x178] sm:$0xff] %v14454_v14   ;;  %v12173_v33 = vadd.f32 %v20905_v43, %v16584_v45  ;;  %v16586_v27 = vadd.f32 %v16449_v42, %v15897_v38  ;;  %v11776_v52 = vpop.f32.mrb[99].mxu0 }
 0x579   : > { %14601 = vst [vmem:[%s20668_s8 + $0x170] sm:$0xff] %v14449_v47   ;;  %v12171_v57 = vadd.f32 %v20905_v43, %v16585_v13  ;;  %v16587_v8 = vadd.f32 %v11776_v52, %v6562_v29 }
 0x57a   : > { %v15900_v4 = vpop.f32.mrb[100].mxu1  ;;  %v12174_v49 = vadd.f32 %v20905_v43, %v16586_v27  ;;  %v12309_v36 = vmax.f32 %v12173_v33, 0.0 }
 0x57b   : > { %v6575_v41 = vpop.f32.mrb[101].mxu1  ;;  %v12172_v19 = vadd.f32 %v20905_v43, %v16587_v8  ;;  %v12307_v1 = vmax.f32 %v12171_v57, 0.0 }
 0x57c   : > { %v15901_v15 = vpop.f32.mrb[102].mxu1  ;;  %v12310_v12 = vmax.f32 %v12174_v49, 0.0 }
 0x57d   : > { %v6578_v39 = vpop.f32.mrb[103].mxu1  ;;  %v12308_v5 = vmax.f32 %v12172_v19, 0.0  ;;  %v16452_v17 = vpop.f32.mrb[100].mxu0 }
 0x57e   : > { %v14464_v9 = vpack.c.bf16 %v12310_v12, %v12309_v36  ;;  %v16588_v2 = vadd.f32 %v16452_v17, %v15900_v4  ;;  %v11789_v16 = vpop.f32.mrb[101].mxu0 }
 0x57f   : > { %v14459_v20 = vpack.c.bf16 %v12308_v5, %v12307_v1  ;;  %v16589_v6 = vadd.f32 %v11789_v16, %v6575_v41  ;;  %v16453_v30 = vpop.f32.mrb[102].mxu0 }
 0x580   : > { %14604 = vst [vmem:[%s20668_s8 + $0x188] sm:$0xff] %v14464_v9   ;;  %v12177_v7 = vadd.f32 %v20905_v43, %v16588_v2  ;;  %v16590_v22 = vadd.f32 %v16453_v30, %v15901_v15  ;;  %v11792_v50 = vpop.f32.mrb[103].mxu0 }
 0x581   : > { %14603 = vst [vmem:[%s20668_s8 + $0x180] sm:$0xff] %v14459_v20   ;;  %v12175_v48 = vadd.f32 %v20905_v43, %v16589_v6  ;;  %v16591_v28 = vadd.f32 %v11792_v50, %v6578_v39 }
 0x582   : > { %v15904_v25 = vpop.f32.mrb[104].mxu1  ;;  %v12178_v18 = vadd.f32 %v20905_v43, %v16590_v22  ;;  %v12313_v40 = vmax.f32 %v12177_v7, 0.0 }
 0x583   : > { %v6591_v37 = vpop.f32.mrb[105].mxu1  ;;  %v12176_v62 = vadd.f32 %v20905_v43, %v16591_v28  ;;  %v12311_v11 = vmax.f32 %v12175_v48, 0.0 }
 0x584   : > { %v15905_v44 = vpop.f32.mrb[106].mxu1  ;;  %v12314_v61 = vmax.f32 %v12178_v18, 0.0 }
 0x585   : > { %v6594_v26 = vpop.f32.mrb[107].mxu1  ;;  %v12312_v56 = vmax.f32 %v12176_v62, 0.0  ;;  %v16456_v32 = vpop.f32.mrb[104].mxu0 }
 0x586   : > { %v14474_v59 = vpack.c.bf16 %v12314_v61, %v12313_v40  ;;  %v16592_v58 = vadd.f32 %v16456_v32, %v15904_v25  ;;  %v11805_v63 = vpop.f32.mrb[105].mxu0 }
 0x587   : > { %v14469_v10 = vpack.c.bf16 %v12312_v56, %v12311_v11  ;;  %v16593_v46 = vadd.f32 %v11805_v63, %v6591_v37  ;;  %v16457_v35 = vpop.f32.mrb[106].mxu0 }
 0x588   : > { %14606 = vst [vmem:[%s20668_s8 + $0x198] sm:$0xff] %v14474_v59   ;;  %v12181_v31 = vadd.f32 %v20905_v43, %v16592_v58  ;;  %v16594_v3 = vadd.f32 %v16457_v35, %v15905_v44  ;;  %v11808_v23 = vpop.f32.mrb[107].mxu0 }
 0x589   : > { %14605 = vst [vmem:[%s20668_s8 + $0x190] sm:$0xff] %v14469_v10   ;;  %v12179_v34 = vadd.f32 %v20905_v43, %v16593_v46  ;;  %v16595_v38 = vadd.f32 %v11808_v23, %v6594_v26 }
 0x58a   : > { %v15908_v55 = vpop.f32.mrb[108].mxu1  ;;  %v12182_v29 = vadd.f32 %v20905_v43, %v16594_v3  ;;  %v12317_v24 = vmax.f32 %v12181_v31, 0.0 }
 0x58b   : > { %v6607_v51 = vpop.f32.mrb[109].mxu1  ;;  %v12180_v54 = vadd.f32 %v20905_v43, %v16595_v38  ;;  %v12315_v14 = vmax.f32 %v12179_v34, 0.0 }
 0x58c   : > { %v15909_v0 = vpop.f32.mrb[110].mxu1  ;;  %v12318_v60 = vmax.f32 %v12182_v29, 0.0 }
 0x58d   : > { %v6610_v21 = vpop.f32.mrb[111].mxu1  ;;  %v12316_v45 = vmax.f32 %v12180_v54, 0.0  ;;  %v16460_v53 = vpop.f32.mrb[108].mxu0 }
 0x58e   : > { %v14484_v47 = vpack.c.bf16 %v12318_v60, %v12317_v24  ;;  %v16596_v13 = vadd.f32 %v16460_v53, %v15908_v55  ;;  %v11821_v42 = vpop.f32.mrb[109].mxu0 }
 0x58f   : > { %v14479_v33 = vpack.c.bf16 %v12316_v45, %v12315_v14  ;;  %v16597_v27 = vadd.f32 %v11821_v42, %v6607_v51  ;;  %v16461_v52 = vpop.f32.mrb[110].mxu0 }
 0x590   : > { %14608 = vst [vmem:[%s20668_s8 + $0x1a8] sm:$0xff] %v14484_v47   ;;  %v12185_v4 = vadd.f32 %v20905_v43, %v16596_v13  ;;  %v16598_v57 = vadd.f32 %v16461_v52, %v15909_v0  ;;  %v11824_v8 = vpop.f32.mrb[111].mxu0 }
 0x591   : > { %14607 = vst [vmem:[%s20668_s8 + $0x1a0] sm:$0xff] %v14479_v33   ;;  %v12183_v49 = vadd.f32 %v20905_v43, %v16597_v27  ;;  %v16599_v15 = vadd.f32 %v11824_v8, %v6610_v21 }
 0x592   : > { %v15912_v41 = vpop.f32.mrb[112].mxu1  ;;  %v12186_v39 = vadd.f32 %v20905_v43, %v16598_v57  ;;  %v12321_v5 = vmax.f32 %v12185_v4, 0.0 }
 0x593   : > { %v6623_v19 = vpop.f32.mrb[113].mxu1  ;;  %v12184_v12 = vadd.f32 %v20905_v43, %v16599_v15  ;;  %v12319_v9 = vmax.f32 %v12183_v49, 0.0 }
 0x594   : > { %v15913_v36 = vpop.f32.mrb[114].mxu1  ;;  %v12322_v17 = vmax.f32 %v12186_v39, 0.0 }
 0x595   : > { %v6626_v1 = vpop.f32.mrb[115].mxu1  ;;  %v12320_v2 = vmax.f32 %v12184_v12, 0.0  ;;  %v16464_v16 = vpop.f32.mrb[112].mxu0 }
 0x596   : > { %v14494_v20 = vpack.c.bf16 %v12322_v17, %v12321_v5  ;;  %v16600_v6 = vadd.f32 %v16464_v16, %v15912_v41  ;;  %v11837_v30 = vpop.f32.mrb[113].mxu0 }
 0x597   : > { %v14489_v7 = vpack.c.bf16 %v12320_v2, %v12319_v9  ;;  %v16601_v22 = vadd.f32 %v11837_v30, %v6623_v19  ;;  %v16465_v50 = vpop.f32.mrb[114].mxu0 }
 0x598   : > { %14610 = vst [vmem:[%s20668_s8 + $0x1b8] sm:$0xff] %v14494_v20   ;;  %v12189_v25 = vadd.f32 %v20905_v43, %v16600_v6  ;;  %v16602_v48 = vadd.f32 %v16465_v50, %v15913_v36  ;;  %v11840_v28 = vpop.f32.mrb[115].mxu0 }
 0x599   : > { %14609 = vst [vmem:[%s20668_s8 + $0x1b0] sm:$0xff] %v14489_v7   ;;  %v12187_v18 = vadd.f32 %v20905_v43, %v16601_v22  ;;  %v16603_v44 = vadd.f32 %v11840_v28, %v6626_v1 }
 0x59a   : > { %v15916_v37 = vpop.f32.mrb[116].mxu1  ;;  %v12190_v26 = vadd.f32 %v20905_v43, %v16602_v48  ;;  %v12325_v56 = vmax.f32 %v12189_v25, 0.0 }
 0x59b   : > { %v6639_v62 = vpop.f32.mrb[117].mxu1  ;;  %v12188_v61 = vadd.f32 %v20905_v43, %v16603_v44  ;;  %v12323_v59 = vmax.f32 %v12187_v18, 0.0 }
 0x59c   : > { %v15917_v40 = vpop.f32.mrb[118].mxu1  ;;  %v12326_v32 = vmax.f32 %v12190_v26, 0.0 }
 0x59d   : > { %v6642_v11 = vpop.f32.mrb[119].mxu1  ;;  %v12324_v58 = vmax.f32 %v12188_v61, 0.0  ;;  %v16468_v63 = vpop.f32.mrb[116].mxu0 }
 0x59e   : > { %v14504_v10 = vpack.c.bf16 %v12326_v32, %v12325_v56  ;;  %v16604_v46 = vadd.f32 %v16468_v63, %v15916_v37  ;;  %v11853_v35 = vpop.f32.mrb[117].mxu0 }
 0x59f   : > { %v14499_v31 = vpack.c.bf16 %v12324_v58, %v12323_v59  ;;  %v16605_v3 = vadd.f32 %v11853_v35, %v6639_v62  ;;  %v16469_v23 = vpop.f32.mrb[118].mxu0 }
 0x5a0   : > { %14612 = vst [vmem:[%s20668_s8 + $0x1c8] sm:$0xff] %v14504_v10   ;;  %v12193_v55 = vadd.f32 %v20905_v43, %v16604_v46  ;;  %v16606_v34 = vadd.f32 %v16469_v23, %v15917_v40  ;;  %v11856_v38 = vpop.f32.mrb[119].mxu0 }
 0x5a1   : > { %14611 = vst [vmem:[%s20668_s8 + $0x1c0] sm:$0xff] %v14499_v31   ;;  %v12191_v29 = vadd.f32 %v20905_v43, %v16605_v3  ;;  %v16607_v0 = vadd.f32 %v11856_v38, %v6642_v11 }
 0x5a2   : > { %v15920_v51 = vpop.f32.mrb[120].mxu1  ;;  %v12194_v21 = vadd.f32 %v20905_v43, %v16606_v34  ;;  %v12329_v45 = vmax.f32 %v12193_v55, 0.0 }
 0x5a3   : > { %v6655_v54 = vpop.f32.mrb[121].mxu1  ;;  %v12192_v60 = vadd.f32 %v20905_v43, %v16607_v0  ;;  %v12327_v47 = vmax.f32 %v12191_v29, 0.0 }
 0x5a4   : > { %v15921_v24 = vpop.f32.mrb[122].mxu1  ;;  %v12330_v53 = vmax.f32 %v12194_v21, 0.0 }
 0x5a5   : > { %v6658_v14 = vpop.f32.mrb[123].mxu1  ;;  %v12328_v13 = vmax.f32 %v12192_v60, 0.0  ;;  %v16472_v42 = vpop.f32.mrb[120].mxu0 }
 0x5a6   : > { %v14514_v33 = vpack.c.bf16 %v12330_v53, %v12329_v45  ;;  %v16608_v27 = vadd.f32 %v16472_v42, %v15920_v51  ;;  %v11869_v52 = vpop.f32.mrb[121].mxu0 }
 0x5a7   : > { %v14509_v4 = vpack.c.bf16 %v12328_v13, %v12327_v47  ;;  %v16609_v57 = vadd.f32 %v11869_v52, %v6655_v54  ;;  %v16473_v8 = vpop.f32.mrb[122].mxu0 }
 0x5a8   : > { %14614 = vst [vmem:[%s20668_s8 + $0x1d8] sm:$0xff] %v14514_v33   ;;  %v12197_v41 = vadd.f32 %v20905_v43, %v16608_v27  ;;  %v16610_v49 = vadd.f32 %v16473_v8, %v15921_v24  ;;  %v11872_v15 = vpop.f32.mrb[123].mxu0 }
 0x5a9   : > { %14613 = vst [vmem:[%s20668_s8 + $0x1d0] sm:$0xff] %v14509_v4   ;;  %v12195_v39 = vadd.f32 %v20905_v43, %v16609_v57  ;;  %v16611_v36 = vadd.f32 %v11872_v15, %v6658_v14 }
 0x5aa   : > { %v15924_v19 = vpop.f32.mrb[124].mxu1  ;;  %v12198_v1 = vadd.f32 %v20905_v43, %v16610_v49  ;;  %v12333_v2 = vmax.f32 %v12197_v41, 0.0 }
 0x5ab   : > { %v6671_v12 = vpop.f32.mrb[125].mxu1  ;;  %v12196_v17 = vadd.f32 %v20905_v43, %v16611_v36  ;;  %v12331_v20 = vmax.f32 %v12195_v39, 0.0 }
 0x5ac   : > { %v15925_v5 = vpop.f32.mrb[126].mxu1  ;;  %v12334_v16 = vmax.f32 %v12198_v1, 0.0 }
 0x5ad   : > { %v6674_v9 = vpop.f32.mrb[127].mxu1  ;;  %v12332_v6 = vmax.f32 %v12196_v17, 0.0  ;;  %v16476_v30 = vpop.f32.mrb[124].mxu0 }
 0x5ae   : > { %v14524_v7 = vpack.c.bf16 %v12334_v16, %v12333_v2  ;;  %v16612_v22 = vadd.f32 %v16476_v30, %v15924_v19  ;;  %v11885_v50 = vpop.f32.mrb[125].mxu0 }
 0x5af   : > { %v14519_v25 = vpack.c.bf16 %v12332_v6, %v12331_v20  ;;  %v16613_v48 = vadd.f32 %v11885_v50, %v6671_v12  ;;  %v16477_v28 = vpop.f32.mrb[126].mxu0 }
 0x5b0   : > { %14616 = vst [vmem:[%s20668_s8 + $0x1e8] sm:$0xff] %v14524_v7   ;;  %v12201_v37 = vadd.f32 %v20905_v43, %v16612_v22  ;;  %v16614_v18 = vadd.f32 %v16477_v28, %v15925_v5  ;;  %v11888_v44 = vpop.f32.mrb[127].mxu0 }
 0x5b1   : > { %14615 = vst [vmem:[%s20668_s8 + $0x1e0] sm:$0xff] %v14519_v25   ;;  %v12199_v26 = vadd.f32 %v20905_v43, %v16613_v48  ;;  %v16615_v40 = vadd.f32 %v11888_v44, %v6674_v9 }
 0x5b2   : > { %v15928_v62 = vpop.f32.mrb[128].mxu1  ;;  %v12202_v11 = vadd.f32 %v20905_v43, %v16614_v18  ;;  %v12337_v58 = vmax.f32 %v12201_v37, 0.0 }
 0x5b3   : > { %v6687_v61 = vpop.f32.mrb[129].mxu1  ;;  %v12200_v32 = vadd.f32 %v20905_v43, %v16615_v40  ;;  %v12335_v10 = vmax.f32 %v12199_v26, 0.0 }
 0x5b4   : > { %v15929_v56 = vpop.f32.mrb[130].mxu1  ;;  %v12338_v63 = vmax.f32 %v12202_v11, 0.0 }
 0x5b5   : > { %v6690_v59 = vpop.f32.mrb[131].mxu1  ;;  %v12336_v46 = vmax.f32 %v12200_v32, 0.0  ;;  %v16480_v35 = vpop.f32.mrb[128].mxu0 }
 0x5b6   : > { %v14534_v31 = vpack.c.bf16 %v12338_v63, %v12337_v58  ;;  %v16616_v3 = vadd.f32 %v16480_v35, %v15928_v62  ;;  %v11901_v23 = vpop.f32.mrb[129].mxu0 }
 0x5b7   : > { %v14529_v55 = vpack.c.bf16 %v12336_v46, %v12335_v10  ;;  %v16617_v34 = vadd.f32 %v11901_v23, %v6687_v61  ;;  %v16481_v38 = vpop.f32.mrb[130].mxu0 }
 0x5b8   : > { %14618 = vst [vmem:[%s20668_s8 + $0x1f8] sm:$0xff] %v14534_v31   ;;  %v12205_v51 = vadd.f32 %v20905_v43, %v16616_v3  ;;  %v16618_v29 = vadd.f32 %v16481_v38, %v15929_v56  ;;  %v11904_v0 = vpop.f32.mrb[131].mxu0 }
 0x5b9   : > { %14617 = vst [vmem:[%s20668_s8 + $0x1f0] sm:$0xff] %v14529_v55   ;;  %v12203_v21 = vadd.f32 %v20905_v43, %v16617_v34  ;;  %v16619_v24 = vadd.f32 %v11904_v0, %v6690_v59 }
 0x5ba   : > { %v15932_v54 = vpop.f32.mrb[132].mxu1  ;;  %v12206_v14 = vadd.f32 %v20905_v43, %v16618_v29  ;;  %v12341_v13 = vmax.f32 %v12205_v51, 0.0 }
 0x5bb   : > { %v6703_v60 = vpop.f32.mrb[133].mxu1  ;;  %v12204_v53 = vadd.f32 %v20905_v43, %v16619_v24  ;;  %v12339_v33 = vmax.f32 %v12203_v21, 0.0 }
 0x5bc   : > { %v15933_v45 = vpop.f32.mrb[134].mxu1  ;;  %v12342_v42 = vmax.f32 %v12206_v14, 0.0 }
 0x5bd   : > { %v6706_v47 = vpop.f32.mrb[135].mxu1  ;;  %v12340_v27 = vmax.f32 %v12204_v53, 0.0  ;;  %v16484_v52 = vpop.f32.mrb[132].mxu0 }
 0x5be   : > { %v14544_v4 = vpack.c.bf16 %v12342_v42, %v12341_v13  ;;  %v16620_v57 = vadd.f32 %v16484_v52, %v15932_v54  ;;  %v11917_v8 = vpop.f32.mrb[133].mxu0 }
 0x5bf   : > { %v14539_v41 = vpack.c.bf16 %v12340_v27, %v12339_v33  ;;  %v16621_v49 = vadd.f32 %v11917_v8, %v6703_v60  ;;  %v16485_v15 = vpop.f32.mrb[134].mxu0 }
 0x5c0   : > { %14620 = vst [vmem:[%s20668_s8 + $0x208] sm:$0xff] %v14544_v4   ;;  %v12209_v19 = vadd.f32 %v20905_v43, %v16620_v57  ;;  %v16622_v39 = vadd.f32 %v16485_v15, %v15933_v45  ;;  %v11920_v36 = vpop.f32.mrb[135].mxu0 }
 0x5c1   : > { %14619 = vst [vmem:[%s20668_s8 + $0x200] sm:$0xff] %v14539_v41   ;;  %v12207_v12 = vadd.f32 %v20905_v43, %v16621_v49  ;;  %v16623_v1 = vadd.f32 %v11920_v36, %v6706_v47 }
 0x5c2   : > { %v12210_v5 = vadd.f32 %v20905_v43, %v16622_v39  ;;  %v12345_v9 = vmax.f32 %v12209_v19, 0.0 }
 0x5c3   : > { %v12208_v17 = vadd.f32 %v20905_v43, %v16623_v1  ;;  %v12343_v16 = vmax.f32 %v12207_v12, 0.0 }
 0x5c4   : > { %v12346_v2 = vmax.f32 %v12210_v5, 0.0 }
 0x5c5   : > { %v12344_v20 = vmax.f32 %v12208_v17, 0.0 }
 0x5c6   : > { %v14554_v6 = vpack.c.bf16 %v12346_v2, %v12345_v9 }
 0x5c7   : > { %v14549_v30 = vpack.c.bf16 %v12344_v20, %v12343_v16 }
 0x5c8   : > { %14622 = vst [vmem:[%s20668_s8 + $0x218] sm:$0xff] %v14554_v6  }
 0x5c9   : > { %14621 = vst [vmem:[%s20668_s8 + $0x210] sm:$0xff] %v14549_v30  }
 0x5ca   : > { %18149 = shalt.err (!%p18146_p3)
}
 0x5cb   : > { %s18150_s29 = scalar_lea.hbm %s20998_s24, 8704  ;;  %s18154_s5 = scalar_lea.hbm %s21050_s3, 17408 }
 0x5cc   : > { %p18151_p4 = scmp.ne.s32.totalorder %s20998_s24, %s18150_s29  ;;  %p18155_p9 = scmp.lt.u32.totalorder %s20998_s24, %s21050_s3 }
 0x5cd   : > { %p18156_p10 = scmp.lt.u32.totalorder %s18154_s5, %s18150_s29  ;;  %p18158_p12 = scmp.lt.u32.totalorder %s18150_s29, %s20998_s24 }
 0x5ce   : > { %p18152_p7 = pnand %p18151_p4, %p18261_p5 }
 0x5cf   : > { %p18157_p11 = por %p18156_p10, %p18155_p9 }
 0x5d0   : > { %p18153_p8 = pneg %p18152_p7 }
 0x5d1   : > { %p18159_p13 = por %p18158_p12, %p18157_p11 }
 0x5d3   : > { %p18160_p0 = pnand %p18159_p13, %p18153_p8 }
 0x5d5   : > { %18163 = shalt.err (!%p18160_p0)
}
 0x5d6   : > { %s18201_s8 = smov 64   ;;  %s18202_s9 = smov 4  }
 0x5d7   : > { %17589 = dma.vmem_to_hbm [thread:$0]  (%p18261_p5), %s21000_s17, 8704, %s20998_s24, %s21006_s16, %s18201_s8, %s18201_s8, %s18202_s9  }
 0x5d8 PF: > { %p17595_p1 = scmp.ge.s32.totalorder %s18198_s15, 2  ;;  %s13056_s10 = sand.u32 1, %s18186_s12  }
 0x5d9   : > { %s13057_s11 = scalar_lea.sflag [#allocation3], %s13056_s10 }
 0x5da   : > { %p17592_p2 = pnand %p17595_p1, %p18265_p6 }
 0x5dc   : > { %18181 = dma.done.wait (!%p17592_p2), %s13057_s11, 8704  }
 0x5dd   : > { %18183 = vsyncadd (!%p17592_p2), %s13057_s11, 4294958592  ;;  %p13_p3 = scmp.ge.s32.totalorder %s18248_s18, 4   ;;  %s21249_s12 = smov %s18190_s13 }
 0x5de   : > { %s21250_s13 = smov %s18194_s14  ;;  %s21251_s14 = smov %s18259_s21 }
 0x5df   : > { %s21252_s15 = smov %s18248_s18  ;;  %15 = sbr.rel (!%p13_p3) target bundleno = 3 (0x3), region = 75 }
 0x5e6   :  { %13062 = vsyncpa [#allocation3], 1 }
 0x5e7   :  { %13064 = vsyncpa [#allocation3 + $0x1], 1 }

</bundles_post_ra>
